<compile_context>
chip_gen: v7x
topology: tpu7x:2x2x1
jax: 0.10.0
libtpu: 0.0.40
codegen_flags: <defaults>
</compile_context>

<pallas_src>
import math

import jax
import jax.numpy as jnp
import numpy as np
from jax.experimental import pallas as pl
from jax.experimental.pallas import tpu as pltpu

# Spatial geometry is fixed by the module itself: fc1 = nn.Linear(225, 112)
# forces H * W == 225, i.e. H = W = 15.
_H = 15
_W = 15
_PADM = 3                     # max halo of the 3/5/7 depthwise branches
_WP = _W + 2 * _PADM          # padded row width  (21)
_HP = _H + 2 * _PADM          # padded height     (21)
_WIN = _H * _WP               # lane-dense output window (315): u = 21*h + w
_W0 = _PADM * _WP + _PADM     # frame index of pixel (0, 0)   (66)
_FRAME = 448                  # >= 441 (flattened 21x21 pad), rounded up

_BN_EPS = 1e-5
_HARMONIC_EPS = 1e-8
_INV_SQRT2 = 1.0 / math.sqrt(2.0)

_KS = (3, 5, 7, 3)            # conv3, conv5, conv7, final conv
_TAP_BASE = (0, 9, 34, 83)    # column offsets of each branch in the packed taps
_NTAPS = 92                   # 9 + 25 + 49 + 9


# --------------------------- in-kernel math ----------------------------------

def _erf(x):
    # Abramowitz & Stegun 7.1.26.  The divide uses the EUP approx reciprocal
    # plus one Newton step (~exact f32), per the review's accuracy concern.
    a1, a2, a3, a4, a5 = 0.254829592, -0.284496736, 1.421413741, -1.453152027, 1.061405429
    p = 0.3275911
    ax = jnp.abs(x)
    d = 1.0 + p * ax
    t = pl.reciprocal(d, approx=True)
    t = t * (2.0 - d * t)                        # Newton refinement
    poly = t * (a1 + t * (a2 + t * (a3 + t * (a4 + t * a5))))
    y = 1.0 - poly * jnp.exp(-ax * ax)
    return jnp.where(x >= 0, y, -y)


def _gelu(x):
    # exact (erf-based) GELU, matching torch.nn.GELU() default
    return 0.5 * x * (1.0 + _erf(x * _INV_SQRT2))


# ------------------------------- wrapper -------------------------------------

def multi_scale_adapter_forward(x, params):
    n, c_in, h, w = x.shape
    if (h, w) != (_H, _W):
        raise ValueError("Multi_scale_adapter requires 15x15 spatial input "
                         "(fc1 = nn.Linear(225, 112)).")
    c_out = params['conv3']['pw'].shape[0]
    if c_out != c_in:
        raise ValueError("forward() composes conv(x3+x5+x7); out_channel must "
                         "equal in_channel.")
    f32 = jnp.float32
    nci, nco = n * c_in, n * c_out
    n_hidden = params['fc1_w'].shape[0]           # 112

    # -------------------- operand packing (8 inputs total) -------------------
    # (1) halo-3 padded, flattened input frame: pixel (h,w) -> lane 21*(h+3)+(w+3)
    xpad = jnp.pad(x.astype(f32), ((0, 0), (0, 0), (_PADM, _PADM), (_PADM, _PADM)))
    frame_x = jnp.pad(xpad.reshape(nci, _HP * _WP), ((0, 0), (0, _FRAME - _HP * _WP)))

    # (2) all depthwise taps in one (N*C, 92) array: [3x3 | 5x5 | 7x7 | final 3x3]
    def dw_cols(blk):
        dwt = blk['dw'][:, 0]                                  # (C, k, k)
        c, k, _ = dwt.shape
        return jnp.tile(dwt.reshape(c, k * k), (n, 1))         # (N*C, k*k)
    dw_all = jnp.concatenate(
        [dw_cols(params['conv3']), dw_cols(params['conv5']),
         dw_cols(params['conv7']), dw_cols(params['conv'])], axis=1)

    # (3) pointwise conv + eval-mode BN folded; block-diagonal over batch; the
    #     three branch matrices merged block-diagonally -> ONE MXU matmul.
    def fold_pw(blk):
        scale = blk['gamma'] * jax.lax.rsqrt(blk['rvar'] + _BN_EPS)
        shift = blk['beta'] - blk['rmean'] * scale
        pw = blk['pw'][:, :, 0, 0] * scale[:, None]            # (Cout, Cin)
        wbig = jnp.kron(jnp.eye(n, dtype=f32), pw)             # (N*Cout, N*Cin)
        bias = jnp.tile(shift, (n,))[:, None]                  # (N*Cout, 1)
        return wbig, bias

    wb3, b3 = fold_pw(params['conv3'])
    wb5, b5 = fold_pw(params['conv5'])
    wb7, b7 = fold_pw(params['conv7'])
    wbf, bf = fold_pw(params['conv'])
    zblk = jnp.zeros_like(wb3)
    w_br = jnp.concatenate([jnp.concatenate([wb3, zblk, zblk], axis=1),
                            jnp.concatenate([zblk, wb5, zblk], axis=1),
                            jnp.concatenate([zblk, zblk, wb7], axis=1)], axis=0)
    b_all = jnp.concatenate([b3, b5, b7, bf], axis=0)          # (4*N*Cout, 1)
    # TODO(synk): the kron block-diagonal weights grow as N^2; if N or C grow,
    # switch to a grid over N (dimension_semantics=("parallel",)) with per-batch
    # (Cout, Cin) blocks so work shards across v7x's 2 TCs and VMEM stays flat.

    # (4) fc1/fc2 weights pre-scattered into the 21-stride window layout
    def scatter_in(wt):    # (225, F) -> (315, F)
        f = wt.shape[1]
        return jnp.pad(wt.reshape(_H, _W, f),
                       ((0, 0), (0, _WP - _W), (0, 0))).reshape(_WIN, f)

    def scatter_out(wt):   # (F, 225) -> (F, 315)
        f = wt.shape[0]
        return jnp.pad(wt.reshape(f, _H, _W),
                       ((0, 0), (0, 0), (0, _WP - _W))).reshape(f, _WIN)

    fc1_w = scatter_in(params['fc1_w'].T)                      # (315, 112)
    fc2_w = scatter_out(params['fc2_w'].T)                     # (112, 315)

    # (5) aux rows: [fc1 bias (lane-padded) ; scattered fc2 bias ; pixel mask]
    aux = jnp.concatenate([
        jnp.pad(params['fc1_b'], (0, _WIN - n_hidden))[None, :],
        scatter_out(params['fc2_b'][None, :]),
        (jnp.arange(_WIN) % _WP < _W).astype(f32)[None, :]], axis=0)   # (3, 315)

    # -------------------------------- kernel ---------------------------------
    def kernel(x_ref, dw_ref, wbr_ref, wfin_ref, b_ref, fc1w_ref, fc2w_ref,
               aux_ref, out_ref, fs_ref, ycat_ref, hm_ref):
        mask = aux_ref[2:3, :]                                  # (1, 315)

        # ---- harmonic gate: channel mean via VPU adds, two MXU matmuls ------
        inv_c = 1.0 / c_in
        for b in range(n):
            acc = None
            for c in range(c_in):
                row = x_ref[b * c_in + c:b * c_in + c + 1, _W0:_W0 + _WIN]
                rinv = pl.reciprocal(row + _HARMONIC_EPS, approx=False)
                acc = rinv if acc is None else acc + rinv
            hm_ref[b:b + 1, :] = acc * inv_c                    # mean of 1/x
        mean_inv = hm_ref[...]                                  # (N, 315)
        # mask -> junk window lanes never reach the gate matmul operand
        hmean = mask * pl.reciprocal(mean_inv + _HARMONIC_EPS, approx=False)
        h1 = jnp.dot(hmean, fc1w_ref[...], preferred_element_type=jnp.float32)
        h1 = _gelu(h1 + aux_ref[0:1, :n_hidden])
        # TODO(synk): nn.Dropout(0.1) treated as eval-mode identity.
        h2 = jnp.dot(h1, fc2w_ref[...], preferred_element_type=jnp.float32)
        gate = jax.nn.sigmoid(h2 + aux_ref[1:2, :])             # (N, 315)
        hm_ref[...] = gate   # park gate in scratch -> per-batch rows via ref reads

        # ---- depthwise conv = shifted lane-dense window MACs off a frame ----
        def depthwise(frame_ref, base, k):
            p = k // 2
            acc = None
            for i in range(k):
                for j in range(k):
                    off = _W0 + _WP * (i - p) + (j - p)
                    col = base + i * k + j
                    term = dw_ref[:, col:col + 1] * frame_ref[:, off:off + _WIN]
                    acc = term if acc is None else acc + term
            return acc                                          # (rows, 315)

        # ---- three branches stacked, then ONE merged pointwise+BN matmul ----
        ycat_ref[0 * nci:1 * nci, :] = depthwise(x_ref, _TAP_BASE[0], _KS[0])
        ycat_ref[1 * nci:2 * nci, :] = depthwise(x_ref, _TAP_BASE[1], _KS[1])
        ycat_ref[2 * nci:3 * nci, :] = depthwise(x_ref, _TAP_BASE[2], _KS[2])
        z_all = jnp.dot(wbr_ref[...], ycat_ref[...],
                        preferred_element_type=jnp.float32) + b_ref[0:3 * nco, :]
        z_all = _gelu(z_all)                                    # (3*N*Cout, 315)
        s = z_all[0:nco, :] + z_all[nco:2 * nco, :] + z_all[2 * nco:3 * nco, :]

        # ---- re-pad s for the final 3x3 conv: zero ONLY the two halo strips --
        fs_ref[:, 0:_W0] = jnp.zeros((nco, _W0), jnp.float32)
        fs_ref[:, _W0 + _WIN:_FRAME] = jnp.zeros((nco, _FRAME - _W0 - _WIN),
                                                 jnp.float32)
        fs_ref[:, _W0:_W0 + _WIN] = s * mask

        yf = depthwise(fs_ref, _TAP_BASE[3], _KS[3])
        zf = jnp.dot(wfin_ref[...], yf,
                     preferred_element_type=jnp.float32) + b_ref[3 * nco:4 * nco, :]
        zf = _gelu(zf)                                          # (N*Cout, 315)

        # ---- apply the harmonic gate: one wide store + per-batch broadcast ----
        out_ref[...] = zf
        for b in range(n):
            rows = slice(b * c_out, (b + 1) * c_out)
            out_ref[rows, :] = hm_ref[b:b + 1, :] * out_ref[rows, :]

    vmem = pl.BlockSpec(memory_space=pltpu.MemorySpace.VMEM)
    out_flat = pl.pallas_call(
        kernel,
        out_shape=jax.ShapeDtypeStruct((nco, _WIN), f32),
        in_specs=[vmem] * 8,
        out_specs=vmem,
        scratch_shapes=[pltpu.VMEM((nco, _FRAME), f32),     # padded branch-sum frame
                        pltpu.VMEM((3 * nci, _WIN), f32),   # stacked depthwise outputs
                        pltpu.VMEM((n, _WIN), f32)],        # harmonic mean / gate rows
    )(frame_x, dw_all, w_br, wbf, b_all, fc1_w, fc2_w, aux)

    return out_flat.reshape(n, c_out, _H, _WP)[:, :, :, :_W]


# --------------------------- parameter setup ---------------------------------

def init_params(key, c_in, c_out):
    ks = jax.random.split(key, 12)

    def conv_block(kd, kp, k):
        return dict(
            dw=0.02 * jax.random.normal(kd, (c_in, 1, k, k), jnp.float32),
            pw=0.02 * jax.random.normal(kp, (c_out, c_in, 1, 1), jnp.float32),
            gamma=jnp.full((c_out,), 0.02, jnp.float32),
            beta=jnp.zeros((c_out,), jnp.float32),
            rmean=jnp.zeros((c_out,), jnp.float32),
            rvar=jnp.ones((c_out,), jnp.float32),
        )

    return dict(
        conv3=conv_block(ks[0], ks[1], 3),
        conv5=conv_block(ks[2], ks[3], 5),
        conv7=conv_block(ks[4], ks[5], 7),
        conv=conv_block(ks[6], ks[7], 3),
        fc1_w=0.02 * jax.random.normal(ks[8], (112, 225), jnp.float32),
        fc1_b=jax.random.uniform(ks[9], (112,), jnp.float32,
                                 -1.0 / math.sqrt(225.0), 1.0 / math.sqrt(225.0)),
        fc2_w=0.02 * jax.random.normal(ks[10], (225, 112), jnp.float32),
        fc2_b=jax.random.uniform(ks[11], (225,), jnp.float32,
                                 -1.0 / math.sqrt(112.0), 1.0 / math.sqrt(112.0)),
    )


# -------------------------- pure-JAX reference --------------------------------

def _bn_fold_ref(blk):
    scale = blk['gamma'] / jnp.sqrt(blk['rvar'] + _BN_EPS)
    shift = blk['beta'] - blk['rmean'] * scale
    return scale, shift


def _ref_conv_block(x, blk, p):
    c_in = x.shape[1]
    y = jax.lax.conv_general_dilated(
        x, blk['dw'], window_strides=(1, 1), padding=[(p, p), (p, p)],
        dimension_numbers=('NCHW', 'OIHW', 'NCHW'), feature_group_count=c_in)
    y = jax.lax.conv_general_dilated(
        y, blk['pw'], window_strides=(1, 1), padding='VALID',
        dimension_numbers=('NCHW', 'OIHW', 'NCHW'))
    scale, shift = _bn_fold_ref(blk)
    y = y * scale[None, :, None, None] + shift[None, :, None, None]
    return jax.nn.gelu(y, approximate=False)


def reference_forward(x, params):
    n, c, h, w = x.shape
    inv = 1.0 / (x + _HARMONIC_EPS)
    m = jnp.mean(inv, axis=1, keepdims=True)
    hf = (1.0 / (m + _HARMONIC_EPS)).reshape(n, h * w)
    h1 = jax.nn.gelu(hf @ params['fc1_w'].T + params['fc1_b'], approximate=False)
    h2 = h1 @ params['fc2_w'].T + params['fc2_b']
    gate = jax.nn.sigmoid(h2).reshape(n, 1, h, w)
    x3 = _ref_conv_block(x, params['conv3'], 1)
    x5 = _ref_conv_block(x, params['conv5'], 2)
    x7 = _ref_conv_block(x, params['conv7'], 3)
    z = _ref_conv_block(x3 + x5 + x7, params['conv'], 1)
    return gate * z


if __name__ == "__main__":
    key = jax.random.PRNGKey(0)
    k_x, k_p = jax.random.split(key)
    C = 4                       # in_channel == out_channel (required by forward)
    x = jax.random.uniform(k_x, (2, C, _H, _W), jnp.float32, 0.1, 1.1)
    params = init_params(k_p, C, C)

    out = jax.block_until_ready(multi_scale_adapter_forward(x, params))

    ref = reference_forward(x, params)
    err = float(jnp.max(jnp.abs(out - ref)))
    if (not np.isfinite(err)) or err > 5e-3:
        raise AssertionError(f"mismatch vs reference: max abs err = {err}")
    print("KERNEL_OK")
</pallas_src>

<mosaic_0001>
module attributes {stable_mosaic.version = 11 : i64} {
  func.func @kernel(%arg0: memref<8x448xf32, #tpu.memory_space<vmem>>, %arg1: memref<8x92xf32, #tpu.memory_space<vmem>>, %arg2: memref<24x24xf32, #tpu.memory_space<vmem>>, %arg3: memref<8x8xf32, #tpu.memory_space<vmem>>, %arg4: memref<32x1xf32, #tpu.memory_space<vmem>>, %arg5: memref<315x112xf32, #tpu.memory_space<vmem>>, %arg6: memref<112x315xf32, #tpu.memory_space<vmem>>, %arg7: memref<3x315xf32, #tpu.memory_space<vmem>>, %arg8: memref<8x315xf32, #tpu.memory_space<vmem>>, %arg9: memref<8x448xf32, #tpu.memory_space<vmem>>, %arg10: memref<24x315xf32, #tpu.memory_space<vmem>>, %arg11: memref<2x315xf32, #tpu.memory_space<vmem>>) attributes {dimension_semantics = [], scalar_prefetch = 0 : i64, scratch_operands = 3 : i64, tpu.core_type = #tpu.core_type<tc>} {
    %c2 = arith.constant 2 : index
    %c0 = arith.constant 0 : index
    %0 = vector.load %arg7[%c2, %c0] : memref<3x315xf32, #tpu.memory_space<vmem>>, vector<1x315xf32>
    %c0_0 = arith.constant 0 : index
    %c66 = arith.constant 66 : index
    %1 = vector.load %arg0[%c0_0, %c66] : memref<8x448xf32, #tpu.memory_space<vmem>>, vector<1x315xf32>
    %cst = arith.constant 9.99999993E-9 : f32
    %2 = vector.broadcast %cst : f32 to vector<1x315xf32>
    %3 = arith.addf %1, %2 : vector<1x315xf32>
    %4 = tpu.reciprocal %3 : vector<1x315xf32> -> vector<1x315xf32>
    %c1 = arith.constant 1 : index
    %c66_1 = arith.constant 66 : index
    %5 = vector.load %arg0[%c1, %c66_1] : memref<8x448xf32, #tpu.memory_space<vmem>>, vector<1x315xf32>
    %cst_2 = arith.constant 9.99999993E-9 : f32
    %6 = vector.broadcast %cst_2 : f32 to vector<1x315xf32>
    %7 = arith.addf %5, %6 : vector<1x315xf32>
    %8 = tpu.reciprocal %7 : vector<1x315xf32> -> vector<1x315xf32>
    %9 = arith.addf %4, %8 : vector<1x315xf32>
    %c2_3 = arith.constant 2 : index
    %c66_4 = arith.constant 66 : index
    %10 = vector.load %arg0[%c2_3, %c66_4] : memref<8x448xf32, #tpu.memory_space<vmem>>, vector<1x315xf32>
    %cst_5 = arith.constant 9.99999993E-9 : f32
    %11 = vector.broadcast %cst_5 : f32 to vector<1x315xf32>
    %12 = arith.addf %10, %11 : vector<1x315xf32>
    %13 = tpu.reciprocal %12 : vector<1x315xf32> -> vector<1x315xf32>
    %14 = arith.addf %9, %13 : vector<1x315xf32>
    %c3 = arith.constant 3 : index
    %c66_6 = arith.constant 66 : index
    %15 = vector.load %arg0[%c3, %c66_6] : memref<8x448xf32, #tpu.memory_space<vmem>>, vector<1x315xf32>
    %cst_7 = arith.constant 9.99999993E-9 : f32
    %16 = vector.broadcast %cst_7 : f32 to vector<1x315xf32>
    %17 = arith.addf %15, %16 : vector<1x315xf32>
    %18 = tpu.reciprocal %17 : vector<1x315xf32> -> vector<1x315xf32>
    %19 = arith.addf %14, %18 : vector<1x315xf32>
    %cst_8 = arith.constant 2.500000e-01 : f32
    %20 = vector.broadcast %cst_8 : f32 to vector<1x315xf32>
    %21 = arith.mulf %19, %20 : vector<1x315xf32>
    %c0_9 = arith.constant 0 : index
    %c0_10 = arith.constant 0 : index
    %22 = vector.load %arg11[%c0_9, %c0_10] : memref<2x315xf32, #tpu.memory_space<vmem>>, vector<1x315xf32>
    tpu.vector_store %arg11[%c0_9, %c0_10], %21 {strides = array<i32>} : memref<2x315xf32, #tpu.memory_space<vmem>>, vector<1x315xf32>,
    %c4 = arith.constant 4 : index
    %c66_11 = arith.constant 66 : index
    %23 = vector.load %arg0[%c4, %c66_11] : memref<8x448xf32, #tpu.memory_space<vmem>>, vector<1x315xf32>
    %cst_12 = arith.constant 9.99999993E-9 : f32
    %24 = vector.broadcast %cst_12 : f32 to vector<1x315xf32>
    %25 = arith.addf %23, %24 : vector<1x315xf32>
    %26 = tpu.reciprocal %25 : vector<1x315xf32> -> vector<1x315xf32>
    %c5 = arith.constant 5 : index
    %c66_13 = arith.constant 66 : index
    %27 = vector.load %arg0[%c5, %c66_13] : memref<8x448xf32, #tpu.memory_space<vmem>>, vector<1x315xf32>
    %cst_14 = arith.constant 9.99999993E-9 : f32
    %28 = vector.broadcast %cst_14 : f32 to vector<1x315xf32>
    %29 = arith.addf %27, %28 : vector<1x315xf32>
    %30 = tpu.reciprocal %29 : vector<1x315xf32> -> vector<1x315xf32>
    %31 = arith.addf %26, %30 : vector<1x315xf32>
    %c6 = arith.constant 6 : index
    %c66_15 = arith.constant 66 : index
    %32 = vector.load %arg0[%c6, %c66_15] : memref<8x448xf32, #tpu.memory_space<vmem>>, vector<1x315xf32>
    %cst_16 = arith.constant 9.99999993E-9 : f32
    %33 = vector.broadcast %cst_16 : f32 to vector<1x315xf32>
    %34 = arith.addf %32, %33 : vector<1x315xf32>
    %35 = tpu.reciprocal %34 : vector<1x315xf32> -> vector<1x315xf32>
    %36 = arith.addf %31, %35 : vector<1x315xf32>
    %c7 = arith.constant 7 : index
    %c66_17 = arith.constant 66 : index
    %37 = vector.load %arg0[%c7, %c66_17] : memref<8x448xf32, #tpu.memory_space<vmem>>, vector<1x315xf32>
    %cst_18 = arith.constant 9.99999993E-9 : f32
    %38 = vector.broadcast %cst_18 : f32 to vector<1x315xf32>
    %39 = arith.addf %37, %38 : vector<1x315xf32>
    %40 = tpu.reciprocal %39 : vector<1x315xf32> -> vector<1x315xf32>
    %41 = arith.addf %36, %40 : vector<1x315xf32>
    %cst_19 = arith.constant 2.500000e-01 : f32
    %42 = vector.broadcast %cst_19 : f32 to vector<1x315xf32>
    %43 = arith.mulf %41, %42 : vector<1x315xf32>
    %c1_20 = arith.constant 1 : index
    %c0_21 = arith.constant 0 : index
    %44 = vector.load %arg11[%c1_20, %c0_21] : memref<2x315xf32, #tpu.memory_space<vmem>>, vector<1x315xf32>
    tpu.vector_store %arg11[%c1_20, %c0_21], %43 {strides = array<i32>} : memref<2x315xf32, #tpu.memory_space<vmem>>, vector<1x315xf32>,
    %c0_22 = arith.constant 0 : index
    %c0_23 = arith.constant 0 : index
    %45 = vector.load %arg11[%c0_22, %c0_23] : memref<2x315xf32, #tpu.memory_space<vmem>>, vector<2x315xf32>
    %cst_24 = arith.constant 9.99999993E-9 : f32
    %46 = vector.broadcast %cst_24 : f32 to vector<2x315xf32>
    %47 = arith.addf %45, %46 : vector<2x315xf32>
    %48 = tpu.reciprocal %47 : vector<2x315xf32> -> vector<2x315xf32>
    %49 = vector.broadcast %0 : vector<1x315xf32> to vector<2x315xf32>
    %50 = arith.mulf %49, %48 : vector<2x315xf32>
    %c0_25 = arith.constant 0 : index
    %c0_26 = arith.constant 0 : index
    %51 = vector.load %arg5[%c0_25, %c0_26] : memref<315x112xf32, #tpu.memory_space<vmem>>, vector<315x112xf32>
    %cst_27 = arith.constant dense<0.000000e+00> : vector<2x112xf32>
    %52 = tpu.matmul %50, %51, %cst_27 {dimension_numbers = #tpu.dot_dimension_numbers<[1], [0], [0], [1], [0, 0, 1, 1], [], []>} : vector<2x315xf32>, vector<315x112xf32>, vector<2x112xf32> -> vector<2x112xf32>
    %c0_28 = arith.constant 0 : index
    %c0_29 = arith.constant 0 : index
    %53 = vector.load %arg7[%c0_28, %c0_29] : memref<3x315xf32, #tpu.memory_space<vmem>>, vector<1x112xf32>
    %54 = vector.broadcast %53 : vector<1x112xf32> to vector<2x112xf32>
    %55 = arith.addf %52, %54 : vector<2x112xf32>
    %cst_30 = arith.constant 5.000000e-01 : f32
    %56 = vector.broadcast %cst_30 : f32 to vector<2x112xf32>
    %57 = arith.mulf %56, %55 : vector<2x112xf32>
    %cst_31 = arith.constant 0.707106769 : f32
    %58 = vector.broadcast %cst_31 : f32 to vector<2x112xf32>
    %59 = arith.mulf %55, %58 : vector<2x112xf32>
    %60 = math.absf %59 : vector<2x112xf32>
    %cst_32 = arith.constant 0.327591091 : f32
    %61 = vector.broadcast %cst_32 : f32 to vector<2x112xf32>
    %62 = arith.mulf %61, %60 : vector<2x112xf32>
    %cst_33 = arith.constant 1.000000e+00 : f32
    %63 = vector.broadcast %cst_33 : f32 to vector<2x112xf32>
    %64 = arith.addf %63, %62 : vector<2x112xf32>
    %65 = tpu.reciprocal %64 {approx = true} : vector<2x112xf32> -> vector<2x112xf32>
    %66 = arith.mulf %64, %65 : vector<2x112xf32>
    %cst_34 = arith.constant 2.000000e+00 : f32
    %67 = vector.broadcast %cst_34 : f32 to vector<2x112xf32>
    %68 = arith.subf %67, %66 : vector<2x112xf32>
    %69 = arith.mulf %65, %68 : vector<2x112xf32>
    %cst_35 = arith.constant 1.06140542 : f32
    %70 = vector.broadcast %cst_35 : f32 to vector<2x112xf32>
    %71 = arith.mulf %69, %70 : vector<2x112xf32>
    %cst_36 = arith.constant -1.45315206 : f32
    %72 = vector.broadcast %cst_36 : f32 to vector<2x112xf32>
    %73 = arith.addf %72, %71 : vector<2x112xf32>
    %74 = arith.mulf %69, %73 : vector<2x112xf32>
    %cst_37 = arith.constant 1.42141378 : f32
    %75 = vector.broadcast %cst_37 : f32 to vector<2x112xf32>
    %76 = arith.addf %75, %74 : vector<2x112xf32>
    %77 = arith.mulf %69, %76 : vector<2x112xf32>
    %cst_38 = arith.constant -0.284496725 : f32
    %78 = vector.broadcast %cst_38 : f32 to vector<2x112xf32>
    %79 = arith.addf %78, %77 : vector<2x112xf32>
    %80 = arith.mulf %69, %79 : vector<2x112xf32>
    %cst_39 = arith.constant 0.254829586 : f32
    %81 = vector.broadcast %cst_39 : f32 to vector<2x112xf32>
    %82 = arith.addf %81, %80 : vector<2x112xf32>
    %83 = arith.mulf %69, %82 : vector<2x112xf32>
    %cst_40 = arith.constant 0.000000e+00 : f32
    %84 = vector.broadcast %cst_40 : f32 to vector<2x112xf32>
    %85 = arith.subf %84, %60 : vector<2x112xf32>
    %86 = arith.mulf %85, %60 : vector<2x112xf32>
    %87 = math.exp %86 : vector<2x112xf32>
    %88 = arith.mulf %83, %87 : vector<2x112xf32>
    %cst_41 = arith.constant 1.000000e+00 : f32
    %89 = vector.broadcast %cst_41 : f32 to vector<2x112xf32>
    %90 = arith.subf %89, %88 : vector<2x112xf32>
    %cst_42 = arith.constant 0.000000e+00 : f32
    %91 = vector.broadcast %cst_42 : f32 to vector<2x112xf32>
    %92 = arith.cmpf oge, %59, %91 : vector<2x112xf32>
    %cst_43 = arith.constant 0.000000e+00 : f32
    %93 = vector.broadcast %cst_43 : f32 to vector<2x112xf32>
    %94 = arith.subf %93, %90 : vector<2x112xf32>
    %95 = arith.select %92, %90, %94 : vector<2x112xi1>, vector<2x112xf32>
    %cst_44 = arith.constant 1.000000e+00 : f32
    %96 = vector.broadcast %cst_44 : f32 to vector<2x112xf32>
    %97 = arith.addf %96, %95 : vector<2x112xf32>
    %98 = arith.mulf %57, %97 : vector<2x112xf32>
    %c0_45 = arith.constant 0 : index
    %c0_46 = arith.constant 0 : index
    %99 = vector.load %arg6[%c0_45, %c0_46] : memref<112x315xf32, #tpu.memory_space<vmem>>, vector<112x315xf32>
    %cst_47 = arith.constant dense<0.000000e+00> : vector<2x315xf32>
    %100 = tpu.matmul %98, %99, %cst_47 {dimension_numbers = #tpu.dot_dimension_numbers<[1], [0], [0], [1], [0, 0, 1, 1], [], []>} : vector<2x112xf32>, vector<112x315xf32>, vector<2x315xf32> -> vector<2x315xf32>
    %c1_48 = arith.constant 1 : index
    %c0_49 = arith.constant 0 : index
    %101 = vector.load %arg7[%c1_48, %c0_49] : memref<3x315xf32, #tpu.memory_space<vmem>>, vector<1x315xf32>
    %102 = vector.broadcast %101 : vector<1x315xf32> to vector<2x315xf32>
    %103 = arith.addf %100, %102 : vector<2x315xf32>
    %104 = arith.negf %103 : vector<2x315xf32>
    %105 = math.exp %104 : vector<2x315xf32>
    %cst_50 = arith.constant 1.000000e+00 : f32
    %106 = vector.broadcast %cst_50 : f32 to vector<2x315xf32>
    %107 = arith.addf %106, %105 : vector<2x315xf32>
    %108 = arith.divf %106, %107 : vector<2x315xf32>
    %c0_51 = arith.constant 0 : index
    %c0_52 = arith.constant 0 : index
    %109 = vector.load %arg11[%c0_51, %c0_52] : memref<2x315xf32, #tpu.memory_space<vmem>>, vector<2x315xf32>
    tpu.vector_store %arg11[%c0_51, %c0_52], %108 {strides = array<i32>} : memref<2x315xf32, #tpu.memory_space<vmem>>, vector<2x315xf32>,
    %c0_53 = arith.constant 0 : index
    %c0_54 = arith.constant 0 : index
    %110 = vector.load %arg1[%c0_53, %c0_54] : memref<8x92xf32, #tpu.memory_space<vmem>>, vector<8x1xf32>
    %c0_55 = arith.constant 0 : index
    %c44 = arith.constant 44 : index
    %111 = vector.load %arg0[%c0_55, %c44] : memref<8x448xf32, #tpu.memory_space<vmem>>, vector<8x315xf32>
    %112 = vector.broadcast %110 : vector<8x1xf32> to vector<8x315xf32>
    %113 = arith.mulf %112, %111 : vector<8x315xf32>
    %c0_56 = arith.constant 0 : index
    %c1_57 = arith.constant 1 : index
    %114 = vector.load %arg1[%c0_56, %c1_57] : memref<8x92xf32, #tpu.memory_space<vmem>>, vector<8x1xf32>
    %c0_58 = arith.constant 0 : index
    %c45 = arith.constant 45 : index
    %115 = vector.load %arg0[%c0_58, %c45] : memref<8x448xf32, #tpu.memory_space<vmem>>, vector<8x315xf32>
    %116 = vector.broadcast %114 : vector<8x1xf32> to vector<8x315xf32>
    %117 = arith.mulf %116, %115 : vector<8x315xf32>
    %118 = arith.addf %113, %117 : vector<8x315xf32>
    %c0_59 = arith.constant 0 : index
    %c2_60 = arith.constant 2 : index
    %119 = vector.load %arg1[%c0_59, %c2_60] : memref<8x92xf32, #tpu.memory_space<vmem>>, vector<8x1xf32>
    %c0_61 = arith.constant 0 : index
    %c46 = arith.constant 46 : index
    %120 = vector.load %arg0[%c0_61, %c46] : memref<8x448xf32, #tpu.memory_space<vmem>>, vector<8x315xf32>
    %121 = vector.broadcast %119 : vector<8x1xf32> to vector<8x315xf32>
    %122 = arith.mulf %121, %120 : vector<8x315xf32>
    %123 = arith.addf %118, %122 : vector<8x315xf32>
    %c0_62 = arith.constant 0 : index
    %c3_63 = arith.constant 3 : index
    %124 = vector.load %arg1[%c0_62, %c3_63] : memref<8x92xf32, #tpu.memory_space<vmem>>, vector<8x1xf32>
    %c0_64 = arith.constant 0 : index
    %c65 = arith.constant 65 : index
    %125 = vector.load %arg0[%c0_64, %c65] : memref<8x448xf32, #tpu.memory_space<vmem>>, vector<8x315xf32>
    %126 = vector.broadcast %124 : vector<8x1xf32> to vector<8x315xf32>
    %127 = arith.mulf %126, %125 : vector<8x315xf32>
    %128 = arith.addf %123, %127 : vector<8x315xf32>
    %c0_65 = arith.constant 0 : index
    %c4_66 = arith.constant 4 : index
    %129 = vector.load %arg1[%c0_65, %c4_66] : memref<8x92xf32, #tpu.memory_space<vmem>>, vector<8x1xf32>
    %c0_67 = arith.constant 0 : index
    %c66_68 = arith.constant 66 : index
    %130 = vector.load %arg0[%c0_67, %c66_68] : memref<8x448xf32, #tpu.memory_space<vmem>>, vector<8x315xf32>
    %131 = vector.broadcast %129 : vector<8x1xf32> to vector<8x315xf32>
    %132 = arith.mulf %131, %130 : vector<8x315xf32>
    %133 = arith.addf %128, %132 : vector<8x315xf32>
    %c0_69 = arith.constant 0 : index
    %c5_70 = arith.constant 5 : index
    %134 = vector.load %arg1[%c0_69, %c5_70] : memref<8x92xf32, #tpu.memory_space<vmem>>, vector<8x1xf32>
    %c0_71 = arith.constant 0 : index
    %c67 = arith.constant 67 : index
    %135 = vector.load %arg0[%c0_71, %c67] : memref<8x448xf32, #tpu.memory_space<vmem>>, vector<8x315xf32>
    %136 = vector.broadcast %134 : vector<8x1xf32> to vector<8x315xf32>
    %137 = arith.mulf %136, %135 : vector<8x315xf32>
    %138 = arith.addf %133, %137 : vector<8x315xf32>
    %c0_72 = arith.constant 0 : index
    %c6_73 = arith.constant 6 : index
    %139 = vector.load %arg1[%c0_72, %c6_73] : memref<8x92xf32, #tpu.memory_space<vmem>>, vector<8x1xf32>
    %c0_74 = arith.constant 0 : index
    %c86 = arith.constant 86 : index
    %140 = vector.load %arg0[%c0_74, %c86] : memref<8x448xf32, #tpu.memory_space<vmem>>, vector<8x315xf32>
    %141 = vector.broadcast %139 : vector<8x1xf32> to vector<8x315xf32>
    %142 = arith.mulf %141, %140 : vector<8x315xf32>
    %143 = arith.addf %138, %142 : vector<8x315xf32>
    %c0_75 = arith.constant 0 : index
    %c7_76 = arith.constant 7 : index
    %144 = vector.load %arg1[%c0_75, %c7_76] : memref<8x92xf32, #tpu.memory_space<vmem>>, vector<8x1xf32>
    %c0_77 = arith.constant 0 : index
    %c87 = arith.constant 87 : index
    %145 = vector.load %arg0[%c0_77, %c87] : memref<8x448xf32, #tpu.memory_space<vmem>>, vector<8x315xf32>
    %146 = vector.broadcast %144 : vector<8x1xf32> to vector<8x315xf32>
    %147 = arith.mulf %146, %145 : vector<8x315xf32>
    %148 = arith.addf %143, %147 : vector<8x315xf32>
    %c0_78 = arith.constant 0 : index
    %c8 = arith.constant 8 : index
    %149 = vector.load %arg1[%c0_78, %c8] : memref<8x92xf32, #tpu.memory_space<vmem>>, vector<8x1xf32>
    %c0_79 = arith.constant 0 : index
    %c88 = arith.constant 88 : index
    %150 = vector.load %arg0[%c0_79, %c88] : memref<8x448xf32, #tpu.memory_space<vmem>>, vector<8x315xf32>
    %151 = vector.broadcast %149 : vector<8x1xf32> to vector<8x315xf32>
    %152 = arith.mulf %151, %150 : vector<8x315xf32>
    %153 = arith.addf %148, %152 : vector<8x315xf32>
    %c0_80 = arith.constant 0 : index
    %c0_81 = arith.constant 0 : index
    %154 = vector.load %arg10[%c0_80, %c0_81] : memref<24x315xf32, #tpu.memory_space<vmem>>, vector<8x315xf32>
    tpu.vector_store %arg10[%c0_80, %c0_81], %153 {strides = array<i32>} : memref<24x315xf32, #tpu.memory_space<vmem>>, vector<8x315xf32>,
    %c0_82 = arith.constant 0 : index
    %c9 = arith.constant 9 : index
    %155 = vector.load %arg1[%c0_82, %c9] : memref<8x92xf32, #tpu.memory_space<vmem>>, vector<8x1xf32>
    %c0_83 = arith.constant 0 : index
    %c22 = arith.constant 22 : index
    %156 = vector.load %arg0[%c0_83, %c22] : memref<8x448xf32, #tpu.memory_space<vmem>>, vector<8x315xf32>
    %157 = vector.broadcast %155 : vector<8x1xf32> to vector<8x315xf32>
    %158 = arith.mulf %157, %156 : vector<8x315xf32>
    %c0_84 = arith.constant 0 : index
    %c10 = arith.constant 10 : index
    %159 = vector.load %arg1[%c0_84, %c10] : memref<8x92xf32, #tpu.memory_space<vmem>>, vector<8x1xf32>
    %c0_85 = arith.constant 0 : index
    %c23 = arith.constant 23 : index
    %160 = vector.load %arg0[%c0_85, %c23] : memref<8x448xf32, #tpu.memory_space<vmem>>, vector<8x315xf32>
    %161 = vector.broadcast %159 : vector<8x1xf32> to vector<8x315xf32>
    %162 = arith.mulf %161, %160 : vector<8x315xf32>
    %163 = arith.addf %158, %162 : vector<8x315xf32>
    %c0_86 = arith.constant 0 : index
    %c11 = arith.constant 11 : index
    %164 = vector.load %arg1[%c0_86, %c11] : memref<8x92xf32, #tpu.memory_space<vmem>>, vector<8x1xf32>
    %c0_87 = arith.constant 0 : index
    %c24 = arith.constant 24 : index
    %165 = vector.load %arg0[%c0_87, %c24] : memref<8x448xf32, #tpu.memory_space<vmem>>, vector<8x315xf32>
    %166 = vector.broadcast %164 : vector<8x1xf32> to vector<8x315xf32>
    %167 = arith.mulf %166, %165 : vector<8x315xf32>
    %168 = arith.addf %163, %167 : vector<8x315xf32>
    %c0_88 = arith.constant 0 : index
    %c12 = arith.constant 12 : index
    %169 = vector.load %arg1[%c0_88, %c12] : memref<8x92xf32, #tpu.memory_space<vmem>>, vector<8x1xf32>
    %c0_89 = arith.constant 0 : index
    %c25 = arith.constant 25 : index
    %170 = vector.load %arg0[%c0_89, %c25] : memref<8x448xf32, #tpu.memory_space<vmem>>, vector<8x315xf32>
    %171 = vector.broadcast %169 : vector<8x1xf32> to vector<8x315xf32>
    %172 = arith.mulf %171, %170 : vector<8x315xf32>
    %173 = arith.addf %168, %172 : vector<8x315xf32>
    %c0_90 = arith.constant 0 : index
    %c13 = arith.constant 13 : index
    %174 = vector.load %arg1[%c0_90, %c13] : memref<8x92xf32, #tpu.memory_space<vmem>>, vector<8x1xf32>
    %c0_91 = arith.constant 0 : index
    %c26 = arith.constant 26 : index
    %175 = vector.load %arg0[%c0_91, %c26] : memref<8x448xf32, #tpu.memory_space<vmem>>, vector<8x315xf32>
    %176 = vector.broadcast %174 : vector<8x1xf32> to vector<8x315xf32>
    %177 = arith.mulf %176, %175 : vector<8x315xf32>
    %178 = arith.addf %173, %177 : vector<8x315xf32>
    %c0_92 = arith.constant 0 : index
    %c14 = arith.constant 14 : index
    %179 = vector.load %arg1[%c0_92, %c14] : memref<8x92xf32, #tpu.memory_space<vmem>>, vector<8x1xf32>
    %c0_93 = arith.constant 0 : index
    %c43 = arith.constant 43 : index
    %180 = vector.load %arg0[%c0_93, %c43] : memref<8x448xf32, #tpu.memory_space<vmem>>, vector<8x315xf32>
    %181 = vector.broadcast %179 : vector<8x1xf32> to vector<8x315xf32>
    %182 = arith.mulf %181, %180 : vector<8x315xf32>
    %183 = arith.addf %178, %182 : vector<8x315xf32>
    %c0_94 = arith.constant 0 : index
    %c15 = arith.constant 15 : index
    %184 = vector.load %arg1[%c0_94, %c15] : memref<8x92xf32, #tpu.memory_space<vmem>>, vector<8x1xf32>
    %c0_95 = arith.constant 0 : index
    %c44_96 = arith.constant 44 : index
    %185 = vector.load %arg0[%c0_95, %c44_96] : memref<8x448xf32, #tpu.memory_space<vmem>>, vector<8x315xf32>
    %186 = vector.broadcast %184 : vector<8x1xf32> to vector<8x315xf32>
    %187 = arith.mulf %186, %185 : vector<8x315xf32>
    %188 = arith.addf %183, %187 : vector<8x315xf32>
    %c0_97 = arith.constant 0 : index
    %c16 = arith.constant 16 : index
    %189 = vector.load %arg1[%c0_97, %c16] : memref<8x92xf32, #tpu.memory_space<vmem>>, vector<8x1xf32>
    %c0_98 = arith.constant 0 : index
    %c45_99 = arith.constant 45 : index
    %190 = vector.load %arg0[%c0_98, %c45_99] : memref<8x448xf32, #tpu.memory_space<vmem>>, vector<8x315xf32>
    %191 = vector.broadcast %189 : vector<8x1xf32> to vector<8x315xf32>
    %192 = arith.mulf %191, %190 : vector<8x315xf32>
    %193 = arith.addf %188, %192 : vector<8x315xf32>
    %c0_100 = arith.constant 0 : index
    %c17 = arith.constant 17 : index
    %194 = vector.load %arg1[%c0_100, %c17] : memref<8x92xf32, #tpu.memory_space<vmem>>, vector<8x1xf32>
    %c0_101 = arith.constant 0 : index
    %c46_102 = arith.constant 46 : index
    %195 = vector.load %arg0[%c0_101, %c46_102] : memref<8x448xf32, #tpu.memory_space<vmem>>, vector<8x315xf32>
    %196 = vector.broadcast %194 : vector<8x1xf32> to vector<8x315xf32>
    %197 = arith.mulf %196, %195 : vector<8x315xf32>
    %198 = arith.addf %193, %197 : vector<8x315xf32>
    %c0_103 = arith.constant 0 : index
    %c18 = arith.constant 18 : index
    %199 = vector.load %arg1[%c0_103, %c18] : memref<8x92xf32, #tpu.memory_space<vmem>>, vector<8x1xf32>
    %c0_104 = arith.constant 0 : index
    %c47 = arith.constant 47 : index
    %200 = vector.load %arg0[%c0_104, %c47] : memref<8x448xf32, #tpu.memory_space<vmem>>, vector<8x315xf32>
    %201 = vector.broadcast %199 : vector<8x1xf32> to vector<8x315xf32>
    %202 = arith.mulf %201, %200 : vector<8x315xf32>
    %203 = arith.addf %198, %202 : vector<8x315xf32>
    %c0_105 = arith.constant 0 : index
    %c19 = arith.constant 19 : index
    %204 = vector.load %arg1[%c0_105, %c19] : memref<8x92xf32, #tpu.memory_space<vmem>>, vector<8x1xf32>
    %c0_106 = arith.constant 0 : index
    %c64 = arith.constant 64 : index
    %205 = vector.load %arg0[%c0_106, %c64] : memref<8x448xf32, #tpu.memory_space<vmem>>, vector<8x315xf32>
    %206 = vector.broadcast %204 : vector<8x1xf32> to vector<8x315xf32>
    %207 = arith.mulf %206, %205 : vector<8x315xf32>
    %208 = arith.addf %203, %207 : vector<8x315xf32>
    %c0_107 = arith.constant 0 : index
    %c20 = arith.constant 20 : index
    %209 = vector.load %arg1[%c0_107, %c20] : memref<8x92xf32, #tpu.memory_space<vmem>>, vector<8x1xf32>
    %c0_108 = arith.constant 0 : index
    %c65_109 = arith.constant 65 : index
    %210 = vector.load %arg0[%c0_108, %c65_109] : memref<8x448xf32, #tpu.memory_space<vmem>>, vector<8x315xf32>
    %211 = vector.broadcast %209 : vector<8x1xf32> to vector<8x315xf32>
    %212 = arith.mulf %211, %210 : vector<8x315xf32>
    %213 = arith.addf %208, %212 : vector<8x315xf32>
    %c0_110 = arith.constant 0 : index
    %c21 = arith.constant 21 : index
    %214 = vector.load %arg1[%c0_110, %c21] : memref<8x92xf32, #tpu.memory_space<vmem>>, vector<8x1xf32>
    %c0_111 = arith.constant 0 : index
    %c66_112 = arith.constant 66 : index
    %215 = vector.load %arg0[%c0_111, %c66_112] : memref<8x448xf32, #tpu.memory_space<vmem>>, vector<8x315xf32>
    %216 = vector.broadcast %214 : vector<8x1xf32> to vector<8x315xf32>
    %217 = arith.mulf %216, %215 : vector<8x315xf32>
    %218 = arith.addf %213, %217 : vector<8x315xf32>
    %c0_113 = arith.constant 0 : index
    %c22_114 = arith.constant 22 : index
    %219 = vector.load %arg1[%c0_113, %c22_114] : memref<8x92xf32, #tpu.memory_space<vmem>>, vector<8x1xf32>
    %c0_115 = arith.constant 0 : index
    %c67_116 = arith.constant 67 : index
    %220 = vector.load %arg0[%c0_115, %c67_116] : memref<8x448xf32, #tpu.memory_space<vmem>>, vector<8x315xf32>
    %221 = vector.broadcast %219 : vector<8x1xf32> to vector<8x315xf32>
    %222 = arith.mulf %221, %220 : vector<8x315xf32>
    %223 = arith.addf %218, %222 : vector<8x315xf32>
    %c0_117 = arith.constant 0 : index
    %c23_118 = arith.constant 23 : index
    %224 = vector.load %arg1[%c0_117, %c23_118] : memref<8x92xf32, #tpu.memory_space<vmem>>, vector<8x1xf32>
    %c0_119 = arith.constant 0 : index
    %c68 = arith.constant 68 : index
    %225 = vector.load %arg0[%c0_119, %c68] : memref<8x448xf32, #tpu.memory_space<vmem>>, vector<8x315xf32>
    %226 = vector.broadcast %224 : vector<8x1xf32> to vector<8x315xf32>
    %227 = arith.mulf %226, %225 : vector<8x315xf32>
    %228 = arith.addf %223, %227 : vector<8x315xf32>
    %c0_120 = arith.constant 0 : index
    %c24_121 = arith.constant 24 : index
    %229 = vector.load %arg1[%c0_120, %c24_121] : memref<8x92xf32, #tpu.memory_space<vmem>>, vector<8x1xf32>
    %c0_122 = arith.constant 0 : index
    %c85 = arith.constant 85 : index
    %230 = vector.load %arg0[%c0_122, %c85] : memref<8x448xf32, #tpu.memory_space<vmem>>, vector<8x315xf32>
    %231 = vector.broadcast %229 : vector<8x1xf32> to vector<8x315xf32>
    %232 = arith.mulf %231, %230 : vector<8x315xf32>
    %233 = arith.addf %228, %232 : vector<8x315xf32>
    %c0_123 = arith.constant 0 : index
    %c25_124 = arith.constant 25 : index
    %234 = vector.load %arg1[%c0_123, %c25_124] : memref<8x92xf32, #tpu.memory_space<vmem>>, vector<8x1xf32>
    %c0_125 = arith.constant 0 : index
    %c86_126 = arith.constant 86 : index
    %235 = vector.load %arg0[%c0_125, %c86_126] : memref<8x448xf32, #tpu.memory_space<vmem>>, vector<8x315xf32>
    %236 = vector.broadcast %234 : vector<8x1xf32> to vector<8x315xf32>
    %237 = arith.mulf %236, %235 : vector<8x315xf32>
    %238 = arith.addf %233, %237 : vector<8x315xf32>
    %c0_127 = arith.constant 0 : index
    %c26_128 = arith.constant 26 : index
    %239 = vector.load %arg1[%c0_127, %c26_128] : memref<8x92xf32, #tpu.memory_space<vmem>>, vector<8x1xf32>
    %c0_129 = arith.constant 0 : index
    %c87_130 = arith.constant 87 : index
    %240 = vector.load %arg0[%c0_129, %c87_130] : memref<8x448xf32, #tpu.memory_space<vmem>>, vector<8x315xf32>
    %241 = vector.broadcast %239 : vector<8x1xf32> to vector<8x315xf32>
    %242 = arith.mulf %241, %240 : vector<8x315xf32>
    %243 = arith.addf %238, %242 : vector<8x315xf32>
    %c0_131 = arith.constant 0 : index
    %c27 = arith.constant 27 : index
    %244 = vector.load %arg1[%c0_131, %c27] : memref<8x92xf32, #tpu.memory_space<vmem>>, vector<8x1xf32>
    %c0_132 = arith.constant 0 : index
    %c88_133 = arith.constant 88 : index
    %245 = vector.load %arg0[%c0_132, %c88_133] : memref<8x448xf32, #tpu.memory_space<vmem>>, vector<8x315xf32>
    %246 = vector.broadcast %244 : vector<8x1xf32> to vector<8x315xf32>
    %247 = arith.mulf %246, %245 : vector<8x315xf32>
    %248 = arith.addf %243, %247 : vector<8x315xf32>
    %c0_134 = arith.constant 0 : index
    %c28 = arith.constant 28 : index
    %249 = vector.load %arg1[%c0_134, %c28] : memref<8x92xf32, #tpu.memory_space<vmem>>, vector<8x1xf32>
    %c0_135 = arith.constant 0 : index
    %c89 = arith.constant 89 : index
    %250 = vector.load %arg0[%c0_135, %c89] : memref<8x448xf32, #tpu.memory_space<vmem>>, vector<8x315xf32>
    %251 = vector.broadcast %249 : vector<8x1xf32> to vector<8x315xf32>
    %252 = arith.mulf %251, %250 : vector<8x315xf32>
    %253 = arith.addf %248, %252 : vector<8x315xf32>
    %c0_136 = arith.constant 0 : index
    %c29 = arith.constant 29 : index
    %254 = vector.load %arg1[%c0_136, %c29] : memref<8x92xf32, #tpu.memory_space<vmem>>, vector<8x1xf32>
    %c0_137 = arith.constant 0 : index
    %c106 = arith.constant 106 : index
    %255 = vector.load %arg0[%c0_137, %c106] : memref<8x448xf32, #tpu.memory_space<vmem>>, vector<8x315xf32>
    %256 = vector.broadcast %254 : vector<8x1xf32> to vector<8x315xf32>
    %257 = arith.mulf %256, %255 : vector<8x315xf32>
    %258 = arith.addf %253, %257 : vector<8x315xf32>
    %c0_138 = arith.constant 0 : index
    %c30 = arith.constant 30 : index
    %259 = vector.load %arg1[%c0_138, %c30] : memref<8x92xf32, #tpu.memory_space<vmem>>, vector<8x1xf32>
    %c0_139 = arith.constant 0 : index
    %c107 = arith.constant 107 : index
    %260 = vector.load %arg0[%c0_139, %c107] : memref<8x448xf32, #tpu.memory_space<vmem>>, vector<8x315xf32>
    %261 = vector.broadcast %259 : vector<8x1xf32> to vector<8x315xf32>
    %262 = arith.mulf %261, %260 : vector<8x315xf32>
    %263 = arith.addf %258, %262 : vector<8x315xf32>
    %c0_140 = arith.constant 0 : index
    %c31 = arith.constant 31 : index
    %264 = vector.load %arg1[%c0_140, %c31] : memref<8x92xf32, #tpu.memory_space<vmem>>, vector<8x1xf32>
    %c0_141 = arith.constant 0 : index
    %c108 = arith.constant 108 : index
    %265 = vector.load %arg0[%c0_141, %c108] : memref<8x448xf32, #tpu.memory_space<vmem>>, vector<8x315xf32>
    %266 = vector.broadcast %264 : vector<8x1xf32> to vector<8x315xf32>
    %267 = arith.mulf %266, %265 : vector<8x315xf32>
    %268 = arith.addf %263, %267 : vector<8x315xf32>
    %c0_142 = arith.constant 0 : index
    %c32 = arith.constant 32 : index
    %269 = vector.load %arg1[%c0_142, %c32] : memref<8x92xf32, #tpu.memory_space<vmem>>, vector<8x1xf32>
    %c0_143 = arith.constant 0 : index
    %c109 = arith.constant 109 : index
    %270 = vector.load %arg0[%c0_143, %c109] : memref<8x448xf32, #tpu.memory_space<vmem>>, vector<8x315xf32>
    %271 = vector.broadcast %269 : vector<8x1xf32> to vector<8x315xf32>
    %272 = arith.mulf %271, %270 : vector<8x315xf32>
    %273 = arith.addf %268, %272 : vector<8x315xf32>
    %c0_144 = arith.constant 0 : index
    %c33 = arith.constant 33 : index
    %274 = vector.load %arg1[%c0_144, %c33] : memref<8x92xf32, #tpu.memory_space<vmem>>, vector<8x1xf32>
    %c0_145 = arith.constant 0 : index
    %c110 = arith.constant 110 : index
    %275 = vector.load %arg0[%c0_145, %c110] : memref<8x448xf32, #tpu.memory_space<vmem>>, vector<8x315xf32>
    %276 = vector.broadcast %274 : vector<8x1xf32> to vector<8x315xf32>
    %277 = arith.mulf %276, %275 : vector<8x315xf32>
    %278 = arith.addf %273, %277 : vector<8x315xf32>
    %c8_146 = arith.constant 8 : index
    %c0_147 = arith.constant 0 : index
    %279 = vector.load %arg10[%c8_146, %c0_147] : memref<24x315xf32, #tpu.memory_space<vmem>>, vector<8x315xf32>
    tpu.vector_store %arg10[%c8_146, %c0_147], %278 {strides = array<i32>} : memref<24x315xf32, #tpu.memory_space<vmem>>, vector<8x315xf32>,
    %c0_148 = arith.constant 0 : index
    %c34 = arith.constant 34 : index
    %280 = vector.load %arg1[%c0_148, %c34] : memref<8x92xf32, #tpu.memory_space<vmem>>, vector<8x1xf32>
    %c0_149 = arith.constant 0 : index
    %c0_150 = arith.constant 0 : index
    %281 = vector.load %arg0[%c0_149, %c0_150] : memref<8x448xf32, #tpu.memory_space<vmem>>, vector<8x315xf32>
    %282 = vector.broadcast %280 : vector<8x1xf32> to vector<8x315xf32>
    %283 = arith.mulf %282, %281 : vector<8x315xf32>
    %c0_151 = arith.constant 0 : index
    %c35 = arith.constant 35 : index
    %284 = vector.load %arg1[%c0_151, %c35] : memref<8x92xf32, #tpu.memory_space<vmem>>, vector<8x1xf32>
    %c0_152 = arith.constant 0 : index
    %c1_153 = arith.constant 1 : index
    %285 = vector.load %arg0[%c0_152, %c1_153] : memref<8x448xf32, #tpu.memory_space<vmem>>, vector<8x315xf32>
    %286 = vector.broadcast %284 : vector<8x1xf32> to vector<8x315xf32>
    %287 = arith.mulf %286, %285 : vector<8x315xf32>
    %288 = arith.addf %283, %287 : vector<8x315xf32>
    %c0_154 = arith.constant 0 : index
    %c36 = arith.constant 36 : index
    %289 = vector.load %arg1[%c0_154, %c36] : memref<8x92xf32, #tpu.memory_space<vmem>>, vector<8x1xf32>
    %c0_155 = arith.constant 0 : index
    %c2_156 = arith.constant 2 : index
    %290 = vector.load %arg0[%c0_155, %c2_156] : memref<8x448xf32, #tpu.memory_space<vmem>>, vector<8x315xf32>
    %291 = vector.broadcast %289 : vector<8x1xf32> to vector<8x315xf32>
    %292 = arith.mulf %291, %290 : vector<8x315xf32>
    %293 = arith.addf %288, %292 : vector<8x315xf32>
    %c0_157 = arith.constant 0 : index
    %c37 = arith.constant 37 : index
    %294 = vector.load %arg1[%c0_157, %c37] : memref<8x92xf32, #tpu.memory_space<vmem>>, vector<8x1xf32>
    %c0_158 = arith.constant 0 : index
    %c3_159 = arith.constant 3 : index
    %295 = vector.load %arg0[%c0_158, %c3_159] : memref<8x448xf32, #tpu.memory_space<vmem>>, vector<8x315xf32>
    %296 = vector.broadcast %294 : vector<8x1xf32> to vector<8x315xf32>
    %297 = arith.mulf %296, %295 : vector<8x315xf32>
    %298 = arith.addf %293, %297 : vector<8x315xf32>
    %c0_160 = arith.constant 0 : index
    %c38 = arith.constant 38 : index
    %299 = vector.load %arg1[%c0_160, %c38] : memref<8x92xf32, #tpu.memory_space<vmem>>, vector<8x1xf32>
    %c0_161 = arith.constant 0 : index
    %c4_162 = arith.constant 4 : index
    %300 = vector.load %arg0[%c0_161, %c4_162] : memref<8x448xf32, #tpu.memory_space<vmem>>, vector<8x315xf32>
    %301 = vector.broadcast %299 : vector<8x1xf32> to vector<8x315xf32>
    %302 = arith.mulf %301, %300 : vector<8x315xf32>
    %303 = arith.addf %298, %302 : vector<8x315xf32>
    %c0_163 = arith.constant 0 : index
    %c39 = arith.constant 39 : index
    %304 = vector.load %arg1[%c0_163, %c39] : memref<8x92xf32, #tpu.memory_space<vmem>>, vector<8x1xf32>
    %c0_164 = arith.constant 0 : index
    %c5_165 = arith.constant 5 : index
    %305 = vector.load %arg0[%c0_164, %c5_165] : memref<8x448xf32, #tpu.memory_space<vmem>>, vector<8x315xf32>
    %306 = vector.broadcast %304 : vector<8x1xf32> to vector<8x315xf32>
    %307 = arith.mulf %306, %305 : vector<8x315xf32>
    %308 = arith.addf %303, %307 : vector<8x315xf32>
    %c0_166 = arith.constant 0 : index
    %c40 = arith.constant 40 : index
    %309 = vector.load %arg1[%c0_166, %c40] : memref<8x92xf32, #tpu.memory_space<vmem>>, vector<8x1xf32>
    %c0_167 = arith.constant 0 : index
    %c6_168 = arith.constant 6 : index
    %310 = vector.load %arg0[%c0_167, %c6_168] : memref<8x448xf32, #tpu.memory_space<vmem>>, vector<8x315xf32>
    %311 = vector.broadcast %309 : vector<8x1xf32> to vector<8x315xf32>
    %312 = arith.mulf %311, %310 : vector<8x315xf32>
    %313 = arith.addf %308, %312 : vector<8x315xf32>
    %c0_169 = arith.constant 0 : index
    %c41 = arith.constant 41 : index
    %314 = vector.load %arg1[%c0_169, %c41] : memref<8x92xf32, #tpu.memory_space<vmem>>, vector<8x1xf32>
    %c0_170 = arith.constant 0 : index
    %c21_171 = arith.constant 21 : index
    %315 = vector.load %arg0[%c0_170, %c21_171] : memref<8x448xf32, #tpu.memory_space<vmem>>, vector<8x315xf32>
    %316 = vector.broadcast %314 : vector<8x1xf32> to vector<8x315xf32>
    %317 = arith.mulf %316, %315 : vector<8x315xf32>
    %318 = arith.addf %313, %317 : vector<8x315xf32>
    %c0_172 = arith.constant 0 : index
    %c42 = arith.constant 42 : index
    %319 = vector.load %arg1[%c0_172, %c42] : memref<8x92xf32, #tpu.memory_space<vmem>>, vector<8x1xf32>
    %c0_173 = arith.constant 0 : index
    %c22_174 = arith.constant 22 : index
    %320 = vector.load %arg0[%c0_173, %c22_174] : memref<8x448xf32, #tpu.memory_space<vmem>>, vector<8x315xf32>
    %321 = vector.broadcast %319 : vector<8x1xf32> to vector<8x315xf32>
    %322 = arith.mulf %321, %320 : vector<8x315xf32>
    %323 = arith.addf %318, %322 : vector<8x315xf32>
    %c0_175 = arith.constant 0 : index
    %c43_176 = arith.constant 43 : index
    %324 = vector.load %arg1[%c0_175, %c43_176] : memref<8x92xf32, #tpu.memory_space<vmem>>, vector<8x1xf32>
    %c0_177 = arith.constant 0 : index
    %c23_178 = arith.constant 23 : index
    %325 = vector.load %arg0[%c0_177, %c23_178] : memref<8x448xf32, #tpu.memory_space<vmem>>, vector<8x315xf32>
    %326 = vector.broadcast %324 : vector<8x1xf32> to vector<8x315xf32>
    %327 = arith.mulf %326, %325 : vector<8x315xf32>
    %328 = arith.addf %323, %327 : vector<8x315xf32>
    %c0_179 = arith.constant 0 : index
    %c44_180 = arith.constant 44 : index
    %329 = vector.load %arg1[%c0_179, %c44_180] : memref<8x92xf32, #tpu.memory_space<vmem>>, vector<8x1xf32>
    %c0_181 = arith.constant 0 : index
    %c24_182 = arith.constant 24 : index
    %330 = vector.load %arg0[%c0_181, %c24_182] : memref<8x448xf32, #tpu.memory_space<vmem>>, vector<8x315xf32>
    %331 = vector.broadcast %329 : vector<8x1xf32> to vector<8x315xf32>
    %332 = arith.mulf %331, %330 : vector<8x315xf32>
    %333 = arith.addf %328, %332 : vector<8x315xf32>
    %c0_183 = arith.constant 0 : index
    %c45_184 = arith.constant 45 : index
    %334 = vector.load %arg1[%c0_183, %c45_184] : memref<8x92xf32, #tpu.memory_space<vmem>>, vector<8x1xf32>
    %c0_185 = arith.constant 0 : index
    %c25_186 = arith.constant 25 : index
    %335 = vector.load %arg0[%c0_185, %c25_186] : memref<8x448xf32, #tpu.memory_space<vmem>>, vector<8x315xf32>
    %336 = vector.broadcast %334 : vector<8x1xf32> to vector<8x315xf32>
    %337 = arith.mulf %336, %335 : vector<8x315xf32>
    %338 = arith.addf %333, %337 : vector<8x315xf32>
    %c0_187 = arith.constant 0 : index
    %c46_188 = arith.constant 46 : index
    %339 = vector.load %arg1[%c0_187, %c46_188] : memref<8x92xf32, #tpu.memory_space<vmem>>, vector<8x1xf32>
    %c0_189 = arith.constant 0 : index
    %c26_190 = arith.constant 26 : index
    %340 = vector.load %arg0[%c0_189, %c26_190] : memref<8x448xf32, #tpu.memory_space<vmem>>, vector<8x315xf32>
    %341 = vector.broadcast %339 : vector<8x1xf32> to vector<8x315xf32>
    %342 = arith.mulf %341, %340 : vector<8x315xf32>
    %343 = arith.addf %338, %342 : vector<8x315xf32>
    %c0_191 = arith.constant 0 : index
    %c47_192 = arith.constant 47 : index
    %344 = vector.load %arg1[%c0_191, %c47_192] : memref<8x92xf32, #tpu.memory_space<vmem>>, vector<8x1xf32>
    %c0_193 = arith.constant 0 : index
    %c27_194 = arith.constant 27 : index
    %345 = vector.load %arg0[%c0_193, %c27_194] : memref<8x448xf32, #tpu.memory_space<vmem>>, vector<8x315xf32>
    %346 = vector.broadcast %344 : vector<8x1xf32> to vector<8x315xf32>
    %347 = arith.mulf %346, %345 : vector<8x315xf32>
    %348 = arith.addf %343, %347 : vector<8x315xf32>
    %c0_195 = arith.constant 0 : index
    %c48 = arith.constant 48 : index
    %349 = vector.load %arg1[%c0_195, %c48] : memref<8x92xf32, #tpu.memory_space<vmem>>, vector<8x1xf32>
    %c0_196 = arith.constant 0 : index
    %c42_197 = arith.constant 42 : index
    %350 = vector.load %arg0[%c0_196, %c42_197] : memref<8x448xf32, #tpu.memory_space<vmem>>, vector<8x315xf32>
    %351 = vector.broadcast %349 : vector<8x1xf32> to vector<8x315xf32>
    %352 = arith.mulf %351, %350 : vector<8x315xf32>
    %353 = arith.addf %348, %352 : vector<8x315xf32>
    %c0_198 = arith.constant 0 : index
    %c49 = arith.constant 49 : index
    %354 = vector.load %arg1[%c0_198, %c49] : memref<8x92xf32, #tpu.memory_space<vmem>>, vector<8x1xf32>
    %c0_199 = arith.constant 0 : index
    %c43_200 = arith.constant 43 : index
    %355 = vector.load %arg0[%c0_199, %c43_200] : memref<8x448xf32, #tpu.memory_space<vmem>>, vector<8x315xf32>
    %356 = vector.broadcast %354 : vector<8x1xf32> to vector<8x315xf32>
    %357 = arith.mulf %356, %355 : vector<8x315xf32>
    %358 = arith.addf %353, %357 : vector<8x315xf32>
    %c0_201 = arith.constant 0 : index
    %c50 = arith.constant 50 : index
    %359 = vector.load %arg1[%c0_201, %c50] : memref<8x92xf32, #tpu.memory_space<vmem>>, vector<8x1xf32>
    %c0_202 = arith.constant 0 : index
    %c44_203 = arith.constant 44 : index
    %360 = vector.load %arg0[%c0_202, %c44_203] : memref<8x448xf32, #tpu.memory_space<vmem>>, vector<8x315xf32>
    %361 = vector.broadcast %359 : vector<8x1xf32> to vector<8x315xf32>
    %362 = arith.mulf %361, %360 : vector<8x315xf32>
    %363 = arith.addf %358, %362 : vector<8x315xf32>
    %c0_204 = arith.constant 0 : index
    %c51 = arith.constant 51 : index
    %364 = vector.load %arg1[%c0_204, %c51] : memref<8x92xf32, #tpu.memory_space<vmem>>, vector<8x1xf32>
    %c0_205 = arith.constant 0 : index
    %c45_206 = arith.constant 45 : index
    %365 = vector.load %arg0[%c0_205, %c45_206] : memref<8x448xf32, #tpu.memory_space<vmem>>, vector<8x315xf32>
    %366 = vector.broadcast %364 : vector<8x1xf32> to vector<8x315xf32>
    %367 = arith.mulf %366, %365 : vector<8x315xf32>
    %368 = arith.addf %363, %367 : vector<8x315xf32>
    %c0_207 = arith.constant 0 : index
    %c52 = arith.constant 52 : index
    %369 = vector.load %arg1[%c0_207, %c52] : memref<8x92xf32, #tpu.memory_space<vmem>>, vector<8x1xf32>
    %c0_208 = arith.constant 0 : index
    %c46_209 = arith.constant 46 : index
    %370 = vector.load %arg0[%c0_208, %c46_209] : memref<8x448xf32, #tpu.memory_space<vmem>>, vector<8x315xf32>
    %371 = vector.broadcast %369 : vector<8x1xf32> to vector<8x315xf32>
    %372 = arith.mulf %371, %370 : vector<8x315xf32>
    %373 = arith.addf %368, %372 : vector<8x315xf32>
    %c0_210 = arith.constant 0 : index
    %c53 = arith.constant 53 : index
    %374 = vector.load %arg1[%c0_210, %c53] : memref<8x92xf32, #tpu.memory_space<vmem>>, vector<8x1xf32>
    %c0_211 = arith.constant 0 : index
    %c47_212 = arith.constant 47 : index
    %375 = vector.load %arg0[%c0_211, %c47_212] : memref<8x448xf32, #tpu.memory_space<vmem>>, vector<8x315xf32>
    %376 = vector.broadcast %374 : vector<8x1xf32> to vector<8x315xf32>
    %377 = arith.mulf %376, %375 : vector<8x315xf32>
    %378 = arith.addf %373, %377 : vector<8x315xf32>
    %c0_213 = arith.constant 0 : index
    %c54 = arith.constant 54 : index
    %379 = vector.load %arg1[%c0_213, %c54] : memref<8x92xf32, #tpu.memory_space<vmem>>, vector<8x1xf32>
    %c0_214 = arith.constant 0 : index
    %c48_215 = arith.constant 48 : index
    %380 = vector.load %arg0[%c0_214, %c48_215] : memref<8x448xf32, #tpu.memory_space<vmem>>, vector<8x315xf32>
    %381 = vector.broadcast %379 : vector<8x1xf32> to vector<8x315xf32>
    %382 = arith.mulf %381, %380 : vector<8x315xf32>
    %383 = arith.addf %378, %382 : vector<8x315xf32>
    %c0_216 = arith.constant 0 : index
    %c55 = arith.constant 55 : index
    %384 = vector.load %arg1[%c0_216, %c55] : memref<8x92xf32, #tpu.memory_space<vmem>>, vector<8x1xf32>
    %c0_217 = arith.constant 0 : index
    %c63 = arith.constant 63 : index
    %385 = vector.load %arg0[%c0_217, %c63] : memref<8x448xf32, #tpu.memory_space<vmem>>, vector<8x315xf32>
    %386 = vector.broadcast %384 : vector<8x1xf32> to vector<8x315xf32>
    %387 = arith.mulf %386, %385 : vector<8x315xf32>
    %388 = arith.addf %383, %387 : vector<8x315xf32>
    %c0_218 = arith.constant 0 : index
    %c56 = arith.constant 56 : index
    %389 = vector.load %arg1[%c0_218, %c56] : memref<8x92xf32, #tpu.memory_space<vmem>>, vector<8x1xf32>
    %c0_219 = arith.constant 0 : index
    %c64_220 = arith.constant 64 : index
    %390 = vector.load %arg0[%c0_219, %c64_220] : memref<8x448xf32, #tpu.memory_space<vmem>>, vector<8x315xf32>
    %391 = vector.broadcast %389 : vector<8x1xf32> to vector<8x315xf32>
    %392 = arith.mulf %391, %390 : vector<8x315xf32>
    %393 = arith.addf %388, %392 : vector<8x315xf32>
    %c0_221 = arith.constant 0 : index
    %c57 = arith.constant 57 : index
    %394 = vector.load %arg1[%c0_221, %c57] : memref<8x92xf32, #tpu.memory_space<vmem>>, vector<8x1xf32>
    %c0_222 = arith.constant 0 : index
    %c65_223 = arith.constant 65 : index
    %395 = vector.load %arg0[%c0_222, %c65_223] : memref<8x448xf32, #tpu.memory_space<vmem>>, vector<8x315xf32>
    %396 = vector.broadcast %394 : vector<8x1xf32> to vector<8x315xf32>
    %397 = arith.mulf %396, %395 : vector<8x315xf32>
    %398 = arith.addf %393, %397 : vector<8x315xf32>
    %c0_224 = arith.constant 0 : index
    %c58 = arith.constant 58 : index
    %399 = vector.load %arg1[%c0_224, %c58] : memref<8x92xf32, #tpu.memory_space<vmem>>, vector<8x1xf32>
    %c0_225 = arith.constant 0 : index
    %c66_226 = arith.constant 66 : index
    %400 = vector.load %arg0[%c0_225, %c66_226] : memref<8x448xf32, #tpu.memory_space<vmem>>, vector<8x315xf32>
    %401 = vector.broadcast %399 : vector<8x1xf32> to vector<8x315xf32>
    %402 = arith.mulf %401, %400 : vector<8x315xf32>
    %403 = arith.addf %398, %402 : vector<8x315xf32>
    %c0_227 = arith.constant 0 : index
    %c59 = arith.constant 59 : index
    %404 = vector.load %arg1[%c0_227, %c59] : memref<8x92xf32, #tpu.memory_space<vmem>>, vector<8x1xf32>
    %c0_228 = arith.constant 0 : index
    %c67_229 = arith.constant 67 : index
    %405 = vector.load %arg0[%c0_228, %c67_229] : memref<8x448xf32, #tpu.memory_space<vmem>>, vector<8x315xf32>
    %406 = vector.broadcast %404 : vector<8x1xf32> to vector<8x315xf32>
    %407 = arith.mulf %406, %405 : vector<8x315xf32>
    %408 = arith.addf %403, %407 : vector<8x315xf32>
    %c0_230 = arith.constant 0 : index
    %c60 = arith.constant 60 : index
    %409 = vector.load %arg1[%c0_230, %c60] : memref<8x92xf32, #tpu.memory_space<vmem>>, vector<8x1xf32>
    %c0_231 = arith.constant 0 : index
    %c68_232 = arith.constant 68 : index
    %410 = vector.load %arg0[%c0_231, %c68_232] : memref<8x448xf32, #tpu.memory_space<vmem>>, vector<8x315xf32>
    %411 = vector.broadcast %409 : vector<8x1xf32> to vector<8x315xf32>
    %412 = arith.mulf %411, %410 : vector<8x315xf32>
    %413 = arith.addf %408, %412 : vector<8x315xf32>
    %c0_233 = arith.constant 0 : index
    %c61 = arith.constant 61 : index
    %414 = vector.load %arg1[%c0_233, %c61] : memref<8x92xf32, #tpu.memory_space<vmem>>, vector<8x1xf32>
    %c0_234 = arith.constant 0 : index
    %c69 = arith.constant 69 : index
    %415 = vector.load %arg0[%c0_234, %c69] : memref<8x448xf32, #tpu.memory_space<vmem>>, vector<8x315xf32>
    %416 = vector.broadcast %414 : vector<8x1xf32> to vector<8x315xf32>
    %417 = arith.mulf %416, %415 : vector<8x315xf32>
    %418 = arith.addf %413, %417 : vector<8x315xf32>
    %c0_235 = arith.constant 0 : index
    %c62 = arith.constant 62 : index
    %419 = vector.load %arg1[%c0_235, %c62] : memref<8x92xf32, #tpu.memory_space<vmem>>, vector<8x1xf32>
    %c0_236 = arith.constant 0 : index
    %c84 = arith.constant 84 : index
    %420 = vector.load %arg0[%c0_236, %c84] : memref<8x448xf32, #tpu.memory_space<vmem>>, vector<8x315xf32>
    %421 = vector.broadcast %419 : vector<8x1xf32> to vector<8x315xf32>
    %422 = arith.mulf %421, %420 : vector<8x315xf32>
    %423 = arith.addf %418, %422 : vector<8x315xf32>
    %c0_237 = arith.constant 0 : index
    %c63_238 = arith.constant 63 : index
    %424 = vector.load %arg1[%c0_237, %c63_238] : memref<8x92xf32, #tpu.memory_space<vmem>>, vector<8x1xf32>
    %c0_239 = arith.constant 0 : index
    %c85_240 = arith.constant 85 : index
    %425 = vector.load %arg0[%c0_239, %c85_240] : memref<8x448xf32, #tpu.memory_space<vmem>>, vector<8x315xf32>
    %426 = vector.broadcast %424 : vector<8x1xf32> to vector<8x315xf32>
    %427 = arith.mulf %426, %425 : vector<8x315xf32>
    %428 = arith.addf %423, %427 : vector<8x315xf32>
    %c0_241 = arith.constant 0 : index
    %c64_242 = arith.constant 64 : index
    %429 = vector.load %arg1[%c0_241, %c64_242] : memref<8x92xf32, #tpu.memory_space<vmem>>, vector<8x1xf32>
    %c0_243 = arith.constant 0 : index
    %c86_244 = arith.constant 86 : index
    %430 = vector.load %arg0[%c0_243, %c86_244] : memref<8x448xf32, #tpu.memory_space<vmem>>, vector<8x315xf32>
    %431 = vector.broadcast %429 : vector<8x1xf32> to vector<8x315xf32>
    %432 = arith.mulf %431, %430 : vector<8x315xf32>
    %433 = arith.addf %428, %432 : vector<8x315xf32>
    %c0_245 = arith.constant 0 : index
    %c65_246 = arith.constant 65 : index
    %434 = vector.load %arg1[%c0_245, %c65_246] : memref<8x92xf32, #tpu.memory_space<vmem>>, vector<8x1xf32>
    %c0_247 = arith.constant 0 : index
    %c87_248 = arith.constant 87 : index
    %435 = vector.load %arg0[%c0_247, %c87_248] : memref<8x448xf32, #tpu.memory_space<vmem>>, vector<8x315xf32>
    %436 = vector.broadcast %434 : vector<8x1xf32> to vector<8x315xf32>
    %437 = arith.mulf %436, %435 : vector<8x315xf32>
    %438 = arith.addf %433, %437 : vector<8x315xf32>
    %c0_249 = arith.constant 0 : index
    %c66_250 = arith.constant 66 : index
    %439 = vector.load %arg1[%c0_249, %c66_250] : memref<8x92xf32, #tpu.memory_space<vmem>>, vector<8x1xf32>
    %c0_251 = arith.constant 0 : index
    %c88_252 = arith.constant 88 : index
    %440 = vector.load %arg0[%c0_251, %c88_252] : memref<8x448xf32, #tpu.memory_space<vmem>>, vector<8x315xf32>
    %441 = vector.broadcast %439 : vector<8x1xf32> to vector<8x315xf32>
    %442 = arith.mulf %441, %440 : vector<8x315xf32>
    %443 = arith.addf %438, %442 : vector<8x315xf32>
    %c0_253 = arith.constant 0 : index
    %c67_254 = arith.constant 67 : index
    %444 = vector.load %arg1[%c0_253, %c67_254] : memref<8x92xf32, #tpu.memory_space<vmem>>, vector<8x1xf32>
    %c0_255 = arith.constant 0 : index
    %c89_256 = arith.constant 89 : index
    %445 = vector.load %arg0[%c0_255, %c89_256] : memref<8x448xf32, #tpu.memory_space<vmem>>, vector<8x315xf32>
    %446 = vector.broadcast %444 : vector<8x1xf32> to vector<8x315xf32>
    %447 = arith.mulf %446, %445 : vector<8x315xf32>
    %448 = arith.addf %443, %447 : vector<8x315xf32>
    %c0_257 = arith.constant 0 : index
    %c68_258 = arith.constant 68 : index
    %449 = vector.load %arg1[%c0_257, %c68_258] : memref<8x92xf32, #tpu.memory_space<vmem>>, vector<8x1xf32>
    %c0_259 = arith.constant 0 : index
    %c90 = arith.constant 90 : index
    %450 = vector.load %arg0[%c0_259, %c90] : memref<8x448xf32, #tpu.memory_space<vmem>>, vector<8x315xf32>
    %451 = vector.broadcast %449 : vector<8x1xf32> to vector<8x315xf32>
    %452 = arith.mulf %451, %450 : vector<8x315xf32>
    %453 = arith.addf %448, %452 : vector<8x315xf32>
    %c0_260 = arith.constant 0 : index
    %c69_261 = arith.constant 69 : index
    %454 = vector.load %arg1[%c0_260, %c69_261] : memref<8x92xf32, #tpu.memory_space<vmem>>, vector<8x1xf32>
    %c0_262 = arith.constant 0 : index
    %c105 = arith.constant 105 : index
    %455 = vector.load %arg0[%c0_262, %c105] : memref<8x448xf32, #tpu.memory_space<vmem>>, vector<8x315xf32>
    %456 = vector.broadcast %454 : vector<8x1xf32> to vector<8x315xf32>
    %457 = arith.mulf %456, %455 : vector<8x315xf32>
    %458 = arith.addf %453, %457 : vector<8x315xf32>
    %c0_263 = arith.constant 0 : index
    %c70 = arith.constant 70 : index
    %459 = vector.load %arg1[%c0_263, %c70] : memref<8x92xf32, #tpu.memory_space<vmem>>, vector<8x1xf32>
    %c0_264 = arith.constant 0 : index
    %c106_265 = arith.constant 106 : index
    %460 = vector.load %arg0[%c0_264, %c106_265] : memref<8x448xf32, #tpu.memory_space<vmem>>, vector<8x315xf32>
    %461 = vector.broadcast %459 : vector<8x1xf32> to vector<8x315xf32>
    %462 = arith.mulf %461, %460 : vector<8x315xf32>
    %463 = arith.addf %458, %462 : vector<8x315xf32>
    %c0_266 = arith.constant 0 : index
    %c71 = arith.constant 71 : index
    %464 = vector.load %arg1[%c0_266, %c71] : memref<8x92xf32, #tpu.memory_space<vmem>>, vector<8x1xf32>
    %c0_267 = arith.constant 0 : index
    %c107_268 = arith.constant 107 : index
    %465 = vector.load %arg0[%c0_267, %c107_268] : memref<8x448xf32, #tpu.memory_space<vmem>>, vector<8x315xf32>
    %466 = vector.broadcast %464 : vector<8x1xf32> to vector<8x315xf32>
    %467 = arith.mulf %466, %465 : vector<8x315xf32>
    %468 = arith.addf %463, %467 : vector<8x315xf32>
    %c0_269 = arith.constant 0 : index
    %c72 = arith.constant 72 : index
    %469 = vector.load %arg1[%c0_269, %c72] : memref<8x92xf32, #tpu.memory_space<vmem>>, vector<8x1xf32>
    %c0_270 = arith.constant 0 : index
    %c108_271 = arith.constant 108 : index
    %470 = vector.load %arg0[%c0_270, %c108_271] : memref<8x448xf32, #tpu.memory_space<vmem>>, vector<8x315xf32>
    %471 = vector.broadcast %469 : vector<8x1xf32> to vector<8x315xf32>
    %472 = arith.mulf %471, %470 : vector<8x315xf32>
    %473 = arith.addf %468, %472 : vector<8x315xf32>
    %c0_272 = arith.constant 0 : index
    %c73 = arith.constant 73 : index
    %474 = vector.load %arg1[%c0_272, %c73] : memref<8x92xf32, #tpu.memory_space<vmem>>, vector<8x1xf32>
    %c0_273 = arith.constant 0 : index
    %c109_274 = arith.constant 109 : index
    %475 = vector.load %arg0[%c0_273, %c109_274] : memref<8x448xf32, #tpu.memory_space<vmem>>, vector<8x315xf32>
    %476 = vector.broadcast %474 : vector<8x1xf32> to vector<8x315xf32>
    %477 = arith.mulf %476, %475 : vector<8x315xf32>
    %478 = arith.addf %473, %477 : vector<8x315xf32>
    %c0_275 = arith.constant 0 : index
    %c74 = arith.constant 74 : index
    %479 = vector.load %arg1[%c0_275, %c74] : memref<8x92xf32, #tpu.memory_space<vmem>>, vector<8x1xf32>
    %c0_276 = arith.constant 0 : index
    %c110_277 = arith.constant 110 : index
    %480 = vector.load %arg0[%c0_276, %c110_277] : memref<8x448xf32, #tpu.memory_space<vmem>>, vector<8x315xf32>
    %481 = vector.broadcast %479 : vector<8x1xf32> to vector<8x315xf32>
    %482 = arith.mulf %481, %480 : vector<8x315xf32>
    %483 = arith.addf %478, %482 : vector<8x315xf32>
    %c0_278 = arith.constant 0 : index
    %c75 = arith.constant 75 : index
    %484 = vector.load %arg1[%c0_278, %c75] : memref<8x92xf32, #tpu.memory_space<vmem>>, vector<8x1xf32>
    %c0_279 = arith.constant 0 : index
    %c111 = arith.constant 111 : index
    %485 = vector.load %arg0[%c0_279, %c111] : memref<8x448xf32, #tpu.memory_space<vmem>>, vector<8x315xf32>
    %486 = vector.broadcast %484 : vector<8x1xf32> to vector<8x315xf32>
    %487 = arith.mulf %486, %485 : vector<8x315xf32>
    %488 = arith.addf %483, %487 : vector<8x315xf32>
    %c0_280 = arith.constant 0 : index
    %c76 = arith.constant 76 : index
    %489 = vector.load %arg1[%c0_280, %c76] : memref<8x92xf32, #tpu.memory_space<vmem>>, vector<8x1xf32>
    %c0_281 = arith.constant 0 : index
    %c126 = arith.constant 126 : index
    %490 = vector.load %arg0[%c0_281, %c126] : memref<8x448xf32, #tpu.memory_space<vmem>>, vector<8x315xf32>
    %491 = vector.broadcast %489 : vector<8x1xf32> to vector<8x315xf32>
    %492 = arith.mulf %491, %490 : vector<8x315xf32>
    %493 = arith.addf %488, %492 : vector<8x315xf32>
    %c0_282 = arith.constant 0 : index
    %c77 = arith.constant 77 : index
    %494 = vector.load %arg1[%c0_282, %c77] : memref<8x92xf32, #tpu.memory_space<vmem>>, vector<8x1xf32>
    %c0_283 = arith.constant 0 : index
    %c127 = arith.constant 127 : index
    %495 = vector.load %arg0[%c0_283, %c127] : memref<8x448xf32, #tpu.memory_space<vmem>>, vector<8x315xf32>
    %496 = vector.broadcast %494 : vector<8x1xf32> to vector<8x315xf32>
    %497 = arith.mulf %496, %495 : vector<8x315xf32>
    %498 = arith.addf %493, %497 : vector<8x315xf32>
    %c0_284 = arith.constant 0 : index
    %c78 = arith.constant 78 : index
    %499 = vector.load %arg1[%c0_284, %c78] : memref<8x92xf32, #tpu.memory_space<vmem>>, vector<8x1xf32>
    %c0_285 = arith.constant 0 : index
    %c128 = arith.constant 128 : index
    %500 = vector.load %arg0[%c0_285, %c128] : memref<8x448xf32, #tpu.memory_space<vmem>>, vector<8x315xf32>
    %501 = vector.broadcast %499 : vector<8x1xf32> to vector<8x315xf32>
    %502 = arith.mulf %501, %500 : vector<8x315xf32>
    %503 = arith.addf %498, %502 : vector<8x315xf32>
    %c0_286 = arith.constant 0 : index
    %c79 = arith.constant 79 : index
    %504 = vector.load %arg1[%c0_286, %c79] : memref<8x92xf32, #tpu.memory_space<vmem>>, vector<8x1xf32>
    %c0_287 = arith.constant 0 : index
    %c129 = arith.constant 129 : index
    %505 = vector.load %arg0[%c0_287, %c129] : memref<8x448xf32, #tpu.memory_space<vmem>>, vector<8x315xf32>
    %506 = vector.broadcast %504 : vector<8x1xf32> to vector<8x315xf32>
    %507 = arith.mulf %506, %505 : vector<8x315xf32>
    %508 = arith.addf %503, %507 : vector<8x315xf32>
    %c0_288 = arith.constant 0 : index
    %c80 = arith.constant 80 : index
    %509 = vector.load %arg1[%c0_288, %c80] : memref<8x92xf32, #tpu.memory_space<vmem>>, vector<8x1xf32>
    %c0_289 = arith.constant 0 : index
    %c130 = arith.constant 130 : index
    %510 = vector.load %arg0[%c0_289, %c130] : memref<8x448xf32, #tpu.memory_space<vmem>>, vector<8x315xf32>
    %511 = vector.broadcast %509 : vector<8x1xf32> to vector<8x315xf32>
    %512 = arith.mulf %511, %510 : vector<8x315xf32>
    %513 = arith.addf %508, %512 : vector<8x315xf32>
    %c0_290 = arith.constant 0 : index
    %c81 = arith.constant 81 : index
    %514 = vector.load %arg1[%c0_290, %c81] : memref<8x92xf32, #tpu.memory_space<vmem>>, vector<8x1xf32>
    %c0_291 = arith.constant 0 : index
    %c131 = arith.constant 131 : index
    %515 = vector.load %arg0[%c0_291, %c131] : memref<8x448xf32, #tpu.memory_space<vmem>>, vector<8x315xf32>
    %516 = vector.broadcast %514 : vector<8x1xf32> to vector<8x315xf32>
    %517 = arith.mulf %516, %515 : vector<8x315xf32>
    %518 = arith.addf %513, %517 : vector<8x315xf32>
    %c0_292 = arith.constant 0 : index
    %c82 = arith.constant 82 : index
    %519 = vector.load %arg1[%c0_292, %c82] : memref<8x92xf32, #tpu.memory_space<vmem>>, vector<8x1xf32>
    %c0_293 = arith.constant 0 : index
    %c132 = arith.constant 132 : index
    %520 = vector.load %arg0[%c0_293, %c132] : memref<8x448xf32, #tpu.memory_space<vmem>>, vector<8x315xf32>
    %521 = vector.broadcast %519 : vector<8x1xf32> to vector<8x315xf32>
    %522 = arith.mulf %521, %520 : vector<8x315xf32>
    %523 = arith.addf %518, %522 : vector<8x315xf32>
    %c16_294 = arith.constant 16 : index
    %c0_295 = arith.constant 0 : index
    %524 = vector.load %arg10[%c16_294, %c0_295] : memref<24x315xf32, #tpu.memory_space<vmem>>, vector<8x315xf32>
    tpu.vector_store %arg10[%c16_294, %c0_295], %523 {strides = array<i32>} : memref<24x315xf32, #tpu.memory_space<vmem>>, vector<8x315xf32>,
    %c0_296 = arith.constant 0 : index
    %c0_297 = arith.constant 0 : index
    %525 = vector.load %arg2[%c0_296, %c0_297] : memref<24x24xf32, #tpu.memory_space<vmem>>, vector<24x24xf32>
    %c0_298 = arith.constant 0 : index
    %c0_299 = arith.constant 0 : index
    %526 = vector.load %arg10[%c0_298, %c0_299] : memref<24x315xf32, #tpu.memory_space<vmem>>, vector<24x315xf32>
    %cst_300 = arith.constant dense<0.000000e+00> : vector<24x315xf32>
    %527 = tpu.matmul %525, %526, %cst_300 {dimension_numbers = #tpu.dot_dimension_numbers<[1], [0], [0], [1], [0, 0, 1, 1], [], []>} : vector<24x24xf32>, vector<24x315xf32>, vector<24x315xf32> -> vector<24x315xf32>
    %c0_301 = arith.constant 0 : index
    %c0_302 = arith.constant 0 : index
    %528 = vector.load %arg4[%c0_301, %c0_302] : memref<32x1xf32, #tpu.memory_space<vmem>>, vector<24x1xf32>
    %529 = vector.broadcast %528 : vector<24x1xf32> to vector<24x315xf32>
    %530 = arith.addf %527, %529 : vector<24x315xf32>
    %cst_303 = arith.constant 5.000000e-01 : f32
    %531 = vector.broadcast %cst_303 : f32 to vector<24x315xf32>
    %532 = arith.mulf %531, %530 : vector<24x315xf32>
    %cst_304 = arith.constant 0.707106769 : f32
    %533 = vector.broadcast %cst_304 : f32 to vector<24x315xf32>
    %534 = arith.mulf %530, %533 : vector<24x315xf32>
    %535 = math.absf %534 : vector<24x315xf32>
    %cst_305 = arith.constant 0.327591091 : f32
    %536 = vector.broadcast %cst_305 : f32 to vector<24x315xf32>
    %537 = arith.mulf %536, %535 : vector<24x315xf32>
    %cst_306 = arith.constant 1.000000e+00 : f32
    %538 = vector.broadcast %cst_306 : f32 to vector<24x315xf32>
    %539 = arith.addf %538, %537 : vector<24x315xf32>
    %540 = tpu.reciprocal %539 {approx = true} : vector<24x315xf32> -> vector<24x315xf32>
    %541 = arith.mulf %539, %540 : vector<24x315xf32>
    %cst_307 = arith.constant 2.000000e+00 : f32
    %542 = vector.broadcast %cst_307 : f32 to vector<24x315xf32>
    %543 = arith.subf %542, %541 : vector<24x315xf32>
    %544 = arith.mulf %540, %543 : vector<24x315xf32>
    %cst_308 = arith.constant 1.06140542 : f32
    %545 = vector.broadcast %cst_308 : f32 to vector<24x315xf32>
    %546 = arith.mulf %544, %545 : vector<24x315xf32>
    %cst_309 = arith.constant -1.45315206 : f32
    %547 = vector.broadcast %cst_309 : f32 to vector<24x315xf32>
    %548 = arith.addf %547, %546 : vector<24x315xf32>
    %549 = arith.mulf %544, %548 : vector<24x315xf32>
    %cst_310 = arith.constant 1.42141378 : f32
    %550 = vector.broadcast %cst_310 : f32 to vector<24x315xf32>
    %551 = arith.addf %550, %549 : vector<24x315xf32>
    %552 = arith.mulf %544, %551 : vector<24x315xf32>
    %cst_311 = arith.constant -0.284496725 : f32
    %553 = vector.broadcast %cst_311 : f32 to vector<24x315xf32>
    %554 = arith.addf %553, %552 : vector<24x315xf32>
    %555 = arith.mulf %544, %554 : vector<24x315xf32>
    %cst_312 = arith.constant 0.254829586 : f32
    %556 = vector.broadcast %cst_312 : f32 to vector<24x315xf32>
    %557 = arith.addf %556, %555 : vector<24x315xf32>
    %558 = arith.mulf %544, %557 : vector<24x315xf32>
    %cst_313 = arith.constant 0.000000e+00 : f32
    %559 = vector.broadcast %cst_313 : f32 to vector<24x315xf32>
    %560 = arith.subf %559, %535 : vector<24x315xf32>
    %561 = arith.mulf %560, %535 : vector<24x315xf32>
    %562 = math.exp %561 : vector<24x315xf32>
    %563 = arith.mulf %558, %562 : vector<24x315xf32>
    %cst_314 = arith.constant 1.000000e+00 : f32
    %564 = vector.broadcast %cst_314 : f32 to vector<24x315xf32>
    %565 = arith.subf %564, %563 : vector<24x315xf32>
    %cst_315 = arith.constant 0.000000e+00 : f32
    %566 = vector.broadcast %cst_315 : f32 to vector<24x315xf32>
    %567 = arith.cmpf oge, %534, %566 : vector<24x315xf32>
    %cst_316 = arith.constant 0.000000e+00 : f32
    %568 = vector.broadcast %cst_316 : f32 to vector<24x315xf32>
    %569 = arith.subf %568, %565 : vector<24x315xf32>
    %570 = arith.select %567, %565, %569 : vector<24x315xi1>, vector<24x315xf32>
    %cst_317 = arith.constant 1.000000e+00 : f32
    %571 = vector.broadcast %cst_317 : f32 to vector<24x315xf32>
    %572 = arith.addf %571, %570 : vector<24x315xf32>
    %573 = arith.mulf %532, %572 : vector<24x315xf32>
    %574 = vector.extract_strided_slice %573 {offsets = [0, 0], sizes = [8, 315], strides = [1, 1]} : vector<24x315xf32> to vector<8x315xf32>
    %575 = vector.extract_strided_slice %573 {offsets = [8, 0], sizes = [8, 315], strides = [1, 1]} : vector<24x315xf32> to vector<8x315xf32>
    %576 = arith.addf %574, %575 : vector<8x315xf32>
    %577 = vector.extract_strided_slice %573 {offsets = [16, 0], sizes = [8, 315], strides = [1, 1]} : vector<24x315xf32> to vector<8x315xf32>
    %578 = arith.addf %576, %577 : vector<8x315xf32>
    %cst_318 = arith.constant 0.000000e+00 : f32
    %579 = vector.broadcast %cst_318 : f32 to vector<8x66xf32>
    %c0_319 = arith.constant 0 : index
    %c0_320 = arith.constant 0 : index
    %580 = vector.load %arg9[%c0_319, %c0_320] : memref<8x448xf32, #tpu.memory_space<vmem>>, vector<8x66xf32>
    tpu.vector_store %arg9[%c0_319, %c0_320], %579 {strides = array<i32>} : memref<8x448xf32, #tpu.memory_space<vmem>>, vector<8x66xf32>,
    %cst_321 = arith.constant 0.000000e+00 : f32
    %581 = vector.broadcast %cst_321 : f32 to vector<8x67xf32>
    %c0_322 = arith.constant 0 : index
    %c381 = arith.constant 381 : index
    %582 = vector.load %arg9[%c0_322, %c381] : memref<8x448xf32, #tpu.memory_space<vmem>>, vector<8x67xf32>
    tpu.vector_store %arg9[%c0_322, %c381], %581 {strides = array<i32>} : memref<8x448xf32, #tpu.memory_space<vmem>>, vector<8x67xf32>,
    %583 = vector.broadcast %0 : vector<1x315xf32> to vector<8x315xf32>
    %584 = arith.mulf %578, %583 : vector<8x315xf32>
    %c0_323 = arith.constant 0 : index
    %c66_324 = arith.constant 66 : index
    %585 = vector.load %arg9[%c0_323, %c66_324] : memref<8x448xf32, #tpu.memory_space<vmem>>, vector<8x315xf32>
    tpu.vector_store %arg9[%c0_323, %c66_324], %584 {strides = array<i32>} : memref<8x448xf32, #tpu.memory_space<vmem>>, vector<8x315xf32>,
    %c0_325 = arith.constant 0 : index
    %c83 = arith.constant 83 : index
    %586 = vector.load %arg1[%c0_325, %c83] : memref<8x92xf32, #tpu.memory_space<vmem>>, vector<8x1xf32>
    %c0_326 = arith.constant 0 : index
    %c44_327 = arith.constant 44 : index
    %587 = vector.load %arg9[%c0_326, %c44_327] : memref<8x448xf32, #tpu.memory_space<vmem>>, vector<8x315xf32>
    %588 = vector.broadcast %586 : vector<8x1xf32> to vector<8x315xf32>
    %589 = arith.mulf %588, %587 : vector<8x315xf32>
    %c0_328 = arith.constant 0 : index
    %c84_329 = arith.constant 84 : index
    %590 = vector.load %arg1[%c0_328, %c84_329] : memref<8x92xf32, #tpu.memory_space<vmem>>, vector<8x1xf32>
    %c0_330 = arith.constant 0 : index
    %c45_331 = arith.constant 45 : index
    %591 = vector.load %arg9[%c0_330, %c45_331] : memref<8x448xf32, #tpu.memory_space<vmem>>, vector<8x315xf32>
    %592 = vector.broadcast %590 : vector<8x1xf32> to vector<8x315xf32>
    %593 = arith.mulf %592, %591 : vector<8x315xf32>
    %594 = arith.addf %589, %593 : vector<8x315xf32>
    %c0_332 = arith.constant 0 : index
    %c85_333 = arith.constant 85 : index
    %595 = vector.load %arg1[%c0_332, %c85_333] : memref<8x92xf32, #tpu.memory_space<vmem>>, vector<8x1xf32>
    %c0_334 = arith.constant 0 : index
    %c46_335 = arith.constant 46 : index
    %596 = vector.load %arg9[%c0_334, %c46_335] : memref<8x448xf32, #tpu.memory_space<vmem>>, vector<8x315xf32>
    %597 = vector.broadcast %595 : vector<8x1xf32> to vector<8x315xf32>
    %598 = arith.mulf %597, %596 : vector<8x315xf32>
    %599 = arith.addf %594, %598 : vector<8x315xf32>
    %c0_336 = arith.constant 0 : index
    %c86_337 = arith.constant 86 : index
    %600 = vector.load %arg1[%c0_336, %c86_337] : memref<8x92xf32, #tpu.memory_space<vmem>>, vector<8x1xf32>
    %c0_338 = arith.constant 0 : index
    %c65_339 = arith.constant 65 : index
    %601 = vector.load %arg9[%c0_338, %c65_339] : memref<8x448xf32, #tpu.memory_space<vmem>>, vector<8x315xf32>
    %602 = vector.broadcast %600 : vector<8x1xf32> to vector<8x315xf32>
    %603 = arith.mulf %602, %601 : vector<8x315xf32>
    %604 = arith.addf %599, %603 : vector<8x315xf32>
    %c0_340 = arith.constant 0 : index
    %c87_341 = arith.constant 87 : index
    %605 = vector.load %arg1[%c0_340, %c87_341] : memref<8x92xf32, #tpu.memory_space<vmem>>, vector<8x1xf32>
    %c0_342 = arith.constant 0 : index
    %c66_343 = arith.constant 66 : index
    %606 = vector.load %arg9[%c0_342, %c66_343] : memref<8x448xf32, #tpu.memory_space<vmem>>, vector<8x315xf32>
    %607 = vector.broadcast %605 : vector<8x1xf32> to vector<8x315xf32>
    %608 = arith.mulf %607, %606 : vector<8x315xf32>
    %609 = arith.addf %604, %608 : vector<8x315xf32>
    %c0_344 = arith.constant 0 : index
    %c88_345 = arith.constant 88 : index
    %610 = vector.load %arg1[%c0_344, %c88_345] : memref<8x92xf32, #tpu.memory_space<vmem>>, vector<8x1xf32>
    %c0_346 = arith.constant 0 : index
    %c67_347 = arith.constant 67 : index
    %611 = vector.load %arg9[%c0_346, %c67_347] : memref<8x448xf32, #tpu.memory_space<vmem>>, vector<8x315xf32>
    %612 = vector.broadcast %610 : vector<8x1xf32> to vector<8x315xf32>
    %613 = arith.mulf %612, %611 : vector<8x315xf32>
    %614 = arith.addf %609, %613 : vector<8x315xf32>
    %c0_348 = arith.constant 0 : index
    %c89_349 = arith.constant 89 : index
    %615 = vector.load %arg1[%c0_348, %c89_349] : memref<8x92xf32, #tpu.memory_space<vmem>>, vector<8x1xf32>
    %c0_350 = arith.constant 0 : index
    %c86_351 = arith.constant 86 : index
    %616 = vector.load %arg9[%c0_350, %c86_351] : memref<8x448xf32, #tpu.memory_space<vmem>>, vector<8x315xf32>
    %617 = vector.broadcast %615 : vector<8x1xf32> to vector<8x315xf32>
    %618 = arith.mulf %617, %616 : vector<8x315xf32>
    %619 = arith.addf %614, %618 : vector<8x315xf32>
    %c0_352 = arith.constant 0 : index
    %c90_353 = arith.constant 90 : index
    %620 = vector.load %arg1[%c0_352, %c90_353] : memref<8x92xf32, #tpu.memory_space<vmem>>, vector<8x1xf32>
    %c0_354 = arith.constant 0 : index
    %c87_355 = arith.constant 87 : index
    %621 = vector.load %arg9[%c0_354, %c87_355] : memref<8x448xf32, #tpu.memory_space<vmem>>, vector<8x315xf32>
    %622 = vector.broadcast %620 : vector<8x1xf32> to vector<8x315xf32>
    %623 = arith.mulf %622, %621 : vector<8x315xf32>
    %624 = arith.addf %619, %623 : vector<8x315xf32>
    %c0_356 = arith.constant 0 : index
    %c91 = arith.constant 91 : index
    %625 = vector.load %arg1[%c0_356, %c91] : memref<8x92xf32, #tpu.memory_space<vmem>>, vector<8x1xf32>
    %c0_357 = arith.constant 0 : index
    %c88_358 = arith.constant 88 : index
    %626 = vector.load %arg9[%c0_357, %c88_358] : memref<8x448xf32, #tpu.memory_space<vmem>>, vector<8x315xf32>
    %627 = vector.broadcast %625 : vector<8x1xf32> to vector<8x315xf32>
    %628 = arith.mulf %627, %626 : vector<8x315xf32>
    %629 = arith.addf %624, %628 : vector<8x315xf32>
    %c0_359 = arith.constant 0 : index
    %c0_360 = arith.constant 0 : index
    %630 = vector.load %arg3[%c0_359, %c0_360] : memref<8x8xf32, #tpu.memory_space<vmem>>, vector<8x8xf32>
    %cst_361 = arith.constant dense<0.000000e+00> : vector<8x315xf32>
    %631 = tpu.matmul %630, %629, %cst_361 {dimension_numbers = #tpu.dot_dimension_numbers<[1], [0], [0], [1], [0, 0, 1, 1], [], []>} : vector<8x8xf32>, vector<8x315xf32>, vector<8x315xf32> -> vector<8x315xf32>
    %c24_362 = arith.constant 24 : index
    %c0_363 = arith.constant 0 : index
    %632 = vector.load %arg4[%c24_362, %c0_363] : memref<32x1xf32, #tpu.memory_space<vmem>>, vector<8x1xf32>
    %633 = vector.broadcast %632 : vector<8x1xf32> to vector<8x315xf32>
    %634 = arith.addf %631, %633 : vector<8x315xf32>
    %cst_364 = arith.constant 5.000000e-01 : f32
    %635 = vector.broadcast %cst_364 : f32 to vector<8x315xf32>
    %636 = arith.mulf %635, %634 : vector<8x315xf32>
    %cst_365 = arith.constant 0.707106769 : f32
    %637 = vector.broadcast %cst_365 : f32 to vector<8x315xf32>
    %638 = arith.mulf %634, %637 : vector<8x315xf32>
    %639 = math.absf %638 : vector<8x315xf32>
    %cst_366 = arith.constant 0.327591091 : f32
    %640 = vector.broadcast %cst_366 : f32 to vector<8x315xf32>
    %641 = arith.mulf %640, %639 : vector<8x315xf32>
    %cst_367 = arith.constant 1.000000e+00 : f32
    %642 = vector.broadcast %cst_367 : f32 to vector<8x315xf32>
    %643 = arith.addf %642, %641 : vector<8x315xf32>
    %644 = tpu.reciprocal %643 {approx = true} : vector<8x315xf32> -> vector<8x315xf32>
    %645 = arith.mulf %643, %644 : vector<8x315xf32>
    %cst_368 = arith.constant 2.000000e+00 : f32
    %646 = vector.broadcast %cst_368 : f32 to vector<8x315xf32>
    %647 = arith.subf %646, %645 : vector<8x315xf32>
    %648 = arith.mulf %644, %647 : vector<8x315xf32>
    %cst_369 = arith.constant 1.06140542 : f32
    %649 = vector.broadcast %cst_369 : f32 to vector<8x315xf32>
    %650 = arith.mulf %648, %649 : vector<8x315xf32>
    %cst_370 = arith.constant -1.45315206 : f32
    %651 = vector.broadcast %cst_370 : f32 to vector<8x315xf32>
    %652 = arith.addf %651, %650 : vector<8x315xf32>
    %653 = arith.mulf %648, %652 : vector<8x315xf32>
    %cst_371 = arith.constant 1.42141378 : f32
    %654 = vector.broadcast %cst_371 : f32 to vector<8x315xf32>
    %655 = arith.addf %654, %653 : vector<8x315xf32>
    %656 = arith.mulf %648, %655 : vector<8x315xf32>
    %cst_372 = arith.constant -0.284496725 : f32
    %657 = vector.broadcast %cst_372 : f32 to vector<8x315xf32>
    %658 = arith.addf %657, %656 : vector<8x315xf32>
    %659 = arith.mulf %648, %658 : vector<8x315xf32>
    %cst_373 = arith.constant 0.254829586 : f32
    %660 = vector.broadcast %cst_373 : f32 to vector<8x315xf32>
    %661 = arith.addf %660, %659 : vector<8x315xf32>
    %662 = arith.mulf %648, %661 : vector<8x315xf32>
    %cst_374 = arith.constant 0.000000e+00 : f32
    %663 = vector.broadcast %cst_374 : f32 to vector<8x315xf32>
    %664 = arith.subf %663, %639 : vector<8x315xf32>
    %665 = arith.mulf %664, %639 : vector<8x315xf32>
    %666 = math.exp %665 : vector<8x315xf32>
    %667 = arith.mulf %662, %666 : vector<8x315xf32>
    %cst_375 = arith.constant 1.000000e+00 : f32
    %668 = vector.broadcast %cst_375 : f32 to vector<8x315xf32>
    %669 = arith.subf %668, %667 : vector<8x315xf32>
    %cst_376 = arith.constant 0.000000e+00 : f32
    %670 = vector.broadcast %cst_376 : f32 to vector<8x315xf32>
    %671 = arith.cmpf oge, %638, %670 : vector<8x315xf32>
    %cst_377 = arith.constant 0.000000e+00 : f32
    %672 = vector.broadcast %cst_377 : f32 to vector<8x315xf32>
    %673 = arith.subf %672, %669 : vector<8x315xf32>
    %674 = arith.select %671, %669, %673 : vector<8x315xi1>, vector<8x315xf32>
    %cst_378 = arith.constant 1.000000e+00 : f32
    %675 = vector.broadcast %cst_378 : f32 to vector<8x315xf32>
    %676 = arith.addf %675, %674 : vector<8x315xf32>
    %677 = arith.mulf %636, %676 : vector<8x315xf32>
    %c0_379 = arith.constant 0 : index
    %c0_380 = arith.constant 0 : index
    %678 = vector.load %arg8[%c0_379, %c0_380] : memref<8x315xf32, #tpu.memory_space<vmem>>, vector<8x315xf32>
    tpu.vector_store %arg8[%c0_379, %c0_380], %677 {strides = array<i32>} : memref<8x315xf32, #tpu.memory_space<vmem>>, vector<8x315xf32>,
    %c0_381 = arith.constant 0 : index
    %c0_382 = arith.constant 0 : index
    %679 = vector.load %arg11[%c0_381, %c0_382] : memref<2x315xf32, #tpu.memory_space<vmem>>, vector<1x315xf32>
    %c0_383 = arith.constant 0 : index
    %c0_384 = arith.constant 0 : index
    %680 = vector.load %arg8[%c0_383, %c0_384] : memref<8x315xf32, #tpu.memory_space<vmem>>, vector<4x315xf32>
    %681 = vector.broadcast %679 : vector<1x315xf32> to vector<4x315xf32>
    %682 = arith.mulf %681, %680 : vector<4x315xf32>
    %c0_385 = arith.constant 0 : index
    %c0_386 = arith.constant 0 : index
    %683 = vector.load %arg8[%c0_385, %c0_386] : memref<8x315xf32, #tpu.memory_space<vmem>>, vector<4x315xf32>
    tpu.vector_store %arg8[%c0_385, %c0_386], %682 {strides = array<i32>} : memref<8x315xf32, #tpu.memory_space<vmem>>, vector<4x315xf32>,
    %c1_387 = arith.constant 1 : index
    %c0_388 = arith.constant 0 : index
    %684 = vector.load %arg11[%c1_387, %c0_388] : memref<2x315xf32, #tpu.memory_space<vmem>>, vector<1x315xf32>
    %c4_389 = arith.constant 4 : index
    %c0_390 = arith.constant 0 : index
    %685 = vector.load %arg8[%c4_389, %c0_390] : memref<8x315xf32, #tpu.memory_space<vmem>>, vector<4x315xf32>
    %686 = vector.broadcast %684 : vector<1x315xf32> to vector<4x315xf32>
    %687 = arith.mulf %686, %685 : vector<4x315xf32>
    %c4_391 = arith.constant 4 : index
    %c0_392 = arith.constant 0 : index
    %688 = vector.load %arg8[%c4_391, %c0_392] : memref<8x315xf32, #tpu.memory_space<vmem>>, vector<4x315xf32>
    tpu.vector_store %arg8[%c4_391, %c0_392], %687 {strides = array<i32>} : memref<8x315xf32, #tpu.memory_space<vmem>>, vector<4x315xf32>,
    return
  }
}

</mosaic_0001>

<bundles_post_ra>
// kernel: tpu_custom_call.1
= control target key start
LH: loop header
LB: loop body
LE: loop exit
PB: predicated region body
PF: predicated region fallthrough
CT: control target
= control target key end

     0   :  { %v4445_v1 = vmov 10   ;;  %v4446_v2 = vmov 12   ;;  %v4447_v11 = vmov 11   ;;  %v4448_v14 = vmov 15   ;;  %s7604_s0 = inlined_call_operand.vmem [shape: f32[8,448], index: 0, kind: input, shape index: {}]   ;;  %s7605_s1 = inlined_call_operand.vmem [shape: f32[8,92], index: 1, kind: input, shape index: {}]   ;;  %s7606_s2 = inlined_call_operand.vmem [shape: f32[24,24], index: 2, kind: input, shape index: {}]   ;;  %s7607_s3 = inlined_call_operand.vmem [shape: f32[8,8], index: 3, kind: input, shape index: {}]   ;;  %s7608_s4 = inlined_call_operand.vmem [shape: f32[32,1], index: 4, kind: input, shape index: {}]   ;;  %s7609_s5 = inlined_call_operand.vmem [shape: f32[315,112], index: 5, kind: input, shape index: {}]   ;;  %s7610_s6 = inlined_call_operand.vmem [shape: f32[112,315], index: 6, kind: input, shape index: {}]   ;;  %s7611_s7 = inlined_call_operand.vmem [shape: f32[3,315], index: 7, kind: input, shape index: {}]   ;;  %s7612_s8 = inlined_call_operand.hbm [shape: f32[8,315], index: 8, kind: output, shape index: {}]  }
   0x1   :  { %v4635_v0 = vld [vmem:[%s7605_s1] sm:$0xff]  ;;  %4229 = vset.pattern.permute.xlu1 %v4445_v1  ;;  %4231 = vset.pattern.permute.xlu0 %v4446_v2 }
   0x2   :  { %865 = vperm.xlu1 %4229, %v4635_v0   ;;  %v32_v3 = vld [vmem:[%s7604_s0] ss:$8 sm:$0x7]  ;;  %v3825_v4 = vld [vmem:[%s7604_s0 + $0x1] ss:$8 sm:$0x7]  ;;  %913 = vperm.xlu0 %4231, %v4635_v0  }
   0x3   :  { %v33_v5 = vadd.f32 1e-08, %v32_v3  ;;  %v37_v6 = vadd.f32 1e-08, %v3825_v4 }
   0x4   :  { %v3826_v7 = vld [vmem:[%s7604_s0 + $0x2] ss:$8 sm:$0x7]  ;;  %v3827_v8 = vld [vmem:[%s7604_s0 + $0x3] ss:$8 sm:$0x7] }
   0x5   :  { %4325 = vrcp.f32 %v33_v5  ;;  %v42_v9 = vadd.f32 1e-08, %v3826_v7  ;;  %v47_v10 = vadd.f32 1e-08, %v3827_v8 }
   0x6   :  { %4230 = vset.pattern.permute.xlu1 %v4447_v11  ;;  %4327 = vrcp.f32 %v37_v6  ;;  %v3828_v12 = vld [vmem:[%s7604_s0 + $0x4] ss:$8 sm:$0x7]  ;;  %v3829_v13 = vld [vmem:[%s7604_s0 + $0x5] ss:$8 sm:$0x7]  ;;  %4234 = vset.pattern.permute.xlu0 %v4448_v14 }
   0x7   :  { %889 = vperm.xlu1 %4230, %v4635_v0   ;;  %4329 = vrcp.f32 %v42_v9  ;;  %v65_v15 = vadd.f32 1e-08, %v3828_v12  ;;  %v69_v16 = vadd.f32 1e-08, %v3829_v13  ;;  %987 = vperm.xlu0 %4234, %v4635_v0  }
   0x8   :  { %4331 = vrcp.f32 %v47_v10  ;;  %v3830_v17 = vld [vmem:[%s7604_s0 + $0x6] ss:$8 sm:$0x7]  ;;  %v3831_v18 = vld [vmem:[%s7604_s0 + $0x7] ss:$8 sm:$0x7] }
   0x9   :  { %4333 = vrcp.f32 %v65_v15  ;;  %v74_v19 = vadd.f32 1e-08, %v3830_v17  ;;  %v79_v20 = vadd.f32 1e-08, %v3831_v18 }
   0xa   :  { %4335 = vrcp.f32 %v69_v16 }
   0xb   :  { %13 = vsyncpa [#allocation6], 0  ;;  %v4449_v21 = vmov 13   ;;  %4337 = vrcp.f32 %v74_v19  ;;  %v4450_v22 = vmov 18   ;;  %v4451_v25 = vmov 14   ;;  %s4453_s23 = smov 62  }
   0xc   :  { %4232 = vset.pattern.permute.xlu1 %v4449_v21  ;;  %4339 = vrcp.f32 %v79_v20  ;;  %4237 = vset.pattern.permute.xlu0 %v4450_v22  ;;  %v4452_v33 = vmov 16   ;;  %v4454_v40 = vmov 17   ;;  %v4455_v42 = vmov 35   ;;  %v149_v49 = vld [vmem:[%s7609_s5 + $0x80] sm:$0xff]  ;;  %v150_v50 = vld [vmem:[%s7609_s5 + $0x88] sm:$0xff]  ;;  %v151_v57 = vld [vmem:[%s7609_s5 + $0x90] sm:$0xff] }
   0xd   :  { %938 = vperm.xlu1 %4232, %v4635_v0   ;;  %v4456_v43 = vmov 19   ;;  %v4457_v44 = vmov 36   ;;  %v4458_v45 = vmov 20   ;;  %v4459_v46 = vmov 21   ;;  %v133_v52 = vld [vmem:[%s7609_s5] sm:$0xff]  ;;  %v134_v53 = vld [vmem:[%s7609_s5 + $0x8] sm:$0xff] }
   0xe   :  { %v4460_v47 = vmov 37   ;;  %v4461_v48 = vmov 39   ;;  %v3986_v51 = vpack.c.bf16 %v150_v50, %v149_v49  ;;  %v4462_v54 = vmov 38   ;;  %v152_v58 = vld [vmem:[%s7609_s5 + $0x98] sm:$0xff]  ;;  %v135_v60 = vld [vmem:[%s7609_s5 + $0x10] sm:$0xff]  ;;  %v153_v2 = vld [vmem:[%s7609_s5 + $0xa0] sm:$0xff] }
   0xf   :  { %v4326_v23 = vpop.eup %4325  ;;  %v3988_v55 = vpack.c.bf16 %v134_v53, %v133_v52  ;;  %v4463_v56 = vmov 24   ;;  %v3990_v59 = vpack.c.bf16 %v152_v58, %v151_v57  ;;  %v136_v61 = vld [vmem:[%s7609_s5 + $0x18] sm:$0xff]  ;;  %v4464_v63 = vmov 22   ;;  %v154_v3 = vld [vmem:[%s7609_s5 + $0xa8] sm:$0xff]  ;;  %v137_v5 = vld [vmem:[%s7609_s5 + $0x20] sm:$0xff]  ;;  %s4497_s22 = smov 127  }
  0x10   :  { %v4328_v24 = vpop.eup %4327  ;;  %3987 = vmatprep.subr.bf16.mxu0 %v3986_v51  ;;  %v3992_v62 = vpack.c.bf16 %v136_v61, %v135_v60  ;;  %v4465_v1 = vmov 42   ;;  %v3994_v4 = vpack.c.bf16 %v154_v3, %v153_v2  ;;  %v138_v6 = vld [vmem:[%s7609_s5 + $0x28] sm:$0xff]  ;;  %v4466_v8 = vmov 23   ;;  %v155_v9 = vld [vmem:[%s7609_s5 + $0xb0] sm:$0xff]  ;;  %v156_v10 = vld [vmem:[%s7609_s5 + $0xb8] sm:$0xff]  ;;  %s7641_s24 = smov 126  }
  0x11   :  { %4233 = vset.pattern.permute.xlu1 %v4451_v25  ;;  %v4330_v26 = vpop.eup %4329  ;;  %v39_v27 = vadd.f32 %v4328_v24, %v4326_v23  ;;  %3989 = vmatpush3.bf16.msra.mxu0 %v3988_v55  ;;  %v3996_v7 = vpack.c.bf16 %v138_v6, %v137_v5  ;;  %v4467_v11 = vmov 43   ;;  %v3998_v12 = vpack.c.bf16 %v156_v10, %v155_v9  ;;  %v139_v13 = vld [vmem:[%s7609_s5 + $0x30] sm:$0xff]  ;;  %v140_v14 = vld [vmem:[%s7609_s5 + $0x38] sm:$0xff]  ;;  %v157_v16 = vld [vmem:[%s7609_s5 + $0xc0] sm:$0xff]  ;;  %s7634_s25 = smov 125   ;;  %s7631_s26 = smov 124  }
  0x12   :  { %963 = vperm.xlu1 %4233, %v4635_v0   ;;  %v4332_v28 = vpop.eup %4331  ;;  %3991 = vmatprep.subr.bf16.mxu0 %v3990_v59  ;;  %v4000_v15 = vpack.c.bf16 %v140_v14, %v139_v13  ;;  %v158_v17 = vld [vmem:[%s7609_s5 + $0xc8] sm:$0xff]  ;;  %v4468_v18 = vmov 40   ;;  %v141_v20 = vld [vmem:[%s7609_s5 + $0x40] sm:$0xff]  ;;  %v4469_v22 = vmov 44   ;;  %v159_v24 = vld [vmem:[%s7609_s5 + $0xd0] sm:$0xff]  ;;  %v4475_v53 = vmov 1  }
  0x13   :  { %v4334_v29 = vpop.eup %4333  ;;  %v44_v30 = vadd.f32 %v4330_v26, %v39_v27  ;;  %v4002_v19 = vpack.c.bf16 %v158_v17, %v157_v16  ;;  %v142_v21 = vld [vmem:[%s7609_s5 + $0x48] sm:$0xff]  ;;  %v160_v25 = vld [vmem:[%s7609_s5 + $0xd8] sm:$0xff]  ;;  %v143_v27 = vld [vmem:[%s7609_s5 + $0x50] sm:$0xff]  ;;  %vm182_vm0 = vcmask 1042432   ;;  %v4477_v61 = vmov 26   ;;  %s7717_s27 = smov 107  }
  0x14   :  { %v4336_v31 = vpop.eup %4335  ;;  %v4004_v23 = vpack.c.bf16 %v142_v21, %v141_v20  ;;  %v4006_v26 = vpack.c.bf16 %v160_v25, %v159_v24  ;;  %v169_v49 = vld [vmem:[%s7609_s5 + $0x120] sm:$0xff]  ;;  %v170_v50 = vld [vmem:[%s7609_s5 + $0x128] sm:$0xff]  ;;  %v148_v55 = vld [vmem:[%s7609_s5 + $0x78] sm:$0xff]  ;;  %vm4478_vm1 = vmmov 1   ;;  %vm7755_vm3 = vmmov 0   ;;  %s4511_s10 = smov 106  }
  0x15   :  { %v4338_v32 = vpop.eup %4337  ;;  %v49_v34 = vadd.f32 %v4332_v28, %v44_v30  ;;  %v71_v35 = vadd.f32 %v4336_v31, %v4334_v29  ;;  %3993 = vmatpush3.bf16.msra.mxu0 %v3992_v62  ;;  %v4470_v28 = vmov 41   ;;  %v144_v29 = vld [vmem:[%s7609_s5 + $0x58] sm:$0xff]  ;;  %v165_v30 = vld [vmem:[%s7609_s5 + $0x100] sm:$0xff]  ;;  %v166_v31 = vld [vmem:[%s7609_s5 + $0x108] sm:$0xff]  ;;  %v4025_v52 = vpack.c.bf16 %v170_v50, %v169_v49  ;;  %s7695_s11 = smov 105   ;;  %s4517_s12 = smov 104  }
  0x16   :  { %4235 = vset.pattern.permute.xlu1 %v4452_v33  ;;  %v4340_v36 = vpop.eup %4339  ;;  %3995 = vmatprep.subr.bf16.mxu0 %v3994_v4  ;;  %v4019_v33 = vpack.c.bf16 %v166_v31, %v165_v30  ;;  %v171_v57 = vld [vmem:[%s7609_s5 + $0x130] sm:$0xff]  ;;  %v172_v58 = vld [vmem:[%s7609_s5 + $0x138] sm:$0x7]  ;;  %vm4029_vm2 = vmpackc.low %vm182_vm0, %vm4478_vm1  ;;  %v4479_v62 = vmov 48   ;;  %v4483_v2 = vmov 49   ;;  %v4484_v3 = vmov 27  }
  0x17   :  { %1011 = vperm.xlu1 %4235, %v4635_v0   ;;  %v50_v37 = vmul.f32 0.25, %v49_v34  ;;  %v76_v38 = vadd.f32 %v4338_v32, %v71_v35  ;;  %v4471_v32 = vmov 45   ;;  %v161_v34 = vld [vmem:[%s7609_s5 + $0xe0] sm:$0xff]  ;;  %v162_v35 = vld [vmem:[%s7609_s5 + $0xe8] sm:$0xff]  ;;  %v4028_v60 = vpack.c.bf16 %v172_v58, %v171_v57  ;;  %s4519_s13 = smov 103   ;;  %s7643_s14 = smov 86  }
  0x18   :  { %v4485_v4 = vmov 50   ;;  %v4486_v5 = vmov 3   ;;  %v4487_v6 = vmov 53   ;;  %v4490_v9 = vmov 4   ;;  %s7639_s15 = smov 85   ;;  %s7636_s16 = smov 84  }
  0x19   :  { %52 = vrot.lane.b32.xlu0 %v50_v37, %s4453_s23  ;;  %v81_v39 = vadd.f32 %v4340_v36, %v76_v38  ;;  %3997 = vmatpush3.bf16.msra.mxu0 %v3996_v7  ;;  %v4008_v36 = vpack.c.bf16 %v144_v29, %v143_v27  ;;  %v7615_v37 = vmov 0.0|0.0   ;;  %v4010_v38 = vpack.c.bf16 %v162_v35, %v161_v34  ;;  %s4533_s17 = smov 83   ;;  %s4534_s19 = smov 123  }
  0x1a   :  { %3999 = vmatprep.subr.bf16.mxu0 %v3998_v12  ;;  %4018 = vmatprep.subr.bf16.mxu1 %v7615_v37  ;;  %v4488_v7 = vmov 28   ;;  %v4491_v10 = vmov 58   ;;  %v4493_v12 = vmov 65   ;;  %v4494_v13 = vmov 5   ;;  %s4536_s20 = smov 82   ;;  %s4538_s21 = smov 122  }
  0x1b   :  { %4236 = vset.pattern.permute.xlu1 %v4454_v40  ;;  %v82_v41 = vmul.f32 0.25, %v81_v39  ;;  %4020 = vmatpush3.bf16.msra.mxu1 %v4019_v33  ;;  %v167_v39 = vld [vmem:[%s7609_s5 + $0x110] sm:$0xff]  ;;  %v168_v40 = vld [vmem:[%s7609_s5 + $0x118] sm:$0xff]  ;;  %v4495_v14 = vmov 30   ;;  %v4498_v24 = vmov 31   ;;  %v58_v25 = vlaneseq  ;;  %s4540_s28 = smov 65  }
  0x1c   :  { %1035 = vperm.xlu1 %4236, %v4635_v0   ;;  %4021 = vmatprep.subr.bf16.mxu1 %v7615_v37  ;;  %vm7766_vm4 = vcmask 506880   ;;  %v4500_v31 = vmov 7   ;;  %v4506_v49 = vmov 1983009808   ;;  %vm7757_vm6 = vcmask 482304   ;;  %s4542_s29 = smov 64  }
  0x1d   :  { %84 = vrot.lane.b32.xlu0 %v82_v41, %s4453_s23  ;;  %4001 = vmatpush3.bf16.msra.mxu0 %v4000_v15  ;;  %v4473_v41 = vmov 25   ;;  %v4838_v15 = vld [vmem:[%s7604_s0 + $0x10] sm:$0xff]  ;;  %vm4866_vm5 = vcmp.lt.s32.totalorder %v58_v25, 315  ;;  %v113_v50 = vunpack.c.l.s4 %v4506_v49  ;;  %s4543_s30 = smov 63   ;;  %vm7763_vm7 = vcmask 523264   ;;  %s4553_s18 = smov 43  }
  0x1e   :  { %4003 = vmatprep.subr.bf16.mxu0 %v4002_v19  ;;  %v4847_v19 = vld [vmem:[%s7604_s0] sm:$0xff]  ;;  %s4554_s9 = smov 101   ;;  %vm415_vm9 = vcmask 916480   ;;  %vm632_vm10 = vcmask 1039360   ;;  %vm7813_vm11 = vcmask 1031168   ;;  %vm7812_vm12 = vcmask 1022976  }
  0x1f   :  { %vm7808_vm13 = vcmask 1014784   ;;  %vm7811_vm14 = vcmask 875520   ;;  %vm707_vm15 = vcmask 867328   ;;  %vm7810_vm0 = vcmask 859136  }
  0x20   :  { %4238 = vset.pattern.permute.xlu1 %v4455_v42  ;;  %v145_v42 = vld [vmem:[%s7609_s5 + $0x60] sm:$0xff]  ;;  %vm7759_vm1 = vcmask 850944  }
  0x21   :  { %1539 = vperm.xlu1 %4238, %v4635_v0   ;;  %1060 = vperm.xlu0 %4237, %v4635_v0  }
  0x22   :  { %4005 = vmatpush3.bf16.msra.mxu0 %v4004_v23 }
  0x23   :  { %4007 = vmatprep.subr.bf16.mxu0 %v4006_v26 }
  0x25   :  { %4239 = vset.pattern.permute.xlu1 %v4456_v43  ;;  %4240 = vset.pattern.permute.xlu0 %v4457_v44  ;;  %v146_v43 = vld [vmem:[%s7609_s5 + $0x68] sm:$0xff]  ;;  %v4022_v44 = vpack.c.bf16 %v168_v40, %v167_v39  ;;  %v4501_v39 = vmov 32  }
  0x26   :  { %1085 = vperm.xlu1 %4239, %v4635_v0   ;;  %1563 = vperm.xlu0 %4240, %v4635_v0  }
  0x27   :  { %4009 = vmatpush3.bf16.msra.mxu0 %v4008_v36  ;;  %4023 = vmatpush3.bf16.msra.mxu1 %v4022_v44 }
  0x28   :  { %4011 = vmatprep.subr.bf16.mxu0 %v4010_v38  ;;  %4024 = vmatprep.subr.bf16.mxu1 %v7615_v37 }
  0x2a   :  { %4241 = vset.pattern.permute.xlu1 %v4458_v45  ;;  %4243 = vset.pattern.permute.xlu0 %v4459_v46  ;;  %v4474_v45 = vmov 46   ;;  %v163_v46 = vld [vmem:[%s7609_s5 + $0xf0] sm:$0xff] }
  0x2b   :  { %1109 = vperm.xlu1 %4241, %v4635_v0   ;;  %1133 = vperm.xlu0 %4243, %v4635_v0  }
  0x2c   :  { %4026 = vmatpush3.bf16.msra.mxu1 %v4025_v52 }
  0x2d   :  { %4027 = vmatprep.subr.bf16.mxu1 %v7615_v37 }
  0x2f   :  { %4242 = vset.pattern.permute.xlu1 %v4460_v47  ;;  %4246 = vset.pattern.permute.xlu0 %v4461_v48  ;;  %v164_v47 = vld [vmem:[%s7609_s5 + $0xf8] sm:$0xff]  ;;  %v4012_v48 = vpack.c.bf16 %v146_v43, %v145_v42  ;;  %v4503_v43 = vmov 8  }
  0x30   :  { %1587 = vperm.xlu1 %4242, %v4635_v0   ;;  %1635 = vperm.xlu0 %4246, %v4635_v0   ;;  %v4014_v51 = vpack.c.bf16 %v164_v47, %v163_v46 }
  0x31   :  { %4013 = vmatpush3.bf16.msra.mxu0 %v4012_v48  ;;  %4030 = vmatpush3.bf16.msk.msra.mxu1 %vm4029_vm2, %v4028_v60  ;;  %v4504_v48 = vmov 33   ;;  %v3824_v60 = vld [vmem:[%s7611_s7 + $0x2] ss:$4 sm:$0x7]  ;;  %vm7758_vm2 = vcmask 842752  }
  0x32   :  { %4015 = vmatprep.subr.bf16.mxu0 %v4014_v51 }
  0x34   :  { %4244 = vset.pattern.permute.xlu1 %v4462_v54  ;;  %4249 = vset.pattern.permute.xlu0 %v4463_v56  ;;  %v147_v54 = vld [vmem:[%s7609_s5 + $0x70] sm:$0xff]  ;;  %v4476_v56 = vmov 47   ;;  %s7884_s5 = smov 126  }
  0x35   :  { %1611 = vperm.xlu1 %4244, %v4635_v0   ;;  %1211 = vperm.xlu0 %4249, %v4635_v0   ;;  %v4016_v59 = vpack.c.bf16 %v148_v55, %v147_v54  ;;  %v114_v55 = vunpack.c.0.s8 %v113_v50 }
  0x37   :  { %4017 = vmatpush3.bf16.msra.mxu0 %v4016_v59 }
  0x38   :  { %4059 = vmatprep.subr.bf16.mxu0 %v7615_v37 }
  0x39   :  { %4245 = vset.pattern.permute.xlu1 %v4464_v63  ;;  %4252 = vset.pattern.permute.xlu0 %v4465_v1  ;;  %v7613_v63 = vmov 0.0   ;;  %v4482_v1 = vmov 2  }
  0x3a   :  { %1157 = vperm.xlu1 %4245, %v4635_v0   ;;  %1709 = vperm.xlu0 %4252, %v4635_v0  }
  0x3b   :  { %3932 = vmatprep.mubr.msk.f32.mxu1 %vm7755_vm3, %v7613_v63 }
  0x3e   :  { %4247 = vset.pattern.permute.xlu1 %v4466_v8  ;;  %4255 = vset.pattern.permute.xlu0 %v4467_v11  ;;  %v4489_v8 = vmov 9   ;;  %v4492_v11 = vmov 29  }
  0x3f   :  { %1182 = vperm.xlu1 %4247, %v4635_v0   ;;  %1733 = vperm.xlu0 %4255, %v4635_v0  }
  0x43   :  { %4248 = vset.pattern.permute.xlu1 %v4468_v18  ;;  %4258 = vset.pattern.permute.xlu0 %v4469_v22  ;;  %v4496_v18 = vmov 6  }
  0x44   :  { %1660 = vperm.xlu1 %4248, %v4635_v0   ;;  %1757 = vperm.xlu0 %4258, %v4635_v0  }
  0x48   :  { %4250 = vset.pattern.permute.xlu1 %v4470_v28  ;;  %4261 = vset.pattern.permute.xlu0 %v4471_v32 }
  0x49   :  { %1685 = vperm.xlu1 %4250, %v4635_v0   ;;  %1781 = vperm.xlu0 %4261, %v4635_v0  }
  0x4d   :  { %4251 = vset.pattern.permute.xlu1 %v4473_v41  ;;  %4264 = vset.pattern.permute.xlu0 %v4474_v45 }
  0x4e   :  { %1241 = vperm.xlu1 %4251, %v4635_v0   ;;  %1805 = vperm.xlu0 %4264, %v4635_v0  }
  0x52   :  { %4253 = vset.pattern.permute.xlu1 %v4475_v53  ;;  %4267 = vset.pattern.permute.xlu0 %v4476_v56  ;;  %v96_v53 = vshrl.u32 %v58_v25, 7  ;;  %v4507_v56 = vmov 51  }
  0x53   :  { %617 = vperm.xlu1 %4253, %v4635_v0   ;;  %1830 = vperm.xlu0 %4267, %v4635_v0  }
  0x54   :  { %v4908_v58 = vsub.s32 0, %v96_v53 }
  0x56   :  { %7817 = vst [vmem:[#allocation8_spill] sm:$0xff] %v4908_v58 }
  0x57   :  { %4254 = vset.pattern.permute.xlu1 %v4477_v61  ;;  %4270 = vset.pattern.permute.xlu0 %v4479_v62  ;;  %v4916_v61 = vsub.s32 1, %v96_v53  ;;  %v4918_v62 = vsub.s32 %v114_v55, %v96_v53 }
  0x58   :  { %1271 = vperm.xlu1 %4254, %v4635_v0   ;;  %1855 = vperm.xlu0 %4270, %v4635_v0  }
  0x59   :  { %7818 = vst [vmem:[#allocation9_spill] sm:$0xff] %v4916_v61  ;;  %7819 = vst [vmem:[#allocation10_spill] sm:$0xff] %v4918_v62 }
  0x5c   :  { %4256 = vset.pattern.permute.xlu1 %v4482_v1  ;;  %4273 = vset.pattern.permute.xlu0 %v4483_v2  ;;  %v4922_v2 = vsub.s32 2, %v96_v53 }
  0x5d   :  { %642 = vperm.xlu1 %4256, %v4635_v0   ;;  %1879 = vperm.xlu0 %4273, %v4635_v0  }
  0x5e   :  { %7820 = vst [vmem:[#allocation11_spill] sm:$0xff] %v4922_v2 }
  0x61   :  { %4257 = vset.pattern.permute.xlu1 %v4484_v3  ;;  %4276 = vset.pattern.permute.xlu0 %v4485_v4  ;;  %v4509_v3 = vmov 52  }
  0x62   :  { %1301 = vperm.xlu1 %4257, %v4635_v0   ;;  %1903 = vperm.xlu0 %4276, %v4635_v0  }
  0x66   :  { %4259 = vset.pattern.permute.xlu1 %v4486_v5  ;;  %4279 = vset.pattern.permute.xlu0 %v4487_v6  ;;  %v4929_v6 = vld [vmem:[%s7604_s0 + $0x8] sm:$0xff] }
  0x67   :  { %667 = vperm.xlu1 %4259, %v4635_v0   ;;  %1975 = vperm.xlu0 %4279, %v4635_v0  }
  0x6b   :  { %4260 = vset.pattern.permute.xlu1 %v4488_v7  ;;  %4282 = vset.pattern.permute.xlu0 %v4489_v8  ;;  %v4933_v7 = vrot.slane %v3824_v60, %v4908_v58 }
  0x6c   :  { %1330 = vperm.xlu1 %4260, %v4635_v0   ;;  %858 = vperm.xlu0 %4282, %v4635_v0  }
  0x6d   :  { %7821 = vst [vmem:[#allocation12_spill] sm:$0xff] %v4933_v7 }
  0x70   :  { %4262 = vset.pattern.permute.xlu1 %v4490_v9  ;;  %4285 = vset.pattern.permute.xlu0 %v4491_v10  ;;  %v4939_v9 = vrot.slane %v3824_v60, %v4916_v61 }
  0x71   :  { %692 = vperm.xlu1 %4262, %v4635_v0   ;;  %2097 = vperm.xlu0 %4285, %v4635_v0  }
  0x72   :  { %7822 = vst [vmem:[#allocation13_spill] sm:$0xff] %v4939_v9 }
  0x75   :  { %4263 = vset.pattern.permute.xlu1 %v4492_v11  ;;  %4293 = vset.pattern.permute.xlu0 %v4493_v12 }
  0x76   :  { %1360 = vperm.xlu1 %4263, %v4635_v0  }
  0x7a   :  { %4265 = vset.pattern.permute.xlu1 %v4494_v13  ;;  %v4945_v13 = vrot.slane %v3824_v60, %v4922_v2 }
  0x7b   :  { %717 = vperm.xlu1 %4265, %v4635_v0  }
  0x7c   :  { %7823 = vst [vmem:[#allocation14_spill] sm:$0xff] %v4945_v13 }
  0x7f   :  { %4266 = vset.pattern.permute.xlu1 %v4495_v14 }
  0x80   :  { %1390 = vperm.xlu1 %4266, %v4635_v0  }
  0x81   :  { %v4840_v16 = vpop.permute.xlu1 %865  ;;  %v4849_v20 = vpop.permute.xlu0 %913 }
  0x82   :  { %v870_v17 = vmul.f32 %v4840_v16, %v4838_v15  ;;  %v868_v22 = vmul.f32 %v4840_v16, %v4847_v19  ;;  %v918_v36 = vmul.f32 %v4849_v20, %v4838_v15  ;;  %v916_v41 = vmul.f32 %v4849_v20, %v4847_v19 }
  0x84   :  { %4268 = vset.pattern.permute.xlu1 %v4496_v18  ;;  %878 = vrot.lane.b32.xlu0 %v870_v17, %s4497_s22  ;;  %v4510_v18 = vmov 54  }
  0x85   :  { %746 = vperm.xlu1 %4268, %v4635_v0  }
  0x86   :  { %v4853_v21 = vpop.permute.xlu1 %889  ;;  %v4857_v23 = vpop.permute.xlu0 %987 }
  0x87   :  { %v894_v26 = vmul.f32 %v4853_v21, %v4838_v15  ;;  %v892_v32 = vmul.f32 %v4853_v21, %v4847_v19  ;;  %v991_v8 = vmul.f32 %v4857_v23, %v4929_v6 }
  0x88   :  { %874 = vrot.lane.b32.xlu0 %v868_v22, %s4497_s22 }
  0x89   :  { %4269 = vset.pattern.permute.xlu1 %v4498_v24 }
  0x8a   :  { %1420 = vperm.xlu1 %4269, %v4635_v0  }
  0x8b   :  { %v53_v28 = vpop.permute.xlu0 %52 }
  0x8c   :  { %v4863_v27 = vpop.permute.xlu1 %938  ;;  %902 = vrot.lane.b32.xlu0 %v894_v26, %s7641_s24  ;;  %v54_v30 = vrot.slane %v53_v28, 1 }
  0x8d   :  { %v943_v45 = vmul.f32 %v4863_v27, %v4838_v15  ;;  %v941_v51 = vmul.f32 %v4863_v27, %v4847_v19 }
  0x8e   :  { %4271 = vset.pattern.permute.xlu1 %v4500_v31  ;;  %v56_v33 = vsel %vm7766_vm4, %v53_v28, %v54_v30  ;;  %v4512_v30 = vmov 55  }
  0x8f   :  { %776 = vperm.xlu1 %4271, %v4635_v0   ;;  %62 = vst.msk [vmem:[#allocation4] ss:$2 sm:$0x7] %vm4866_vm5, %v56_v33  ;;  %v85_v34 = vpop.permute.xlu0 %84 }
  0x90   :  { %898 = vrot.lane.b32.xlu0 %v892_v32, %s7641_s24  ;;  %v86_v38 = vrot.slane %v85_v34, 1 }
  0x91   :  { %v4876_v35 = vpop.permute.xlu1 %963 }
  0x92   :  { %v87_v40 = vsel %vm7766_vm4, %v85_v34, %v86_v38  ;;  %v968_v57 = vmul.f32 %v4876_v35, %v4838_v15  ;;  %v966_v4 = vmul.f32 %v4876_v35, %v4847_v19  ;;  %v4514_v34 = vmov 56  }
  0x93   :  { %4272 = vset.pattern.permute.xlu1 %v4501_v39  ;;  %90 = vst.msk [vmem:[#allocation4 + $0x1] ss:$2 sm:$0x7] %vm4866_vm5, %v87_v40  ;;  %vm7814_vm5 = vcmask 703488  }
  0x94   :  { %1450 = vperm.xlu1 %4272, %v4635_v0   ;;  %926 = vrot.lane.b32.xlu0 %v918_v36, %s7634_s25  ;;  %v4515_v36 = vmov 69  }
  0x96   :  { %v4888_v42 = vpop.permute.xlu1 %1011 }
  0x97   :  { %v1016_v31 = vmul.f32 %v4888_v42, %v4838_v15  ;;  %v1014_v38 = vmul.f32 %v4888_v42, %v4847_v19 }
  0x98   :  { %4274 = vset.pattern.permute.xlu1 %v4503_v43  ;;  %922 = vrot.lane.b32.xlu0 %v916_v41, %s7634_s25  ;;  %v4516_v41 = vmov 57  }
  0x99   :  { %806 = vperm.xlu1 %4274, %v4635_v0  }
  0x9a   :  { %v91_v46 = vld [vmem:[#allocation4] sm:$0x3f] }
  0x9b   :  { %v4892_v44 = vpop.permute.xlu1 %1035  ;;  %v92_v47 = vadd.f32 1e-08, %v91_v46 }
  0x9c   :  { %951 = vrot.lane.b32.xlu0 %v943_v45, %s7631_s26  ;;  %v1040_v43 = vmul.f32 %v4892_v44, %v4838_v15  ;;  %v1038_v46 = vmul.f32 %v4892_v44, %v4847_v19 }
  0x9d   :  { %4275 = vset.pattern.permute.xlu1 %v4504_v48  ;;  %4341 = vrcp.f32 %v92_v47  ;;  %v4518_v48 = vmov 59  }
  0x9e   :  { %1480 = vperm.xlu1 %4275, %v4635_v0  }
  0xa0   :  { %v4900_v52 = vpop.permute.xlu1 %1539  ;;  %947 = vrot.lane.b32.xlu0 %v941_v51, %s7631_s26  ;;  %v4903_v54 = vpop.permute.xlu0 %1060  ;;  %v869_v51 = vmul.f32 %v4840_v16, %v4929_v6  ;;  %v893_v16 = vmul.f32 %v4853_v21, %v4929_v6  ;;  %v917_v21 = vmul.f32 %v4849_v20, %v4929_v6  ;;  %v4524_v20 = vmov 70  }
  0xa1   :  { %v1065_v49 = vmul.f32 %v4903_v54, %v4838_v15  ;;  %v1063_v55 = vmul.f32 %v4903_v54, %v4847_v19 }
  0xa2   :  { %4277 = vset.pattern.permute.xlu1 %v4507_v56  ;;  %v4520_v56 = vmov 60  }
  0xa3   :  { %1927 = vperm.xlu1 %4277, %v4635_v0  }
  0xa4   :  { %976 = vrot.lane.b32.xlu0 %v968_v57, %s7717_s27 }
  0xa5   :  { %v4910_v59 = vpop.permute.xlu1 %1085  ;;  %v4920_v1 = vpop.permute.xlu0 %1563 }
  0xa7   :  { %4278 = vset.pattern.permute.xlu1 %v4509_v3  ;;  %v4342_v5 = vpop.eup %4341  ;;  %v1544_v3 = vmul.f32 %v4900_v52, %v4838_v15 }
  0xa8   :  { %1951 = vperm.xlu1 %4278, %v4635_v0   ;;  %972 = vrot.lane.b32.xlu0 %v966_v4, %s7717_s27  ;;  %v118_v10 = vrot.slane %v4342_v5, %v4918_v62  ;;  %v111_v11 = vcombine.high %v4342_v5, %v4342_v5  ;;  %v4521_v5 = vmov 61  }
  0xaa   :  { %v4942_v12 = vpop.permute.xlu1 %1109  ;;  %v4947_v14 = vpop.permute.xlu0 %1133  ;;  %v126_v17 = vcombine.high %v118_v10, %v118_v10  ;;  %v130_v22 = vmul.f32 %v118_v10, %v4933_v7  ;;  %v125_v24 = vrot.slane %v111_v11, %v4918_v62  ;;  %v1090_v10 = vmul.f32 %v4910_v59, %v4838_v15 }
  0xac   :  { %4280 = vset.pattern.permute.xlu1 %v4510_v18  ;;  %998 = vrot.lane.b32.xlu0 %v991_v8, %s4511_s10  ;;  %v131_v25 = vmul.f32 %v126_v17, %v4939_v9  ;;  %v132_v26 = vmul.f32 %v125_v24, %v4945_v13  ;;  %v1568_v18 = vmul.f32 %v4920_v1, %v4838_v15 }
  0xad   :  { %2000 = vperm.xlu1 %4280, %v4635_v0  }
  0xae   :  { %250 = vmatprep.mubr.f32.mxu0 %v131_v25  ;;  %3933 = vmatmul.mubr.msk.f32.vlgmr.msra.gmra.mrb[0].mxu1 %vm7757_vm6, %v132_v26  ;;  %v942_v26 = vmul.f32 %v4863_v27, %v4929_v6  ;;  %vm7762_vm6 = vcmask 531456  }
  0xaf   :  { %v4955_v28 = vpop.permute.xlu1 %1587  ;;  %v4957_v29 = vpop.permute.xlu0 %1635  ;;  %251 = vmatmul.mubr.f32.vlgmr.msra.gmra.mrb[0].mxu0 %v130_v22  ;;  %483 = vmatprep.mubr.f32.mxu1 %v7613_v63  ;;  %v4523_v22 = vmov 62  }
  0xb0   :  { %2285 = vperm.xlu0 %4293, %v4635_v0   ;;  %3963 = vmatprep.mubr.msk.f32.mxu0 %vm7755_vm3, %v7613_v63  ;;  %v1089_v63 = vmul.f32 %v4910_v59, %v4929_v6  ;;  %v1591_v61 = vmul.f32 %v4955_v28, %v4929_v6  ;;  %vm7760_vm3 = vcmask 678912  }
  0xb1   :  { %4281 = vset.pattern.permute.xlu1 %v4512_v30  ;;  %v1114_v30 = vmul.f32 %v4942_v12, %v4838_v15 }
  0xb2   :  { %2025 = vperm.xlu1 %4281, %v4635_v0  }
  0xb4   :  { %v4967_v32 = vpop.permute.xlu1 %1611  ;;  %1024 = vrot.lane.b32.xlu0 %v1016_v31, %s7695_s11  ;;  %v4970_v33 = vpop.permute.xlu0 %1211 }
  0xb5   :  { %4297 = vset.pattern.permute.xlu0 %v4515_v36  ;;  %v4526_v36 = vmov 63  }
  0xb6   :  { %4283 = vset.pattern.permute.xlu1 %v4514_v34 }
  0xb7   :  { %2049 = vperm.xlu1 %4283, %v4635_v0  }
  0xb8   :  { %1020 = vrot.lane.b32.xlu0 %v1014_v38, %s7695_s11 }
  0xb9   :  { %v4975_v39 = vpop.permute.xlu1 %1157  ;;  %v4978_v40 = vpop.permute.xlu0 %1709 }
  0xba   :  { %v1714_v62 = vmul.f32 %v4978_v40, %v4838_v15 }
  0xbb   :  { %4284 = vset.pattern.permute.xlu1 %v4516_v41  ;;  %v967_v41 = vmul.f32 %v4876_v35, %v4929_v6 }
  0xbc   :  { %2073 = vperm.xlu1 %4284, %v4635_v0   ;;  %1048 = vrot.lane.b32.xlu0 %v1040_v43, %s4517_s12  ;;  %v1592_v43 = vmul.f32 %v4955_v28, %v4838_v15 }
  0xbe   :  { %v4984_v45 = vpop.permute.xlu1 %1182  ;;  %v4988_v47 = vpop.permute.xlu0 %1733 }
  0xc0   :  { %4286 = vset.pattern.permute.xlu1 %v4518_v48  ;;  %1044 = vrot.lane.b32.xlu0 %v1038_v46, %s4517_s12  ;;  %v1138_v46 = vmul.f32 %v4947_v14, %v4838_v15 }
  0xc1   :  { %2121 = vperm.xlu1 %4286, %v4635_v0  }
  0xc3   :  { %v4994_v50 = vpop.permute.xlu1 %1660  ;;  %v4998_v53 = vpop.permute.xlu0 %1757 }
  0xc4   :  { %1073 = vrot.lane.b32.xlu0 %v1065_v49, %s4519_s13  ;;  %v4527_v49 = vmov 64  }
  0xc5   :  { %876 = vrot.lane.b32.xlu1 %v869_v51, %s4497_s22  ;;  %v4528_v51 = vmov 71  }
  0xc6   :  { %4287 = vset.pattern.permute.xlu1 %v4520_v56 }
  0xc8   :  { %v5004_v57 = vpop.permute.xlu1 %1685  ;;  %1069 = vrot.lane.b32.xlu0 %v1063_v55, %s4519_s13  ;;  %v5008_v60 = vpop.permute.xlu0 %1781 }
  0xc9   :  { %2145 = vperm.xlu1 %4287, %v4635_v0   ;;  %v1690_v13 = vmul.f32 %v5004_v57, %v4838_v15 }
  0xcc   :  { %1552 = vrot.lane.b32.xlu0 %v1544_v3, %s4497_s22  ;;  %v992_v3 = vmul.f32 %v4857_v23, %v4838_v15 }
  0xcd   :  { %v5014_v4 = vpop.permute.xlu1 %1241  ;;  %900 = vrot.lane.b32.xlu1 %v893_v16, %s7641_s24  ;;  %v5018_v8 = vpop.permute.xlu0 %1805  ;;  %v4530_v16 = vmov 34  }
  0xce   :  { %4288 = vset.pattern.permute.xlu1 %v4521_v5  ;;  %v1616_v5 = vmul.f32 %v4967_v32, %v4838_v15 }
  0xd0   :  { %1098 = vrot.lane.b32.xlu0 %v1090_v10, %s7643_s14 }
  0xd1   :  { %2170 = vperm.xlu1 %4288, %v4635_v0  }
  0xd2   :  { %v5026_v11 = vpop.permute.xlu1 %617  ;;  %v5028_v17 = vpop.permute.xlu0 %1830 }
  0xd4   :  { %2403 = vperm.xlu0 %4297, %v4635_v0  }
  0xd5   :  { %924 = vrot.lane.b32.xlu1 %v917_v21, %s7634_s25 }
  0xd6   :  { %4289 = vset.pattern.permute.xlu1 %v4523_v22  ;;  %v1161_v22 = vmul.f32 %v4975_v39, %v4929_v6 }
  0xd7   :  { %v5034_v24 = vpop.permute.xlu1 %1271  ;;  %v5036_v25 = vpop.permute.xlu0 %1855 }
  0xd8   :  { %1576 = vrot.lane.b32.xlu0 %v1568_v18, %s7641_s24  ;;  %v4531_v18 = vmov 73  }
  0xd9   :  { %2198 = vperm.xlu1 %4289, %v4635_v0   ;;  %4298 = vset.pattern.permute.xlu0 %v4524_v20  ;;  %v4532_v20 = vmov 66  }
  0xdc   :  { %v5044_v31 = vpop.permute.xlu1 %642  ;;  %1122 = vrot.lane.b32.xlu0 %v1114_v30, %s7639_s15  ;;  %v5048_v34 = vpop.permute.xlu0 %1879  ;;  %v1614_v30 = vmul.f32 %v4967_v32, %v4847_v19 }
  0xdd   :  { %949 = vrot.lane.b32.xlu1 %v942_v26, %s7631_s26 }
  0xde   :  { %4290 = vset.pattern.permute.xlu1 %v4526_v36 }
  0xe0   :  { %2433 = vperm.xlu0 %4298, %v4635_v0  }
  0xe1   :  { %2227 = vperm.xlu1 %4290, %v4635_v0   ;;  %v5051_v38 = vpop.permute.xlu1 %1301  ;;  %v5054_v27 = vpop.permute.xlu0 %1903 }
  0xe4   :  { %1600 = vrot.lane.b32.xlu0 %v1592_v43, %s7634_s25  ;;  %v1160_v43 = vmul.f32 %v4975_v39, %v4847_v19 }
  0xe5   :  { %974 = vrot.lane.b32.xlu1 %v967_v41, %s7717_s27  ;;  %4299 = vset.pattern.permute.xlu0 %v4528_v51  ;;  %v1015_v41 = vmul.f32 %v4888_v42, %v4929_v6  ;;  %v5114_v42 = vld [vmem:[%s7605_s1] sm:$0xff] }
  0xe6   :  { %v5064_v48 = vpop.permute.xlu1 %667  ;;  %4291 = vset.pattern.permute.xlu1 %v4527_v49  ;;  %v5066_v55 = vpop.permute.xlu0 %1975  ;;  %v1640_v49 = vmul.f32 %v4957_v29, %v4838_v15 }
  0xe8   :  { %1146 = vrot.lane.b32.xlu0 %v1138_v46, %s7636_s16 }
  0xe9   :  { %2256 = vperm.xlu1 %4291, %v4635_v0  }
  0xeb   :  { %v5070_v35 = vpop.permute.xlu1 %1330  ;;  %v5072_v56 = vpop.permute.xlu0 %858 }
  0xec   :  { %7824 = vst [vmem:[#allocation15_spill] sm:$0xff] %v5072_v56  ;;  %2463 = vperm.xlu0 %4299, %v4635_v0  }
  0xed   :  { %4292 = vset.pattern.permute.xlu1 %v4530_v16 }
  0xee   :  { %1532 = vperm.xlu1 %4292, %v4635_v0   ;;  %v990_v0 = vmul.f32 %v4857_v23, %v4847_v19 }
  0xf0   :  { %v5080_v10 = vpop.permute.xlu1 %692  ;;  %1624 = vrot.lane.b32.xlu0 %v1616_v5, %s7631_s26  ;;  %v5083_v21 = vpop.permute.xlu0 %2097  ;;  %v1187_v5 = vmul.f32 %v4984_v45, %v4838_v15 }
  0xf1   :  { %4302 = vset.pattern.permute.xlu0 %v4531_v18 }
  0xf2   :  { %1000 = vrot.lane.b32.xlu1 %v992_v3, %s4511_s10  ;;  %v1039_v3 = vmul.f32 %v4892_v44, %v4929_v6  ;;  %v1064_v44 = vmul.f32 %v4903_v54, %v4929_v6  ;;  %v1216_v54 = vmul.f32 %v4970_v33, %v4838_v15 }
  0xf3   :  { %4294 = vset.pattern.permute.xlu1 %v4532_v20 }
  0xf4   :  { %1168 = vrot.lane.b32.xlu0 %v1161_v22, %s4533_s17  ;;  %v4535_v22 = vmov 67  }
  0xf5   :  { %v5090_v26 = vpop.permute.xlu1 %1360 }
  0xf6   :  { %996 = vrot.lane.b32.xlu1 %v990_v0, %s4511_s10  ;;  %v5096_v36 = vpop.permute.xlu0 %878 }
  0xf7   :  { %7825 = vst [vmem:[#allocation16_spill] sm:$0xff] %v5096_v36 }
  0xf8   :  { %1620 = vrot.lane.b32.xlu0 %v1614_v30, %s7631_s26 }
  0xfa   :  { %1022 = vrot.lane.b32.xlu1 %v1015_v41, %s7695_s11  ;;  %v5102_v23 = vpop.permute.xlu1 %717  ;;  %v5106_v46 = vpop.permute.xlu0 %874  ;;  %v1665_v41 = vmul.f32 %v4994_v50, %v4838_v15 }
  0xfb   :  { %7826 = vst [vmem:[#allocation17_spill] sm:$0xff] %v5106_v46 }
  0xfc   :  { %1166 = vrot.lane.b32.xlu0 %v1160_v43, %s4533_s17  ;;  %v4537_v43 = vmov 68  }
  0xfe   :  { %2314 = vperm.xlu1 %4294, %v5114_v42   ;;  %v5119_v16 = vpop.permute.xlu0 %902 }
  0xff   :  { %v5117_v51 = vpop.permute.xlu1 %1390  ;;  %7827 = vst [vmem:[#allocation18_spill] sm:$0xff] %v5119_v16 }
 0x100   :  { %1648 = vrot.lane.b32.xlu0 %v1640_v49, %s4534_s19 }
 0x102   :  { %1046 = vrot.lane.b32.xlu1 %v1039_v3, %s4517_s12  ;;  %v5127_v18 = vpop.permute.xlu0 %898 }
 0x103   :  { %7828 = vst [vmem:[#allocation19_spill] sm:$0xff] %v5127_v18  ;;  %4295 = vset.pattern.permute.xlu1 %v4535_v22  ;;  %v1543_v22 = vmul.f32 %v4900_v52, %v4929_v6  ;;  %v4544_v18 = vmov 72  }
 0x104   :  { %v5129_v20 = vpop.permute.xlu1 %746  ;;  %1195 = vrot.lane.b32.xlu0 %v1187_v5, %s4536_s20  ;;  %v4539_v5 = vmov 77  }
 0x106   :  { %2343 = vperm.xlu1 %4295, %v5114_v42   ;;  %v5135_v0 = vpop.permute.xlu0 %926 }
 0x107   :  { %7829 = vst [vmem:[#allocation20_spill] sm:$0xff] %v5135_v0 }
 0x108   :  { %2523 = vperm.xlu0 %4302, %v5114_v42  }
 0x109   :  { %v5137_v30 = vpop.permute.xlu1 %1420 }
 0x10a   :  { %1071 = vrot.lane.b32.xlu1 %v1064_v44, %s4519_s13  ;;  %v5146_v49 = vpop.permute.xlu0 %922  ;;  %v1663_v44 = vmul.f32 %v4994_v50, %v4847_v19 }
 0x10b   :  { %4296 = vset.pattern.permute.xlu1 %v4537_v43  ;;  %7830 = vst [vmem:[#allocation21_spill] sm:$0xff] %v5146_v49  ;;  %v7617_v43 = vmov 0   ;;  %v356_v49 = vld [vmem:[%s7610_s6 + $0x8] sm:$0xff] }
 0x10c   :  { %1673 = vrot.lane.b32.xlu0 %v1665_v41, %s4538_s21 }
 0x10d   :  { %4306 = vset.pattern.permute.xlu0 %v4539_v5 }
 0x10e   :  { %v5148_v3 = vpop.permute.xlu1 %776  ;;  %2373 = vperm.xlu1 %4296, %v5114_v42   ;;  %v5162_v5 = vpop.permute.xlu0 %951 }
 0x10f   :  { %7831 = vst [vmem:[#allocation22_spill] sm:$0xff] %v5162_v5  ;;  %v671_v5 = vmul.f32 %v4929_v6, %v5064_v48 }
 0x110   :  { %1226 = vrot.lane.b32.xlu0 %v1216_v54, %s4540_s28  ;;  %v1214_v54 = vmul.f32 %v4970_v33, %v4847_v19 }
 0x112   :  { %1550 = vrot.lane.b32.xlu1 %v1543_v22, %s4497_s22  ;;  %v1542_v22 = vmul.f32 %v4900_v52, %v4847_v19  ;;  %v1567_v52 = vmul.f32 %v4920_v1, %v4929_v6 }
 0x113   :  { %v5157_v41 = vpop.permute.xlu1 %1450  ;;  %4300 = vset.pattern.permute.xlu1 %v7617_v43  ;;  %v5173_v43 = vpop.permute.xlu0 %947 }
 0x114   :  { %1669 = vrot.lane.b32.xlu0 %v1663_v44, %s4538_s21  ;;  %7832 = vst [vmem:[#allocation23_spill] sm:$0xff] %v5173_v43  ;;  %v1088_v44 = vmul.f32 %v4910_v59, %v4847_v19  ;;  %v1688_v59 = vmul.f32 %v5004_v57, %v4847_v19 }
 0x116   :  { %1096 = vrot.lane.b32.xlu1 %v1089_v63, %s7643_s14  ;;  %v1246_v63 = vmul.f32 %v5014_v4, %v4838_v15 }
 0x118   :  { %v5170_v37 = vpop.permute.xlu1 %806  ;;  %1222 = vrot.lane.b32.xlu0 %v1214_v54, %s4540_s28  ;;  %v5188_v54 = vpop.permute.xlu0 %976 }
 0x119   :  { %7833 = vst [vmem:[#allocation24_spill] sm:$0xff] %v5188_v54  ;;  %v1186_v54 = vmul.f32 %v4984_v45, %v4929_v6 }
 0x11a   :  { %1548 = vrot.lane.b32.xlu1 %v1542_v22, %s4497_s22 }
 0x11c   :  { %1698 = vrot.lane.b32.xlu0 %v1690_v13, %s7717_s27  ;;  %v1113_v13 = vmul.f32 %v4942_v12, %v4929_v6 }
 0x11d   :  { %v5180_v9 = vpop.permute.xlu1 %1480 }
 0x11e   :  { %1094 = vrot.lane.b32.xlu1 %v1088_v44, %s7643_s14  ;;  %v5199_v44 = vpop.permute.xlu0 %972  ;;  %s4558_s14 = smov 40  }
 0x11f   :  { %7834 = vst [vmem:[#allocation25_spill] sm:$0xff] %v5199_v44  ;;  %v620_v44 = vmul.f32 %v4847_v19, %v5026_v11 }
 0x120   :  { %1256 = vrot.lane.b32.xlu0 %v1246_v63, %s4542_s29  ;;  %v1244_v63 = vmul.f32 %v5014_v4, %v4847_v19 }
 0x122   :  { %v5191_v22 = vpop.permute.xlu1 %1927  ;;  %1574 = vrot.lane.b32.xlu1 %v1567_v52, %s7641_s24  ;;  %v1566_v52 = vmul.f32 %v4920_v1, %v4847_v19  ;;  %v622_v1 = vmul.f32 %v4838_v15, %v5026_v11 }
 0x124   :  { %1694 = vrot.lane.b32.xlu0 %v1688_v59, %s7717_s27  ;;  %v5212_v59 = vpop.permute.xlu0 %998 }
 0x125   :  { %7835 = vst [vmem:[#allocation26_spill] sm:$0xff] %v5212_v59 }
 0x126   :  { %1120 = vrot.lane.b32.xlu1 %v1113_v13, %s7639_s15  ;;  %v1112_v13 = vmul.f32 %v4942_v12, %v4847_v19  ;;  %v1276_v12 = vmul.f32 %v5034_v24, %v4838_v15 }
 0x127   :  { %v5202_v7 = vpop.permute.xlu1 %1951 }
 0x128   :  { %1252 = vrot.lane.b32.xlu0 %v1244_v63, %s4542_s29 }
 0x12a   :  { %1572 = vrot.lane.b32.xlu1 %v1566_v52, %s7641_s24 }
 0x12c   :  { %v5216_v2 = vpop.permute.xlu1 %2000  ;;  %1722 = vrot.lane.b32.xlu0 %v1714_v62, %s4511_s10  ;;  %v1137_v62 = vmul.f32 %v4947_v14, %v4929_v6 }
 0x12e   :  { %1118 = vrot.lane.b32.xlu1 %v1112_v13, %s7639_s15  ;;  %s7879_s15 = smov 86  }
 0x12f   :  { %v5224_v63 = vpop.permute.xlu0 %2285 }
 0x130   :  { %630 = vrot.lane.b32.xlu0 %v622_v1, %s4497_s22  ;;  %v1712_v1 = vmul.f32 %v4978_v40, %v4847_v19 }
 0x131   :  { %v5226_v52 = vpop.permute.xlu1 %2025 }
 0x132   :  { %1598 = vrot.lane.b32.xlu1 %v1591_v61, %s7634_s25  ;;  %v1590_v61 = vmul.f32 %v4955_v28, %v4847_v19  ;;  %v1737_v28 = vmul.f32 %v4988_v47, %v4929_v6 }
 0x133   :  { %v5234_v13 = vpop.permute.xlu0 %1024 }
 0x134   :  { %7836 = vst [vmem:[#allocation27_spill] sm:$0xff] %v5234_v13  ;;  %1286 = vrot.lane.b32.xlu0 %v1276_v12, %s4543_s30  ;;  %v367_v13 = vld [vmem:[%s7610_s6 + $0x60] sm:$0xff] }
 0x136   :  { %v5237_v58 = vpop.permute.xlu1 %2049  ;;  %1144 = vrot.lane.b32.xlu1 %v1137_v62, %s7636_s16  ;;  %v1136_v62 = vmul.f32 %v4947_v14, %v4847_v19  ;;  %v646_v14 = vmul.f32 %v4929_v6, %v5044_v31 }
 0x137   :  { %v5244_v59 = vpop.permute.xlu0 %1020 }
 0x138   :  { %7837 = vst [vmem:[#allocation28_spill] sm:$0xff] %v5244_v59  ;;  %1718 = vrot.lane.b32.xlu0 %v1712_v1, %s4511_s10  ;;  %v1615_v1 = vmul.f32 %v4967_v32, %v4929_v6  ;;  %v1305_v32 = vmul.f32 %v5051_v38, %v4929_v6 }
 0x13a   :  { %1596 = vrot.lane.b32.xlu1 %v1590_v61, %s7634_s25  ;;  %s7891_s25 = smov 85  }
 0x13b   :  { %v5250_v12 = vpop.permute.xlu1 %2073  ;;  %v5254_v43 = vpop.permute.xlu0 %1048 }
 0x13c   :  { %7838 = vst [vmem:[#allocation29_spill] sm:$0xff] %v5254_v43  ;;  %626 = vrot.lane.b32.xlu0 %v620_v44, %s4497_s22  ;;  %v355_v43 = vld [vmem:[%s7610_s6] sm:$0xff] }
 0x13e   :  { %1142 = vrot.lane.b32.xlu1 %v1136_v62, %s7636_s16  ;;  %s4562_s16 = smov 60  }
 0x13f   :  { %v5264_v59 = vpop.permute.xlu0 %1044 }
 0x140   :  { %v5262_v61 = vpop.permute.xlu1 %2121  ;;  %7839 = vst [vmem:[#allocation30_spill] sm:$0xff] %v5264_v59  ;;  %1744 = vrot.lane.b32.xlu0 %v1737_v28, %s7695_s11  ;;  %v1162_v59 = vmul.f32 %v4975_v39, %v4838_v15  ;;  %v358_v15 = vld [vmem:[%s7610_s6 + $0x18] sm:$0xff] }
 0x141   :  { %v5301_v39 = vld [vmem:[%s7604_s0 + $0x18] sm:$0xff] }
 0x142   :  { %1622 = vrot.lane.b32.xlu1 %v1615_v1, %s7631_s26  ;;  %s4547_s26 = smov 61  }
 0x143   :  { %v5272_v62 = vpop.permute.xlu0 %1073 }
 0x144   :  { %v5270_v44 = vpop.permute.xlu1 %876  ;;  %7841 = vst [vmem:[#allocation32_spill] sm:$0xff] %v5272_v62  ;;  %653 = vrot.lane.b32.xlu0 %v646_v14, %s7641_s24  ;;  %v359_v14 = vld [vmem:[%s7610_s6 + $0x20] sm:$0xff]  ;;  %s4557_s24 = smov 41  }
 0x145   :  { %7840 = vst [vmem:[#allocation31_spill] sm:$0xff] %v5270_v44  ;;  %v4031_v62 = vpack.c.bf16 %v359_v14, %v356_v49  ;;  %v1307_v49 = vmul.f32 %v5051_v38, %v5301_v39  ;;  %v361_v44 = vld [vmem:[%s7610_s6 + $0x30] sm:$0xff] }
 0x146   :  { %610 = vperm.xlu1 %4300, %v5114_v42  }
 0x147   :  { %v5282_v1 = vpop.permute.xlu0 %1069  ;;  %4032 = vmatprep.subr.bf16.mxu1 %v4031_v62  ;;  %v365_v62 = vld [vmem:[%s7610_s6 + $0x50] sm:$0xff] }
 0x148   :  { %v5280_v28 = vpop.permute.xlu1 %2145  ;;  %7842 = vst [vmem:[#allocation33_spill] sm:$0xff] %v5282_v1  ;;  %1314 = vrot.lane.b32.xlu0 %v1305_v32, %s4453_s23  ;;  %v4033_v1 = vpack.c.bf16 %v358_v15, %v355_v43  ;;  %v357_v32 = vld [vmem:[%s7610_s6 + $0x10] sm:$0xff] }
 0x14a   :  { %1170 = vrot.lane.b32.xlu1 %v1162_v59, %s4533_s17  ;;  %v360_v59 = vld [vmem:[%s7610_s6 + $0x28] sm:$0xff]  ;;  %4034 = vmatpush1.bf16.msra.mxu1 %v4033_v1 }
 0x14b   :  { %4301 = vset.pattern.permute.xlu1 %v4544_v18  ;;  %v5313_v46 = vpop.permute.xlu0 %1552  ;;  %v4060_v43 = vpack.c.bf16 %v360_v59, %v357_v32  ;;  %v362_v18 = vld [vmem:[%s7610_s6 + $0x38] sm:$0xff]  ;;  %v364_v1 = vld [vmem:[%s7610_s6 + $0x48] sm:$0xff]  ;;  %v7845_v59 = vmov 0.0|0.0  }
 0x14c   :  { %v5311_v14 = vpop.permute.xlu1 %900  ;;  %7844 = vst [vmem:[#allocation35_spill] sm:$0xff] %v5313_v46  ;;  %1318 = vrot.lane.b32.xlu0 %v1307_v49, %s4453_s23  ;;  %v4035_v15 = vpack.c.bf16 %v365_v62, %v362_v18  ;;  %v4037_v32 = vpack.c.bf16 %v364_v1, %v361_v44  ;;  %v363_v49 = vld [vmem:[%s7610_s6 + $0x40] sm:$0xff]  ;;  %v366_v18 = vld [vmem:[%s7610_s6 + $0x58] sm:$0xff]  ;;  %v1639_v62 = vmul.f32 %v4957_v29, %v4929_v6 }
 0x14d   :  { %7843 = vst [vmem:[#allocation34_spill] sm:$0xff] %v5311_v14  ;;  %4061 = vmatpush3.bf16.msra.mxu0 %v4060_v43  ;;  %v4063_v44 = vpack.c.bf16 %v366_v18, %v363_v49  ;;  %v368_v43 = vld [vmem:[%s7610_s6 + $0x68] sm:$0xff]  ;;  %v1761_v18 = vmul.f32 %v4998_v53, %v4929_v6 }
 0x14e   :  { %2493 = vperm.xlu1 %4301, %v5114_v42   ;;  %4036 = vmatprep.subr.bf16.mxu1 %v4035_v15  ;;  %v371_v15 = vld [vmem:[%s7610_s6 + $0x80] sm:$0xff] }
 0x14f   :  { %4062 = vmatprep.subr.bf16.mxu0 %v7845_v59  ;;  %v5340_v14 = vpop.permute.xlu0 %1098  ;;  %4038 = vmatpush1.bf16.msra.mxu1 %v4037_v32  ;;  %v4039_v1 = vpack.c.bf16 %v371_v15, %v368_v43  ;;  %v370_v32 = vld [vmem:[%s7610_s6 + $0x78] sm:$0xff]  ;;  %v369_v43 = vld [vmem:[%s7610_s6 + $0x70] sm:$0xff]  ;;  %v372_v15 = vld [vmem:[%s7610_s6 + $0x88] sm:$0xff] }
 0x150   :  { %v5338_v46 = vpop.permute.xlu1 %2170  ;;  %7846 = vst [vmem:[#allocation36_spill] sm:$0xff] %v5340_v14  ;;  %2643 = vperm.xlu0 %4306, %v5114_v42   ;;  %v4041_v49 = vpack.c.bf16 %v370_v32, %v367_v13  ;;  %v4545_v14 = vmov 74  }
 0x151   :  { %4064 = vmatpush3.bf16.msra.mxu0 %v4063_v44  ;;  %4040 = vmatprep.subr.bf16.mxu1 %v4039_v1  ;;  %v374_v44 = vld [vmem:[%s7610_s6 + $0x98] sm:$0xff]  ;;  %v377_v1 = vld [vmem:[%s7610_s6 + $0xb0] sm:$0xff] }
 0x152   :  { %1646 = vrot.lane.b32.xlu1 %v1639_v62, %s4534_s19  ;;  %4065 = vmatprep.subr.bf16.mxu0 %v7845_v59  ;;  %v4043_v32 = vpack.c.bf16 %v377_v1, %v374_v44  ;;  %v378_v44 = vld [vmem:[%s7610_s6 + $0xb8] sm:$0xff]  ;;  %v1638_v1 = vmul.f32 %v4957_v29, %v4847_v19  ;;  %v379_v29 = vld [vmem:[%s7610_s6 + $0xc0] sm:$0xff] }
 0x153   :  { %4303 = vset.pattern.permute.xlu1 %v4545_v14  ;;  %v5368_v13 = vpop.permute.xlu0 %2403  ;;  %4042 = vmatpush1.bf16.msra.mxu1 %v4041_v49  ;;  %v4066_v14 = vpack.c.bf16 %v372_v15, %v369_v43  ;;  %v376_v49 = vld [vmem:[%s7610_s6 + $0xa8] sm:$0xff]  ;;  %v4546_v43 = vmov 79  }
 0x154   :  { %v5366_v62 = vpop.permute.xlu1 %924  ;;  %7848 = vst [vmem:[#allocation38_spill] sm:$0xff] %v5368_v13  ;;  %1768 = vrot.lane.b32.xlu0 %v1761_v18, %s4517_s12  ;;  %4044 = vmatprep.subr.bf16.mxu1 %v4043_v32  ;;  %v375_v18 = vld [vmem:[%s7610_s6 + $0xa0] sm:$0xff] }
 0x155   :  { %7847 = vst [vmem:[#allocation37_spill] sm:$0xff] %v5366_v62  ;;  %v373_v62 = vld [vmem:[%s7610_s6 + $0x90] sm:$0xff]  ;;  %4307 = vset.pattern.permute.xlu0 %v4546_v43  ;;  %4067 = vmatpush3.bf16.msra.mxu0 %v4066_v14  ;;  %v380_v14 = vld [vmem:[%s7610_s6 + $0xc8] sm:$0xff]  ;;  %v383_v32 = vld [vmem:[%s7610_s6 + $0xe0] sm:$0xff] }
 0x156   :  { %1193 = vrot.lane.b32.xlu1 %v1186_v54, %s4536_s20  ;;  %v4045_v15 = vpack.c.bf16 %v376_v49, %v373_v62  ;;  %4068 = vmatprep.subr.bf16.mxu0 %v7845_v59  ;;  %v4069_v62 = vpack.c.bf16 %v378_v44, %v375_v18  ;;  %v4047_v49 = vpack.c.bf16 %v383_v32, %v380_v14  ;;  %v384_v14 = vld [vmem:[%s7610_s6 + $0xe8] sm:$0xff] }
 0x157   :  { %v5397_v43 = vpop.permute.xlu0 %1576  ;;  %v1334_v44 = vmul.f32 %v5070_v35, %v4929_v6  ;;  %v1185_v32 = vmul.f32 %v4984_v45, %v4847_v19 }
 0x158   :  { %v5395_v54 = vpop.permute.xlu1 %2198  ;;  %7849 = vst [vmem:[#allocation39_spill] sm:$0xff] %v5397_v43  ;;  %4046 = vmatpush1.bf16.msra.mxu1 %v4045_v15  ;;  %678 = vrot.lane.b32.xlu0 %v671_v5, %s7717_s27  ;;  %v382_v15 = vld [vmem:[%s7610_s6 + $0xd8] sm:$0xff]  ;;  %v381_v5 = vld [vmem:[%s7610_s6 + $0xd0] sm:$0xff] }
 0x159   :  { %v4049_v18 = vpack.c.bf16 %v382_v15, %v379_v29  ;;  %4070 = vmatpush3.bf16.msra.mxu0 %v4069_v62  ;;  %4048 = vmatprep.subr.bf16.mxu1 %v4047_v49  ;;  %v4072_v62 = vpack.c.bf16 %v384_v14, %v381_v5  ;;  %v386_v49 = vld [vmem:[%s7610_s6 + $0xf8] sm:$0xff]  ;;  %v389_v29 = vld [vmem:[%s7610_s6 + $0x110] sm:$0xff]  ;;  %v1336_v14 = vmul.f32 %v5070_v35, %v5301_v39 }
 0x15a   :  { %1644 = vrot.lane.b32.xlu1 %v1638_v1, %s4534_s19  ;;  %4071 = vmatprep.subr.bf16.mxu0 %v7845_v59  ;;  %v4051_v45 = vpack.c.bf16 %v389_v29, %v386_v49  ;;  %v385_v15 = vld [vmem:[%s7610_s6 + $0xf0] sm:$0xff]  ;;  %v390_v49 = vld [vmem:[%s7610_s6 + $0x118] sm:$0xff]  ;;  %v1664_v29 = vmul.f32 %v4994_v50, %v4929_v6  ;;  %v391_v50 = vld [vmem:[%s7610_s6 + $0x120] sm:$0xff]  ;;  %s4556_s19 = smov 42  }
 0x15b   :  { %v5426_v1 = vpop.permute.xlu0 %1122 }
 0x15c   :  { %v5424_v43 = vpop.permute.xlu1 %949  ;;  %7851 = vst [vmem:[#allocation41_spill] sm:$0xff] %v5426_v1  ;;  %4050 = vmatpush1.bf16.msra.mxu1 %v4049_v18  ;;  %1343 = vrot.lane.b32.xlu0 %v1334_v44, %s4547_s26  ;;  %v388_v18 = vld [vmem:[%s7610_s6 + $0x108] sm:$0xff]  ;;  %v387_v44 = vld [vmem:[%s7610_s6 + $0x100] sm:$0xff] }
 0x15d   :  { %7850 = vst [vmem:[#allocation40_spill] sm:$0xff] %v5424_v43  ;;  %v4053_v5 = vpack.c.bf16 %v388_v18, %v385_v15  ;;  %4073 = vmatpush3.bf16.msra.mxu0 %v4072_v62  ;;  %4052 = vmatprep.subr.bf16.mxu1 %v4051_v45  ;;  %v4075_v62 = vpack.c.bf16 %v390_v49, %v387_v44  ;;  %v392_v45 = vld [vmem:[%s7610_s6 + $0x128] sm:$0xff]  ;;  %v395_v15 = vld [vmem:[%s7610_s6 + $0x140] sm:$0xff] }
 0x15e   :  { %1191 = vrot.lane.b32.xlu1 %v1185_v32, %s4536_s20  ;;  %4074 = vmatprep.subr.bf16.mxu0 %v7845_v59  ;;  %v4055_v18 = vpack.c.bf16 %v395_v15, %v392_v45  ;;  %v670_v49 = vmul.f32 %v4847_v19, %v5064_v48  ;;  %v396_v45 = vld [vmem:[%s7610_s6 + $0x148] sm:$0xff] }
 0x15f   :  { %v5455_v32 = vpop.permute.xlu0 %2433 }
 0x160   :  { %v5453_v1 = vpop.permute.xlu1 %2227  ;;  %7853 = vst [vmem:[#allocation43_spill] sm:$0xff] %v5455_v32  ;;  %4054 = vmatpush1.bf16.msra.mxu1 %v4053_v5  ;;  %1347 = vrot.lane.b32.xlu0 %v1336_v14, %s4547_s26  ;;  %v394_v5 = vld [vmem:[%s7610_s6 + $0x138] sm:$0xff]  ;;  %v393_v14 = vld [vmem:[%s7610_s6 + $0x130] sm:$0xff]  ;;  %s4548_s6 = smov 44  }
 0x161   :  { %7852 = vst [vmem:[#allocation42_spill] sm:$0xff] %v5453_v1  ;;  %v4057_v44 = vpack.c.bf16 %v394_v5, %v391_v50  ;;  %4076 = vmatpush3.bf16.msra.mxu0 %v4075_v62  ;;  %4056 = vmatprep.subr.bf16.mxu1 %v4055_v18  ;;  %v4078_v19 = vpack.c.bf16 %v396_v45, %v393_v14 }
 0x162   :  { %1671 = vrot.lane.b32.xlu1 %v1664_v29, %s4538_s21  ;;  %v1215_v29 = vmul.f32 %v4970_v33, %v4929_v6  ;;  %4077 = vmatprep.subr.bf16.mxu0 %v7845_v59  ;;  %v1785_v62 = vmul.f32 %v5008_v60, %v4929_v6  ;;  %v1217_v5 = vmul.f32 %v4970_v33, %v5301_v39  ;;  %s4550_s21 = smov 102  }
 0x163   :  { %v5482_v43 = vpop.permute.xlu0 %1600  ;;  %v1364_v45 = vmul.f32 %v5090_v26, %v4929_v6  ;;  %v1689_v33 = vmul.f32 %v5004_v57, %v4929_v6  ;;  %v1245_v59 = vmul.f32 %v5014_v4, %v4929_v6 }
 0x164   :  { %v5480_v15 = vpop.permute.xlu1 %974  ;;  %7855 = vst [vmem:[#allocation45_spill] sm:$0xff] %v5482_v43  ;;  %4058 = vmatpush1.bf16.msra.mxu1 %v4057_v44  ;;  %676 = vrot.lane.b32.xlu0 %v670_v49, %s7717_s27  ;;  %v696_v44 = vmul.f32 %v4929_v6, %v5080_v10  ;;  %v1809_v43 = vmul.f32 %v5018_v8, %v4929_v6 }
 0x165   :  { %7854 = vst [vmem:[#allocation44_spill] sm:$0xff] %v5480_v15  ;;  %4079 = vmatpush3.bf16.msra.mxu0 %v4078_v19 }
 0x166   :  { %1224 = vrot.lane.b32.xlu1 %v1215_v29, %s4540_s28 }
 0x167   :  { %v5493_v50 = vpop.permute.xlu0 %1146 }
 0x168   :  { %v5491_v18 = vpop.permute.xlu1 %2256  ;;  %7857 = vst [vmem:[#allocation47_spill] sm:$0xff] %v5493_v50  ;;  %1792 = vrot.lane.b32.xlu0 %v1785_v62, %s4519_s13  ;;  %v1366_v62 = vmul.f32 %v5090_v26, %v5301_v39 }
 0x169   :  { %7856 = vst [vmem:[#allocation46_spill] sm:$0xff] %v5491_v18 }
 0x16a   :  { %1228 = vrot.lane.b32.xlu1 %v1217_v5, %s4540_s28  ;;  %v4549_v5 = vmov 75  }
 0x16b   :  { %v5501_v49 = vpop.permute.xlu0 %2463 }
 0x16c   :  { %7858 = vst [vmem:[#allocation48_spill] sm:$0xff] %v5501_v49  ;;  %703 = vrot.lane.b32.xlu0 %v696_v44, %s4511_s10 }
 0x16d   :  { %v5503_v14 = vpop.permute.xlu1 %1532 }
 0x16e   :  { %7859 = vst [vmem:[#allocation49_spill] sm:$0xff] %v5503_v14  ;;  %2553 = vperm.xlu1 %4303, %v5114_v42  }
 0x16f   :  { %v5511_v29 = vpop.permute.xlu0 %1624 }
 0x170   :  { %7860 = vst [vmem:[#allocation50_spill] sm:$0xff] %v5511_v29  ;;  %1373 = vrot.lane.b32.xlu0 %v1364_v45, %s4548_s6  ;;  %v7864_v29 = vmov 0.0  }
 0x171   :  { %v5513_v19 = vpop.permute.xlu1 %1000  ;;  %3255 = vst.msk [vmem:[#allocation2 + $0x18] sm:$0xff] %vm7763_vm7, %v7864_v29 }
 0x172   :  { %7861 = vst [vmem:[#allocation51_spill] sm:$0xff] %v5513_v19  ;;  %1696 = vrot.lane.b32.xlu1 %v1689_v33, %s7717_s27  ;;  %v1247_v33 = vmul.f32 %v5014_v4, %v5301_v39  ;;  %v721_v4 = vmul.f32 %v4929_v6, %v5102_v23 }
 0x173   :  { %4304 = vset.pattern.permute.xlu1 %v4549_v5  ;;  %v5519_v44 = vpop.permute.xlu0 %1168 }
 0x174   :  { %7862 = vst [vmem:[#allocation52_spill] sm:$0xff] %v5519_v44  ;;  %1377 = vrot.lane.b32.xlu0 %v1366_v62, %s4548_s6 }
 0x175   :  { %v5523_v57 = vpop.permute.xlu1 %996 }
 0x176   :  { %7863 = vst [vmem:[#allocation53_spill] sm:$0xff] %v5523_v57  ;;  %1254 = vrot.lane.b32.xlu1 %v1245_v59, %s4542_s29  ;;  %v4551_v59 = vmov 80  }
 0x177   :  { %v5529_v45 = vpop.permute.xlu0 %1620 }
 0x178   :  { %7865 = vst [vmem:[#allocation54_spill] sm:$0xff] %v5529_v45  ;;  %2683 = vperm.xlu0 %4307, %v5114_v42  }
 0x179   :  { %v5533_v5 = vpop.permute.xlu1 %1022 }
 0x17a   :  { %7866 = vst [vmem:[#allocation55_spill] sm:$0xff] %v5533_v5  ;;  %1258 = vrot.lane.b32.xlu1 %v1247_v33, %s4542_s29  ;;  %v1713_v33 = vmul.f32 %v4978_v40, %v4929_v6  ;;  %v621_v5 = vmul.f32 %v4929_v6, %v5026_v11 }
 0x17b   :  { %v5539_v62 = vpop.permute.xlu0 %1166 }
 0x17c   :  { %7867 = vst [vmem:[#allocation56_spill] sm:$0xff] %v5539_v62  ;;  %1816 = vrot.lane.b32.xlu0 %v1809_v43, %s4550_s21  ;;  %v1394_v43 = vmul.f32 %v5117_v51, %v4929_v6  ;;  %v4552_v62 = vmov 76  }
 0x17d   :  { %v5541_v14 = vpop.permute.xlu1 %2314  ;;  %4308 = vset.pattern.permute.xlu0 %v4551_v59 }
 0x17e   :  { %2583 = vperm.xlu1 %4304, %v5114_v42  }
 0x17f   :  { %v5549_v45 = vpop.permute.xlu0 %1648 }
 0x180   :  { %7868 = vst [vmem:[#allocation57_spill] sm:$0xff] %v5549_v45  ;;  %728 = vrot.lane.b32.xlu0 %v721_v4, %s7695_s11  ;;  %v3832_v45 = vld [vmem:[%s7611_s7] ss:$0 sm:$0xff] }
 0x181   :  { %v5551_v44 = vpop.permute.xlu1 %1046  ;;  %v322_v50 = vpop.f32.mrb[0].mxu1 }
 0x182   :  { %7869 = vst [vmem:[#allocation58_spill] sm:$0xff] %v5551_v44  ;;  %1720 = vrot.lane.b32.xlu1 %v1713_v33, %s4511_s10  ;;  %v3881_v59 = vpop.f32.mrb[0].mxu0  ;;  %v3934_v44 = vpop.f32.mrb[1].mxu1 }
 0x183   :  { %4305 = vset.pattern.permute.xlu1 %v4552_v62  ;;  %v5559_v57 = vpop.permute.xlu0 %1195  ;;  %v3882_v40 = vpop.f32.mrb[1].mxu0  ;;  %v1396_v62 = vmul.f32 %v5117_v51, %v5301_v39 }
 0x184   :  { %7870 = vst [vmem:[#allocation59_spill] sm:$0xff] %v5559_v57  ;;  %1403 = vrot.lane.b32.xlu0 %v1394_v43, %s4553_s18  ;;  %v3883_v33 = vadd.f32 %v3882_v40, %v3881_v59  ;;  %v1275_v57 = vmul.f32 %v5034_v24, %v4929_v6 }
 0x185   :  { %v5564_v4 = vpop.permute.xlu1 %2343 }
 0x186   :  { %628 = vrot.lane.b32.xlu1 %v621_v5, %s4497_s22  ;;  %v253_v11 = vadd.f32 %v3883_v33, %v3832_v45  ;;  %v1277_v45 = vmul.f32 %v5034_v24, %v5301_v39  ;;  %v5599_v33 = vld [vmem:[%s7604_s0 + $0x8] sm:$0xff] }
 0x187   :  { %v5570_v15 = vpop.permute.xlu0 %2523 }
 0x188   :  { %7871 = vst [vmem:[#allocation60_spill] sm:$0xff] %v5570_v15  ;;  %1407 = vrot.lane.b32.xlu0 %v1396_v62, %s4553_s18  ;;  %v5577_v0 = vadd.f32 %v322_v50, %v253_v11  ;;  %v1834_v50 = vmul.f32 %v5028_v17, %v4929_v6  ;;  %v750_v6 = vmul.f32 %v5129_v20, %v5599_v33 }
 0x189   :  { %v5574_v19 = vpop.permute.xlu1 %1071 }
 0x18a   :  { %7872 = vst [vmem:[#allocation61_spill] sm:$0xff] %v5574_v19  ;;  %1284 = vrot.lane.b32.xlu1 %v1275_v57, %s4543_s30  ;;  %v5581_v44 = vmul.f32 0.70710677, %v5577_v0 }
 0x18b   :  { %v5583_v5 = vpop.permute.xlu0 %1673 }
 0x18c   :  { %7873 = vst [vmem:[#allocation62_spill] sm:$0xff] %v5583_v5  ;;  %2707 = vperm.xlu0 %4308, %v5114_v42   ;;  %v328_v59 = vand.u32 2147483647, %v5581_v44  ;;  %vm350_vm8 = vcmp.ge.f32.partialorder %v5581_v44, 0.0 }
 0x18d   :  { %v5587_v43 = vpop.permute.xlu1 %2373 }
 0x18e   :  { %1288 = vrot.lane.b32.xlu1 %v1277_v45, %s4543_s30  ;;  %v329_v57 = vmul.f32 0.3275911, %v328_v59  ;;  %v7876_v45 = vmov 0  }
 0x18f   :  { %v5594_v40 = vpop.permute.xlu0 %1226 }
 0x190   :  { %7874 = vst [vmem:[#allocation63_spill] sm:$0xff] %v5594_v40  ;;  %1841 = vrot.lane.b32.xlu0 %v1834_v50, %s4554_s9  ;;  %v330_v11 = vadd.f32 1.0, %v329_v57  ;;  %v5613_v40 = vld [vmem:[%s7604_s0] sm:$0xff]  ;;  %v4555_v57 = vmov 81  }
 0x191   :  { %v5601_v62 = vpop.permute.xlu1 %1550  ;;  %4312 = vset.pattern.permute.xlu0 %v7876_v45 }
 0x192   :  { %7875 = vst [vmem:[#allocation64_spill] sm:$0xff] %v5601_v62  ;;  %2613 = vperm.xlu1 %4305, %v5114_v42   ;;  %4343 = vrcp.f32 %v330_v11  ;;  %v1274_v62 = vmul.f32 %v5613_v40, %v5034_v24  ;;  %v752_v42 = vmul.f32 %v5301_v39, %v5129_v20 }
 0x193   :  { %v5608_v5 = vpop.permute.xlu0 %1669 }
 0x194   :  { %7877 = vst [vmem:[#allocation65_spill] sm:$0xff] %v5608_v5  ;;  %759 = vrot.lane.b32.xlu0 %v750_v6, %s7879_s15  ;;  %v5626_v5 = vld [vmem:[%s7604_s0 + $0x10] sm:$0xff] }
 0x195   :  { %v5617_v50 = vpop.permute.xlu1 %1096  ;;  %v1738_v45 = vmul.f32 %v5626_v5, %v4988_v47  ;;  %v647_v6 = vmul.f32 %v5626_v5, %v5044_v31  ;;  %v1306_v36 = vmul.f32 %v5626_v5, %v5051_v38 }
 0x196   :  { %7878 = vst [vmem:[#allocation66_spill] sm:$0xff] %v5617_v50  ;;  %1282 = vrot.lane.b32.xlu1 %v1274_v62, %s4543_s30  ;;  %v1425_v62 = vmul.f32 %v5626_v5, %v5137_v30 }
 0x197   :  { %4309 = vset.pattern.permute.xlu1 %v4555_v57  ;;  %v5630_v24 = vpop.permute.xlu0 %1222 }
 0x198   :  { %7880 = vst [vmem:[#allocation67_spill] sm:$0xff] %v5630_v24  ;;  %763 = vrot.lane.b32.xlu0 %v752_v42, %s7879_s15  ;;  %v344_v24 = vsub.f32 0.0, %v328_v59 }
 0x199   :  { %v5632_v50 = vpop.permute.xlu1 %1548 }
 0x19a   :  { %7881 = vst [vmem:[#allocation68_spill] sm:$0xff] %v5632_v50  ;;  %1746 = vrot.lane.b32.xlu1 %v1738_v45, %s7695_s11  ;;  %v1833_v45 = vmul.f32 %v5613_v40, %v5028_v17 }
 0x19b   :  { %v5640_v57 = vpop.permute.xlu0 %1698 }
 0x19c   :  { %7882 = vst [vmem:[#allocation69_spill] sm:$0xff] %v5640_v57  ;;  %v4344_v19 = vpop.eup %4343  ;;  %1435 = vrot.lane.b32.xlu0 %v1425_v62, %s4556_s19  ;;  %v5655_v57 = vld [vmem:[%s7604_s0] sm:$0xff]  ;;  %v345_v62 = vmul.f32 %v344_v24, %v328_v59 }
 0x19d   :  { %v5642_v16 = vpop.permute.xlu1 %1094  ;;  %v332_v42 = vmul.f32 %v4344_v19, %v330_v11 }
 0x19e   :  { %7883 = vst [vmem:[#allocation70_spill] sm:$0xff] %v5642_v16  ;;  %655 = vrot.lane.b32.xlu1 %v647_v6, %s7884_s5  ;;  %v749_v6 = vmul.f32 %v5129_v20, %v5655_v57 }
 0x19f   :  { %v5648_v50 = vpop.permute.xlu0 %1256  ;;  %v333_v16 = vsub.f32 2.0, %v332_v42  ;;  %v346_v42 = vmul.f32 1.442695, %v345_v62 }
 0x1a0   :  { %7885 = vst [vmem:[#allocation71_spill] sm:$0xff] %v5648_v50  ;;  %1839 = vrot.lane.b32.xlu0 %v1833_v45, %s4554_s9  ;;  %v1736_v50 = vmul.f32 %v5613_v40, %v4988_v47  ;;  %v645_v47 = vmul.f32 %v5613_v40, %v5044_v31  ;;  %v1304_v31 = vmul.f32 %v5613_v40, %v5051_v38 }
 0x1a1   :  { %v5657_v56 = vpop.permute.xlu1 %1574  ;;  %v334_v11 = vmul.f32 %v4344_v19, %v333_v16  ;;  %4345 = vpow2.f32 %v346_v42  ;;  %v782_v42 = vmul.f32 %v5301_v39, %v5148_v3 }
 0x1a2   :  { %7886 = vst [vmem:[#allocation72_spill] sm:$0xff] %v5657_v56  ;;  %1316 = vrot.lane.b32.xlu1 %v1306_v36, %s4453_s23  ;;  %v5674_v36 = vld [vmem:[%s7604_s0 + $0x8] sm:$0xff] }
 0x1a3   :  { %v5665_v15 = vpop.permute.xlu0 %1694  ;;  %v335_v49 = vmul.f32 1.0614054, %v334_v11  ;;  %v1859_v16 = vmul.f32 %v5674_v36, %v5036_v25 }
 0x1a4   :  { %7887 = vst [vmem:[#allocation73_spill] sm:$0xff] %v5665_v15  ;;  %757 = vrot.lane.b32.xlu0 %v749_v6, %s7879_s15 }
 0x1a5   :  { %v5667_v32 = vpop.permute.xlu1 %1120  ;;  %v336_v59 = vadd.f32 -1.4531521, %v335_v49 }
 0x1a6   :  { %1742 = vrot.lane.b32.xlu1 %v1736_v50, %s7695_s11  ;;  %v780_v50 = vmul.f32 %v5148_v3, %v5599_v33 }
 0x1a7   :  { %v5680_v19 = vpop.permute.xlu0 %1252  ;;  %v337_v24 = vmul.f32 %v336_v59, %v334_v11 }
 0x1a8   :  { %7888 = vst [vmem:[#allocation74_spill] sm:$0xff] %v5680_v19  ;;  %1866 = vrot.lane.b32.xlu0 %v1859_v16, %s7879_s15  ;;  %v1762_v16 = vmul.f32 %v5626_v5, %v4998_v53 }
 0x1a9   :  { %v5682_v45 = vpop.permute.xlu1 %1572  ;;  %v338_v49 = vadd.f32 1.4214138, %v337_v24 }
 0x1aa   :  { %7889 = vst [vmem:[#allocation75_spill] sm:$0xff] %v5682_v45  ;;  %651 = vrot.lane.b32.xlu1 %v645_v47, %s7884_s5 }
 0x1ab   :  { %v5688_v62 = vpop.permute.xlu0 %1722  ;;  %v339_v6 = vmul.f32 %v338_v49, %v334_v11 }
 0x1ac   :  { %7890 = vst [vmem:[#allocation76_spill] sm:$0xff] %v5688_v62  ;;  %789 = vrot.lane.b32.xlu0 %v780_v50, %s7891_s25  ;;  %v4346_v50 = vpop.eup %4345  ;;  %v1956_v62 = vmul.f32 %v5626_v5, %v5202_v7 }
 0x1ad   :  { %v5692_v15 = vpop.permute.xlu1 %1118  ;;  %v340_v59 = vadd.f32 -0.28449672, %v339_v6  ;;  %v1455_v6 = vmul.f32 %v5626_v5, %v5157_v41 }
 0x1ae   :  { %1312 = vrot.lane.b32.xlu1 %v1304_v31, %s4453_s23  ;;  %v672_v31 = vmul.f32 %v5626_v5, %v5064_v48  ;;  %v1335_v48 = vmul.f32 %v5626_v5, %v5070_v35 }
 0x1af   :  { %v341_v47 = vmul.f32 %v340_v59, %v334_v11  ;;  %v5700_v24 = vpop.permute.xlu0 %630 }
 0x1b0   :  { %793 = vrot.lane.b32.xlu0 %v782_v42, %s7891_s25  ;;  %v1858_v42 = vmul.f32 %v5613_v40, %v5036_v25 }
 0x1b1   :  { %v5702_v49 = vpop.permute.xlu1 %1598  ;;  %v342_v38 = vadd.f32 0.2548296, %v341_v47 }
 0x1b2   :  { %7892 = vst [vmem:[#allocation77_spill] sm:$0xff] %v5702_v49  ;;  %1770 = vrot.lane.b32.xlu1 %v1762_v16, %s4517_s12 }
 0x1b3   :  { %v343_v45 = vmul.f32 %v342_v38, %v334_v11  ;;  %v5710_v56 = vpop.permute.xlu0 %1286 }
 0x1b4   :  { %1465 = vrot.lane.b32.xlu0 %v1455_v6, %s4557_s24 }
 0x1b5   :  { %v5712_v59 = vpop.permute.xlu1 %1144  ;;  %v348_v49 = vmul.f32 %v4346_v50, %v343_v45  ;;  %v326_v45 = vmul.f32 0.5, %v5577_v0  ;;  %v779_v50 = vmul.f32 %v5148_v3, %v5655_v57  ;;  %v1883_v0 = vmul.f32 %v5674_v36, %v5048_v34 }
 0x1b6   :  { %680 = vrot.lane.b32.xlu1 %v672_v31, %s7717_s27  ;;  %s4565_s27 = smov 38  }
 0x1b7   :  { %v349_v16 = vsub.f32 1.0, %v348_v49  ;;  %v5718_v47 = vpop.permute.xlu0 %1718  ;;  %v1760_v49 = vmul.f32 %v5613_v40, %v4998_v53  ;;  %v1333_v53 = vmul.f32 %v5613_v40, %v5070_v35 }
 0x1b8   :  { %7893 = vst [vmem:[#allocation78_spill] sm:$0xff] %v5718_v47  ;;  %1864 = vrot.lane.b32.xlu0 %v1858_v42, %s7879_s15 }
 0x1b9   :  { %v5723_v11 = vpop.permute.xlu1 %1596  ;;  %v351_v38 = vsub.f32 0.0, %v349_v16 }
 0x1ba   :  { %7894 = vst [vmem:[#allocation79_spill] sm:$0xff] %v5723_v11  ;;  %1345 = vrot.lane.b32.xlu1 %v1335_v48, %s4547_s26 }
 0x1bb   :  { %v352_v6 = vsel %vm350_vm8, %v349_v16, %v351_v38  ;;  %v5732_v31 = vpop.permute.xlu0 %626  ;;  %v810_v38 = vmul.f32 %v5170_v37, %v5599_v33  ;;  %vm7772_vm8 = vcmask 695296  }
 0x1bc   :  { %7895 = vst [vmem:[#allocation80_spill] sm:$0xff] %v5732_v31  ;;  %v353_v47 = vadd.f32 1.0, %v352_v6  ;;  %787 = vrot.lane.b32.xlu0 %v779_v50, %s7891_s25  ;;  %v812_v50 = vmul.f32 %v5301_v39, %v5170_v37 }
 0x1bd   :  { %v5734_v44 = vpop.permute.xlu1 %1142 }
 0x1be   :  { %1766 = vrot.lane.b32.xlu1 %v1760_v49, %s4517_s12  ;;  %v354_v42 = vmul.f32 %v353_v47, %v326_v45  ;;  %v1786_v47 = vmul.f32 %v5626_v5, %v5008_v60  ;;  %s7899_s12 = smov 84   ;;  %v697_v49 = vmul.f32 %v5626_v5, %v5080_v10 }
 0x1bf   :  { %v5740_v48 = vpop.permute.xlu0 %1744 }
 0x1c0   :  { %7896 = vst [vmem:[#allocation81_spill] sm:$0xff] %v5740_v48  ;;  %1890 = vrot.lane.b32.xlu0 %v1883_v0, %s7891_s25  ;;  %3836 = vmatmul.mubr.msk.f32.vlgmr.msra.gmra.mrb[2].mxu1 %vm415_vm9, %v354_v42 }
 0x1c1   :  { %v5744_v16 = vpop.permute.xlu1 %1622  ;;  %3964 = vmatmul.mubr.msk.f32.vlgmr.msra.gmra.mrb[2].mxu0 %vm415_vm9, %v354_v42  ;;  %2885 = vmatprep.mubr.f32.mxu1 %v7864_v29  ;;  %v1485_v42 = vmul.f32 %v5626_v5, %v5180_v9  ;;  %vm7767_vm9 = vcmask 687104  }
 0x1c2   :  { %7897 = vst [vmem:[#allocation82_spill] sm:$0xff] %v5744_v16  ;;  %1341 = vrot.lane.b32.xlu1 %v1333_v53, %s4547_s26  ;;  %3589 = vmatprep.mubr.f32.mxu0 %v7864_v29  ;;  %v1483_v16 = vmul.f32 %v5613_v40, %v5180_v9 }
 0x1c3   :  { %v5754_v45 = vpop.permute.xlu0 %653 }
 0x1c4   :  { %7898 = vst [vmem:[#allocation83_spill] sm:$0xff] %v5754_v45  ;;  %819 = vrot.lane.b32.xlu0 %v810_v38, %s7899_s12  ;;  %v1365_v38 = vmul.f32 %v5626_v5, %v5090_v26 }
 0x1c5   :  { %v5756_v35 = vpop.permute.xlu1 %610 }
 0x1c6   :  { %1794 = vrot.lane.b32.xlu1 %v1786_v47, %s4519_s13 }
 0x1c7   :  { %v5764_v6 = vpop.permute.xlu0 %1314 }
 0x1c8   :  { %7900 = vst [vmem:[#allocation84_spill] sm:$0xff] %v5764_v6  ;;  %823 = vrot.lane.b32.xlu0 %v812_v50, %s7899_s12  ;;  %v1882_v50 = vmul.f32 %v5613_v40, %v5048_v34 }
 0x1c9   :  { %v5766_v0 = vpop.permute.xlu1 %1170 }
 0x1ca   :  { %705 = vrot.lane.b32.xlu1 %v697_v49, %s4511_s10  ;;  %v1784_v49 = vmul.f32 %v5613_v40, %v5008_v60  ;;  %v1908_v60 = vmul.f32 %v5626_v5, %v5054_v27 }
 0x1cb   :  { %v5772_v53 = vpop.permute.xlu0 %1318 }
 0x1cc   :  { %1495 = vrot.lane.b32.xlu0 %v1485_v42, %s4558_s14  ;;  %v695_v42 = vmul.f32 %v5613_v40, %v5080_v10  ;;  %v1931_v10 = vmul.f32 %v5674_v36, %v5191_v22 }
 0x1cd   :  { %v5776_v47 = vpop.permute.xlu1 %2493 }
 0x1ce   :  { %7901 = vst [vmem:[#allocation85_spill] sm:$0xff] %v5776_v47  ;;  %1375 = vrot.lane.b32.xlu1 %v1365_v38, %s4548_s6 }
 0x1cf   :  { %v5784_v29 = vpop.permute.xlu0 %2643 }
 0x1d0   :  { %7902 = vst [vmem:[#allocation86_spill] sm:$0xff] %v5784_v29  ;;  %1888 = vrot.lane.b32.xlu0 %v1882_v50, %s7891_s25 }
 0x1d1   :  { %v5786_v48 = vpop.permute.xlu1 %1646 }
 0x1d2   :  { %7903 = vst [vmem:[#allocation87_spill] sm:$0xff] %v5786_v48  ;;  %1790 = vrot.lane.b32.xlu1 %v1784_v49, %s4519_s13  ;;  %v1363_v49 = vmul.f32 %v5613_v40, %v5090_v26  ;;  %v1930_v26 = vmul.f32 %v5613_v40, %v5191_v22  ;;  %s4559_s13 = smov 81  }
 0x1d3   :  { %v5794_v38 = vpop.permute.xlu0 %1768 }
 0x1d4   :  { %7904 = vst [vmem:[#allocation88_spill] sm:$0xff] %v5794_v38  ;;  %1491 = vrot.lane.b32.xlu0 %v1483_v16, %s4558_s14  ;;  %v1810_v16 = vmul.f32 %v5626_v5, %v5018_v8 }
 0x1d5   :  { %v5796_v11 = vpop.permute.xlu1 %1193 }
 0x1d6   :  { %701 = vrot.lane.b32.xlu1 %v695_v42, %s4511_s10 }
 0x1d7   :  { %v5802_v50 = vpop.permute.xlu0 %678 }
 0x1d8   :  { %7905 = vst [vmem:[#allocation89_spill] sm:$0xff] %v5802_v50  ;;  %1916 = vrot.lane.b32.xlu0 %v1908_v60, %s7899_s12  ;;  %v722_v60 = vmul.f32 %v5626_v5, %v5102_v23 }
 0x1d9   :  { %v5806_v48 = vpop.permute.xlu1 %1644 }
 0x1da   :  { %7906 = vst [vmem:[#allocation90_spill] sm:$0xff] %v5806_v48  ;;  %1371 = vrot.lane.b32.xlu1 %v1363_v49, %s4548_s6 }
 0x1db   :  { %v5814_v42 = vpop.permute.xlu0 %1343 }
 0x1dc   :  { %7907 = vst [vmem:[#allocation91_spill] sm:$0xff] %v5814_v42  ;;  %1938 = vrot.lane.b32.xlu0 %v1931_v10, %s4533_s17 }
 0x1dd   :  { %v5816_v38 = vpop.permute.xlu1 %1191 }
 0x1de   :  { %1818 = vrot.lane.b32.xlu1 %v1810_v16, %s4550_s21  ;;  %v1395_v16 = vmul.f32 %v5626_v5, %v5117_v51 }
 0x1df   :  { %v5824_v49 = vpop.permute.xlu0 %1347 }
 0x1e0   :  { %1936 = vrot.lane.b32.xlu0 %v1930_v26, %s4533_s17  ;;  %v1808_v26 = vmul.f32 %v5613_v40, %v5018_v8  ;;  %v2005_v8 = vmul.f32 %v5626_v5, %v5216_v2 }
 0x1e1   :  { %v5826_v48 = vpop.permute.xlu1 %1671 }
 0x1e2   :  { %7908 = vst [vmem:[#allocation92_spill] sm:$0xff] %v5826_v48  ;;  %730 = vrot.lane.b32.xlu1 %v722_v60, %s7695_s11  ;;  %v1979_v48 = vmul.f32 %v5674_v36, %v5066_v55 }
 0x1e3   :  { %v5832_v10 = vpop.permute.xlu0 %676 }
 0x1e4   :  { %7909 = vst [vmem:[#allocation93_spill] sm:$0xff] %v5832_v10  ;;  %1964 = vrot.lane.b32.xlu0 %v1956_v62, %s4536_s20  ;;  %v1978_v62 = vmul.f32 %v5613_v40, %v5066_v55 }
 0x1e5   :  { %v5836_v31 = vpop.permute.xlu1 %1224 }
 0x1e6   :  { %1405 = vrot.lane.b32.xlu1 %v1395_v16, %s4553_s18  ;;  %v720_v16 = vmul.f32 %v5613_v40, %v5102_v23  ;;  %v2029_v23 = vmul.f32 %v5674_v36, %v5226_v52 }
 0x1e7   :  { %v5844_v60 = vpop.permute.xlu0 %1792 }
 0x1e8   :  { %7910 = vst [vmem:[#allocation94_spill] sm:$0xff] %v5844_v60  ;;  %1986 = vrot.lane.b32.xlu0 %v1979_v48, %s4559_s13 }
 0x1e9   :  { %v5846_v50 = vpop.permute.xlu1 %1228 }
 0x1ea   :  { %1814 = vrot.lane.b32.xlu1 %v1808_v26, %s4550_s21  ;;  %v1393_v26 = vmul.f32 %v5613_v40, %v5117_v51  ;;  %s4560_s21 = smov 80   ;;  %v5882_v51 = vld [vmem:[%s7604_s0 + $0x10] sm:$0xff] }
 0x1eb   :  { %v5854_v10 = vpop.permute.xlu0 %703 }
 0x1ec   :  { %7911 = vst [vmem:[#allocation95_spill] sm:$0xff] %v5854_v10  ;;  %1984 = vrot.lane.b32.xlu0 %v1978_v62, %s4559_s13  ;;  %v1835_v62 = vmul.f32 %v5626_v5, %v5028_v17  ;;  %v751_v17 = vmul.f32 %v5882_v51, %v5129_v20  ;;  %v2077_v20 = vmul.f32 %v5674_v36, %v5250_v12 }
 0x1ed   :  { %v5856_v45 = vpop.permute.xlu1 %2553 }
 0x1ee   :  { %7912 = vst [vmem:[#allocation96_spill] sm:$0xff] %v5856_v45  ;;  %726 = vrot.lane.b32.xlu1 %v720_v16, %s7695_s11  ;;  %s4563_s11 = smov 59  }
 0x1ef   :  { %v5862_v48 = vpop.permute.xlu0 %1373 }
 0x1f0   :  { %7913 = vst [vmem:[#allocation97_spill] sm:$0xff] %v5862_v48  ;;  %2013 = vrot.lane.b32.xlu0 %v2005_v8, %s4560_s21  ;;  %v2028_v8 = vmul.f32 %v5613_v40, %v5226_v52 }
 0x1f1   :  { %v5866_v60 = vpop.permute.xlu1 %1696 }
 0x1f2   :  { %7914 = vst [vmem:[#allocation98_spill] sm:$0xff] %v5866_v60  ;;  %1401 = vrot.lane.b32.xlu1 %v1393_v26, %s4553_s18 }
 0x1f3   :  { %v5874_v16 = vpop.permute.xlu0 %1377 }
 0x1f4   :  { %7915 = vst [vmem:[#allocation99_spill] sm:$0xff] %v5874_v16  ;;  %2036 = vrot.lane.b32.xlu0 %v2029_v23, %s4540_s28  ;;  %v2054_v23 = vmul.f32 %v5626_v5, %v5237_v58  ;;  %v1860_v16 = vmul.f32 %v5626_v5, %v5036_v25  ;;  %v2150_v25 = vmul.f32 %v5626_v5, %v5280_v28 }
 0x1f5   :  { %v5876_v10 = vpop.permute.xlu1 %1254 }
 0x1f6   :  { %1843 = vrot.lane.b32.xlu1 %v1835_v62, %s4554_s9  ;;  %v1424_v62 = vmul.f32 %v5674_v36, %v5137_v30  ;;  %s4564_s9 = smov 39  }
 0x1f7   :  { %v5887_v26 = vpop.permute.xlu0 %2683 }
 0x1f8   :  { %2034 = vrot.lane.b32.xlu0 %v2028_v8, %s4540_s28 }
 0x1f9   :  { %v5891_v60 = vpop.permute.xlu1 %1258 }
 0x1fa   :  { %761 = vrot.lane.b32.xlu1 %v751_v17, %s7879_s15  ;;  %v1426_v17 = vmul.f32 %v5137_v30, %v5301_v39 }
 0x1fb   :  { %v5897_v48 = vpop.permute.xlu0 %1816 }
 0x1fc   :  { %7916 = vst [vmem:[#allocation100_spill] sm:$0xff] %v5897_v48  ;;  %2062 = vrot.lane.b32.xlu0 %v2054_v23, %s4542_s29  ;;  %v2076_v48 = vmul.f32 %v5613_v40, %v5250_v12 }
 0x1fd   :  { %v5901_v42 = vpop.permute.xlu1 %2583 }
 0x1fe   :  { %7917 = vst [vmem:[#allocation101_spill] sm:$0xff] %v5901_v42  ;;  %1433 = vrot.lane.b32.xlu1 %v1424_v62, %s4556_s19 }
 0x1ff   :  { %v5907_v8 = vpop.permute.xlu0 %728 }
 0x200   :  { %7918 = vst [vmem:[#allocation102_spill] sm:$0xff] %v5907_v8  ;;  %2084 = vrot.lane.b32.xlu0 %v2077_v20, %s4543_s30  ;;  %v5925_v8 = vld [vmem:[%s7605_s1] sm:$0xff]  ;;  %v2102_v20 = vmul.f32 %v5626_v5, %v5083_v21 }
 0x201   :  { %v5911_v6 = vpop.permute.xlu1 %1720  ;;  %7922 = vst [vmem:[#allocation106_spill] sm:$0xff] %v5925_v8 }
 0x202   :  { %7919 = vst [vmem:[#allocation103_spill] sm:$0xff] %v5911_v6  ;;  %1437 = vrot.lane.b32.xlu1 %v1426_v17, %s4556_s19  ;;  %v1423_v6 = vmul.f32 %v5613_v40, %v5137_v30  ;;  %v2124_v30 = vmul.f32 %v5613_v40, %v5262_v61 }
 0x203   :  { %v5917_v23 = vpop.permute.xlu0 %1403 }
 0x204   :  { %7920 = vst [vmem:[#allocation104_spill] sm:$0xff] %v5917_v23  ;;  %2082 = vrot.lane.b32.xlu0 %v2076_v48, %s4543_s30  ;;  %v2125_v48 = vmul.f32 %v5674_v36, %v5262_v61 }
 0x205   :  { %v5919_v62 = vpop.permute.xlu1 %628 }
 0x206   :  { %7921 = vst [vmem:[#allocation105_spill] sm:$0xff] %v5919_v62  ;;  %2731 = vperm.xlu1 %4309, %v5925_v8   ;;  %v4561_v62 = vmov 82  }
 0x207   :  { %v5930_v17 = vpop.permute.xlu0 %1407 }
 0x208   :  { %7923 = vst [vmem:[#allocation107_spill] sm:$0xff] %v5930_v17  ;;  %2110 = vrot.lane.b32.xlu0 %v2102_v20, %s4453_s23  ;;  %v781_v20 = vmul.f32 %v5882_v51, %v5148_v3  ;;  %v2174_v3 = vmul.f32 %v5674_v36, %v5338_v46 }
 0x209   :  { %v5934_v23 = vpop.permute.xlu1 %1284 }
 0x20a   :  { %7924 = vst [vmem:[#allocation108_spill] sm:$0xff] %v5934_v23  ;;  %1431 = vrot.lane.b32.xlu1 %v1423_v6, %s4556_s19 }
 0x20b   :  { %4310 = vset.pattern.permute.xlu1 %v4561_v62  ;;  %v5942_v19 = vpop.permute.xlu0 %2707 }
 0x20c   :  { %7925 = vst [vmem:[#allocation109_spill] sm:$0xff] %v5942_v19  ;;  %2132 = vrot.lane.b32.xlu0 %v2125_v48, %s4547_s26 }
 0x20d   :  { %v5944_v17 = vpop.permute.xlu1 %1288 }
 0x20e   :  { %1868 = vrot.lane.b32.xlu1 %v1860_v16, %s7879_s15  ;;  %v1454_v16 = vmul.f32 %v5674_v36, %v5157_v41 }
 0x20f   :  { %v5950_v6 = vpop.permute.xlu0 %1841 }
 0x210   :  { %7926 = vst [vmem:[#allocation110_spill] sm:$0xff] %v5950_v6  ;;  %2130 = vrot.lane.b32.xlu0 %v2124_v30, %s4547_s26 }
 0x211   :  { %v5954_v62 = vpop.permute.xlu1 %2613 }
 0x212   :  { %7927 = vst [vmem:[#allocation111_spill] sm:$0xff] %v5954_v62  ;;  %791 = vrot.lane.b32.xlu1 %v781_v20, %s7891_s25  ;;  %v1456_v20 = vmul.f32 %v5157_v41, %v5301_v39 }
 0x213   :  { %v5960_v48 = vpop.permute.xlu0 %759 }
 0x214   :  { %7928 = vst [vmem:[#allocation112_spill] sm:$0xff] %v5960_v48  ;;  %2158 = vrot.lane.b32.xlu0 %v2150_v25, %s4562_s16  ;;  %v2173_v25 = vmul.f32 %v5613_v40, %v5338_v46 }
 0x215   :  { %v5964_v19 = vpop.permute.xlu1 %1282 }
 0x216   :  { %7929 = vst [vmem:[#allocation113_spill] sm:$0xff] %v5964_v19  ;;  %1463 = vrot.lane.b32.xlu1 %v1454_v16, %s4557_s24  ;;  %v2203_v19 = vmul.f32 %v5395_v54, %v5882_v51 }
 0x217   :  { %v5970_v30 = vpop.permute.xlu0 %763 }
 0x218   :  { %2181 = vrot.lane.b32.xlu0 %v2174_v3, %s4563_s11  ;;  %v1453_v3 = vmul.f32 %v5613_v40, %v5157_v41  ;;  %v2230_v41 = vmul.f32 %v5453_v1, %v5655_v57 }
 0x219   :  { %v5974_v6 = vpop.permute.xlu1 %1746 }
 0x21a   :  { %7930 = vst [vmem:[#allocation114_spill] sm:$0xff] %v5974_v6  ;;  %1467 = vrot.lane.b32.xlu1 %v1456_v20, %s4557_s24 }
 0x21b   :  { %v5980_v48 = vpop.permute.xlu0 %1435 }
 0x21c   :  { %7931 = vst [vmem:[#allocation115_spill] sm:$0xff] %v5980_v48  ;;  %2179 = vrot.lane.b32.xlu0 %v2173_v25, %s4563_s11  ;;  %v2231_v48 = vmul.f32 %v5453_v1, %v5599_v33  ;;  %v1884_v25 = vmul.f32 %v5626_v5, %v5048_v34  ;;  %v2261_v34 = vmul.f32 %v5491_v18, %v5882_v51 }
 0x21d   :  { %v5982_v16 = vpop.permute.xlu1 %655 }
 0x21e   :  { %2755 = vperm.xlu1 %4310, %v5925_v8  }
 0x21f   :  { %v5988_v6 = vpop.permute.xlu0 %1839 }
 0x220   :  { %7932 = vst [vmem:[#allocation116_spill] sm:$0xff] %v5988_v6  ;;  %2213 = vrot.lane.b32.xlu0 %v2203_v19, %s4548_s6 }
 0x221   :  { %v5992_v20 = vpop.permute.xlu1 %1316 }
 0x222   :  { %1461 = vrot.lane.b32.xlu1 %v1453_v3, %s4557_s24  ;;  %v811_v3 = vmul.f32 %v5882_v51, %v5170_v37 }
 0x223   :  { %v6000_v8 = vpop.permute.xlu0 %757 }
 0x224   :  { %7933 = vst [vmem:[#allocation117_spill] sm:$0xff] %v6000_v8  ;;  %2240 = vrot.lane.b32.xlu0 %v2231_v48, %s4553_s18 }
 0x225   :  { %v6002_v23 = vpop.permute.xlu1 %1742 }
 0x226   :  { %7934 = vst [vmem:[#allocation118_spill] sm:$0xff] %v6002_v23  ;;  %1892 = vrot.lane.b32.xlu1 %v1884_v25, %s7891_s25  ;;  %v1484_v25 = vmul.f32 %v5674_v36, %v5180_v9 }
 0x227   :  { %v6008_v19 = vpop.permute.xlu0 %1866 }
 0x228   :  { %7935 = vst [vmem:[#allocation119_spill] sm:$0xff] %v6008_v19  ;;  %2238 = vrot.lane.b32.xlu0 %v2230_v41, %s4553_s18  ;;  %v2289_v19 = vmul.f32 %v5224_v63, %v5599_v33 }
 0x229   :  { %v6012_v6 = vpop.permute.xlu1 %651 }
 0x22a   :  { %7936 = vst [vmem:[#allocation120_spill] sm:$0xff] %v6012_v6  ;;  %821 = vrot.lane.b32.xlu1 %v811_v3, %s7899_s12  ;;  %v1486_v3 = vmul.f32 %v5180_v9, %v5301_v39  ;;  %v2319_v9 = vmul.f32 %v5541_v14, %v5882_v51  ;;  %v1907_v39 = vmul.f32 %v5674_v36, %v5054_v27 }
 0x22b   :  { %v6018_v48 = vpop.permute.xlu0 %789 }
 0x22c   :  { %7937 = vst [vmem:[#allocation121_spill] sm:$0xff] %v6018_v48  ;;  %2271 = vrot.lane.b32.xlu0 %v2261_v34, %s4556_s19  ;;  %v2288_v48 = vmul.f32 %v5224_v63, %v5655_v57 }
 0x22d   :  { %v6022_v23 = vpop.permute.xlu1 %1312 }
 0x22e   :  { %7938 = vst [vmem:[#allocation122_spill] sm:$0xff] %v6022_v23  ;;  %1493 = vrot.lane.b32.xlu1 %v1484_v25, %s4558_s14  ;;  %v809_v25 = vmul.f32 %v5170_v37, %v5655_v57  ;;  %v2347_v37 = vmul.f32 %v5564_v4, %v5599_v33 }
 0x22f   :  { %v6028_v41 = vpop.permute.xlu0 %793 }
 0x230   :  { %2298 = vrot.lane.b32.xlu0 %v2289_v19, %s4557_s24 }
 0x231   :  { %v6032_v8 = vpop.permute.xlu1 %1770 }
 0x232   :  { %7939 = vst [vmem:[#allocation123_spill] sm:$0xff] %v6032_v8  ;;  %1497 = vrot.lane.b32.xlu1 %v1486_v3, %s4558_s14 }
 0x233   :  { %v6038_v34 = vpop.permute.xlu0 %1465 }
 0x234   :  { %7940 = vst [vmem:[#allocation124_spill] sm:$0xff] %v6038_v34  ;;  %2296 = vrot.lane.b32.xlu0 %v2288_v48, %s4557_s24  ;;  %v1906_v48 = vmul.f32 %v5613_v40, %v5054_v27  ;;  %v2378_v27 = vmul.f32 %v5587_v43, %v5882_v51 }
 0x235   :  { %v6042_v6 = vpop.permute.xlu1 %680 }
 0x236   :  { %817 = vrot.lane.b32.xlu1 %v809_v25, %s7899_s12 }
 0x237   :  { %v6050_v19 = vpop.permute.xlu0 %1864 }
 0x238   :  { %7941 = vst [vmem:[#allocation125_spill] sm:$0xff] %v6050_v19  ;;  %2329 = vrot.lane.b32.xlu0 %v2319_v9, %s4558_s14  ;;  %v2346_v9 = vmul.f32 %v5564_v4, %v5655_v57 }
 0x239   :  { %v6052_v3 = vpop.permute.xlu1 %1345 }
 0x23a   :  { %1914 = vrot.lane.b32.xlu1 %v1907_v39, %s7899_s12  ;;  %v1932_v39 = vmul.f32 %v5626_v5, %v5191_v22  ;;  %v2376_v22 = vmul.f32 %v5587_v43, %v5655_v57 }
 0x23b   :  { %v6060_v25 = vpop.permute.xlu0 %787 }
 0x23c   :  { %7942 = vst [vmem:[#allocation126_spill] sm:$0xff] %v6060_v25  ;;  %2356 = vrot.lane.b32.xlu0 %v2347_v37, %s4564_s9  ;;  %v1955_v37 = vmul.f32 %v5674_v36, %v5202_v7 }
 0x23d   :  { %v6062_v8 = vpop.permute.xlu1 %1766 }
 0x23e   :  { %7943 = vst [vmem:[#allocation127_spill] sm:$0xff] %v6062_v8  ;;  %1912 = vrot.lane.b32.xlu1 %v1906_v48, %s7899_s12 }
 0x23f   :  { %v6070_v19 = vpop.permute.xlu0 %1890 }
 0x240   :  { %7944 = vst [vmem:[#allocation128_spill] sm:$0xff] %v6070_v19  ;;  %2354 = vrot.lane.b32.xlu0 %v2346_v9, %s4564_s9  ;;  %v1954_v9 = vmul.f32 %v5613_v40, %v5202_v7  ;;  %v2406_v7 = vmul.f32 %v5368_v13, %v5655_v57 }
 0x241   :  { %v6072_v34 = vpop.permute.xlu1 %1341 }
 0x242   :  { %7945 = vst [vmem:[#allocation129_spill] sm:$0xff] %v6072_v34  ;;  %1940 = vrot.lane.b32.xlu1 %v1932_v39, %s4533_s17  ;;  %s4566_s17 = smov 23  }
 0x243   :  { %v6080_v48 = vpop.permute.xlu0 %819 }
 0x244   :  { %7946 = vst [vmem:[#allocation130_spill] sm:$0xff] %v6080_v48  ;;  %2388 = vrot.lane.b32.xlu0 %v2378_v27, %s4565_s27  ;;  %v1980_v27 = vmul.f32 %v5626_v5, %v5066_v55  ;;  %v7951_v55 = vld [vmem:[#allocation43_spill] sm:$0xff] }
 0x245   :  { %v6082_v8 = vpop.permute.xlu1 %1794 }
 0x246   :  { %7947 = vst [vmem:[#allocation131_spill] sm:$0xff] %v6082_v8  ;;  %1962 = vrot.lane.b32.xlu1 %v1955_v37, %s4536_s20  ;;  %v2408_v8 = vmul.f32 %v5368_v13, %v5882_v51 }
 0x247   :  { %v6090_v39 = vpop.permute.xlu0 %823 }
 0x248   :  { %2384 = vrot.lane.b32.xlu0 %v2376_v22, %s4565_s27  ;;  %v2004_v22 = vmul.f32 %v5674_v36, %v5216_v2 }
 0x249   :  { %v6092_v19 = vpop.permute.xlu1 %705 }
 0x24a   :  { %1960 = vrot.lane.b32.xlu1 %v1954_v9, %s4536_s20  ;;  %s4567_s20 = smov 22  }
 0x24b   :  { %v6100_v37 = vpop.permute.xlu0 %1495 }
 0x24c   :  { %7948 = vst [vmem:[#allocation132_spill] sm:$0xff] %v6100_v37  ;;  %2418 = vrot.lane.b32.xlu0 %v2408_v8, %s4566_s17  ;;  %v2438_v37 = vmul.f32 %v7951_v55, %v5882_v51  ;;  %v2003_v8 = vmul.f32 %v5613_v40, %v5216_v2  ;;  %v4568_v2 = vmov 78  }
 0x24d   :  { %v6102_v25 = vpop.permute.xlu1 %1375  ;;  %4311 = vset.pattern.permute.xlu1 %v4568_v2 }
 0x24e   :  { %1988 = vrot.lane.b32.xlu1 %v1980_v27, %s4559_s13  ;;  %s4569_s13 = smov 21  }
 0x24f   :  { %v6110_v9 = vpop.permute.xlu0 %1888 }
 0x250   :  { %7949 = vst [vmem:[#allocation133_spill] sm:$0xff] %v6110_v9  ;;  %2414 = vrot.lane.b32.xlu0 %v2406_v7, %s4566_s17  ;;  %v2436_v7 = vmul.f32 %v7951_v55, %v5655_v57 }
 0x251   :  { %v6112_v48 = vpop.permute.xlu1 %1790 }
 0x252   :  { %7950 = vst [vmem:[#allocation134_spill] sm:$0xff] %v6112_v48  ;;  %2011 = vrot.lane.b32.xlu1 %v2004_v22, %s4560_s21  ;;  %v2030_v22 = vmul.f32 %v5626_v5, %v5226_v52 }
 0x253   :  { %v6120_v27 = vpop.permute.xlu0 %1491 }
 0x254   :  { %7952 = vst [vmem:[#allocation135_spill] sm:$0xff] %v6120_v27  ;;  %2448 = vrot.lane.b32.xlu0 %v2438_v37, %s4567_s20  ;;  %v7956_v37 = vld [vmem:[#allocation48_spill] sm:$0xff] }
 0x255   :  { %v6122_v34 = vpop.permute.xlu1 %701  ;;  %v2466_v52 = vmul.f32 %v7956_v37, %v5655_v57 }
 0x256   :  { %7953 = vst [vmem:[#allocation136_spill] sm:$0xff] %v6122_v34  ;;  %2009 = vrot.lane.b32.xlu1 %v2003_v8, %s4560_s21  ;;  %v2468_v34 = vmul.f32 %v7956_v37, %v5882_v51  ;;  %v2053_v8 = vmul.f32 %v5674_v36, %v5237_v58 }
 0x257   :  { %v6130_v9 = vpop.permute.xlu0 %1916 }
 0x258   :  { %7954 = vst [vmem:[#allocation137_spill] sm:$0xff] %v6130_v9  ;;  %2444 = vrot.lane.b32.xlu0 %v2436_v7, %s4567_s20  ;;  %v2052_v7 = vmul.f32 %v5613_v40, %v5237_v58  ;;  %v2496_v58 = vmul.f32 %v5776_v47, %v5655_v57 }
 0x259   :  { %v6132_v48 = vpop.permute.xlu1 %1371 }
 0x25a   :  { %7955 = vst [vmem:[#allocation138_spill] sm:$0xff] %v6132_v48  ;;  %2038 = vrot.lane.b32.xlu1 %v2030_v22, %s4540_s28  ;;  %s4570_s28 = smov 20  }
 0x25b   :  { %v6140_v27 = vpop.permute.xlu0 %1938 }
 0x25c   :  { %7957 = vst [vmem:[#allocation139_spill] sm:$0xff] %v6140_v27  ;;  %2478 = vrot.lane.b32.xlu0 %v2468_v34, %s4569_s13  ;;  %v2498_v27 = vmul.f32 %v5776_v47, %v5882_v51  ;;  %v2078_v34 = vmul.f32 %v5626_v5, %v5250_v12  ;;  %v7963_v12 = vld [vmem:[#allocation60_spill] sm:$0xff] }
 0x25d   :  { %v6142_v23 = vpop.permute.xlu1 %1818 }
 0x25e   :  { %7958 = vst [vmem:[#allocation140_spill] sm:$0xff] %v6142_v23  ;;  %2060 = vrot.lane.b32.xlu1 %v2053_v8, %s4542_s29 }
 0x25f   :  { %v6150_v22 = vpop.permute.xlu0 %1936 }
 0x260   :  { %7959 = vst [vmem:[#allocation141_spill] sm:$0xff] %v6150_v22  ;;  %2474 = vrot.lane.b32.xlu0 %v2466_v52, %s4569_s13  ;;  %v2101_v52 = vmul.f32 %v5674_v36, %v5083_v21 }
 0x261   :  { %v6152_v2 = vpop.permute.xlu1 %730 }
 0x262   :  { %2058 = vrot.lane.b32.xlu1 %v2052_v7, %s4542_s29  ;;  %s4571_s29 = smov 19  }
 0x263   :  { %v6160_v8 = vpop.permute.xlu0 %1964 }
 0x264   :  { %7960 = vst [vmem:[#allocation142_spill] sm:$0xff] %v6160_v8  ;;  %2508 = vrot.lane.b32.xlu0 %v2498_v27, %s4570_s28  ;;  %v2528_v8 = vmul.f32 %v7963_v12, %v5882_v51  ;;  %v2100_v27 = vmul.f32 %v5613_v40, %v5083_v21  ;;  %v7968_v21 = vld [vmem:[#allocation15_spill] sm:$0xff] }
 0x265   :  { %v6162_v9 = vpop.permute.xlu1 %1405 }
 0x266   :  { %2086 = vrot.lane.b32.xlu1 %v2078_v34, %s4543_s30 }
 0x267   :  { %v6170_v7 = vpop.permute.xlu0 %1986 }
 0x268   :  { %7961 = vst [vmem:[#allocation143_spill] sm:$0xff] %v6170_v7  ;;  %2504 = vrot.lane.b32.xlu0 %v2496_v58, %s4570_s28  ;;  %v2526_v58 = vmul.f32 %v7963_v12, %v5655_v57 }
 0x269   :  { %v6172_v22 = vpop.permute.xlu1 %1814 }
 0x26a   :  { %7962 = vst [vmem:[#allocation144_spill] sm:$0xff] %v6172_v22  ;;  %2108 = vrot.lane.b32.xlu1 %v2101_v52, %s4453_s23  ;;  %v2126_v52 = vmul.f32 %v5626_v5, %v5262_v61 }
 0x26b   :  { %v6180_v34 = vpop.permute.xlu0 %1984 }
 0x26c   :  { %7964 = vst [vmem:[#allocation145_spill] sm:$0xff] %v6180_v34  ;;  %2538 = vrot.lane.b32.xlu0 %v2528_v8, %s4571_s29  ;;  %v863_v34 = vmul.f32 %v5626_v5, %v7968_v21  ;;  %v2558_v8 = vmul.f32 %v5856_v45, %v5882_v51 }
 0x26d   :  { %v6182_v23 = vpop.permute.xlu1 %726 }
 0x26e   :  { %7965 = vst [vmem:[#allocation146_spill] sm:$0xff] %v6182_v23  ;;  %2106 = vrot.lane.b32.xlu1 %v2100_v27, %s4453_s23  ;;  %v2149_v27 = vmul.f32 %v5674_v36, %v5280_v28  ;;  %s4572_s23 = smov 18   ;;  %v7972_v36 = vld [vmem:[#allocation18_spill] sm:$0xff] }
 0x26f   :  { %v6190_v7 = vpop.permute.xlu0 %2013 }
 0x270   :  { %7966 = vst [vmem:[#allocation147_spill] sm:$0xff] %v6190_v7  ;;  %2534 = vrot.lane.b32.xlu0 %v2526_v58, %s4571_s29  ;;  %v7971_v7 = vld [vmem:[#allocation16_spill] sm:$0xff] }
 0x271   :  { %v6192_v22 = vpop.permute.xlu1 %1401  ;;  %v887_v58 = vadd.f32 %v7971_v7, %v863_v34  ;;  %v7974_v34 = vld [vmem:[#allocation20_spill] sm:$0xff]  ;;  %v2587_v7 = vmul.f32 %v5901_v42, %v5599_v33 }
 0x272   :  { %7967 = vst [vmem:[#allocation148_spill] sm:$0xff] %v6192_v22  ;;  %2134 = vrot.lane.b32.xlu1 %v2126_v52, %s4547_s26  ;;  %v6212_v52 = vld [vmem:[%s7604_s0 + $0x18] sm:$0xff]  ;;  %s4573_s26 = smov 17  }
 0x273   :  { %v6202_v23 = vpop.permute.xlu0 %2036  ;;  %v2379_v45 = vmul.f32 %v6212_v52, %v5587_v43  ;;  %v911_v12 = vadd.f32 %v7972_v36, %v887_v58  ;;  %v7975_v22 = vld [vmem:[#allocation22_spill] sm:$0xff]  ;;  %v2175_v58 = vmul.f32 %v5626_v5, %v5338_v46  ;;  %v2202_v46 = vmul.f32 %v5395_v54, %v5599_v33 }
 0x274   :  { %7969 = vst [vmem:[#allocation149_spill] sm:$0xff] %v6202_v23  ;;  %2568 = vrot.lane.b32.xlu0 %v2558_v8, %s4572_s23  ;;  %v2148_v23 = vmul.f32 %v5613_v40, %v5280_v28 }
 0x275   :  { %v6204_v61 = vpop.permute.xlu1 %1843 }
 0x276   :  { %7970 = vst [vmem:[#allocation150_spill] sm:$0xff] %v6204_v61  ;;  %2156 = vrot.lane.b32.xlu1 %v2149_v27, %s4562_s16  ;;  %v936_v27 = vadd.f32 %v7974_v34, %v911_v12  ;;  %v7979_v12 = vld [vmem:[#allocation51_spill] sm:$0xff] }
 0x277   :  { %v6219_v61 = vpop.permute.xlu0 %2034 }
 0x278   :  { %7973 = vst [vmem:[#allocation151_spill] sm:$0xff] %v6219_v61  ;;  %2390 = vrot.lane.b32.xlu0 %v2379_v45, %s4565_s27  ;;  %v961_v48 = vadd.f32 %v7975_v22, %v936_v27  ;;  %v7978_v45 = vld [vmem:[#allocation24_spill] sm:$0xff]  ;;  %v7985_v22 = vld [vmem:[#allocation17_spill] sm:$0xff] }
 0x279   :  { %v6221_v8 = vpop.permute.xlu1 %761 }
 0x27a   :  { %2154 = vrot.lane.b32.xlu1 %v2148_v23, %s4562_s16  ;;  %v985_v61 = vadd.f32 %v7978_v45, %v961_v48  ;;  %v2409_v23 = vmul.f32 %v6212_v52, %v5368_v13  ;;  %v2617_v48 = vmul.f32 %v5954_v62, %v5599_v33  ;;  %v7984_v45 = vld [vmem:[#allocation31_spill] sm:$0xff]  ;;  %s4574_s16 = smov 2  }
 0x27b   :  { %v6231_v36 = vpop.permute.xlu0 %2062 }
 0x27c   :  { %7976 = vst [vmem:[#allocation152_spill] sm:$0xff] %v6231_v36  ;;  %2596 = vrot.lane.b32.xlu0 %v2587_v7, %s4573_s26  ;;  %v1009_v42 = vadd.f32 %v7979_v12, %v985_v61  ;;  %v861_v7 = vmul.f32 %v5613_v40, %v7968_v21  ;;  %v7982_v61 = vld [vmem:[#allocation27_spill] sm:$0xff]  ;;  %v2201_v12 = vmul.f32 %v5395_v54, %v5655_v57  ;;  %v7987_v40 = vld [vmem:[#allocation34_spill] sm:$0xff] }
 0x27d   :  { %v6233_v28 = vpop.permute.xlu1 %1433 }
 0x27e   :  { %7977 = vst [vmem:[#allocation153_spill] sm:$0xff] %v6233_v28  ;;  %2183 = vrot.lane.b32.xlu1 %v2175_v58, %s4563_s11  ;;  %v1033_v58 = vadd.f32 %v7982_v61, %v1009_v42  ;;  %v7989_v61 = vld [vmem:[#allocation29_spill] sm:$0xff]  ;;  %s4575_s11 = smov 1  }
 0x27f   :  { %v6241_v27 = vpop.permute.xlu0 %2084 }
 0x280   :  { %7980 = vst [vmem:[#allocation154_spill] sm:$0xff] %v6241_v27  ;;  %2420 = vrot.lane.b32.xlu0 %v2409_v23, %s4566_s17  ;;  %v880_v23 = vsel %vm632_vm10, %v7985_v22, %v7984_v45  ;;  %v1058_v21 = vadd.f32 %v7989_v61, %v1033_v58  ;;  %v2232_v45 = vmul.f32 %v5453_v1, %v5882_v51 }
 0x281   :  { %v6245_v36 = vpop.permute.xlu1 %1437  ;;  %v885_v62 = vadd.f32 %v880_v23, %v861_v7  ;;  %v7994_v7 = vld [vmem:[#allocation40_spill] sm:$0xff]  ;;  %v7995_v23 = vld [vmem:[#allocation23_spill] sm:$0xff] }
 0x282   :  { %7981 = vst [vmem:[#allocation155_spill] sm:$0xff] %v6245_v36  ;;  %2211 = vrot.lane.b32.xlu1 %v2202_v46, %s4548_s6  ;;  %v7988_v46 = vld [vmem:[#allocation19_spill] sm:$0xff]  ;;  %v954_v58 = vsel %vm7808_vm13, %v7995_v23, %v7994_v7 }
 0x283   :  { %v6254_v27 = vpop.permute.xlu0 %2082  ;;  %v904_v42 = vsel %vm7813_vm11, %v7988_v46, %v7987_v40  ;;  %v7996_v40 = vld [vmem:[#allocation32_spill] sm:$0xff] }
 0x284   :  { %7983 = vst [vmem:[#allocation156_spill] sm:$0xff] %v6254_v27  ;;  %2626 = vrot.lane.b32.xlu0 %v2617_v48, %s4574_s16  ;;  %v2439_v27 = vmul.f32 %v6212_v52, %v7951_v55  ;;  %v7991_v48 = vld [vmem:[#allocation37_spill] sm:$0xff]  ;;  %v909_v46 = vadd.f32 %v904_v42, %v885_v62  ;;  %v1083_v55 = vadd.f32 %v7996_v40, %v1058_v21  ;;  %v3835_v21 = vld [vmem:[%s7611_s7 + $0x1] ss:$4 sm:$0x7] }
 0x285   :  { %v6261_v34 = vpop.permute.xlu1 %2731  ;;  %v7999_v62 = vld [vmem:[#allocation25_spill] sm:$0xff]  ;;  %v8006_v40 = vld [vmem:[#allocation28_spill] sm:$0xff] }
 0x286   :  { %7986 = vst [vmem:[#allocation17_spill] sm:$0xff] %v6261_v34  ;;  %2209 = vrot.lane.b32.xlu1 %v2201_v12, %s4548_s6  ;;  %v7992_v34 = vld [vmem:[#allocation21_spill] sm:$0xff] }
 0x287   :  { %v6271_v22 = vpop.permute.xlu0 %2110  ;;  %v929_v12 = vsel %vm7812_vm12, %v7992_v34, %v7991_v48  ;;  %v2260_v34 = vmul.f32 %v5491_v18, %v5599_v33 }
 0x288   :  { %7990 = vst [vmem:[#allocation19_spill] sm:$0xff] %v6271_v22  ;;  %2450 = vrot.lane.b32.xlu0 %v2439_v27, %s4567_s20  ;;  %v2647_v22 = vmul.f32 %v5784_v29, %v5599_v33  ;;  %v934_v61 = vadd.f32 %v929_v12, %v909_v46  ;;  %v7998_v27 = vld [vmem:[#allocation44_spill] sm:$0xff]  ;;  %v8001_v12 = vld [vmem:[#allocation26_spill] sm:$0xff]  ;;  %v8002_v46 = vld [vmem:[#allocation53_spill] sm:$0xff] }
 0x289   :  { %v6278_v28 = vpop.permute.xlu1 %1431  ;;  %v978_v42 = vsel %vm7811_vm14, %v7999_v62, %v7998_v27  ;;  %v2469_v62 = vmul.f32 %v6212_v52, %v7956_v37  ;;  %v8003_v29 = vld [vmem:[#allocation36_spill] sm:$0xff]  ;;  %v2499_v37 = vmul.f32 %v6212_v52, %v5776_v47 }
 0x28a   :  { %7993 = vst [vmem:[#allocation21_spill] sm:$0xff] %v6278_v28  ;;  %2242 = vrot.lane.b32.xlu1 %v2232_v45, %s4553_s18  ;;  %v959_v23 = vadd.f32 %v954_v58, %v934_v61  ;;  %v2259_v58 = vmul.f32 %v5491_v18, %v5655_v57  ;;  %v8012_v28 = vld [vmem:[#allocation41_spill] sm:$0xff] }
 0x28b   :  { %v6288_v1 = vpop.permute.xlu0 %2132 }
 0x28c   :  { %7997 = vst [vmem:[#allocation23_spill] sm:$0xff] %v6288_v1  ;;  %2656 = vrot.lane.b32.xlu0 %v2647_v22, %s4575_s11  ;;  %v1002_v1 = vsel %vm707_vm15, %v8002_v46, %v8001_v12  ;;  %v1107_v22 = vadd.f32 %v8003_v29, %v1083_v55  ;;  %v8007_v46 = vld [vmem:[#allocation8_spill] sm:$0xff]  ;;  %v8008_v55 = vld [vmem:[#allocation9_spill] sm:$0xff] }
 0x28d   :  { %v6295_v45 = vpop.permute.xlu1 %1868  ;;  %v403_v12 = vrot.slane %v3835_v21, %v8007_v46 }
 0x28e   :  { %8000 = vst [vmem:[#allocation25_spill] sm:$0xff] %v6295_v45  ;;  %2269 = vrot.lane.b32.xlu1 %v2260_v34, %s4556_s19  ;;  %v983_v45 = vadd.f32 %v978_v42, %v959_v23  ;;  %v8005_v34 = vld [vmem:[#allocation55_spill] sm:$0xff]  ;;  %v407_v42 = vrot.slane %v3835_v21, %v8008_v55  ;;  %v8009_v23 = vld [vmem:[#allocation58_spill] sm:$0xff]  ;;  %v8015_v55 = vld [vmem:[#allocation33_spill] sm:$0xff] }
 0x28f   :  { %v6308_v61 = vpop.permute.xlu0 %2130  ;;  %v1026_v27 = vsel %vm7810_vm0, %v8006_v40, %v8005_v34  ;;  %v8011_v40 = vld [vmem:[#allocation11_spill] sm:$0xff] }
 0x290   :  { %8004 = vst [vmem:[#allocation53_spill] sm:$0xff] %v6308_v61  ;;  %2480 = vrot.lane.b32.xlu0 %v2469_v62, %s4569_s13  ;;  %v1007_v48 = vadd.f32 %v1002_v1, %v983_v45  ;;  %v8010_v61 = vld [vmem:[#allocation30_spill] sm:$0xff]  ;;  %v411_v34 = vrot.slane %v3835_v21, %v8011_v40  ;;  %v1131_v62 = vadd.f32 %v8012_v28, %v1107_v22 }
 0x291   :  { %v6315_v7 = vpop.permute.xlu1 %791  ;;  %v1051_v29 = vsel %vm7759_vm1, %v8010_v61, %v8009_v23  ;;  %v2290_v1 = vmul.f32 %v5224_v63, %v5882_v51  ;;  %v8016_v22 = vld [vmem:[#allocation66_spill] sm:$0xff]  ;;  %vm7765_vm1 = vcmask 515072  }
 0x292   :  { %2267 = vrot.lane.b32.xlu1 %v2259_v58, %s4556_s19  ;;  %v1031_v18 = vadd.f32 %v1026_v27, %v1007_v48  ;;  %v8014_v58 = vld [vmem:[#allocation61_spill] sm:$0xff]  ;;  %v8017_v40 = vld [vmem:[#allocation70_spill] sm:$0xff] }
 0x293   :  { %v6328_v13 = vpop.permute.xlu0 %2158  ;;  %v485_v45 = vpop.f32.mrb[2].mxu1  ;;  %v1076_v46 = vsel %vm7758_vm2, %v8015_v55, %v8014_v58  ;;  %v2688_v55 = vmul.f32 %v6212_v52, %v5887_v26  ;;  %vm7761_vm2 = vcmask 670720  }
 0x294   :  { %8013 = vst [vmem:[#allocation28_spill] sm:$0xff] %v6328_v13  ;;  %2510 = vrot.lane.b32.xlu0 %v2499_v37, %s4570_s28  ;;  %v486_v61 = vadd.f32 %v485_v45, %v403_v12  ;;  %v487_v23 = vpop.f32.mrb[3].mxu1  ;;  %v1056_v21 = vadd.f32 %v1051_v29, %v1031_v18  ;;  %v556_v27 = vpop.f32.mrb[2].mxu0  ;;  %v1100_v13 = vsel %vm7814_vm5, %v8017_v40, %v8016_v22  ;;  %v8018_v12 = vld [vmem:[#allocation47_spill] sm:$0xff] }
 0x295   :  { %v6335_v36 = vpop.permute.xlu1 %1463  ;;  %v488_v48 = vadd.f32 %v487_v23, %v407_v42  ;;  %v557_v58 = vadd.f32 %v556_v27, %v411_v34  ;;  %v3965_v47 = vpop.f32.mrb[3].mxu0  ;;  %v1155_v45 = vadd.f32 %v8018_v12, %v1131_v62  ;;  %v2318_v29 = vmul.f32 %v5541_v14, %v5599_v33  ;;  %v8023_v27 = vld [vmem:[#allocation59_spill] sm:$0xff] }
 0x296   :  { %2300 = vrot.lane.b32.xlu1 %v2290_v1, %s4557_s24  ;;  %v3838_v28 = vmul.f32 -1.442695, %v486_v61  ;;  %v1081_v37 = vadd.f32 %v1076_v46, %v1056_v21  ;;  %v1124_v23 = vsel %vm7772_vm8, %v5692_v15, %v5667_v32  ;;  %v615_v40 = vmul.f32 %v5626_v5, %v5756_v35  ;;  %v6365_v5 = vld [vmem:[%s7604_s0 + $0x8] sm:$0xff]  ;;  %v8022_v21 = vld [vmem:[#allocation63_spill] sm:$0xff] }
 0x297   :  { %v6345_v18 = vpop.permute.xlu0 %2181  ;;  %v3839_v42 = vmul.f32 -1.442695, %v488_v48  ;;  %v3840_v47 = vmul.f32 -1.442695, %v557_v58  ;;  %v1148_v33 = vsel %vm7767_vm9, %v5734_v44, %v5712_v59  ;;  %v1180_v15 = vadd.f32 %v5766_v0, %v1155_v45  ;;  %v8025_v45 = vld [vmem:[#allocation56_spill] sm:$0xff] }
 0x298   :  { %8019 = vst [vmem:[#allocation30_spill] sm:$0xff] %v6345_v18  ;;  %2696 = vrot.lane.b32.xlu0 %v2688_v55, %s4497_s22  ;;  %4347 = vpow2.f32 %v3838_v28  ;;  %v1105_v34 = vadd.f32 %v1100_v13, %v1081_v37  ;;  %v2686_v28 = vmul.f32 %v6365_v5, %v5887_v26  ;;  %v2317_v62 = vmul.f32 %v5541_v14, %v5655_v57  ;;  %v8024_v57 = vld [vmem:[#allocation52_spill] sm:$0xff] }
 0x299   :  { %v6354_v1 = vpop.permute.xlu1 %1467  ;;  %4349 = vpow2.f32 %v3839_v42  ;;  %v640_v44 = vadd.f32 %v5700_v24, %v615_v40  ;;  %v1233_v48 = vsel %vm7762_vm6, %v8022_v21, %v5846_v50  ;;  %v1205_v55 = vadd.f32 %v8023_v27, %v1180_v15  ;;  %v8026_v42 = vld [vmem:[#allocation71_spill] sm:$0xff] }
 0x29a   :  { %2327 = vrot.lane.b32.xlu1 %v2318_v29, %s4558_s14  ;;  %4351 = vpow2.f32 %v3840_v47  ;;  %v1129_v13 = vadd.f32 %v1124_v23, %v1105_v34  ;;  %v1173_v29 = vsel %vm7760_vm3, %v8025_v45, %v8024_v57  ;;  %v1263_v23 = vsel %vm7763_vm7, %v8026_v42, %v5891_v60  ;;  %v8029_v45 = vld [vmem:[#allocation67_spill] sm:$0xff] }
 0x29b   :  { %v6369_v46 = vpop.permute.xlu0 %2179  ;;  %v665_v37 = vadd.f32 %v5982_v16, %v640_v44  ;;  %v2348_v50 = vmul.f32 %v5564_v4, %v5882_v51  ;;  %v1198_v47 = vsel %vm7761_vm2, %v5816_v38, %v5796_v11  ;;  %v1239_v34 = vadd.f32 %v1233_v48, %v1205_v55 }
 0x29c   :  { %8020 = vst [vmem:[#allocation33_spill] sm:$0xff] %v6369_v46  ;;  %2692 = vrot.lane.b32.xlu0 %v2686_v28, %s4497_s22  ;;  %v1153_v61 = vadd.f32 %v1148_v33, %v1129_v13  ;;  %v1293_v60 = vsel %vm7765_vm1, %v5710_v56, %v5944_v17  ;;  %v2377_v51 = vmul.f32 %v6365_v5, %v5587_v43  ;;  %vm7769_vm3 = vcmask 498688  }
 0x29d   :  { %v6374_v58 = vpop.permute.xlu1 %2755  ;;  %v690_v33 = vadd.f32 %v6042_v6, %v665_v37  ;;  %vm7771_vm2 = vcmask 359424   ;;  %v768_v17 = vsel %vm7814_vm5, %v6221_v8, %v5970_v30  ;;  %v798_v30 = vsel %vm7772_vm8, %v6315_v7, %v6028_v41 }
 0x29e   :  { %8021 = vst [vmem:[#allocation66_spill] sm:$0xff] %v6374_v58  ;;  %2325 = vrot.lane.b32.xlu1 %v2317_v62, %s4558_s14  ;;  %v1178_v28 = vadd.f32 %v1173_v29, %v1153_v61  ;;  %v1269_v62 = vadd.f32 %v1263_v23, %v1239_v34  ;;  %v1322_v61 = vsel %vm7766_vm4, %v5992_v20, %v5772_v53  ;;  %vm601_vm8 = vcmask 480260  }
 0x29f   :  { %v6389_v40 = vpop.permute.xlu0 %2213  ;;  %v715_v38 = vadd.f32 %v6092_v19, %v690_v33  ;;  %v1231_v29 = vsel %vm7762_vm6, %v8029_v45, %v5836_v31  ;;  %v1352_v53 = vsel %vm7769_vm3, %v6052_v3, %v5824_v49  ;;  %vm1409_vm6 = vcmask 351232   ;;  %v8035_v45 = vld [vmem:[#allocation113_spill] sm:$0xff] }
 0x2a0   :  { %8027 = vst [vmem:[#allocation70_spill] sm:$0xff] %v6389_v40  ;;  %v1203_v48 = vadd.f32 %v1198_v47, %v1178_v28  ;;  %v1299_v23 = vadd.f32 %v1293_v60, %v1269_v62  ;;  %v2204_v41 = vmul.f32 %v6212_v52, %v5395_v54 }
 0x2a1   :  { %v6397_v15 = vpop.permute.xlu1 %1461 }
 0x2a2   :  { %2358 = vrot.lane.b32.xlu1 %v2348_v50, %s4564_s9  ;;  %v4348_v13 = vpop.eup %4347  ;;  %v740_v50 = vadd.f32 %v6152_v2, %v715_v38  ;;  %v1328_v28 = vadd.f32 %v1322_v61, %v1299_v23  ;;  %v8032_v38 = vld [vmem:[#allocation99_spill] sm:$0xff] }
 0x2a3   :  { %v4350_v44 = vpop.eup %4349  ;;  %v6412_v55 = vpop.permute.xlu0 %2240  ;;  %v569_v37 = vadd.f32 1.0, %v4348_v13  ;;  %v8031_v13 = vld [vmem:[#allocation74_spill] sm:$0xff]  ;;  %v1382_v49 = vsel %vm7771_vm2, %v6102_v25, %v8032_v38 }
 0x2a4   :  { %8028 = vst [vmem:[#allocation47_spill] sm:$0xff] %v6412_v55  ;;  %v4352_v43 = vpop.eup %4351  ;;  %v570_v34 = vadd.f32 1.0, %v4350_v44  ;;  %v774_v60 = vadd.f32 %v768_v17, %v740_v50  ;;  %v1261_v62 = vsel %vm7763_vm7, %v8031_v13, %v5876_v10  ;;  %v8034_v17 = vld [vmem:[#allocation108_spill] sm:$0xff]  ;;  %v8036_v50 = vld [vmem:[#allocation107_spill] sm:$0xff]  ;;  %vm1439_vm7 = vcmask 343040  }
 0x2a5   :  { %v6418_v47 = vpop.permute.xlu1 %1892  ;;  %4353 = vrcp.f32 %v569_v37  ;;  %v571_v33 = vadd.f32 1.0, %v4352_v43  ;;  %v1358_v37 = vadd.f32 %v1352_v53, %v1328_v28  ;;  %v1291_v23 = vsel %vm7765_vm1, %v8035_v45, %v8034_v17  ;;  %v8037_v53 = vld [vmem:[#allocation84_spill] sm:$0xff]  ;;  %v8039_v28 = vld [vmem:[#allocation155_spill] sm:$0xff] }
 0x2a6   :  { %8030 = vst [vmem:[#allocation63_spill] sm:$0xff] %v6418_v47  ;;  %2386 = vrot.lane.b32.xlu1 %v2377_v51, %s4565_s27  ;;  %4355 = vrcp.f32 %v570_v34  ;;  %v1237_v51 = vadd.f32 %v1231_v29, %v1203_v48  ;;  %v804_v61 = vadd.f32 %v798_v30, %v774_v60  ;;  %v1412_v34 = vsel %vm1409_vm6, %v6162_v9, %v8036_v50  ;;  %v8038_v30 = vld [vmem:[#allocation122_spill] sm:$0xff]  ;;  %v8040_v60 = vld [vmem:[#allocation115_spill] sm:$0xff]  ;;  %s8072_s27 = smov 125  }
 0x2a7   :  { %v6433_v44 = vpop.permute.xlu0 %2238  ;;  %4357 = vrcp.f32 %v571_v33  ;;  %v1388_v48 = vadd.f32 %v1382_v49, %v1358_v37  ;;  %v1320_v33 = vsel %vm7766_vm4, %v8038_v30, %v8037_v53  ;;  %v1442_v38 = vsel %vm1439_vm7, %v8040_v60, %v8039_v28  ;;  %v8042_v50 = vld [vmem:[#allocation38_spill] sm:$0xff]  ;;  %v8043_v49 = vld [vmem:[#allocation91_spill] sm:$0xff]  ;;  %v8045_v37 = vld [vmem:[#allocation124_spill] sm:$0xff] }
 0x2a8   :  { %8033 = vst [vmem:[#allocation59_spill] sm:$0xff] %v6433_v44  ;;  %v1267_v54 = vadd.f32 %v1261_v62, %v1237_v51  ;;  %v2407_v44 = vmul.f32 %v6365_v5, %v8042_v50  ;;  %vm1469_vm1 = vcmask 334848   ;;  %vm598_vm4 = vcmask 1041408   ;;  %v8049_v28 = vld [vmem:[#allocation42_spill] sm:$0xff] }
 0x2a9   :  { %v6437_v43 = vpop.permute.xlu1 %821  ;;  %v1418_v55 = vadd.f32 %v1412_v34, %v1388_v48  ;;  %v8046_v34 = vld [vmem:[#allocation97_spill] sm:$0xff]  ;;  %v2233_v50 = vmul.f32 %v6212_v52, %v8049_v28 }
 0x2aa   :  { %v828_v13 = vsel %vm7767_vm9, %v6437_v43, %v6090_v39  ;;  %2215 = vrot.lane.b32.xlu1 %v2204_v41, %s4548_s6  ;;  %v1297_v39 = vadd.f32 %v1291_v23, %v1267_v54  ;;  %v8044_v41 = vld [vmem:[#allocation129_spill] sm:$0xff]  ;;  %vm599_vm9 = vcmask 1043458   ;;  %v8047_v54 = vld [vmem:[#allocation138_spill] sm:$0xff]  ;;  %s8078_s6 = smov 124  }
 0x2ab   :  { %v834_v29 = vadd.f32 %v828_v13, %v804_v61  ;;  %v6455_v45 = vpop.permute.xlu0 %2271  ;;  %v1350_v51 = vsel %vm7769_vm3, %v8044_v41, %v8043_v49  ;;  %v1472_v61 = vsel %vm1469_vm1, %v8045_v37, %v6354_v1  ;;  %v1448_v30 = vadd.f32 %v1442_v38, %v1418_v55  ;;  %v8051_v55 = vld [vmem:[#allocation148_spill] sm:$0xff] }
 0x2ac   :  { %8041 = vst [vmem:[#allocation52_spill] sm:$0xff] %v6455_v45  ;;  %v1326_v13 = vadd.f32 %v1320_v33, %v1297_v39  ;;  %v1380_v48 = vsel %vm7771_vm2, %v8047_v54, %v8046_v34  ;;  %vm7806_vm3 = vcmask 326656   ;;  %v8050_v33 = vld [vmem:[#allocation104_spill] sm:$0xff]  ;;  %vm600_vm2 = vmor %vm599_vm9, %vm598_vm4  ;;  %vm8116_vm9 = vcmask 695296  }
 0x2ad   :  { %v6459_v62 = vpop.permute.xlu1 %1493  ;;  %842 = vrot.lane.b32.xlu0 %v834_v29, %s7899_s12  ;;  %v1478_v18 = vadd.f32 %v1472_v61, %v1448_v30  ;;  %v1410_v38 = vsel %vm1409_vm6, %v8051_v55, %v8050_v33  ;;  %v8052_v39 = vld [vmem:[#allocation132_spill] sm:$0xff]  ;;  %v8053_v61 = vld [vmem:[#allocation10_spill] sm:$0xff]  ;;  %v8054_v30 = vld [vmem:[#allocation153_spill] sm:$0xff] }
 0x2ae   :  { %2416 = vrot.lane.b32.xlu1 %v2407_v44, %s4566_s17  ;;  %v1356_v46 = vadd.f32 %v1350_v51, %v1326_v13  ;;  %v8057_v55 = vld [vmem:[#allocation43_spill] sm:$0xff]  ;;  %vm602_vm4 = vmor %vm601_vm8, %vm600_vm2  ;;  %vm8110_vm2 = vcmask 850944   ;;  %vm8113_vm8 = vcmask 842752  }
 0x2af   :  { %v4354_v23 = vpop.eup %4353  ;;  %v6472_v29 = vpop.permute.xlu0 %2298 }
 0x2b0   :  { %8048 = vst [vmem:[#allocation56_spill] sm:$0xff] %v6472_v29  ;;  %v4356_v41 = vpop.eup %4355  ;;  %v1386_v28 = vadd.f32 %v1380_v48, %v1356_v46  ;;  %v8055_v29 = vld [vmem:[#allocation21_spill] sm:$0xff] }
 0x2b1   :  { %v1498_v1 = vpop.permute.xlu1 %1497  ;;  %v4358_v44 = vpop.eup %4357  ;;  %v581_v54 = vcombine.low %v4354_v23, %v4356_v41  ;;  %v1440_v40 = vsel %vm1439_vm7, %v8055_v29, %v8054_v30 }
 0x2b2   :  { %v1502_v45 = vsel %vm7806_vm3, %v8052_v39, %v1498_v1  ;;  %2244 = vrot.lane.b32.xlu1 %v2233_v50, %s4553_s18  ;;  %v595_v13 = vrot.slane %v4358_v44, %v8053_v61  ;;  %v2437_v1 = vmul.f32 %v6365_v5, %v8057_v55  ;;  %v1416_v23 = vadd.f32 %v1410_v38, %v1386_v28  ;;  %v8059_v44 = vld [vmem:[#allocation135_spill] sm:$0xff]  ;;  %v8061_v28 = vld [vmem:[#allocation46_spill] sm:$0xff] }
 0x2b3   :  { %v1508_v51 = vadd.f32 %v1502_v45, %v1478_v18  ;;  %v6488_v47 = vpop.permute.xlu0 %2296  ;;  %v588_v50 = vrot.slane %v581_v54, %v8053_v61  ;;  %v1470_v18 = vsel %vm1469_vm1, %v6397_v15, %v6335_v36  ;;  %v8058_v45 = vld [vmem:[#allocation109_spill] sm:$0xff]  ;;  %v1500_v38 = vsel %vm7806_vm3, %v8059_v44, %v6459_v62 }
 0x2b4   :  { %8056 = vst [vmem:[#allocation71_spill] sm:$0xff] %v6488_v47  ;;  %v2712_v48 = vmul.f32 %v6212_v52, %v8058_v45  ;;  %v1446_v29 = vadd.f32 %v1440_v40, %v1416_v23  ;;  %v8064_v40 = vld [vmem:[#allocation48_spill] sm:$0xff]  ;;  %v2710_v23 = vmul.f32 %v6365_v5, %v8058_v45  ;;  %v8083_v47 = vld [vmem:[#allocation31_spill] sm:$0xff] }
 0x2b5   :  { %v6493_v41 = vpop.permute.xlu1 %817  ;;  %1516 = vrot.lane.b32.xlu0 %v1508_v51, %s4511_s10  ;;  %v596_v46 = vcombine.low %v588_v50, %v595_v13  ;;  %v2262_v51 = vmul.f32 %v6212_v52, %v8061_v28  ;;  %v8070_v28 = vld [vmem:[#allocation85_spill] sm:$0xff] }
 0x2b6   :  { %2446 = vrot.lane.b32.xlu1 %v2437_v1, %s4567_s20  ;;  %v1476_v61 = vadd.f32 %v1470_v18, %v1446_v29  ;;  %v2467_v1 = vmul.f32 %v6365_v5, %v8064_v40  ;;  %v8068_v29 = vld [vmem:[#allocation17_spill] sm:$0xff]  ;;  %v2320_v40 = vmul.f32 %v6212_v52, %v5541_v14  ;;  %v2758_v14 = vmul.f32 %v6365_v5, %v6374_v58 }
 0x2b7   :  { %v6505_v54 = vpop.permute.xlu0 %2329  ;;  %603 = vst.msk [vmem:[#allocation4] sm:$0x3f] %vm602_vm4, %v596_v46  ;;  %v2291_v46 = vmul.f32 %v6212_v52, %v5224_v63  ;;  %v2736_v44 = vmul.f32 %v6212_v52, %v8068_v29  ;;  %v2734_v63 = vmul.f32 %v6365_v5, %v8068_v29  ;;  %vm8119_vm4 = vcmask 687104  }
 0x2b8   :  { %8060 = vst [vmem:[#allocation67_spill] sm:$0xff] %v6505_v54  ;;  %v1506_v15 = vadd.f32 %v1500_v38, %v1476_v61 }
 0x2b9   :  { %v6509_v55 = vpop.permute.xlu1 %1914  ;;  %2720 = vrot.lane.b32.xlu0 %v2712_v48, %s7884_s5 }
 0x2ba   :  { %8062 = vst [vmem:[#allocation74_spill] sm:$0xff] %v6509_v55  ;;  %2273 = vrot.lane.b32.xlu1 %v2262_v51, %s4556_s19  ;;  %v2497_v51 = vmul.f32 %v6365_v5, %v8070_v28 }
 0x2bb   :  { %v6513_v13 = vpop.permute.xlu0 %2356 }
 0x2bc   :  { %8063 = vst [vmem:[#allocation99_spill] sm:$0xff] %v6513_v13  ;;  %v8082_v13 = vld [vmem:[#allocation16_spill] sm:$0xff] }
 0x2bd   :  { %v6517_v50 = vpop.permute.xlu1 %1912  ;;  %1512 = vrot.lane.b32.xlu0 %v1506_v15, %s4511_s10 }
 0x2be   :  { %8065 = vst [vmem:[#allocation108_spill] sm:$0xff] %v6517_v50  ;;  %2476 = vrot.lane.b32.xlu1 %v2467_v1, %s4569_s13 }
 0x2bf   :  { %v6523_v18 = vpop.permute.xlu0 %2354 }
 0x2c0   :  { %8066 = vst [vmem:[#allocation113_spill] sm:$0xff] %v6523_v18  ;;  %v6573_v18 = vld [vmem:[%s7604_s0 + $0x8] sm:$0xff] }
 0x2c1   :  { %v6527_v48 = vpop.permute.xlu1 %1940  ;;  %2716 = vrot.lane.b32.xlu0 %v2710_v23, %s7884_s5  ;;  %v2760_v23 = vmul.f32 %v6212_v52, %v6374_v58 }
 0x2c2   :  { %8067 = vst [vmem:[#allocation107_spill] sm:$0xff] %v6527_v48  ;;  %2302 = vrot.lane.b32.xlu1 %v2291_v46, %s4557_s24 }
 0x2c3   :  { %v6533_v38 = vpop.permute.xlu0 %2388 }
 0x2c4   :  { %8069 = vst [vmem:[#allocation84_spill] sm:$0xff] %v6533_v38 }
 0x2c5   :  { %v6537_v61 = vpop.permute.xlu1 %1962  ;;  %2744 = vrot.lane.b32.xlu0 %v2736_v44, %s8072_s27  ;;  %v8076_v44 = vld [vmem:[#allocation60_spill] sm:$0xff] }
 0x2c6   :  { %8071 = vst [vmem:[#allocation122_spill] sm:$0xff] %v6537_v61  ;;  %2506 = vrot.lane.b32.xlu1 %v2497_v51, %s4570_s28  ;;  %v2527_v28 = vmul.f32 %v6365_v5, %v8076_v44  ;;  %s8341_s28 = smov 105  }
 0x2c7   :  { %v6543_v15 = vpop.permute.xlu0 %2384 }
 0x2c8   :  { %8073 = vst [vmem:[#allocation155_spill] sm:$0xff] %v6543_v15 }
 0x2c9   :  { %v6547_v1 = vpop.permute.xlu1 %1960  ;;  %2740 = vrot.lane.b32.xlu0 %v2734_v63, %s8072_s27 }
 0x2ca   :  { %8074 = vst [vmem:[#allocation115_spill] sm:$0xff] %v6547_v1  ;;  %2331 = vrot.lane.b32.xlu1 %v2320_v40, %s4558_s14  ;;  %v2349_v40 = vmul.f32 %v6212_v52, %v5564_v4  ;;  %v8085_v4 = vld [vmem:[#allocation96_spill] sm:$0xff] }
 0x2cb   :  { %v6553_v46 = vpop.permute.xlu0 %2418  ;;  %v2557_v38 = vmul.f32 %v6365_v5, %v8085_v4 }
 0x2cc   :  { %8075 = vst [vmem:[#allocation38_spill] sm:$0xff] %v6553_v46 }
 0x2cd   :  { %v6557_v51 = vpop.permute.xlu1 %1988  ;;  %2768 = vrot.lane.b32.xlu0 %v2760_v23, %s8078_s6  ;;  %v8081_v23 = vld [vmem:[#allocation15_spill] sm:$0xff] }
 0x2ce   :  { %8077 = vst [vmem:[#allocation91_spill] sm:$0xff] %v6557_v51  ;;  %2536 = vrot.lane.b32.xlu1 %v2527_v28, %s4571_s29  ;;  %v862_v28 = vmul.f32 %v6573_v18, %v8081_v23  ;;  %v8089_v23 = vld [vmem:[#allocation20_spill] sm:$0xff] }
 0x2cf   :  { %v6563_v63 = vpop.permute.xlu0 %2414 }
 0x2d0   :  { %8079 = vst [vmem:[#allocation129_spill] sm:$0xff] %v6563_v63  ;;  %v881_v63 = vsel %vm632_vm10, %v8083_v47, %v8082_v13  ;;  %v8092_v13 = vld [vmem:[#allocation22_spill] sm:$0xff] }
 0x2d1   :  { %v6567_v15 = vpop.permute.xlu1 %2011  ;;  %2764 = vrot.lane.b32.xlu0 %v2758_v14, %s8078_s6  ;;  %v8086_v14 = vld [vmem:[#allocation18_spill] sm:$0xff]  ;;  %v886_v61 = vadd.f32 %v881_v63, %v862_v28  ;;  %v8097_v63 = vld [vmem:[#allocation44_spill] sm:$0xff] }
 0x2d2   :  { %8080 = vst [vmem:[#allocation124_spill] sm:$0xff] %v6567_v15  ;;  %2360 = vrot.lane.b32.xlu1 %v2349_v40, %s4564_s9  ;;  %v8087_v15 = vld [vmem:[#allocation34_spill] sm:$0xff]  ;;  %v8090_v40 = vld [vmem:[#allocation37_spill] sm:$0xff] }
 0x2d3   :  { %v6581_v46 = vpop.permute.xlu0 %2448  ;;  %v905_v54 = vsel %vm7813_vm11, %v8087_v15, %v8086_v14  ;;  %v930_v50 = vsel %vm7812_vm12, %v8090_v40, %v8089_v23  ;;  %v8095_v15 = vld [vmem:[#allocation106_spill] sm:$0xff]  ;;  %v8096_v14 = vld [vmem:[#allocation24_spill] sm:$0xff]  ;;  %v8099_v23 = vld [vmem:[#allocation51_spill] sm:$0xff] }
 0x2d4   :  { %8084 = vst [vmem:[#allocation97_spill] sm:$0xff] %v6581_v46  ;;  %v910_v55 = vadd.f32 %v905_v54, %v886_v61  ;;  %v8093_v46 = vld [vmem:[#allocation40_spill] sm:$0xff] }
 0x2d5   :  { %v6588_v1 = vpop.permute.xlu1 %2009  ;;  %v955_v5 = vsel %vm7808_vm13, %v8093_v46, %v8092_v13  ;;  %v4415_v54 = vld [vmem:[%s7604_s0] sm:$0xff]  ;;  %v8100_v46 = vld [vmem:[#allocation26_spill] sm:$0xff] }
 0x2d6   :  { %8088 = vst [vmem:[#allocation138_spill] sm:$0xff] %v6588_v1  ;;  %2566 = vrot.lane.b32.xlu1 %v2557_v38, %s4572_s23  ;;  %v935_v48 = vadd.f32 %v930_v50, %v910_v55  ;;  %v979_v38 = vsel %vm7811_vm14, %v8097_v63, %v8096_v14  ;;  %v2556_v61 = vmul.f32 %v4415_v54, %v8085_v4  ;;  %v8102_v13 = vld [vmem:[#allocation27_spill] sm:$0xff] }
 0x2d7   :  { %v6594_v47 = vpop.permute.xlu0 %2444  ;;  %v1003_v40 = vsel %vm707_vm15, %v8100_v46, %v8099_v23  ;;  %v8107_v23 = vld [vmem:[#allocation101_spill] sm:$0xff] }
 0x2d8   :  { %8091 = vst [vmem:[#allocation42_spill] sm:$0xff] %v6594_v47  ;;  %v960_v28 = vadd.f32 %v955_v5, %v935_v48  ;;  %v8104_v5 = vmov 0   ;;  %v6626_v47 = vld [vmem:[%s7604_s0 + $0x10] sm:$0xff] }
 0x2d9   :  { %v6599_v51 = vpop.permute.xlu1 %2038  ;;  %8106 = vst [vmem:[#allocation153_spill] sm:$0xff] %v6626_v47  ;;  %v2588_v46 = vmul.f32 %v6626_v47, %v8107_v23 }
 0x2da   :  { %8094 = vst [vmem:[#allocation104_spill] sm:$0xff] %v6599_v51  ;;  %2673 = vperm.xlu1 %4311, %v8095_v15   ;;  %v984_v50 = vadd.f32 %v979_v38, %v960_v28  ;;  %v8103_v15 = vld [vmem:[#allocation55_spill] sm:$0xff]  ;;  %v8108_v38 = vld [vmem:[#allocation29_spill] sm:$0xff]  ;;  %v8109_v28 = vld [vmem:[#allocation58_spill] sm:$0xff] }
 0x2db   :  { %v6605_v1 = vpop.permute.xlu0 %2478  ;;  %v1027_v48 = vsel %vm7810_vm0, %v8103_v15, %v8102_v13  ;;  %v8114_v51 = vld [vmem:[#allocation36_spill] sm:$0xff] }
 0x2dc   :  { %8098 = vst [vmem:[#allocation148_spill] sm:$0xff] %v6605_v1  ;;  %v1008_v14 = vadd.f32 %v1003_v40, %v984_v50  ;;  %v8111_v40 = vld [vmem:[#allocation32_spill] sm:$0xff]  ;;  %v8112_v50 = vld [vmem:[#allocation61_spill] sm:$0xff]  ;;  %v1101_v58 = vsel %vm7814_vm5, %v8016_v22, %v8114_v51 }
 0x2dd   :  { %v6614_v55 = vpop.permute.xlu1 %2060  ;;  %v1077_v15 = vsel %vm8113_vm8, %v8112_v50, %v8111_v40  ;;  %v1149_v40 = vsel %vm8119_vm4, %v5712_v59, %v8018_v12  ;;  %vm8123_vm8 = vcmask 670720   ;;  %vm8129_vm4 = vcmask 523264  }
 0x2de   :  { %8101 = vst [vmem:[#allocation132_spill] sm:$0xff] %v6614_v55  ;;  %2564 = vrot.lane.b32.xlu1 %v2556_v61, %s4572_s23  ;;  %v1052_v61 = vsel %vm8110_vm2, %v8109_v28, %v8108_v38  ;;  %v1032_v13 = vadd.f32 %v1027_v48, %v1008_v14  ;;  %v2586_v55 = vmul.f32 %v4415_v54, %v8107_v23  ;;  %v8115_v48 = vld [vmem:[#allocation41_spill] sm:$0xff]  ;;  %vm8121_vm2 = vcmask 678912  }
 0x2df   :  { %4313 = vset.pattern.permute.xlu1 %v8104_v5  ;;  %v6621_v63 = vpop.permute.xlu0 %2474  ;;  %v1125_v14 = vsel %vm8116_vm9, %v5667_v32, %v8115_v48  ;;  %v1199_v50 = vsel %vm8123_vm8, %v5796_v11, %v8023_v27  ;;  %vm8125_vm9 = vcmask 531456   ;;  %v8128_v11 = vld [vmem:[#allocation86_spill] sm:$0xff]  ;;  %vm8135_vm8 = vcmask 506880  }
 0x2e0   :  { %8105 = vst [vmem:[#allocation10_spill] sm:$0xff] %v6621_v63  ;;  %v1057_v5 = vadd.f32 %v1052_v61, %v1032_v13  ;;  %v8118_v61 = vld [vmem:[#allocation111_spill] sm:$0xff]  ;;  %v1232_v12 = vsel %vm8125_vm9, %v5836_v31, %v8022_v21  ;;  %v2648_v27 = vmul.f32 %v6626_v47, %v8128_v11  ;;  %vm8139_vm9 = vcmask 498688  }
 0x2e1   :  { %v6633_v1 = vpop.permute.xlu1 %2058  ;;  %v2618_v13 = vmul.f32 %v6626_v47, %v8118_v61 }
 0x2e2   :  { %2598 = vrot.lane.b32.xlu1 %v2588_v46, %s4573_s26  ;;  %v1082_v38 = vadd.f32 %v1077_v15, %v1057_v5  ;;  %v2616_v5 = vmul.f32 %v4415_v54, %v8118_v61 }
 0x2e3   :  { %v6639_v63 = vpop.permute.xlu0 %2508 }
 0x2e4   :  { %v1106_v46 = vadd.f32 %v1101_v58, %v1082_v38  ;;  %v614_v38 = vmul.f32 %v6573_v18, %v5756_v35 }
 0x2e5   :  { %v6645_v29 = vpop.permute.xlu1 %2086 }
 0x2e6   :  { %2594 = vrot.lane.b32.xlu1 %v2586_v55, %s4573_s26  ;;  %v1130_v51 = vadd.f32 %v1125_v14, %v1106_v46  ;;  %v1174_v55 = vsel %vm8121_vm2, %v8024_v57, %v5766_v0  ;;  %v8126_v0 = vld [vmem:[#allocation105_spill] sm:$0xff]  ;;  %v1262_v46 = vsel %vm8129_vm4, %v5876_v10, %v8026_v42  ;;  %vm8131_vm2 = vcmask 515072  }
 0x2e7   :  { %v6651_v28 = vpop.permute.xlu0 %2504  ;;  %v634_v57 = vsel %vm632_vm10, %v8126_v0, %v5700_v24  ;;  %vm8141_vm4 = vcmask 359424  }
 0x2e8   :  { %8117 = vst [vmem:[#allocation21_spill] sm:$0xff] %v6651_v28  ;;  %v1154_v32 = vadd.f32 %v1149_v40, %v1130_v51  ;;  %v639_v40 = vadd.f32 %v634_v57, %v614_v38  ;;  %v1292_v51 = vsel %vm8131_vm2, %v8034_v17, %v5710_v56  ;;  %v8136_v56 = vld [vmem:[#allocation95_spill] sm:$0xff]  ;;  %vm8145_vm2 = vcmask 695296  }
 0x2e9   :  { %v6658_v22 = vpop.permute.xlu1 %2108  ;;  %v709_v17 = vsel %vm707_vm15, %v8136_v56, %v6092_v19  ;;  %v1351_v19 = vsel %vm8139_vm9, %v8043_v49, %v6052_v3  ;;  %vm8161_vm9 = vmmov %vm8145_vm2 }
 0x2ea   :  { %8120 = vst [vmem:[#allocation43_spill] sm:$0xff] %v6658_v22  ;;  %2628 = vrot.lane.b32.xlu1 %v2618_v13, %s4574_s16  ;;  %v1179_v59 = vadd.f32 %v1174_v55, %v1154_v32  ;;  %v8130_v13 = vld [vmem:[#allocation83_spill] sm:$0xff]  ;;  %v8132_v55 = vld [vmem:[#allocation89_spill] sm:$0xff]  ;;  %v8220_v22 = vld [vmem:[#allocation100_spill] sm:$0xff] }
 0x2eb   :  { %v6664_v58 = vpop.permute.xlu0 %2538  ;;  %v659_v31 = vsel %vm7813_vm11, %v8130_v13, %v5982_v16  ;;  %v684_v32 = vsel %vm7811_vm14, %v8132_v55, %v6042_v6  ;;  %v2646_v16 = vmul.f32 %v4415_v54, %v8128_v11  ;;  %v6717_v6 = vld [vmem:[%s7604_s0] sm:$0xff] }
 0x2ec   :  { %8122 = vst [vmem:[#allocation109_spill] sm:$0xff] %v6664_v58  ;;  %v1204_v48 = vadd.f32 %v1199_v50, %v1179_v59  ;;  %v664_v10 = vadd.f32 %v659_v31, %v639_v40  ;;  %v8134_v50 = vld [vmem:[#allocation80_spill] sm:$0xff]  ;;  %v613_v54 = vmul.f32 %v6717_v6, %v5756_v35  ;;  %v8196_v58 = vld [vmem:[#allocation54_spill] sm:$0xff] }
 0x2ed   :  { %v6670_v15 = vpop.permute.xlu1 %2106  ;;  %v633_v59 = vsel %vm632_vm10, %v8134_v50, %v8126_v0 }
 0x2ee   :  { %8124 = vst [vmem:[#allocation135_spill] sm:$0xff] %v6670_v15  ;;  %2624 = vrot.lane.b32.xlu1 %v2616_v5, %s4574_s16  ;;  %v1238_v24 = vadd.f32 %v1232_v12, %v1204_v48  ;;  %v1321_v12 = vsel %vm8135_vm8, %v8037_v53, %v5992_v20  ;;  %v689_v0 = vadd.f32 %v684_v32, %v664_v10  ;;  %v8138_v20 = vld [vmem:[#allocation120_spill] sm:$0xff]  ;;  %v8140_v48 = vld [vmem:[#allocation102_spill] sm:$0xff]  ;;  %v8144_v10 = vld [vmem:[#allocation121_spill] sm:$0xff]  ;;  %vm8151_vm8 = vcmask 687104  }
 0x2ef   :  { %v6681_v14 = vpop.permute.xlu0 %2534  ;;  %v658_v53 = vsel %vm7813_vm11, %v8138_v20, %v8130_v13  ;;  %v638_v35 = vadd.f32 %v633_v59, %v613_v54  ;;  %v1381_v13 = vsel %vm8141_vm4, %v8046_v34, %v6102_v25  ;;  %v4418_v25 = vld [vmem:[%s7604_s0 + $0x10] sm:$0xff]  ;;  %vm8162_vm4 = vmmov %vm8151_vm8 }
 0x2f0   :  { %8127 = vst [vmem:[#allocation46_spill] sm:$0xff] %v6681_v14  ;;  %v1268_v5 = vadd.f32 %v1262_v46, %v1238_v24  ;;  %v2687_v46 = vmul.f32 %v6626_v47, %v5887_v26  ;;  %v714_v24 = vadd.f32 %v709_v17, %v689_v0  ;;  %v1411_v26 = vsel %vm1409_vm6, %v8050_v33, %v6162_v9  ;;  %v8148_v54 = vld [vmem:[#allocation93_spill] sm:$0xff]  ;;  %v8149_v33 = vld [vmem:[#allocation136_spill] sm:$0xff]  ;;  %v8150_v0 = vld [vmem:[#allocation130_spill] sm:$0xff] }
 0x2f1   :  { %v6691_v21 = vpop.permute.xlu1 %2134  ;;  %v663_v32 = vadd.f32 %v658_v53, %v638_v35  ;;  %v2529_v17 = vmul.f32 %v6212_v52, %v8076_v44  ;;  %v683_v9 = vsel %vm7811_vm14, %v8148_v54, %v8132_v55  ;;  %v827_v20 = vsel %vm8151_vm8, %v8150_v0, %v6437_v43  ;;  %v8152_v55 = vld [vmem:[#allocation146_spill] sm:$0xff]  ;;  %v8153_v43 = vld [vmem:[#allocation35_spill] sm:$0xff]  ;;  %v8202_v14 = vld [vmem:[#allocation65_spill] sm:$0xff] }
 0x2f2   :  { %2658 = vrot.lane.b32.xlu1 %v2648_v27, %s4575_s11  ;;  %v1298_v38 = vadd.f32 %v1292_v51, %v1268_v5  ;;  %v734_v27 = vsel %vm7810_vm0, %v8140_v48, %v6152_v2  ;;  %v8142_v51 = vld [vmem:[#allocation112_spill] sm:$0xff]  ;;  %v8217_v15 = vld [vmem:[#allocation94_spill] sm:$0xff] }
 0x2f3   :  { %v6700_v42 = vpop.permute.xlu0 %2568  ;;  %v767_v3 = vsel %vm7814_vm5, %v8142_v51, %v6221_v8  ;;  %v739_v5 = vadd.f32 %v734_v27, %v714_v24  ;;  %v8146_v8 = vld [vmem:[#allocation49_spill] sm:$0xff] }
 0x2f4   :  { %8133 = vst [vmem:[#allocation48_spill] sm:$0xff] %v6700_v42  ;;  %v1327_v31 = vadd.f32 %v1321_v12, %v1298_v38  ;;  %v1537_v34 = vmul.f32 %v4418_v25, %v8146_v8  ;;  %v1441_v38 = vsel %vm1439_vm7, %v8054_v30, %v8040_v60  ;;  %v8195_v42 = vld [vmem:[#allocation82_spill] sm:$0xff] }
 0x2f5   :  { %v6712_v57 = vpop.permute.xlu1 %2156  ;;  %v773_v59 = vadd.f32 %v767_v3, %v739_v5 }
 0x2f6   :  { %8137 = vst [vmem:[#allocation85_spill] sm:$0xff] %v6712_v57  ;;  %2654 = vrot.lane.b32.xlu1 %v2646_v16, %s4575_s11  ;;  %v1357_v2 = vadd.f32 %v1351_v19, %v1327_v31  ;;  %v797_v16 = vsel %vm8145_vm2, %v8144_v10, %v6315_v7  ;;  %v708_v7 = vsel %vm707_vm15, %v8149_v33, %v8136_v56  ;;  %vm8184_vm2 = vcmask 482304   ;;  %v8214_v57 = vld [vmem:[#allocation127_spill] sm:$0xff] }
 0x2f7   :  { %v6733_v40 = vpop.permute.xlu0 %2390  ;;  %v688_v19 = vadd.f32 %v683_v9, %v663_v32  ;;  %v803_v27 = vadd.f32 %v797_v16, %v773_v59  ;;  %v1471_v56 = vsel %vm1469_vm1, %v6335_v36, %v8045_v37  ;;  %v1561_v24 = vadd.f32 %v8153_v43, %v1537_v34  ;;  %v8156_v36 = vld [vmem:[#allocation39_spill] sm:$0xff]  ;;  %vm8197_vm8 = vmmov %vm8184_vm2 }
 0x2f8   :  { %v1387_v50 = vadd.f32 %v1381_v13, %v1357_v2  ;;  %v1501_v13 = vsel %vm7806_vm3, %v6459_v62, %v8052_v39  ;;  %v2711_v62 = vmul.f32 %v6626_v47, %v8058_v45  ;;  %v8164_v45 = vld [vmem:[#allocation50_spill] sm:$0xff]  ;;  %vm1820_vm3 = vcmask 834560  }
 0x2f9   :  { %v6741_v49 = vpop.permute.xlu1 %2154  ;;  %v713_v60 = vadd.f32 %v708_v7, %v688_v19  ;;  %v833_v35 = vadd.f32 %v827_v20, %v803_v27  ;;  %v1585_v37 = vadd.f32 %v8156_v36, %v1561_v24 }
 0x2fa   :  { %8143 = vst [vmem:[#allocation60_spill] sm:$0xff] %v6741_v49  ;;  %2694 = vrot.lane.b32.xlu1 %v2687_v46, %s4497_s22  ;;  %v1417_v44 = vadd.f32 %v1411_v26, %v1387_v50  ;;  %v733_v46 = vsel %vm7810_vm0, %v8152_v55, %v8140_v48  ;;  %v8157_v26 = vld [vmem:[#allocation117_spill] sm:$0xff]  ;;  %v8213_v49 = vld [vmem:[#allocation88_spill] sm:$0xff] }
 0x2fb   :  { %v6754_v12 = vpop.permute.xlu0 %2596  ;;  %v738_v32 = vadd.f32 %v733_v46, %v713_v60  ;;  %v766_v16 = vsel %vm7814_vm5, %v8157_v26, %v8142_v51  ;;  %v8159_v50 = vld [vmem:[#allocation45_spill] sm:$0xff]  ;;  %v826_v51 = vsel %vm8162_vm4, %v6493_v41, %v8150_v0  ;;  %v2559_v41 = vmul.f32 %v6212_v52, %v8085_v4  ;;  %v8167_v0 = vld [vmem:[#allocation62_spill] sm:$0xff] }
 0x2fc   :  { %8147 = vst [vmem:[#allocation15_spill] sm:$0xff] %v6754_v12  ;;  %v1447_v30 = vadd.f32 %v1441_v38, %v1417_v44  ;;  %v1609_v59 = vadd.f32 %v8159_v50, %v1585_v37  ;;  %v8166_v44 = vld [vmem:[#allocation57_spill] sm:$0xff]  ;;  %v8172_v4 = vld [vmem:[#allocation114_spill] sm:$0xff]  ;;  %v2589_v26 = vmul.f32 %v6212_v52, %v8107_v23  ;;  %vm1675_vm4 = vcmask 998400  }
 0x2fd   :  { %v6770_v53 = vpop.permute.xlu1 %2183  ;;  %v772_v34 = vadd.f32 %v766_v16, %v738_v32  ;;  %v8174_v16 = vld [vmem:[#allocation123_spill] sm:$0xff]  ;;  %v8181_v23 = vld [vmem:[#allocation150_spill] sm:$0xff] }
 0x2fe   :  { %2540 = vrot.lane.b32.xlu1 %v2529_v17, %s4571_s29  ;;  %v1477_v2 = vadd.f32 %v1471_v56, %v1447_v30  ;;  %v8160_v17 = vld [vmem:[#allocation126_spill] sm:$0xff]  ;;  %v1633_v20 = vadd.f32 %v8164_v45, %v1609_v59  ;;  %v8169_v56 = vld [vmem:[#allocation69_spill] sm:$0xff]  ;;  %v8176_v59 = vld [vmem:[#allocation131_spill] sm:$0xff] }
 0x2ff   :  { %v6779_v31 = vpop.permute.xlu0 %2420  ;;  %v796_v54 = vsel %vm8161_vm9, %v8160_v17, %v8144_v10  ;;  %v8170_v30 = vld [vmem:[#allocation17_spill] sm:$0xff]  ;;  %vm1650_vm9 = vcmask 1006592  }
 0x300   :  { %v1507_v48 = vadd.f32 %v1501_v13, %v1477_v2  ;;  %v802_v33 = vadd.f32 %v796_v54, %v772_v34  ;;  %v1658_v10 = vadd.f32 %v8166_v44, %v1633_v20  ;;  %v8171_v13 = vld [vmem:[#allocation76_spill] sm:$0xff]  ;;  %v8177_v54 = vld [vmem:[#allocation66_spill] sm:$0xff] }
 0x301   :  { %v6785_v3 = vpop.permute.xlu1 %2211 }
 0x302   :  { %8154 = vst [vmem:[#allocation16_spill] sm:$0xff] %v6785_v3  ;;  %840 = vrot.lane.b32.xlu1 %v833_v35, %s7899_s12  ;;  %v832_v7 = vadd.f32 %v826_v51, %v802_v33  ;;  %v1683_v55 = vadd.f32 %v8167_v0, %v1658_v10  ;;  %v2735_v35 = vmul.f32 %v6626_v47, %v8170_v30  ;;  %v8183_v30 = vld [vmem:[#allocation25_spill] sm:$0xff] }
 0x303   :  { %v6788_v5 = vpop.permute.xlu0 %2626  ;;  %v2759_v51 = vmul.f32 %v6626_v47, %v8177_v54  ;;  %v8187_v54 = vld [vmem:[#allocation63_spill] sm:$0xff]  ;;  %v8210_v3 = vld [vmem:[#allocation81_spill] sm:$0xff] }
 0x304   :  { %8155 = vst [vmem:[#allocation31_spill] sm:$0xff] %v6788_v5  ;;  %v1707_v60 = vadd.f32 %v8169_v56, %v1683_v55  ;;  %v8192_v5 = vld [vmem:[#allocation79_spill] sm:$0xff] }
 0x305   :  { %v6794_v25 = vpop.permute.xlu1 %2209 }
 0x306   :  { %8158 = vst [vmem:[#allocation96_spill] sm:$0xff] %v6794_v25  ;;  %1514 = vrot.lane.b32.xlu1 %v1507_v48, %s4511_s10  ;;  %v1731_v32 = vadd.f32 %v8171_v13, %v1707_v60  ;;  %v2619_v60 = vmul.f32 %v6212_v52, %v8118_v61  ;;  %v8189_v61 = vld [vmem:[#allocation75_spill] sm:$0xff]  ;;  %v8209_v25 = vld [vmem:[#allocation78_spill] sm:$0xff] }
 0x307   :  { %v6799_v39 = vpop.permute.xlu0 %2450 }
 0x308   :  { %v1755_v48 = vadd.f32 %v8172_v4, %v1731_v32 }
 0x309   :  { %v6808_v9 = vpop.permute.xlu1 %2242 }
 0x30a   :  { %2718 = vrot.lane.b32.xlu1 %v2711_v62, %s7884_s5  ;;  %v1779_v34 = vadd.f32 %v8174_v16, %v1755_v48  ;;  %v8185_v48 = vld [vmem:[#allocation64_spill] sm:$0xff] }
 0x30b   :  { %v6811_v38 = vpop.permute.xlu0 %2656 }
 0x30c   :  { %8163 = vst [vmem:[#allocation18_spill] sm:$0xff] %v6811_v38  ;;  %v1803_v17 = vadd.f32 %v8176_v59, %v1779_v34  ;;  %v8191_v38 = vld [vmem:[#allocation77_spill] sm:$0xff] }
 0x30d   :  { %v6814_v19 = vpop.permute.xlu1 %2269 }
 0x30e   :  { %8165 = vst [vmem:[#allocation34_spill] sm:$0xff] %v6814_v19  ;;  %838 = vrot.lane.b32.xlu1 %v832_v7, %s7899_s12  ;;  %v8179_v7 = vld [vmem:[#allocation140_spill] sm:$0xff]  ;;  %v8208_v19 = vld [vmem:[#allocation103_spill] sm:$0xff] }
 0x30f   :  { %v6818_v27 = vpop.permute.xlu0 %2480  ;;  %v1828_v20 = vadd.f32 %v8179_v7, %v1803_v17  ;;  %v1535_v17 = vmul.f32 %v6717_v6, %v8146_v8  ;;  %v8193_v6 = vld [vmem:[#allocation137_spill] sm:$0xff] }
 0x311   :  { %v6823_v46 = vpop.permute.xlu1 %2267 }
 0x312   :  { %8168 = vst [vmem:[#allocation20_spill] sm:$0xff] %v6823_v46  ;;  %2570 = vrot.lane.b32.xlu1 %v2559_v41, %s4572_s23  ;;  %v1853_v41 = vadd.f32 %v8181_v23, %v1828_v20  ;;  %v8188_v20 = vld [vmem:[#allocation72_spill] sm:$0xff] }
 0x313   :  { %v6829_v24 = vpop.permute.xlu0 %2510 }
 0x315   :  { %v6832_v2 = vpop.permute.xlu1 %2300 }
 0x316   :  { %2742 = vrot.lane.b32.xlu1 %v2735_v35, %s8072_s27  ;;  %v1877_v35 = vadd.f32 %v8183_v30, %v1853_v41  ;;  %v1578_v41 = vsel %vm7813_vm11, %v8189_v61, %v8188_v20  ;;  %v1626_v61 = vsel %vm7808_vm13, %v8196_v58, %v8195_v42  ;;  %v8203_v58 = vld [vmem:[#allocation142_spill] sm:$0xff] }
 0x317   :  { %v6836_v37 = vpop.permute.xlu0 %2696 }
 0x318   :  { %8173 = vst [vmem:[#allocation37_spill] sm:$0xff] %v6836_v37  ;;  %v2649_v37 = vmul.f32 %v6212_v52, %v8128_v11  ;;  %v8198_v11 = vld [vmem:[#allocation107_spill] sm:$0xff] }
 0x319   :  { %v6841_v62 = vpop.permute.xlu1 %2327 }
 0x31a   :  { %8175 = vst [vmem:[#allocation22_spill] sm:$0xff] %v6841_v62  ;;  %2600 = vrot.lane.b32.xlu1 %v2589_v26, %s4573_s26  ;;  %v8186_v26 = vld [vmem:[#allocation68_spill] sm:$0xff]  ;;  %v8207_v62 = vld [vmem:[#allocation91_spill] sm:$0xff] }
 0x31b   :  { %v6847_v33 = vpop.permute.xlu0 %2692  ;;  %v1554_v34 = vsel %vm632_vm10, %v8186_v26, %v8185_v48  ;;  %v1602_v26 = vsel %vm7812_vm12, %v8192_v5, %v8191_v38 }
 0x31c   :  { %8178 = vst [vmem:[#allocation40_spill] sm:$0xff] %v6847_v33  ;;  %v1559_v33 = vadd.f32 %v1554_v34, %v1535_v17  ;;  %v8199_v17 = vld [vmem:[#allocation87_spill] sm:$0xff] }
 0x31d   :  { %v6850_v10 = vpop.permute.xlu1 %2325 }
 0x31e   :  { %8180 = vst [vmem:[#allocation106_spill] sm:$0xff] %v6850_v10  ;;  %2766 = vrot.lane.b32.xlu1 %v2759_v51, %s8078_s6  ;;  %v1901_v51 = vadd.f32 %v8187_v54, %v1877_v35 }
 0x31f   :  { %v6854_v55 = vpop.permute.xlu0 %842 }
 0x320   :  { %8182 = vst [vmem:[#allocation24_spill] sm:$0xff] %v6854_v55  ;;  %851 = vst.msk [vmem:[#allocation3 + $0x10] sm:$0xff] %vm8184_vm2, %v6854_v55  ;;  %v1925_v12 = vadd.f32 %v8193_v6, %v1901_v51  ;;  %vm8215_vm2 = vcmask 850944  }
 0x321   :  { %v6861_v32 = vpop.permute.xlu1 %2358 }
 0x322   :  { %2630 = vrot.lane.b32.xlu1 %v2619_v60, %s4574_s16  ;;  %v1583_v60 = vadd.f32 %v1578_v41, %v1559_v33  ;;  %v1949_v34 = vadd.f32 %v8198_v11, %v1925_v12  ;;  %v8201_v41 = vld [vmem:[#allocation92_spill] sm:$0xff] }
 0x323   :  { %v1676_v28 = vsel %vm1675_vm4, %v8202_v14, %v8201_v41  ;;  %v8211_v14 = vld [vmem:[#allocation118_spill] sm:$0xff] }
 0x324   :  { %v1607_v52 = vadd.f32 %v1602_v26, %v1583_v60  ;;  %v8205_v26 = vld [vmem:[#allocation98_spill] sm:$0xff]  ;;  %v8206_v60 = vld [vmem:[#allocation73_spill] sm:$0xff] }
 0x325   :  { %v6875_v47 = vpop.permute.xlu1 %2386 }
 0x326   :  { %8190 = vst [vmem:[#allocation44_spill] sm:$0xff] %v6875_v47  ;;  %2660 = vrot.lane.b32.xlu1 %v2649_v37, %s4575_s11  ;;  %v8200_v37 = vld [vmem:[#allocation90_spill] sm:$0xff]  ;;  %v1631_v51 = vadd.f32 %v1626_v61, %v1607_v52  ;;  %v1973_v47 = vadd.f32 %v8203_v58, %v1949_v34  ;;  %v1724_v61 = vsel %vm707_vm15, %v8209_v25, %v8208_v19 }
 0x327   :  { %v6882_v35 = vpop.permute.xlu0 %1516  ;;  %v1651_v33 = vsel %vm1650_vm9, %v8200_v37, %v8199_v17  ;;  %v8218_v25 = vld [vmem:[#allocation134_spill] sm:$0xff] }
 0x328   :  { %8194 = vst [vmem:[#allocation51_spill] sm:$0xff] %v6882_v35  ;;  %1525 = vst.msk [vmem:[#allocation3 + $0x28] sm:$0xff] %vm8197_vm8, %v6882_v35  ;;  %v1656_v55 = vadd.f32 %v1651_v33, %v1631_v51  ;;  %v1700_v35 = vsel %vm7811_vm14, %v8206_v60, %v8205_v26  ;;  %v1998_v46 = vadd.f32 %v8207_v62, %v1973_v47  ;;  %v8212_v51 = vld [vmem:[#allocation147_spill] sm:$0xff]  ;;  %vm8219_vm8 = vcmask 842752  }
 0x329   :  { %v2216_v5 = vpop.permute.xlu1 %2215  ;;  %v1748_v33 = vsel %vm7810_vm0, %v8211_v14, %v8210_v3  ;;  %v1772_v60 = vsel %vm8215_vm2, %v8214_v57, %v8213_v49  ;;  %v8221_v14 = vld [vmem:[#allocation144_spill] sm:$0xff]  ;;  %v1555_v57 = vsel %vm632_vm10, %v8185_v48, %v8153_v43  ;;  %vm1845_vm2 = vcmask 826368  }
 0x32a   :  { %v1681_v12 = vadd.f32 %v1676_v28, %v1656_v55  ;;  %v8216_v55 = vld [vmem:[#allocation104_spill] sm:$0xff]  ;;  %v1603_v43 = vsel %vm7812_vm12, %v8191_v38, %v8159_v50  ;;  %v1652_v50 = vsel %vm1650_vm9, %v8199_v17, %v8166_v44  ;;  %vm8232_vm9 = vcmask 695296  }
 0x32b   :  { %v8230_v17 = vld [vmem:[#allocation128_spill] sm:$0xff]  ;;  %vm2392_vm12 = vcmask 310272  }
 0x32c   :  { %v1705_v52 = vadd.f32 %v1700_v35, %v1681_v12  ;;  %v1796_v35 = vsel %vm8219_vm8, %v8218_v25, %v8217_v15  ;;  %vm8235_vm8 = vcmask 687104  }
 0x32d   :  { %v6897_v10 = vpop.permute.xlu1 %2416 }
 0x32e   :  { %8204 = vst [vmem:[#allocation26_spill] sm:$0xff] %v6897_v10  ;;  %v1729_v34 = vadd.f32 %v1724_v61, %v1705_v52  ;;  %v2023_v10 = vadd.f32 %v8212_v51, %v1998_v46  ;;  %v1821_v61 = vsel %vm1820_vm3, %v8221_v14, %v8220_v22  ;;  %v8222_v52 = vld [vmem:[#allocation152_spill] sm:$0xff] }
 0x330   :  { %v1753_v28 = vadd.f32 %v1748_v33, %v1729_v34  ;;  %v2047_v47 = vadd.f32 %v8216_v55, %v2023_v10  ;;  %v1536_v34 = vmul.f32 %v6573_v18, %v8146_v8  ;;  %v1627_v18 = vsel %vm7808_vm13, %v8195_v42, %v8164_v45  ;;  %v2794_v42 = vld [vmem:[%s7608_s4 + $0x8] sm:$0xff] }
 0x331   :  { %v2245_v37 = vpop.permute.xlu1 %2244  ;;  %v1677_v45 = vsel %vm1675_vm4, %v8201_v41, %v8167_v0  ;;  %2803 = vperm.xlu1 %4313, %v2794_v42   ;;  %vm8237_vm13 = vcmask 359424   ;;  %v2795_v0 = vld [vmem:[%s7608_s4 + $0x10] sm:$0xff]  ;;  %v1701_v41 = vsel %vm7811_vm14, %v8205_v26, %v8169_v56  ;;  %v1749_v56 = vsel %vm7810_vm0, %v8210_v3, %v8172_v4 }
 0x332   :  { %v1777_v12 = vadd.f32 %v1772_v60, %v1753_v28  ;;  %v2071_v51 = vadd.f32 %v8222_v52, %v2047_v47  ;;  %v1579_v60 = vsel %vm7813_vm11, %v8188_v20, %v8156_v36  ;;  %v1560_v25 = vadd.f32 %v1555_v57, %v1536_v34  ;;  %v8223_v47 = vld [vmem:[#allocation110_spill] sm:$0xff]  ;;  %v8227_v57 = vld [vmem:[#allocation125_spill] sm:$0xff] }
 0x333   :  { %vm8244_vm4 = vcmask 670720   ;;  %vm2362_vm0 = vcmask 318464   ;;  %vm2015_vm14 = vcmask 654336   ;;  %vm8260_vm11 = vcmask 523264  }
 0x334   :  { %v1801_v46 = vadd.f32 %v1796_v35, %v1777_v12  ;;  %v2095_v33 = vadd.f32 %v6645_v29, %v2071_v51  ;;  %v8224_v35 = vld [vmem:[#allocation116_spill] sm:$0xff]  ;;  %v8225_v51 = vld [vmem:[#allocation19_spill] sm:$0xff] }
 0x335   :  { %v6914_v62 = vpop.permute.xlu1 %2446  ;;  %v1846_v12 = vsel %vm1845_vm2, %v8224_v35, %v8223_v47  ;;  %2808 = vperm.xlu1 %4313, %v2795_v0   ;;  %v8246_v0 = vld [vmem:[#allocation67_spill] sm:$0xff] }
 0x336   :  { %v1826_v10 = vadd.f32 %v1821_v61, %v1801_v46  ;;  %v2119_v14 = vadd.f32 %v8225_v51, %v2095_v33  ;;  %v1584_v61 = vadd.f32 %v1579_v60, %v1560_v25  ;;  %v8226_v46 = vld [vmem:[#allocation119_spill] sm:$0xff]  ;;  %v8228_v60 = vld [vmem:[#allocation28_spill] sm:$0xff] }
 0x337   :  { %v1870_v34 = vsel %vm7814_vm5, %v8227_v57, %v8226_v46  ;;  %v2793_v33 = vld [vmem:[%s7608_s4] sm:$0xff] }
 0x338   :  { %v1851_v48 = vadd.f32 %v1846_v12, %v1826_v10  ;;  %v2143_v8 = vadd.f32 %v6691_v21, %v2119_v14  ;;  %v1608_v20 = vadd.f32 %v1603_v43, %v1584_v61  ;;  %2798 = vperm.xlu0 %4312, %v2793_v33   ;;  %v8231_v12 = vld [vmem:[#allocation133_spill] sm:$0xff]  ;;  %v8234_v14 = vld [vmem:[#allocation108_spill] sm:$0xff] }
 0x339   :  { %v2274_v58 = vpop.permute.xlu1 %2273  ;;  %v1894_v43 = vsel %vm8232_vm9, %v8231_v12, %v8230_v17  ;;  %vm8245_vm9 = vcmask 850944  }
 0x33a   :  { %v1875_v38 = vadd.f32 %v1870_v34, %v1851_v48  ;;  %v1632_v10 = vadd.f32 %v1627_v18, %v1608_v20  ;;  %v2168_v25 = vadd.f32 %v8228_v60, %v2143_v8  ;;  %v8233_v48 = vld [vmem:[#allocation74_spill] sm:$0xff] }
 0x33b   :  { %v1918_v61 = vsel %vm8235_vm8, %v8234_v14, %v8233_v48  ;;  %v8236_v18 = vld [vmem:[#allocation70_spill] sm:$0xff]  ;;  %v8238_v14 = vld [vmem:[#allocation52_spill] sm:$0xff]  ;;  %vm8247_vm8 = vcmask 326656  }
 0x33c   :  { %v1657_v44 = vadd.f32 %v1652_v50, %v1632_v10  ;;  %v2219_v20 = vsel %vm8237_vm13, %v8236_v18, %v2216_v5  ;;  %v1899_v8 = vadd.f32 %v1894_v43, %v1875_v38  ;;  %v2192_v57 = vadd.f32 %v6770_v53, %v2168_v25 }
 0x33d   :  { %v6932_v28 = vpop.permute.xlu1 %2476  ;;  %v2248_v50 = vsel %vm1409_vm6, %v6808_v9, %v2245_v37  ;;  %v1725_v10 = vsel %vm707_vm15, %v8208_v19, %v8171_v13  ;;  %v8240_v37 = vld [vmem:[#allocation141_spill] sm:$0xff]  ;;  %vm8241_vm13 = vcmask 678912   ;;  %v8243_v19 = vld [vmem:[#allocation115_spill] sm:$0xff] }
 0x33e   :  { %v1682_v34 = vadd.f32 %v1677_v45, %v1657_v44  ;;  %v1923_v5 = vadd.f32 %v1918_v61, %v1899_v8  ;;  %v2225_v33 = vadd.f32 %v2219_v20, %v2192_v57  ;;  %v8239_v45 = vld [vmem:[#allocation139_spill] sm:$0xff]  ;;  %v8242_v44 = vld [vmem:[#allocation122_spill] sm:$0xff] }
 0x33f   :  { %v1942_v25 = vsel %vm8241_vm13, %v8240_v37, %v8239_v45  ;;  %v1966_v13 = vsel %vm8244_vm4, %v8243_v19, %v8242_v44  ;;  %vm1990_vm13 = vcmask 662528   ;;  %vm8248_vm4 = vcmask 842752  }
 0x340   :  { %v1706_v12 = vadd.f32 %v1701_v41, %v1682_v34  ;;  %v2254_v26 = vadd.f32 %v2248_v50, %v2225_v33  ;;  %v1947_v61 = vadd.f32 %v1942_v25, %v1923_v5  ;;  %v8249_v50 = vld [vmem:[#allocation143_spill] sm:$0xff]  ;;  %v8251_v33 = vld [vmem:[#allocation124_spill] sm:$0xff] }
 0x341   :  { %v2303_v36 = vpop.permute.xlu1 %2302 }
 0x342   :  { %v1730_v38 = vadd.f32 %v1725_v10, %v1706_v12  ;;  %v2306_v43 = vsel %vm1469_vm1, %v6832_v2, %v2303_v36  ;;  %v1971_v8 = vadd.f32 %v1966_v13, %v1947_v61  ;;  %v1797_v36 = vsel %vm8248_vm4, %v8217_v15, %v8176_v59  ;;  %v8250_v10 = vld [vmem:[#allocation145_spill] sm:$0xff] }
 0x343   :  { %v1991_v5 = vsel %vm1990_vm13, %v8250_v10, %v8249_v50  ;;  %vm8258_vm4 = vcmask 695296  }
 0x344   :  { %v1754_v4 = vadd.f32 %v1749_v56, %v1730_v38  ;;  %v1996_v56 = vadd.f32 %v1991_v5, %v1971_v8  ;;  %v1847_v38 = vsel %vm1845_vm2, %v8223_v47, %v8181_v23  ;;  %vm2482_vm2 = vcmask 171008   ;;  %v8255_v47 = vld [vmem:[#allocation149_spill] sm:$0xff]  ;;  %v8259_v8 = vld [vmem:[#allocation132_spill] sm:$0xff] }
 0x345   :  { %v6961_v35 = vpop.permute.xlu1 %2506 }
 0x346   :  { %8229 = vst [vmem:[#allocation27_spill] sm:$0xff] %v6961_v35  ;;  %v2277_v35 = vsel %vm1439_vm7, %v8238_v14, %v2274_v58  ;;  %v1773_v58 = vsel %vm8245_vm9, %v8213_v49, %v8174_v16  ;;  %vm2422_vm9 = vcmask 187392  }
 0x347   :  { %v2283_v20 = vadd.f32 %v2277_v35, %v2254_v26  ;;  %v1778_v34 = vadd.f32 %v1773_v58, %v1754_v4  ;;  %v1822_v35 = vsel %vm1820_vm3, %v8220_v22, %v8179_v7  ;;  %v8253_v22 = vld [vmem:[#allocation84_spill] sm:$0xff]  ;;  %vm2452_vm3 = vcmask 179200   ;;  %v8254_v58 = vld [vmem:[#allocation38_spill] sm:$0xff]  ;;  %v8256_v4 = vld [vmem:[#allocation151_spill] sm:$0xff] }
 0x348   :  { %v2395_v7 = vsel %vm2392_vm12, %v8253_v22, %v6733_v40  ;;  %v2425_v61 = vsel %vm2422_vm9, %v8254_v58, %v6779_v31 }
 0x349   :  { %v2332_v42 = vpop.permute.xlu1 %2331  ;;  %v2312_v57 = vadd.f32 %v2306_v43, %v2283_v20  ;;  %v1802_v59 = vadd.f32 %v1797_v36, %v1778_v34  ;;  %v1871_v43 = vsel %vm7814_vm5, %v8226_v46, %v8183_v30  ;;  %v8261_v30 = vld [vmem:[#allocation97_spill] sm:$0xff]  ;;  %vm2512_vm5 = vcmask 162816  }
 0x34a   :  { %v2335_v41 = vsel %vm8247_vm8, %v8246_v0, %v2332_v42  ;;  %v8252_v42 = vld [vmem:[#allocation138_spill] sm:$0xff]  ;;  %vm8257_vm8 = vcmask 531456   ;;  %v2455_v46 = vsel %vm2452_vm3, %v8261_v30, %v6799_v39  ;;  %v2515_v5 = vsel %vm2512_vm5, %v6639_v63, %v6829_v24  ;;  %v8273_v24 = vld [vmem:[#allocation91_spill] sm:$0xff] }
 0x34b   :  { %v2341_v49 = vadd.f32 %v2335_v41, %v2312_v57  ;;  %v2016_v12 = vsel %vm2015_vm14, %v8252_v42, %v8251_v33  ;;  %v1827_v37 = vadd.f32 %v1822_v35, %v1802_v59  ;;  %v2040_v40 = vsel %vm8257_vm8, %v8256_v4, %v8255_v47  ;;  %v8268_v59 = vld [vmem:[#allocation142_spill] sm:$0xff]  ;;  %v8276_v4 = vld [vmem:[#allocation53_spill] sm:$0xff] }
 0x34c   :  { %v2021_v25 = vadd.f32 %v2016_v12, %v1996_v56  ;;  %v1895_v41 = vsel %vm8258_vm4, %v8230_v17, %v8187_v54  ;;  %v2064_v57 = vsel %vm8260_vm11, %v6633_v1, %v8259_v8  ;;  %vm8262_vm8 = vcmask 687104   ;;  %v8263_v54 = vld [vmem:[#allocation148_spill] sm:$0xff] }
 0x34d   :  { %v6999_v3 = vpop.permute.xlu1 %2536  ;;  %v1852_v20 = vadd.f32 %v1847_v38, %v1827_v37  ;;  %v2485_v17 = vsel %vm2482_vm2, %v8263_v54, %v6818_v27  ;;  %vm8264_vm11 = vcmask 678912   ;;  %vm8267_vm4 = vcmask 515072   ;;  %v8271_v38 = vld [vmem:[#allocation135_spill] sm:$0xff] }
 0x34e   :  { %v2045_v34 = vadd.f32 %v2040_v40, %v2021_v25  ;;  %v1943_v39 = vsel %vm8264_vm11, %v8239_v45, %v8198_v11  ;;  %vm8272_vm11 = vcmask 506880   ;;  %v1992_v37 = vsel %vm1990_vm13, %v8249_v50, %v8273_v24  ;;  %v8280_v50 = vld [vmem:[#allocation60_spill] sm:$0xff]  ;;  %v8293_v24 = vld [vmem:[#allocation34_spill] sm:$0xff] }
 0x34f   :  { %v1876_v31 = vadd.f32 %v1871_v43, %v1852_v20  ;;  %vm8282_vm13 = vcmask 515072  }
 0x350   :  { %v2069_v1 = vadd.f32 %v2064_v57, %v2045_v34  ;;  %v8279_v57 = vld [vmem:[#allocation85_spill] sm:$0xff] }
 0x351   :  { %v2361_v16 = vpop.permute.xlu1 %2360  ;;  %v1900_v35 = vadd.f32 %v1895_v41, %v1876_v31 }
 0x352   :  { %v2365_v15 = vsel %vm2362_vm0, %v6861_v32, %v2361_v16  ;;  %v1919_v16 = vsel %vm8262_vm8, %v8233_v48, %v8193_v6  ;;  %v8265_v6 = vld [vmem:[#allocation154_spill] sm:$0xff]  ;;  %v8266_v48 = vld [vmem:[#allocation156_spill] sm:$0xff]  ;;  %vm8269_vm8 = vcmask 670720  }
 0x353   :  { %v2371_v26 = vadd.f32 %v2365_v15, %v2341_v49  ;;  %v1924_v42 = vadd.f32 %v1919_v16, %v1900_v35  ;;  %v2088_v27 = vsel %vm8267_vm4, %v8266_v48, %v8265_v6  ;;  %v1967_v56 = vsel %vm8269_vm8, %v8242_v44, %v8268_v59  ;;  %v8275_v44 = vld [vmem:[#allocation23_spill] sm:$0xff]  ;;  %v8288_v48 = vld [vmem:[#allocation96_spill] sm:$0xff] }
 0x354   :  { %vm2160_vm4 = vcmask 490496   ;;  %vm8277_vm8 = vcmask 498688   ;;  %v2089_v35 = vsel %vm8282_vm13, %v8265_v6, %v6645_v29  ;;  %vm8290_vm13 = vcmask 498688  }
 0x355   :  { %v2401_v19 = vadd.f32 %v2395_v7, %v2371_v26  ;;  %v7023_v13 = vpop.permute.xlu1 %2566  ;;  %v8270_v26 = vld [vmem:[#allocation43_spill] sm:$0xff]  ;;  %v1948_v45 = vadd.f32 %v1943_v39, %v1924_v42  ;;  %v2093_v7 = vadd.f32 %v2088_v27, %v2069_v1  ;;  %v2136_v40 = vsel %vm8277_vm8, %v8276_v4, %v8275_v44  ;;  %v8287_v42 = vld [vmem:[#allocation16_spill] sm:$0xff] }
 0x356   :  { %v2112_v11 = vsel %vm8272_vm11, %v8271_v38, %v8270_v26  ;;  %vm8278_vm11 = vcmask 531456   ;;  %vm8285_vm8 = vcmask 482304   ;;  %v2137_v29 = vsel %vm8290_vm13, %v8275_v44, %v6691_v21 }
 0x357   :  { %v2431_v23 = vadd.f32 %v2425_v61, %v2401_v19  ;;  %v1972_v25 = vadd.f32 %v1967_v56, %v1948_v45  ;;  %v2117_v19 = vadd.f32 %v2112_v11, %v2093_v7  ;;  %v8274_v61 = vld [vmem:[#allocation147_spill] sm:$0xff]  ;;  %v2041_v41 = vsel %vm8278_vm11, %v8255_v47, %v8216_v55  ;;  %v8283_v47 = vld [vmem:[#allocation30_spill] sm:$0xff] }
 0x358   :  { %v2017_v20 = vsel %vm2015_vm14, %v8251_v33, %v8274_v61  ;;  %vm8281_vm14 = vcmask 523264   ;;  %vm8286_vm11 = vcmask 506880   ;;  %v2162_v38 = vsel %vm2160_vm4, %v8279_v57, %v8228_v60 }
 0x359   :  { %v7043_v36 = vpop.permute.xlu1 %2673  ;;  %v2461_v49 = vadd.f32 %v2455_v46, %v2431_v23  ;;  %v1997_v23 = vadd.f32 %v1992_v37, %v1972_v25  ;;  %v2161_v46 = vsel %vm2160_vm4, %v8280_v50, %v8279_v57  ;;  %v2141_v34 = vadd.f32 %v2136_v40, %v2117_v19  ;;  %v8294_v37 = vld [vmem:[#allocation20_spill] sm:$0xff] }
 0x35a   :  { %v2065_v33 = vsel %vm8281_vm14, %v8259_v8, %v8222_v52  ;;  %vm8289_vm14 = vcmask 359424   ;;  %v2186_v7 = vsel %vm8285_vm8, %v8283_v47, %v6770_v53  ;;  %v2275_v21 = vsel %vm1439_vm7, %v8294_v37, %v8293_v24  ;;  %v8296_v40 = vld [vmem:[#allocation56_spill] sm:$0xff] }
 0x35b   :  { %v2491_v10 = vadd.f32 %v2485_v17, %v2461_v49  ;;  %v2022_v31 = vadd.f32 %v2017_v20, %v1997_v23  ;;  %v2166_v17 = vadd.f32 %v2161_v46, %v2141_v34  ;;  %v2217_v52 = vsel %vm8289_vm14, %v8288_v48, %v8287_v42  ;;  %vm8295_vm4 = vmmov %vm8289_vm14  ;;  %v8298_v46 = vld [vmem:[#allocation22_spill] sm:$0xff]  ;;  %v8305_v48 = vld [vmem:[#allocation155_spill] sm:$0xff] }
 0x35c   :  { %v2218_v60 = vsel %vm8295_vm4, %v8287_v42, %v8236_v18  ;;  %v2276_v50 = vsel %vm1439_vm7, %v8293_v24, %v8238_v14  ;;  %vm8311_vm7 = vcmask 687104   ;;  %vm8327_vm13 = vcmask 1022976  }
 0x35d   :  { %v7057_v12 = vpop.permute.xlu1 %2564  ;;  %v7059_v15 = vadd.f32 %v2515_v5, %v2491_v10  ;;  %v2046_v16 = vadd.f32 %v2041_v41, %v2022_v31  ;;  %v8284_v10 = vld [vmem:[#allocation33_spill] sm:$0xff]  ;;  %v2113_v5 = vsel %vm8286_vm11, %v8270_v26, %v8225_v51  ;;  %v8291_v51 = vld [vmem:[#allocation47_spill] sm:$0xff]  ;;  %v8299_v31 = vld [vmem:[#allocation106_spill] sm:$0xff]  ;;  %vm8300_vm11 = vcmask 326656  }
 0x35e   :  { %v2185_v39 = vsel %vm8285_vm8, %v8284_v10, %v8283_v47  ;;  %v8292_v26 = vld [vmem:[#allocation59_spill] sm:$0xff]  ;;  %v2247_v44 = vsel %vm1409_vm6, %v8291_v51, %v6808_v9  ;;  %v2333_v18 = vsel %vm8300_vm11, %v8299_v31, %v8298_v46  ;;  %v2305_v9 = vsel %vm1469_vm1, %v8296_v40, %v6832_v2  ;;  %v8304_v2 = vld [vmem:[#allocation44_spill] sm:$0xff]  ;;  %v8314_v31 = vld [vmem:[#allocation46_spill] sm:$0xff] }
 0x35f   :  { %v2070_v1 = vadd.f32 %v2065_v33, %v2046_v16  ;;  %v2190_v27 = vadd.f32 %v2185_v39, %v2166_v17  ;;  %v2246_v45 = vsel %vm1409_vm6, %v8292_v26, %v8291_v51  ;;  %v8297_v41 = vld [vmem:[#allocation71_spill] sm:$0xff]  ;;  %vm8301_vm6 = vmmov %vm8300_vm11  ;;  %v8303_v39 = vld [vmem:[#allocation113_spill] sm:$0xff]  ;;  %vm8329_vm4 = vcmask 1014784  }
 0x360   :  { %v2304_v57 = vsel %vm1469_vm1, %v8297_v41, %v8296_v40  ;;  %v2334_v14 = vsel %vm8301_vm6, %v8298_v46, %v8246_v0  ;;  %v8302_v10 = vld [vmem:[#allocation99_spill] sm:$0xff]  ;;  %v2394_v0 = vsel %vm2392_vm12, %v8304_v2, %v8253_v22  ;;  %v2454_v22 = vsel %vm2452_vm3, %v6914_v62, %v8261_v30  ;;  %v8313_v40 = vld [vmem:[#allocation21_spill] sm:$0xff]  ;;  %vm8328_vm8 = vmmov %vm8327_vm13 }
 0x361   :  { %v7073_v43 = vpop.permute.xlu1 %2598  ;;  %v2094_v8 = vadd.f32 %v2089_v35, %v2070_v1  ;;  %v2223_v59 = vadd.f32 %v2217_v52, %v2190_v27  ;;  %v7145_v35 = vpop.permute.xlu0 %2720  ;;  %v2364_v42 = vsel %vm2362_vm0, %v8302_v10, %v6861_v32  ;;  %v2393_v52 = vsel %vm2392_vm12, %v8305_v48, %v8304_v2  ;;  %v8318_v2 = vld [vmem:[#allocation15_spill] sm:$0xff]  ;;  %vm8330_vm11 = vmmov %vm8329_vm4 }
 0x362   :  { %vm2542_vm12 = vcmask 154624   ;;  %vm2602_vm1 = vcmask 138240   ;;  %vm2811_vm6 = vcmask 195584  }
 0x363   :  { %v2118_v6 = vadd.f32 %v2113_v5, %v2094_v8  ;;  %v2252_v19 = vadd.f32 %v2246_v45, %v2223_v59  ;;  %v2363_v5 = vsel %vm2362_vm0, %v8303_v39, %v8302_v10  ;;  %v8307_v59 = vld [vmem:[#allocation129_spill] sm:$0xff]  ;;  %v8308_v45 = vld [vmem:[#allocation42_spill] sm:$0xff]  ;;  %vm2572_vm0 = vcmask 146432  }
 0x365   :  { %v7087_v49 = vpop.permute.xlu1 %2594  ;;  %v2142_v11 = vadd.f32 %v2137_v29, %v2118_v6  ;;  %v2281_v23 = vadd.f32 %v2275_v21, %v2252_v19  ;;  %v8306_v6 = vld [vmem:[#allocation26_spill] sm:$0xff]  ;;  %v1513_v26 = vpop.permute.xlu0 %1512 }
 0x366   :  { %v2424_v32 = vsel %vm2422_vm9, %v8306_v6, %v8254_v58  ;;  %v2603_v48 = vsel %vm2602_vm1, %v7087_v49, %v8318_v2 }
 0x367   :  { %v2167_v25 = vadd.f32 %v2162_v38, %v2142_v11  ;;  %v2310_v33 = vadd.f32 %v2304_v57, %v2281_v23  ;;  %v2423_v38 = vsel %vm2422_vm9, %v8307_v59, %v8306_v6  ;;  %vm2662_vm9 = vcmask 7168  }
 0x369   :  { %v7095_v55 = vpop.permute.xlu1 %2628  ;;  %v2191_v20 = vadd.f32 %v2186_v7, %v2167_v25  ;;  %v2339_v17 = vadd.f32 %v2333_v18, %v2310_v33  ;;  %v2453_v7 = vsel %vm2452_vm3, %v8308_v45, %v6914_v62  ;;  %v8309_v25 = vld [vmem:[#allocation10_spill] sm:$0xff]  ;;  %v2717_v57 = vpop.permute.xlu0 %2716  ;;  %v2543_v18 = vsel %vm2542_vm12, %v8314_v31, %v6999_v3  ;;  %v8315_v33 = vld [vmem:[#allocation51_spill] sm:$0xff]  ;;  %vm8321_vm3 = vmmov %vm8311_vm7 }
 0x36a   :  { %v2483_v19 = vsel %vm2482_vm2, %v8309_v25, %v6932_v28  ;;  %v4419_v25 = vld [vmem:[%s7604_s0 + $0x8] sm:$0xff] }
 0x36b   :  { %v2224_v4 = vadd.f32 %v2218_v60, %v2191_v20  ;;  %v2369_v27 = vadd.f32 %v2363_v5, %v2339_v17  ;;  %v8310_v60 = vld [vmem:[#allocation24_spill] sm:$0xff]  ;;  %v8316_v17 = vld [vmem:[#allocation109_spill] sm:$0xff] }
 0x36c   :  { %v8317_v5 = vld [vmem:[#allocation48_spill] sm:$0xff] }
 0x36d   :  { %v7109_v56 = vpop.permute.xlu1 %2624  ;;  %v2253_v34 = vadd.f32 %v2247_v44, %v2224_v4  ;;  %v2399_v51 = vadd.f32 %v2393_v52, %v2369_v27  ;;  %v2484_v44 = vsel %vm2482_vm2, %v6932_v28, %v8263_v54  ;;  %v8312_v4 = vld [vmem:[#allocation27_spill] sm:$0xff]  ;;  %v7210_v52 = vpop.permute.xlu0 %2744  ;;  %vm8325_vm2 = vcmask 1031168  }
 0x36e   :  { %v2513_v41 = vsel %vm2512_vm5, %v8313_v40, %v8312_v4  ;;  %v2514_v46 = vsel %vm2512_vm5, %v8312_v4, %v6639_v63  ;;  %v2573_v63 = vsel %vm2572_vm0, %v7057_v12, %v7023_v13  ;;  %vm2632_vm5 = vcmask 15360   ;;  %v8319_v27 = vld [vmem:[#allocation31_spill] sm:$0xff]  ;;  %v8324_v40 = vld [vmem:[#allocation37_spill] sm:$0xff]  ;;  %vm8326_vm14 = vmmov %vm8325_vm2 }
 0x36f   :  { %v2282_v16 = vadd.f32 %v2276_v50, %v2253_v34  ;;  %v2429_v37 = vadd.f32 %v2423_v38, %v2399_v51  ;;  %v2604_v12 = vsel %vm2602_vm1, %v8318_v2, %v7073_v43  ;;  %v2634_v49 = vsel %vm2632_vm5, %v8319_v27, %v7095_v55  ;;  %v8320_v38 = vld [vmem:[#allocation18_spill] sm:$0xff]  ;;  %v2789_v2 = vld [vmem:[#allocation3 + $0x28] sm:$0xff] }
 0x371   :  { %v7123_v61 = vpop.permute.xlu1 %2658  ;;  %v2311_v47 = vadd.f32 %v2305_v9, %v2282_v16  ;;  %v2459_v58 = vadd.f32 %v2453_v7, %v2429_v37  ;;  %v2741_v7 = vpop.permute.xlu0 %2740 }
 0x373   :  { %v2340_v8 = vadd.f32 %v2334_v14, %v2311_v47  ;;  %v2489_v30 = vadd.f32 %v2483_v19, %v2459_v58  ;;  %v2544_v14 = vsel %vm2542_vm12, %v6999_v3, %v8316_v17 }
 0x375   :  { %v7131_v53 = vpop.permute.xlu1 %2654  ;;  %v2370_v11 = vadd.f32 %v2364_v42, %v2340_v8  ;;  %v2519_v9 = vadd.f32 %v2513_v41, %v2489_v30  ;;  %v2574_v42 = vsel %vm2572_vm0, %v7023_v13, %v8317_v5  ;;  %v2769_v30 = vpop.permute.xlu0 %2768 }
 0x377   :  { %v2400_v24 = vadd.f32 %v2394_v0, %v2370_v11  ;;  %v2549_v10 = vadd.f32 %v2543_v18, %v2519_v9  ;;  %v2633_v0 = vsel %vm2632_vm5, %v7109_v56, %v8319_v27  ;;  %v2663_v11 = vsel %vm2662_vm9, %v7131_v53, %v8320_v38 }
 0x378   :  { %v2664_v56 = vsel %vm2662_vm9, %v8320_v38, %v7123_v61  ;;  %v2676_v53 = vmul.f32 %v4419_v25, %v7043_v36  ;;  %v8331_v27 = vmov 0.0|0.0  }
 0x379   :  { %v7147_v1 = vpop.permute.xlu1 %2694  ;;  %v2430_v23 = vadd.f32 %v2424_v32, %v2400_v24  ;;  %v2579_v8 = vadd.f32 %v2573_v63, %v2549_v10 }
 0x37a   :  { %v2699_v41 = vsel %vm632_vm10, %v7147_v1, %v8324_v40 }
 0x37b   :  { %v2460_v62 = vadd.f32 %v2454_v22, %v2430_v23  ;;  %v2609_v59 = vadd.f32 %v2603_v48, %v2579_v8  ;;  %v2781_v48 = vld [vmem:[%s7606_s2] sm:$0xff] }
 0x37d   :  { %v7161_v29 = vpop.permute.xlu1 %2540  ;;  %v2490_v54 = vadd.f32 %v2484_v44, %v2460_v62  ;;  %v2639_v32 = vadd.f32 %v2633_v0, %v2609_v59  ;;  %v8323_v44 = vld [vmem:[#allocation40_spill] sm:$0xff]  ;;  %v8332_v0 = vmov 0.0  }
 0x37e   :  { %v2698_v4 = vsel %vm632_vm10, %v8323_v44, %v7147_v1 }
 0x37f   :  { %v2520_v47 = vadd.f32 %v2514_v46, %v2490_v54  ;;  %v2669_v37 = vadd.f32 %v2663_v11, %v2639_v32 }
 0x381   :  { %v841_v21 = vpop.permute.xlu1 %840  ;;  %v2550_v3 = vadd.f32 %v2544_v14, %v2520_v47  ;;  %v2679_v23 = vadd.f32 %v2676_v53, %v2669_v37  ;;  %v2765_v14 = vpop.permute.xlu0 %2764 }
 0x382   :  { %v845_v20 = vsel %vm8311_vm7, %v841_v21, %v8310_v60  ;;  %v8322_v60 = vld [vmem:[#allocation153_spill] sm:$0xff]  ;;  %vm8333_vm7 = vmmov 0  }
 0x383   :  { %v2580_v6 = vadd.f32 %v2574_v42, %v2550_v3  ;;  %v2703_v18 = vadd.f32 %v2698_v4, %v2679_v23  ;;  %v2786_v3 = vld [vmem:[#allocation3 + $0x10] sm:$0xff] }
 0x385   :  { %v1515_v50 = vpop.permute.xlu1 %1514 }
 0x386   :  { %v1518_v34 = vsel %vm707_vm15, %v1513_v26, %v1515_v50  ;;  %v1519_v28 = vsel %vm707_vm15, %v1515_v50, %v8315_v33  ;;  %v2610_v26 = vadd.f32 %v2604_v12, %v2580_v6  ;;  %v4085_v12 = vpack.c.bf16 %v2789_v2, %v2786_v3  ;;  %v2782_v6 = vld [vmem:[%s7606_s2 + $0x8] sm:$0xff] }
 0x387   :  { %v4080_v16 = vpack.c.bf16 %v1519_v28, %v845_v20  ;;  %v2677_v20 = vmul.f32 %v8322_v60, %v7043_v36 }
 0x388   :  { %v2640_v24 = vadd.f32 %v2634_v49, %v2610_v26  ;;  %v4420_v49 = vld [vmem:[%s7604_s0 + $0x18] sm:$0xff]  ;;  %s4578_s0 = smov 66  }
 0x389   :  { %v2719_v39 = vpop.permute.xlu1 %2718  ;;  %4081 = vmatprep.subr.bf16.mxu1 %v4080_v16  ;;  %v2678_v38 = vmul.f32 %v4420_v49, %v7043_v36 }
 0x38a   :  { %v2670_v19 = vadd.f32 %v2664_v56, %v2640_v24  ;;  %v2722_v46 = vsel %vm8325_vm2, %v2717_v57, %v2719_v39  ;;  %v2723_v31 = vsel %vm8326_vm14, %v2719_v39, %v7145_v35  ;;  %vm3253_vm14 = vcmask 1048552  }
 0x38b   :  { %v2727_v16 = vadd.f32 %v2722_v46, %v2703_v18  ;;  %3254 = vst.msk [vmem:[#allocation2 + $0x10] sm:$0xff] %vm3253_vm14, %v8332_v0 }
 0x38c   :  { %v2680_v50 = vadd.f32 %v2677_v20, %v2670_v19 }
 0x38d   :  { %v839_v13 = vpop.permute.xlu1 %838 }
 0x38e   :  { %v844_v51 = vsel %vm8321_vm3, %v839_v13, %v841_v21  ;;  %v2545_v21 = vsel %vm2542_vm12, %v8316_v17, %v7161_v29  ;;  %vm8334_vm12 = vcmask 482304  }
 0x38f   :  { %v4082_v45 = vpack.c.bf16 %v1518_v34, %v844_v51  ;;  %v2551_v29 = vadd.f32 %v2545_v21, %v7059_v15  ;;  %v2704_v34 = vadd.f32 %v2699_v41, %v2680_v50  ;;  %v2783_v51 = vld [vmem:[%s7606_s2 + $0x10] sm:$0xff] }
 0x391   :  { %v2571_v22 = vpop.permute.xlu1 %2570  ;;  %4083 = vmatpush1.bf16.msra.mxu1 %v4082_v45  ;;  %v2728_v17 = vadd.f32 %v2723_v31, %v2704_v34 }
 0x392   :  { %v2575_v62 = vsel %vm2572_vm0, %v8317_v5, %v2571_v22  ;;  %vm3251_vm0 = vcmask 539648  }
 0x393   :  { %v2581_v33 = vadd.f32 %v2575_v62, %v2551_v29  ;;  %3252 = vst.msk [vmem:[#allocation2] sm:$0xff] %vm3251_vm0, %v8332_v0 }
 0x395   :  { %v2743_v58 = vpop.permute.xlu1 %2742 }
 0x396   :  { %v2746_v54 = vsel %vm8327_vm13, %v2741_v7, %v2743_v58  ;;  %v2747_v1 = vsel %vm8328_vm8, %v2743_v58, %v7210_v52 }
 0x397   :  { %v2751_v57 = vadd.f32 %v2746_v54, %v2727_v16  ;;  %v2752_v63 = vadd.f32 %v2747_v1, %v2728_v17 }
 0x399   :  { %v2601_v28 = vpop.permute.xlu1 %2600 }
 0x39a   :  { %v2605_v9 = vsel %vm2602_vm1, %v7073_v43, %v2601_v28 }
 0x39b   :  { %v2611_v15 = vadd.f32 %v2605_v9, %v2581_v33 }
 0x39d   :  { %v2767_v47 = vpop.permute.xlu1 %2766 }
 0x39e   :  { %v2770_v10 = vsel %vm8329_vm4, %v2765_v14, %v2767_v47  ;;  %v2771_v39 = vsel %vm8330_vm11, %v2767_v47, %v2769_v30 }
 0x39f   :  { %v2775_v5 = vadd.f32 %v2770_v10, %v2751_v57  ;;  %v2776_v42 = vadd.f32 %v2771_v39, %v2752_v63 }
 0x3a1   :  { %v2631_v43 = vpop.permute.xlu1 %2630  ;;  %2825 = vmatprep.subr.mxu1 %v2776_v42 }
 0x3a2   :  { %v2635_v8 = vsel %vm2632_vm5, %v7095_v55, %v2631_v43  ;;  %2826 = vmatpush1.msra.mxu1 %v2775_v5 }
 0x3a3   :  { %3841 = vmatmul.mubr.msk.f32.vlgmr.msra.gmra.mrb[4].mxu1 %vm2811_vm6, %v2781_v48  ;;  %4084 = vmatprep.subr.bf16.mxu1 %v8331_v27  ;;  %v2641_v59 = vadd.f32 %v2635_v8, %v2611_v15 }
 0x3a4   :  { %4086 = vmatpush3.bf16.msra.mxu1 %v4085_v12  ;;  %2891 = vmatprep.mubr.f32.mxu1 %v8332_v0 }
 0x3a5   :  { %v2661_v13 = vpop.permute.xlu1 %2660  ;;  %3970 = vmatprep.subr.mxu1 %v8332_v0 }
 0x3a6   :  { %v2665_v55 = vsel %vm2662_vm9, %v7123_v61, %v2661_v13 }
 0x3a7   :  { %v2671_v11 = vadd.f32 %v2665_v55, %v2641_v59  ;;  %3842 = vmatmul.mubr.msk.f32.gmra.mrb[6].mxu1 %vm2811_vm6, %v2782_v6 }
 0x3a8   :  { %2897 = vmatprep.mubr.f32.mxu1 %v8332_v0 }
 0x3a9   :  { %v2681_v26 = vadd.f32 %v2678_v38, %v2671_v11 }
 0x3ab   :  { %v2705_v32 = vadd.f32 %v8324_v40, %v2681_v26  ;;  %3843 = vmatmul.mubr.msk.f32.gmra.mrb[8].mxu1 %vm2811_vm6, %v2783_v51 }
 0x3ac   :  { %3972 = vmatprep.mubr.msk.f32.mxu1 %vm8333_vm7, %v8332_v0 }
 0x3ad   :  { %v2729_v61 = vadd.f32 %v7145_v35, %v2705_v32  ;;  %v4576_v35 = vmov 84  }
 0x3ae   :  { %4314 = vset.pattern.permute.xlu1 %v4576_v35 }
 0x3af   :  { %v2753_v36 = vadd.f32 %v7210_v52, %v2729_v61  ;;  %v4577_v52 = vmov 85  }
 0x3b0   :  { %4315 = vset.pattern.permute.xlu0 %v4577_v52  ;;  %v7299_v53 = vpop.permute.xlu1 %2803 }
 0x3b1   :  { %v2777_v45 = vadd.f32 %v2769_v30, %v2753_v36 }
 0x3b3   :  { %2780 = vst.msk [vmem:[#allocation3 + $0x40] sm:$0xff] %vm8334_vm12, %v2777_v45  ;;  %vm8340_vm12 = vcmask 1022976  }
 0x3b4   :  { %v7315_v34 = vpop.permute.xlu1 %2808 }
 0x3b7   :  { %v7293_v7 = vpop.permute.xlu0 %2798 }
 0x3ba   :  { %v2792_v56 = vld [vmem:[#allocation3 + $0x40] sm:$0xff] }
 0x3bb   :  { %3971 = vmatpush3.msra.mxu1 %v2792_v56 }
 0x3bc   :  { %3973 = vmatmul.mubr.msk.f32.vlgmr.msra.gmra.mrb[10].mxu1 %vm2811_vm6, %v2781_v48 }
 0x3bd   :  { %3975 = vmatprep.mubr.msk.f32.mxu1 %vm8333_vm7, %v8332_v0 }
 0x3c0   :  { %3976 = vmatmul.mubr.msk.f32.gmra.mrb[12].mxu1 %vm2811_vm6, %v2782_v6 }
 0x3c1   :  { %3978 = vmatprep.mubr.msk.f32.mxu1 %vm8333_vm7, %v8332_v0 }
 0x3c4   :  { %3979 = vmatmul.mubr.msk.f32.gmra.mrb[14].mxu1 %vm2811_vm6, %v2783_v51  ;;  %vm3273_vm6 = vcmask 1048080  }
 0x476   :  { %v2887_v24 = vpop.f32.mrb[4].mxu1 }
 0x477   :  { %v2888_v37 = vadd.f32 %v2887_v24, %v7293_v7  ;;  %v2889_v22 = vpop.f32.mrb[5].mxu1 }
 0x478   :  { %v2890_v25 = vadd.f32 %v2889_v22, %v7293_v7 }
 0x479   :  { %v7301_v19 = vmul.f32 0.70710677, %v2888_v37  ;;  %v7334_v49 = vmul.f32 0.5, %v2888_v37 }
 0x47a   :  { %v7303_v21 = vmul.f32 0.70710677, %v2890_v25  ;;  %v2893_v60 = vpop.f32.mrb[6].mxu1  ;;  %v7336_v26 = vmul.f32 0.5, %v2890_v25 }
 0x47b   :  { %v3002_v20 = vand.u32 2147483647, %v7301_v19  ;;  %v2894_v23 = vadd.f32 %v2893_v60, %v7299_v53  ;;  %v2895_v58 = vpop.f32.mrb[7].mxu1  ;;  %vm3200_vm1 = vcmp.ge.f32.partialorder %v7301_v19, 0.0 }
 0x47c   :  { %v3003_v44 = vand.u32 2147483647, %v7303_v21  ;;  %v2896_v4 = vadd.f32 %v2895_v58, %v7299_v53  ;;  %vm3201_vm5 = vcmp.ge.f32.partialorder %v7303_v21, 0.0 }
 0x47d   :  { %v3011_v40 = vmul.f32 0.3275911, %v3002_v20  ;;  %v7309_v41 = vmul.f32 0.70710677, %v2894_v23  ;;  %v3146_v14 = vsub.f32 0.0, %v3002_v20  ;;  %v7338_v36 = vmul.f32 0.5, %v2894_v23 }
 0x47e   :  { %v3012_v62 = vmul.f32 0.3275911, %v3003_v44  ;;  %v7311_v30 = vmul.f32 0.70710677, %v2896_v4  ;;  %v2899_v46 = vpop.f32.mrb[8].mxu1  ;;  %v3147_v63 = vsub.f32 0.0, %v3003_v44 }
 0x47f   :  { %v3020_v50 = vadd.f32 1.0, %v3011_v40  ;;  %v3005_v29 = vand.u32 2147483647, %v7309_v41  ;;  %v2901_v33 = vpop.f32.mrb[9].mxu1  ;;  %v7318_v9 = vadd.f32 %v2899_v46, %v7315_v34  ;;  %v3155_v2 = vmul.f32 %v3146_v14, %v3002_v20 }
 0x480   :  { %v3021_v31 = vadd.f32 1.0, %v3012_v62  ;;  %v3006_v18 = vand.u32 2147483647, %v7311_v30  ;;  %v7321_v17 = vadd.f32 %v2901_v33, %v7315_v34  ;;  %v3156_v3 = vmul.f32 %v3147_v63, %v3003_v44 }
 0x481   :  { %4359 = vrcp.f32 %v3020_v50  ;;  %v3014_v28 = vmul.f32 0.3275911, %v3005_v29  ;;  %v7324_v15 = vmul.f32 0.70710677, %v7318_v9  ;;  %v3149_v10 = vsub.f32 0.0, %v3005_v29 }
 0x482   :  { %4361 = vrcp.f32 %v3021_v31  ;;  %v3015_v54 = vmul.f32 0.3275911, %v3006_v18  ;;  %v7327_v57 = vmul.f32 0.70710677, %v7321_v17  ;;  %v3150_v5 = vsub.f32 0.0, %v3006_v18 }
 0x483   :  { %v3023_v1 = vadd.f32 1.0, %v3014_v28  ;;  %v3008_v47 = vand.u32 2147483647, %v7324_v15  ;;  %v3158_v6 = vmul.f32 %v3149_v10, %v3005_v29  ;;  %v3164_v11 = vmul.f32 1.442695, %v3155_v2 }
 0x484   :  { %v3024_v16 = vadd.f32 1.0, %v3015_v54  ;;  %v7331_v39 = vand.u32 2147483647, %v7327_v57  ;;  %v3159_v55 = vmul.f32 %v3150_v5, %v3006_v18  ;;  %v3166_v61 = vmul.f32 1.442695, %v3156_v3 }
 0x485   :  { %4363 = vrcp.f32 %v3023_v1  ;;  %v3017_v42 = vmul.f32 0.3275911, %v3008_v47  ;;  %v3170_v24 = vmul.f32 1.442695, %v3158_v6  ;;  %v7347_v20 = vmul.f32 0.5, %v2896_v4 }
 0x486   :  { %4365 = vrcp.f32 %v3024_v16  ;;  %v3018_v48 = vmul.f32 0.3275911, %v7331_v39  ;;  %v3172_v58 = vmul.f32 1.442695, %v3159_v55  ;;  %v3153_v54 = vsub.f32 0.0, %v7331_v39 }
 0x487   :  { %v3026_v8 = vadd.f32 1.0, %v3017_v42  ;;  %vm3203_vm9 = vcmp.ge.f32.partialorder %v7309_v41, 0.0  ;;  %vm3204_vm3 = vcmp.ge.f32.partialorder %v7311_v30, 0.0  ;;  %vm3206_vm2 = vcmp.ge.f32.partialorder %v7324_v15, 0.0 }
 0x488   :  { %v3027_v59 = vadd.f32 1.0, %v3018_v48  ;;  %vm3207_vm13 = vcmp.ge.f32.partialorder %v7327_v57, 0.0 }
 0x489   :  { %4367 = vrcp.f32 %v3026_v8 }
 0x48a   :  { %4369 = vrcp.f32 %v3027_v59 }
 0x48b   :  { %v4360_v43 = vpop.eup %4359  ;;  %4371 = vpow2.f32 %v3164_v11 }
 0x48c   :  { %v4362_v12 = vpop.eup %4361  ;;  %v3038_v27 = vmul.f32 %v4360_v43, %v3020_v50  ;;  %4373 = vpow2.f32 %v3166_v61 }
 0x48d   :  { %v3039_v13 = vmul.f32 %v4362_v12, %v3021_v31  ;;  %4375 = vpow2.f32 %v3170_v24 }
 0x48e   :  { %v3047_v38 = vsub.f32 2.0, %v3038_v27  ;;  %4377 = vpow2.f32 %v3172_v58 }
 0x48f   :  { %v4364_v51 = vpop.eup %4363  ;;  %v3048_v32 = vsub.f32 2.0, %v3039_v13  ;;  %v2970_v45 = vpop.f32.mrb[10].mxu1 }
 0x490   :  { %v4366_v56 = vpop.eup %4365  ;;  %v7340_v35 = vmul.f32 %v4360_v43, %v3047_v38  ;;  %v3041_v52 = vmul.f32 %v4364_v51, %v3023_v1  ;;  %v7343_v22 = vadd.f32 %v2970_v45, %v7293_v7  ;;  %v3974_v37 = vpop.f32.mrb[11].mxu1  ;;  %v3152_v7 = vsub.f32 0.0, %v3008_v47 }
 0x491   :  { %v7345_v60 = vmul.f32 %v4362_v12, %v3048_v32  ;;  %v3042_v25 = vmul.f32 %v4366_v56, %v3024_v16 }
 0x492   :  { %v3065_v44 = vmul.f32 1.0614054, %v7340_v35  ;;  %v3050_v23 = vsub.f32 2.0, %v3041_v52  ;;  %v7351_v40 = vmul.f32 0.70710677, %v7343_v22  ;;  %v3161_v2 = vmul.f32 %v3152_v7, %v3008_v47 }
 0x493   :  { %v3066_v62 = vmul.f32 1.0614054, %v7345_v60  ;;  %v3051_v50 = vsub.f32 2.0, %v3042_v25  ;;  %v2975_v29 = vpop.f32.mrb[12].mxu1  ;;  %v4368_v10 = vpop.eup %4367 }
 0x494   :  { %v3074_v46 = vadd.f32 -1.4531521, %v3065_v44  ;;  %v7354_v31 = vmul.f32 %v4364_v51, %v3050_v23  ;;  %v3004_v4 = vand.u32 2147483647, %v7351_v40  ;;  %v3977_v18 = vpop.f32.mrb[13].mxu1  ;;  %v7361_v1 = vadd.f32 %v2975_v29, %v7299_v53  ;;  %v4370_v3 = vpop.eup %4369 }
 0x495   :  { %v3075_v33 = vadd.f32 -1.4531521, %v3066_v62  ;;  %v7357_v28 = vmul.f32 %v4366_v56, %v3051_v50  ;;  %v3044_v27 = vmul.f32 %v4368_v10, %v3026_v8  ;;  %v3045_v11 = vmul.f32 %v4370_v3, %v3027_v59  ;;  %v4372_v8 = vpop.eup %4371 }
 0x496   :  { %v3083_v16 = vmul.f32 %v3074_v46, %v7340_v35  ;;  %v3068_v14 = vmul.f32 1.0614054, %v7354_v31  ;;  %v3013_v63 = vmul.f32 0.3275911, %v3004_v4  ;;  %v7368_v48 = vmul.f32 0.70710677, %v7361_v1 }
 0x497   :  { %v3084_v5 = vmul.f32 %v3075_v33, %v7345_v60  ;;  %v3069_v42 = vmul.f32 1.0614054, %v7357_v28  ;;  %v7370_v43 = vpop.f32.mrb[14].mxu1  ;;  %v3162_v51 = vmul.f32 %v3153_v54, %v7331_v39  ;;  %v3053_v61 = vsub.f32 2.0, %v3044_v27  ;;  %v4374_v39 = vpop.eup %4373 }
 0x498   :  { %v3092_v53 = vadd.f32 1.4214138, %v3083_v16  ;;  %v3077_v12 = vadd.f32 -1.4531521, %v3068_v14  ;;  %v3022_v6 = vadd.f32 1.0, %v3013_v63  ;;  %v3980_v13 = vpop.f32.mrb[15].mxu1  ;;  %v4376_v7 = vpop.eup %4375 }
 0x499   :  { %v3093_v55 = vadd.f32 1.4214138, %v3084_v5  ;;  %v3078_v38 = vadd.f32 -1.4531521, %v3069_v42  ;;  %v3176_v52 = vmul.f32 1.442695, %v3161_v2  ;;  %v7377_v58 = vmul.f32 %v4368_v10, %v3053_v61  ;;  %v4378_v10 = vpop.eup %4377 }
 0x49a   :  { %v3101_v32 = vmul.f32 %v3092_v53, %v7340_v35  ;;  %v3086_v47 = vmul.f32 %v3077_v12, %v7354_v31  ;;  %4379 = vrcp.f32 %v3022_v6  ;;  %v3054_v24 = vsub.f32 2.0, %v3045_v11 }
 0x49b   :  { %v3102_v45 = vmul.f32 %v3093_v55, %v7345_v60  ;;  %v3087_v56 = vmul.f32 %v3078_v38, %v7357_v28  ;;  %v7380_v59 = vand.u32 2147483647, %v7368_v48  ;;  %v3148_v50 = vsub.f32 0.0, %v3004_v4 }
 0x49c   :  { %v3110_v37 = vadd.f32 -0.28449672, %v3101_v32  ;;  %v3095_v25 = vadd.f32 1.4214138, %v3086_v47  ;;  %v7382_v62 = vmul.f32 %v4370_v3, %v3054_v24  ;;  %v3071_v18 = vmul.f32 1.0614054, %v7377_v58 }
 0x49d   :  { %v3111_v44 = vadd.f32 -0.28449672, %v3102_v45  ;;  %v3096_v23 = vadd.f32 1.4214138, %v3087_v56  ;;  %v3016_v33 = vmul.f32 0.3275911, %v7380_v59  ;;  %4381 = vpow2.f32 %v3176_v52 }
 0x49e   :  { %v3119_v29 = vmul.f32 %v3110_v37, %v7340_v35  ;;  %v3104_v46 = vmul.f32 %v3095_v25, %v7354_v31  ;;  %v3072_v14 = vmul.f32 1.0614054, %v7382_v62  ;;  %v3178_v63 = vmul.f32 1.442695, %v3162_v51 }
 0x49f   :  { %v3120_v54 = vmul.f32 %v3111_v44, %v7345_v60  ;;  %v3105_v16 = vmul.f32 %v3096_v23, %v7357_v28  ;;  %v3080_v2 = vadd.f32 -1.4531521, %v3071_v18  ;;  %v3157_v27 = vmul.f32 %v3148_v50, %v3004_v4 }
 0x4a0   :  { %v3128_v5 = vadd.f32 0.2548296, %v3119_v29  ;;  %v3113_v42 = vadd.f32 -0.28449672, %v3104_v46  ;;  %v3081_v12 = vadd.f32 -1.4531521, %v3072_v14  ;;  %4383 = vpow2.f32 %v3178_v63 }
 0x4a1   :  { %v3129_v3 = vadd.f32 0.2548296, %v3120_v54  ;;  %v3114_v53 = vadd.f32 -0.28449672, %v3105_v16  ;;  %v3089_v38 = vmul.f32 %v3080_v2, %v7377_v58  ;;  %v3025_v11 = vadd.f32 1.0, %v3016_v33 }
 0x4a2   :  { %v3137_v13 = vmul.f32 %v3128_v5, %v7340_v35  ;;  %v3122_v55 = vmul.f32 %v3113_v42, %v7354_v31  ;;  %v3090_v47 = vmul.f32 %v3081_v12, %v7382_v62  ;;  %v3168_v23 = vmul.f32 1.442695, %v3157_v27 }
 0x4a3   :  { %v3138_v51 = vmul.f32 %v3129_v3, %v7345_v60  ;;  %v3123_v32 = vmul.f32 %v3114_v53, %v7357_v28  ;;  %v3098_v4 = vadd.f32 1.4214138, %v3089_v38  ;;  %4385 = vrcp.f32 %v3025_v11 }
 0x4a4   :  { %v4380_v61 = vpop.eup %4379  ;;  %v3182_v45 = vmul.f32 %v4372_v8, %v3137_v13  ;;  %v3131_v56 = vadd.f32 0.2548296, %v3122_v55  ;;  %v3099_v24 = vadd.f32 1.4214138, %v3090_v47  ;;  %4387 = vpow2.f32 %v3168_v23 }
 0x4a5   :  { %v3183_v35 = vmul.f32 %v4374_v39, %v3138_v51  ;;  %v3132_v52 = vadd.f32 0.2548296, %v3123_v32  ;;  %v3040_v37 = vmul.f32 %v4380_v61, %v3022_v6  ;;  %v3107_v60 = vmul.f32 %v3098_v4, %v7377_v58 }
 0x4a6   :  { %v3191_v25 = vsub.f32 1.0, %v3182_v45  ;;  %v3140_v44 = vmul.f32 %v3131_v56, %v7354_v31  ;;  %v3108_v29 = vmul.f32 %v3099_v24, %v7382_v62  ;;  %v7407_v6 = vadd.f32 %v7370_v43, %v7315_v34 }
 0x4a7   :  { %v3192_v50 = vsub.f32 1.0, %v3183_v35  ;;  %v3141_v8 = vmul.f32 %v3132_v52, %v7357_v28  ;;  %v3049_v46 = vsub.f32 2.0, %v3040_v37  ;;  %v3116_v33 = vadd.f32 -0.28449672, %v3107_v60  ;;  %v4382_v63 = vpop.eup %4381 }
 0x4a8   :  { %v3209_v39 = vsub.f32 0.0, %v3191_v25  ;;  %v3185_v18 = vmul.f32 %v4376_v7, %v3140_v44  ;;  %v3117_v16 = vadd.f32 -0.28449672, %v3108_v29  ;;  %v3151_v12 = vsub.f32 0.0, %v7380_v59 }
 0x4a9   :  { %v3210_v54 = vsub.f32 0.0, %v3192_v50  ;;  %v3186_v31 = vmul.f32 %v4378_v10, %v3141_v8  ;;  %v7409_v14 = vmul.f32 %v4380_v61, %v3049_v46  ;;  %v3125_v42 = vmul.f32 %v3116_v33, %v7377_v58 }
 0x4aa   :  { %v3218_v5 = vsel %vm3200_vm1, %v3191_v25, %v3209_v39  ;;  %v3194_v28 = vsub.f32 1.0, %v3185_v18  ;;  %v3126_v34 = vmul.f32 %v3117_v16, %v7382_v62  ;;  %v4384_v27 = vpop.eup %4383  ;;  %v7420_v38 = vmul.f32 0.70710677, %v7407_v6 }
 0x4ab   :  { %v3227_v2 = vadd.f32 1.0, %v3218_v5  ;;  %v3219_v7 = vsel %vm3201_vm5, %v3192_v50, %v3210_v54  ;;  %v3195_v3 = vsub.f32 1.0, %v3186_v31  ;;  %v3134_v10 = vadd.f32 0.2548296, %v3125_v42 }
 0x4ac   :  { %v3212_v43 = vsub.f32 0.0, %v3194_v28  ;;  %v3067_v53 = vmul.f32 1.0614054, %v7409_v14  ;;  %v3228_v19 = vadd.f32 1.0, %v3219_v7  ;;  %v3135_v55 = vadd.f32 0.2548296, %v3126_v34 }
 0x4ad   :  { %v3213_v13 = vsub.f32 0.0, %v3195_v3  ;;  %v4386_v51 = vpop.eup %4385  ;;  %v3236_v21 = vmul.f32 %v3227_v2, %v7334_v49  ;;  %v3143_v47 = vmul.f32 %v3134_v10, %v7377_v58  ;;  %v7431_v25 = vand.u32 2147483647, %v7420_v38 }
 0x4ae   :  { %v3221_v32 = vsel %vm3203_vm9, %v3194_v28, %v3212_v43  ;;  %v3076_v61 = vadd.f32 -1.4531521, %v3067_v53  ;;  %v3144_v4 = vmul.f32 %v3135_v55, %v7382_v62  ;;  %v3043_v35 = vmul.f32 %v4386_v51, %v3025_v11  ;;  %v4388_v46 = vpop.eup %4387  ;;  %v8336_v55 = vld [vmem:[#allocation13_spill] sm:$0xff] }
 0x4af   :  { %v3230_v45 = vadd.f32 1.0, %v3221_v32  ;;  %v3222_v56 = vsel %vm3204_vm3, %v3195_v3, %v3213_v13  ;;  %v3188_v24 = vmul.f32 %v4382_v63, %v3143_v47  ;;  %v3237_v41 = vmul.f32 %v3228_v19, %v7336_v26 }
 0x4b0   :  { %v3231_v52 = vadd.f32 1.0, %v3222_v56  ;;  %v3085_v37 = vmul.f32 %v3076_v61, %v7409_v14  ;;  %v3189_v58 = vmul.f32 %v4384_v27, %v3144_v4  ;;  %v3052_v44 = vsub.f32 2.0, %v3043_v35  ;;  %v8335_v27 = vld [vmem:[#allocation12_spill] sm:$0xff] }
 0x4b1   :  { %v3239_v49 = vmul.f32 %v3230_v45, %v7338_v36  ;;  %v3197_v30 = vsub.f32 1.0, %v3188_v24  ;;  %v3019_v62 = vmul.f32 0.3275911, %v7431_v25  ;;  %v3160_v29 = vmul.f32 %v3151_v12, %v7380_v59 }
 0x4b2   :  { %v3240_v60 = vmul.f32 %v3231_v52, %v7347_v20  ;;  %v3094_v23 = vadd.f32 1.4214138, %v3085_v37  ;;  %v3198_v50 = vsub.f32 1.0, %v3189_v58  ;;  %v3061_v8 = vmul.f32 %v4386_v51, %v3052_v44 }
 0x4b3   :  { %v3245_v11 = vadd.f32 %v3239_v49, %v3236_v21  ;;  %v3215_v18 = vsub.f32 0.0, %v3197_v30  ;;  %v3028_v33 = vadd.f32 1.0, %v3019_v62  ;;  %v2990_v59 = vmul.f32 0.5, %v7318_v9 }
 0x4b4   :  { %v3246_v39 = vadd.f32 %v3240_v60, %v3237_v41  ;;  %v3103_v26 = vmul.f32 %v3094_v23, %v7409_v14  ;;  %v3216_v36 = vsub.f32 0.0, %v3198_v50  ;;  %v3070_v54 = vmul.f32 1.0614054, %v3061_v8 }
 0x4b5   :  { %v3224_v20 = vsel %vm3206_vm2, %v3197_v30, %v3215_v18  ;;  %4389 = vrcp.f32 %v3028_v33  ;;  %v2991_v28 = vmul.f32 0.5, %v7321_v17  ;;  %v3174_v2 = vmul.f32 1.442695, %v3160_v29 }
 0x4b6   :  { %v3112_v31 = vadd.f32 -0.28449672, %v3103_v26  ;;  %v3233_v16 = vadd.f32 1.0, %v3224_v20  ;;  %v3225_v63 = vsel %vm3207_vm13, %v3198_v50, %v3216_v36  ;;  %v3079_v5 = vadd.f32 -1.4531521, %v3070_v54 }
 0x4b7   :  { %v3234_v42 = vadd.f32 1.0, %v3225_v63  ;;  %4391 = vpow2.f32 %v3174_v2  ;;  %v3154_v45 = vsub.f32 0.0, %v7431_v25  ;;  %vm3202_vm8 = vcmp.ge.f32.partialorder %v7351_v40, 0.0 }
 0x4b8   :  { %v3121_v15 = vmul.f32 %v3112_v31, %v7409_v14  ;;  %v3242_v7 = vmul.f32 %v3233_v16, %v2990_v59  ;;  %v3088_v3 = vmul.f32 %v3079_v5, %v3061_v8  ;;  %v4579_v44 = vmov 86  }
 0x4b9   :  { %v3243_v34 = vmul.f32 %v3234_v42, %v2991_v28  ;;  %v3163_v41 = vmul.f32 %v3154_v45, %v7431_v25  ;;  %vm3205_vm4 = vcmp.ge.f32.partialorder %v7368_v48, 0.0  ;;  %v4580_v25 = vmov 87  }
 0x4ba   :  { %v3130_v43 = vadd.f32 0.2548296, %v3121_v15  ;;  %v3248_v57 = vadd.f32 %v3245_v11, %v3242_v7  ;;  %v3097_v10 = vadd.f32 1.4214138, %v3088_v3  ;;  %v2989_v40 = vmul.f32 0.5, %v7361_v1 }
 0x4bb   :  { %v3249_v53 = vadd.f32 %v3246_v39, %v3243_v34  ;;  %v3180_v62 = vmul.f32 1.442695, %v3163_v41  ;;  %v2986_v39 = vmul.f32 0.5, %v7343_v22  ;;  %v4581_v31 = vmov 89  }
 0x4bc   :  { %v3139_v12 = vmul.f32 %v3130_v43, %v7409_v14  ;;  %v3106_v9 = vmul.f32 %v3097_v10, %v3061_v8  ;;  %v3256_v19 = vmul.f32 %v3248_v57, %v8335_v27  ;;  %v7453_v14 = vld [vmem:[%s7605_s1] sm:$0xff]  ;;  %v4582_v63 = vmov 90   ;;  %v8338_v57 = vld [vmem:[#allocation14_spill] sm:$0xff]  ;;  %s8339_s1 = smov 107  }
 0x4bd   :  { %v3257_v17 = vmul.f32 %v3249_v53, %v8336_v55  ;;  %4393 = vpow2.f32 %v3180_v62  ;;  %v4583_v28 = vmov 83   ;;  %vm3208_vm11 = vcmp.ge.f32.partialorder %v7420_v38, 0.0 }
 0x4be   :  { %v3184_v13 = vmul.f32 %v4388_v46, %v3139_v12  ;;  %v3115_v51 = vadd.f32 -0.28449672, %v3106_v9  ;;  %3262 = vrot.lane.b32.xlu0 %v3256_v19, %s4578_s0  ;;  %v2992_v2 = vmul.f32 0.5, %v7407_v6  ;;  %v8337_v3 = vmov 0  }
 0x4bf   :  { %v4390_v21 = vpop.eup %4389  ;;  %3264 = vrot.lane.b32.xlu1 %v3257_v17, %s4578_s0  ;;  %v4584_v53 = vmov 88   ;;  %v4585_v12 = vmov 91   ;;  %vm8343_vm1 = vcmask 875520   ;;  %vm8348_vm2 = vcmask 703488  }
 0x4c0   :  { %v3193_v32 = vsub.f32 1.0, %v3184_v13  ;;  %v3124_v47 = vmul.f32 %v3115_v51, %v3061_v8  ;;  %v3046_v61 = vmul.f32 %v4390_v21, %v3028_v33  ;;  %vm8345_vm9 = vmmov %vm8343_vm1  ;;  %vm8350_vm13 = vcmask 695296  }
 0x4c1   :  { %v4392_v37 = vpop.eup %4391  ;;  %vm8349_vm14 = vmmov %vm8348_vm2 }
 0x4c2   :  { %v3133_v56 = vadd.f32 0.2548296, %v3124_v47  ;;  %v3055_v4 = vsub.f32 2.0, %v3046_v61  ;;  %v3211_v35 = vsub.f32 0.0, %v3193_v32 }
 0x4c3   :  { %3290 = vperm.xlu1 %4314, %v7453_v14  }
 0x4c4   :  { %v3142_v52 = vmul.f32 %v3133_v56, %v3061_v8  ;;  %v3064_v24 = vmul.f32 %v4390_v21, %v3055_v4  ;;  %v3220_v60 = vsel %vm3202_vm8, %v3193_v32, %v3211_v35  ;;  %v3412_v21 = vld [vmem:[#allocation2 + $0x18] sm:$0xff]  ;;  %vm8351_vm8 = vmmov %vm8350_vm13 }
 0x4c5   :  { %v3229_v29 = vadd.f32 1.0, %v3220_v60 }
 0x4c6   :  { %v3187_v49 = vmul.f32 %v4392_v37, %v3142_v52  ;;  %v3073_v58 = vmul.f32 1.0614054, %v3064_v24 }
 0x4c7   :  { %4316 = vset.pattern.permute.xlu1 %v4579_v44  ;;  %v3238_v33 = vmul.f32 %v3229_v29, %v2986_v39  ;;  %v4394_v22 = vpop.eup %4393 }
 0x4c8   :  { %v3196_v30 = vsub.f32 1.0, %v3187_v49  ;;  %v3082_v23 = vadd.f32 -1.4531521, %v3073_v58  ;;  %3338 = vperm.xlu1 %4316, %v7453_v14  }
 0x4ca   :  { %v3214_v11 = vsub.f32 0.0, %v3196_v30  ;;  %v3091_v50 = vmul.f32 %v3082_v23, %v3064_v24 }
 0x4cc   :  { %v3223_v8 = vsel %vm3205_vm4, %v3196_v30, %v3214_v11  ;;  %v3100_v46 = vadd.f32 1.4214138, %v3091_v50  ;;  %4317 = vset.pattern.permute.xlu1 %v4580_v25  ;;  %vm8353_vm4 = vcmask 687104  }
 0x4cd   :  { %v3232_v18 = vadd.f32 1.0, %v3223_v8  ;;  %3362 = vperm.xlu1 %4317, %v7453_v14  }
 0x4ce   :  { %v3109_v26 = vmul.f32 %v3100_v46, %v3064_v24 }
 0x4cf   :  { %v3241_v36 = vmul.f32 %v3232_v18, %v2989_v40 }
 0x4d0   :  { %v3118_v54 = vadd.f32 -0.28449672, %v3109_v26 }
 0x4d1   :  { %v3247_v20 = vadd.f32 %v3241_v36, %v3238_v33  ;;  %4319 = vset.pattern.permute.xlu1 %v4581_v31 }
 0x4d2   :  { %v3127_v48 = vmul.f32 %v3118_v54, %v3064_v24  ;;  %3414 = vperm.xlu1 %4319, %v7453_v14  }
 0x4d4   :  { %v3136_v59 = vadd.f32 0.2548296, %v3127_v48 }
 0x4d6   :  { %v3145_v16 = vmul.f32 %v3136_v59, %v3064_v24  ;;  %4320 = vset.pattern.permute.xlu1 %v4582_v63 }
 0x4d7   :  { %3443 = vperm.xlu1 %4320, %v7453_v14  }
 0x4d8   :  { %v3190_v1 = vmul.f32 %v4394_v22, %v3145_v16 }
 0x4da   :  { %v3199_v5 = vsub.f32 1.0, %v3190_v1 }
 0x4db   :  { %4322 = vset.pattern.permute.xlu1 %v4583_v28 }
 0x4dc   :  { %v3217_v42 = vsub.f32 0.0, %v3199_v5  ;;  %3283 = vperm.xlu1 %4322, %v7453_v14  }
 0x4de   :  { %v3226_v15 = vsel %vm3208_vm11, %v3199_v5, %v3217_v42  ;;  %vm8354_vm11 = vmmov %vm8353_vm4 }
 0x4df   :  { %v3235_v7 = vadd.f32 1.0, %v3226_v15 }
 0x4e0   :  { %4323 = vset.pattern.permute.xlu1 %v8337_v3 }
 0x4e1   :  { %v3244_v34 = vmul.f32 %v3235_v7, %v2992_v2 }
 0x4e3   :  { %v3250_v43 = vadd.f32 %v3247_v20, %v3244_v34 }
 0x4e5   :  { %v3258_v10 = vmul.f32 %v3250_v43, %v8338_v57 }
 0x4e7   :  { %3266 = vrot.lane.b32.xlu0 %v3258_v10, %s4578_s0 }
 0x4eb   :  { %3314 = vperm.xlu0 %4315, %v7453_v14  }
 0x4ef   :  { %4318 = vset.pattern.permute.xlu0 %v4584_v53 }
 0x4f0   :  { %3386 = vperm.xlu0 %4318, %v7453_v14  }
 0x4f4   :  { %4321 = vset.pattern.permute.xlu0 %v4585_v12 }
 0x4f5   :  { %3472 = vperm.xlu0 %4321, %v7453_v14  }
 0x4f9   :  { %4324 = vset.pattern.permute.xlu0 %v8337_v3 }
 0x530   :  { %v3263_v6 = vpop.permute.xlu0 %3262 }
 0x531   :  { %3274 = vst.msk [vmem:[#allocation2] sm:$0xff] %vm3273_vm6, %v3263_v6  ;;  %v3265_v38 = vpop.permute.xlu1 %3264  ;;  %vm8355_vm6 = vmmov %vm8351_vm8 }
 0x532   :  { %v7477_v9 = vsel %vm3251_vm0, %v3263_v6, %v3265_v38 }
 0x538   :  { %v7479_v19 = vld [vmem:[#allocation2] sm:$0xff] }
 0x542   :  { %v3291_v27 = vpop.permute.xlu1 %3290 }
 0x543   :  { %v3293_v13 = vmul.f32 %v3291_v27, %v7479_v19  ;;  %v3294_v30 = vmul.f32 %v3291_v27, %v7477_v9 }
 0x545   :  { %3299 = vrot.lane.b32.xlu1 %v3293_v13, %s4497_s22 }
 0x547   :  { %v3339_v55 = vpop.permute.xlu1 %3338 }
 0x548   :  { %v3341_v17 = vmul.f32 %v3339_v55, %v7479_v19  ;;  %v3342_v11 = vmul.f32 %v3339_v55, %v7477_v9 }
 0x54a   :  { %3347 = vrot.lane.b32.xlu1 %v3341_v17, %s8339_s1 }
 0x54c   :  { %v3363_v51 = vpop.permute.xlu1 %3362 }
 0x54d   :  { %v3365_v52 = vmul.f32 %v3363_v51, %v7479_v19  ;;  %v3366_v58 = vmul.f32 %v3363_v51, %v7477_v9 }
 0x551   :  { %v3415_v32 = vpop.permute.xlu1 %3414 }
 0x552   :  { %v3420_v47 = vmul.f32 %v3415_v32, %v3412_v21  ;;  %v3417_v49 = vmul.f32 %v3415_v32, %v7479_v19  ;;  %v3418_v60 = vmul.f32 %v3415_v32, %v7477_v9 }
 0x554   :  { %3431 = vrot.lane.b32.xlu0 %v3420_v47, %s7879_s15 }
 0x556   :  { %v3444_v61 = vpop.permute.xlu1 %3443 }
 0x557   :  { %v3449_v14 = vmul.f32 %v3444_v61, %v3412_v21  ;;  %v3446_v44 = vmul.f32 %v3444_v61, %v7479_v19  ;;  %v3447_v23 = vmul.f32 %v3444_v61, %v7477_v9 }
 0x559   :  { %v3267_v45 = vpop.permute.xlu0 %3266  ;;  %3460 = vrot.lane.b32.xlu0 %v3449_v14, %s7891_s25 }
 0x55a   :  { %v3269_v56 = vsel %vm3251_vm0, %v3265_v38, %v3267_v45  ;;  %vm8342_vm0 = vcmask 1031168  }
 0x55b   :  { %3276 = vst.msk [vmem:[#allocation2 + $0x10] sm:$0xff] %vm8340_vm12, %v3269_v56  ;;  %v3284_v48 = vpop.permute.xlu1 %3283  ;;  %vm8344_vm5 = vmmov %vm8342_vm0 }
 0x55c   :  { %v3286_v10 = vmul.f32 %v3284_v48, %v7479_v19  ;;  %v3287_v13 = vmul.f32 %v3284_v48, %v7477_v9  ;;  %vm8356_vm12 = vmmov %vm8353_vm4 }
 0x562   :  { %v3280_v62 = vld [vmem:[#allocation2 + $0x10] sm:$0xff] }
 0x563   :  { %v3295_v50 = vmul.f32 %v3291_v27, %v3280_v62  ;;  %v3343_v8 = vmul.f32 %v3339_v55, %v3280_v62  ;;  %v3367_v39 = vmul.f32 %v3363_v51, %v3280_v62  ;;  %v3419_v26 = vmul.f32 %v3415_v32, %v3280_v62 }
 0x564   :  { %v3448_v36 = vmul.f32 %v3444_v61, %v3280_v62  ;;  %v3288_v38 = vmul.f32 %v3284_v48, %v3280_v62 }
 0x56a   :  { %v3315_v4 = vpop.permute.xlu0 %3314 }
 0x56b   :  { %v3317_v35 = vmul.f32 %v3315_v4, %v7479_v19  ;;  %v3318_v41 = vmul.f32 %v3315_v4, %v7477_v9  ;;  %v3319_v46 = vmul.f32 %v3315_v4, %v3280_v62 }
 0x56d   :  { %3323 = vrot.lane.b32.xlu0 %v3317_v35, %s7884_s5 }
 0x56f   :  { %v3387_v24 = vpop.permute.xlu0 %3386 }
 0x570   :  { %v3389_v37 = vmul.f32 %v3387_v24, %v7479_v19  ;;  %v3390_v29 = vmul.f32 %v3387_v24, %v7477_v9  ;;  %v3391_v25 = vmul.f32 %v3387_v24, %v3280_v62 }
 0x571   :  { %3371 = vrot.lane.b32.xlu0 %v3365_v52, %s4511_s10 }
 0x572   :  { %3395 = vrot.lane.b32.xlu1 %v3389_v37, %s8341_s28 }
 0x574   :  { %v3473_v40 = vpop.permute.xlu0 %3472 }
 0x575   :  { %3325 = vrot.lane.b32.xlu0 %v3318_v41, %s7884_s5  ;;  %v3476_v18 = vmul.f32 %v3473_v40, %v7477_v9  ;;  %v3478_v33 = vmul.f32 %v3473_v40, %v3412_v21  ;;  %v3477_v54 = vmul.f32 %v3473_v40, %v3280_v62  ;;  %v3475_v20 = vmul.f32 %v3473_v40, %v7479_v19 }
 0x576   :  { %3425 = vrot.lane.b32.xlu1 %v3417_v49, %s7879_s15 }
 0x579   :  { %3373 = vrot.lane.b32.xlu0 %v3366_v58, %s4511_s10 }
 0x57a   :  { %3454 = vrot.lane.b32.xlu1 %v3446_v44, %s7891_s25 }
 0x57d   :  { %3427 = vrot.lane.b32.xlu0 %v3418_v60, %s7879_s15 }
 0x57e   :  { %3301 = vrot.lane.b32.xlu1 %v3294_v30, %s4497_s22 }
 0x581   :  { %3456 = vrot.lane.b32.xlu0 %v3447_v23, %s7891_s25 }
 0x582   :  { %3349 = vrot.lane.b32.xlu1 %v3342_v11, %s8339_s1 }
 0x585   :  { %3303 = vrot.lane.b32.xlu0 %v3295_v50, %s4497_s22 }
 0x586   :  { %3397 = vrot.lane.b32.xlu1 %v3390_v29, %s8341_s28 }
 0x589   :  { %3351 = vrot.lane.b32.xlu0 %v3343_v8, %s8339_s1 }
 0x58a   :  { %3327 = vrot.lane.b32.xlu1 %v3319_v46, %s7884_s5 }
 0x58d   :  { %3399 = vrot.lane.b32.xlu0 %v3391_v25, %s8341_s28 }
 0x58e   :  { %3375 = vrot.lane.b32.xlu1 %v3367_v39, %s4511_s10 }
 0x591   :  { %3485 = vrot.lane.b32.xlu0 %v3476_v18, %s7899_s12 }
 0x592   :  { %3429 = vrot.lane.b32.xlu1 %v3419_v26, %s7879_s15 }
 0x595   :  { %3489 = vrot.lane.b32.xlu0 %v3478_v33, %s7899_s12 }
 0x596   :  { %3458 = vrot.lane.b32.xlu1 %v3448_v36, %s7891_s25 }
 0x59a   :  { %3487 = vrot.lane.b32.xlu1 %v3477_v54, %s7899_s12 }
 0x59e   :  { %3483 = vrot.lane.b32.xlu1 %v3475_v20, %s7899_s12 }
 0x5b7   :  { %v3300_v16 = vpop.permute.xlu1 %3299 }
 0x5bc   :  { %v3348_v22 = vpop.permute.xlu1 %3347 }
 0x5c6   :  { %v3432_v31 = vpop.permute.xlu0 %3431 }
 0x5cb   :  { %v3461_v59 = vpop.permute.xlu0 %3460 }
 0x5df   :  { %v3324_v63 = vpop.permute.xlu0 %3323 }
 0x5e3   :  { %v3372_v1 = vpop.permute.xlu0 %3371 }
 0x5e4   :  { %v3396_v5 = vpop.permute.xlu1 %3395 }
 0x5e7   :  { %v3326_v28 = vpop.permute.xlu0 %3325 }
 0x5e8   :  { %v3426_v42 = vpop.permute.xlu1 %3425  ;;  %v3329_v55 = vsel %vm8342_vm0, %v3324_v63, %v3326_v28  ;;  %vm8357_vm0 = vmmov %vm8353_vm4 }
 0x5eb   :  { %v3374_v15 = vpop.permute.xlu0 %3373 }
 0x5ec   :  { %v3455_v2 = vpop.permute.xlu1 %3454  ;;  %v3377_v58 = vsel %vm707_vm15, %v3372_v1, %v3374_v15 }
 0x5ef   :  { %v3428_v7 = vpop.permute.xlu0 %3427 }
 0x5f0   :  { %v3302_v3 = vpop.permute.xlu1 %3301 }
 0x5f1   :  { %v3305_v57 = vsel %vm632_vm10, %v3300_v16, %v3302_v3 }
 0x5f2   :  { %v3310_v12 = vadd.f32 %v3305_v57, %v3286_v10  ;;  %v3500_v57 = vld [vmem:[%s7607_s3] sm:$0xff]  ;;  %s4586_s3 = smov [#allocation5]  }
 0x5f3   :  { %v3457_v34 = vpop.permute.xlu0 %3456 }
 0x5f4   :  { %v3350_v43 = vpop.permute.xlu1 %3349  ;;  %v3334_v21 = vadd.f32 %v3329_v55, %v3310_v12 }
 0x5f5   :  { %v3353_v61 = vsel %vm8343_vm1, %v3348_v22, %v3350_v43  ;;  %vm3521_vm1 = vcmask 64512  }
 0x5f6   :  { %v3358_v35 = vadd.f32 %v3353_v61, %v3334_v21 }
 0x5f7   :  { %v3304_v53 = vpop.permute.xlu0 %3303 }
 0x5f8   :  { %v3398_v6 = vpop.permute.xlu1 %3397  ;;  %v3306_v27 = vsel %vm632_vm10, %v3302_v3, %v3304_v53  ;;  %v3312_v17 = vadd.f32 %v3304_v53, %v3288_v38  ;;  %v3382_v44 = vadd.f32 %v3377_v58, %v3358_v35  ;;  %vm8346_vm10 = vcmask 859136  }
 0x5f9   :  { %v3311_v47 = vadd.f32 %v3306_v27, %v3287_v13  ;;  %v3401_v30 = vsel %vm8346_vm10, %v3396_v5, %v3398_v6  ;;  %vm8347_vm3 = vmmov %vm8346_vm10  ;;  %v3462_v5 = vsel %vm8355_vm6, %v3455_v2, %v3457_v34 }
 0x5fa   :  { %v3406_v46 = vadd.f32 %v3401_v30, %v3382_v44 }
 0x5fb   :  { %v3352_v51 = vpop.permute.xlu0 %3351 }
 0x5fc   :  { %v3328_v32 = vpop.permute.xlu1 %3327  ;;  %v3354_v56 = vsel %vm8345_vm9, %v3350_v43, %v3352_v51 }
 0x5fd   :  { %v3330_v14 = vsel %vm8344_vm5, %v3326_v28, %v3328_v32  ;;  %v3336_v19 = vadd.f32 %v3328_v32, %v3312_v17  ;;  %vm8358_vm5 = vmmov %vm8357_vm0 }
 0x5fe   :  { %v3335_v45 = vadd.f32 %v3330_v14, %v3311_v47 }
 0x5ff   :  { %v3360_v4 = vadd.f32 %v3352_v51, %v3336_v19  ;;  %v3400_v9 = vpop.permute.xlu0 %3399 }
 0x600   :  { %v3376_v52 = vpop.permute.xlu1 %3375  ;;  %v3359_v24 = vadd.f32 %v3354_v56, %v3335_v45  ;;  %v3402_v23 = vsel %vm8347_vm3, %v3398_v6, %v3400_v9  ;;  %vm8359_vm3 = vcmask 482304  }
 0x601   :  { %v3378_v37 = vsel %vm707_vm15, %v3374_v15, %v3376_v52  ;;  %v3384_v49 = vadd.f32 %v3376_v52, %v3360_v4  ;;  %vm8352_vm15 = vmmov %vm8348_vm2 }
 0x602   :  { %v3383_v41 = vadd.f32 %v3378_v37, %v3359_v24  ;;  %v3433_v36 = vsel %vm8352_vm15, %v3426_v42, %v3428_v7  ;;  %v3501_v42 = vld [vmem:[%s7608_s4 + $0x18] sm:$0xff]  ;;  %s3816_s4 = sshll.u32 %s4586_s3, 4  ;;  %s3817_s4 = int_to_ptr.vmem [resolvable:$true] %s3816_s4 }
 0x603   :  { %v3408_v11 = vadd.f32 %v3400_v9, %v3384_v49  ;;  %v3486_v50 = vpop.permute.xlu0 %3485  ;;  %v3439_v54 = vadd.f32 %v3433_v36, %v3406_v46  ;;  %s4421_s25 = scalar_lea.vmem %s3817_s4, 384  ;;  %p4426_p1 = scmp.lt.s32.totalorder %s3817_s4, %s3817_s4 }
 0x604   :  { %v3430_v60 = vpop.permute.xlu1 %3429  ;;  %v3407_v62 = vadd.f32 %v3402_v23, %v3383_v41  ;;  %p4422_p0 = scmp.ne.s32.totalorder %s3817_s4, %s4421_s25  ;;  %p4427_p2 = scmp.lt.s32.totalorder %s4421_s25, %s4421_s25 }
 0x605   :  { %v3434_v29 = vsel %vm8348_vm2, %v3428_v7, %v3430_v60  ;;  %v3435_v8 = vsel %vm8349_vm14, %v3430_v60, %v3432_v31  ;;  %v3468_v28 = vadd.f32 %v3462_v5, %v3439_v54  ;;  %vm3781_vm2 = vcmask 478208  }
 0x606   :  { %v3441_v18 = vadd.f32 %v3435_v8, %v3408_v11  ;;  %v3440_v26 = vadd.f32 %v3434_v29, %v3407_v62  ;;  %vm3808_vm14 = vcmask 482308   ;;  %p4428_p3 = por %p4427_p2, %p4426_p1 }
 0x607   :  { %v3490_v33 = vpop.permute.xlu0 %3489 }
 0x608   :  { %v3459_v25 = vpop.permute.xlu1 %3458  ;;  %p4429_p4 = pnand %p4428_p3, %p4422_p0 }
 0x609   :  { %v3463_v39 = vsel %vm8350_vm13, %v3457_v34, %v3459_v25  ;;  %v3464_v40 = vsel %vm8351_vm8, %v3459_v25, %v3461_v59 }
 0x60a   :  { %v3469_v20 = vadd.f32 %v3463_v39, %v3440_v26  ;;  %v3470_v48 = vadd.f32 %v3464_v40, %v3441_v18 }
 0x60c   :  { %v3488_v16 = vpop.permute.xlu1 %3487 }
 0x60d   :  { %v3492_v63 = vsel %vm8353_vm4, %v3486_v50, %v3488_v16  ;;  %v3493_v22 = vsel %vm8354_vm11, %v3488_v16, %v3490_v33 }
 0x60e   :  { %v3498_v31 = vadd.f32 %v3492_v63, %v3469_v20  ;;  %v3499_v1 = vadd.f32 %v3493_v22, %v3470_v48 }
 0x610   :  { %v3484_v15 = vpop.permute.xlu1 %3483  ;;  %3512 = vrot.lane.b32.xlu0 %v3498_v31, %s7899_s12  ;;  %3514 = vrot.lane.b32.xlu1 %v3499_v1, %s7899_s12 }
 0x611   :  { %v3491_v59 = vsel %vm8356_vm12, %v3484_v15, %v3486_v50 }
 0x612   :  { %v3497_v7 = vadd.f32 %v3491_v59, %v3468_v28 }
 0x614   :  { %3510 = vrot.lane.b32.xlu0 %v3497_v7, %s7899_s12  ;;  %3504 = vperm.xlu1 %4323, %v3501_v42  }
 0x682   :  { %v3513_v3 = vpop.permute.xlu0 %3512  ;;  %v3515_v43 = vpop.permute.xlu1 %3514 }
 0x683   :  { %v3517_v2 = vsel %vm8357_vm0, %v3513_v3, %v3515_v43 }
 0x684   :  { %3525 = vmatprep.subr.mxu0 %v3517_v2 }
 0x686   :  { %v3511_v34 = vpop.permute.xlu0 %3510 }
 0x687   :  { %v3516_v10 = vsel %vm8358_vm5, %v3511_v34, %v3513_v3 }
 0x688   :  { %3526 = vmatpush1.msra.mxu0 %v3516_v10 }
 0x689   :  { %3847 = vmatmul.mubr.msk.f32.vlgmr.msra.gmra.mrb[4].mxu0 %vm3521_vm1, %v3500_v57  ;;  %3981 = vmatprep.subr.mxu0 %v8332_v0 }
 0x68a   :  { %3982 = vmatpush3.msra.mxu0 %v3515_v43  ;;  %3983 = vmatprep.mubr.msk.f32.mxu0 %vm8333_vm7, %v8332_v0 }
 0x68d   :  { %3984 = vmatmul.mubr.msk.f32.vlgmr.msra.gmra.mrb[6].mxu0 %vm3521_vm1, %v3500_v57 }
 0x693   :  { %v3505_v53 = vpop.permute.xlu1 %3504 }
 0x75c   :  { %v3591_v12 = vpop.f32.mrb[4].mxu0 }
 0x75d   :  { %v7561_v6 = vadd.f32 %v3591_v12, %v3505_v53  ;;  %v3593_v38 = vpop.f32.mrb[5].mxu0 }
 0x75e   :  { %v7563_v27 = vadd.f32 %v3593_v38, %v3505_v53 }
 0x75f   :  { %v7566_v13 = vmul.f32 0.70710677, %v7561_v6 }
 0x760   :  { %v7569_v55 = vmul.f32 0.70710677, %v7563_v27  ;;  %v3662_v17 = vpop.f32.mrb[6].mxu0 }
 0x761   :  { %v3672_v51 = vand.u32 2147483647, %v7566_v13  ;;  %v7572_v21 = vadd.f32 %v3662_v17, %v3505_v53  ;;  %v3985_v0 = vpop.f32.mrb[7].mxu0  ;;  %vm3738_vm7 = vcmp.ge.f32.partialorder %v7566_v13, 0.0 }
 0x762   :  { %v3673_v32 = vand.u32 2147483647, %v7569_v55  ;;  %vm3739_vm9 = vcmp.ge.f32.partialorder %v7569_v55, 0.0 }
 0x763   :  { %v3675_v47 = vmul.f32 0.3275911, %v3672_v51  ;;  %v7576_v61 = vmul.f32 0.70710677, %v7572_v21  ;;  %v3720_v37 = vsub.f32 0.0, %v3672_v51  ;;  %v3668_v13 = vmul.f32 0.5, %v7572_v21 }
 0x764   :  { %v3676_v14 = vmul.f32 0.3275911, %v3673_v32  ;;  %v3721_v58 = vsub.f32 0.0, %v3673_v32 }
 0x765   :  { %v3678_v19 = vadd.f32 1.0, %v3675_v47  ;;  %v3674_v45 = vand.u32 2147483647, %v7576_v61  ;;  %v3723_v62 = vmul.f32 %v3720_v37, %v3672_v51  ;;  %vm3740_vm10 = vcmp.ge.f32.partialorder %v7576_v61, 0.0 }
 0x766   :  { %v3679_v56 = vadd.f32 1.0, %v3676_v14  ;;  %v3724_v8 = vmul.f32 %v3721_v58, %v3673_v32 }
 0x767   :  { %4395 = vrcp.f32 %v3678_v19  ;;  %v3677_v4 = vmul.f32 0.3275911, %v3674_v45  ;;  %v3722_v50 = vsub.f32 0.0, %v3674_v45  ;;  %v3726_v18 = vmul.f32 1.442695, %v3723_v62 }
 0x768   :  { %4397 = vrcp.f32 %v3679_v56  ;;  %v3728_v54 = vmul.f32 1.442695, %v3724_v8 }
 0x769   :  { %v3680_v35 = vadd.f32 1.0, %v3677_v4  ;;  %v3725_v33 = vmul.f32 %v3722_v50, %v3674_v45  ;;  %v3783_v50 = vld [vmem:[#allocation4 + $0x1] ss:$2 sm:$0x7] }
 0x76b   :  { %4399 = vrcp.f32 %v3680_v35  ;;  %v3730_v31 = vmul.f32 1.442695, %v3725_v33 }
 0x76c   :  { %4401 = vpow2.f32 %v3726_v18 }
 0x76d   :  { %4403 = vpow2.f32 %v3728_v54  ;;  %v8362_v54 = vld [vmem:[#allocation11_spill] sm:$0xff] }
 0x76e   :  { %4405 = vpow2.f32 %v3730_v31 }
 0x771   :  { %v4396_v52 = vpop.eup %4395 }
 0x772   :  { %v4398_v24 = vpop.eup %4397  ;;  %v3684_v9 = vmul.f32 %v4396_v52, %v3678_v19 }
 0x773   :  { %v3685_v41 = vmul.f32 %v4398_v24, %v3679_v56 }
 0x774   :  { %v3687_v49 = vsub.f32 2.0, %v3684_v9  ;;  %v3666_v9 = vmul.f32 0.5, %v7561_v6  ;;  %v8360_v6 = vld [vmem:[#allocation8_spill] sm:$0xff] }
 0x775   :  { %v4400_v44 = vpop.eup %4399  ;;  %v3688_v60 = vsub.f32 2.0, %v3685_v41 }
 0x776   :  { %v3690_v30 = vmul.f32 %v4396_v52, %v3687_v49  ;;  %v3686_v23 = vmul.f32 %v4400_v44, %v3680_v35  ;;  %v4402_v12 = vpop.eup %4401  ;;  %v3667_v49 = vmul.f32 0.5, %v7563_v27  ;;  %v3791_v27 = vrot.slane %v3783_v50, %v8360_v6 }
 0x777   :  { %v3691_v11 = vmul.f32 %v4398_v24, %v3688_v60  ;;  %v4404_v17 = vpop.eup %4403 }
 0x778   :  { %v3693_v29 = vmul.f32 1.0614054, %v3690_v30  ;;  %v3689_v46 = vsub.f32 2.0, %v3686_v23  ;;  %v4406_v19 = vpop.eup %4405 }
 0x779   :  { %v3694_v25 = vmul.f32 1.0614054, %v3691_v11 }
 0x77a   :  { %v3696_v39 = vadd.f32 -1.4531521, %v3693_v29  ;;  %v3692_v40 = vmul.f32 %v4400_v44, %v3689_v46 }
 0x77b   :  { %v3697_v26 = vadd.f32 -1.4531521, %v3694_v25  ;;  %v8361_v25 = vld [vmem:[#allocation9_spill] sm:$0xff] }
 0x77c   :  { %v3699_v36 = vmul.f32 %v3696_v39, %v3690_v30  ;;  %v3695_v20 = vmul.f32 1.0614054, %v3692_v40  ;;  %v3795_v39 = vrot.slane %v3783_v50, %v8361_v25 }
 0x77d   :  { %v3700_v48 = vmul.f32 %v3697_v26, %v3691_v11 }
 0x77e   :  { %v3702_v16 = vadd.f32 1.4214138, %v3699_v36  ;;  %v3698_v63 = vadd.f32 -1.4531521, %v3695_v20 }
 0x77f   :  { %v3703_v22 = vadd.f32 1.4214138, %v3700_v48  ;;  %v3799_v48 = vrot.slane %v3783_v50, %v8362_v54 }
 0x780   :  { %v3705_v1 = vmul.f32 %v3702_v16, %v3690_v30  ;;  %v3701_v5 = vmul.f32 %v3698_v63, %v3692_v40 }
 0x781   :  { %v3706_v28 = vmul.f32 %v3703_v22, %v3691_v11 }
 0x782   :  { %v3708_v15 = vadd.f32 -0.28449672, %v3705_v1  ;;  %v3704_v59 = vadd.f32 1.4214138, %v3701_v5 }
 0x783   :  { %v3709_v42 = vadd.f32 -0.28449672, %v3706_v28 }
 0x784   :  { %v3711_v7 = vmul.f32 %v3708_v15, %v3690_v30  ;;  %v3707_v3 = vmul.f32 %v3704_v59, %v3692_v40 }
 0x785   :  { %v3712_v43 = vmul.f32 %v3709_v42, %v3691_v11 }
 0x786   :  { %v3714_v2 = vadd.f32 0.2548296, %v3711_v7  ;;  %v3710_v34 = vadd.f32 -0.28449672, %v3707_v3 }
 0x787   :  { %v3715_v57 = vadd.f32 0.2548296, %v3712_v43 }
 0x788   :  { %v3717_v10 = vmul.f32 %v3714_v2, %v3690_v30  ;;  %v3713_v53 = vmul.f32 %v3710_v34, %v3692_v40 }
 0x789   :  { %v3718_v38 = vmul.f32 %v3715_v57, %v3691_v11  ;;  %v3756_v11 = vld [vmem:[#allocation4] ss:$2 sm:$0x7] }
 0x78a   :  { %v3732_v51 = vmul.f32 %v4402_v12, %v3717_v10  ;;  %v3716_v0 = vadd.f32 0.2548296, %v3713_v53  ;;  %v3764_v29 = vrot.slane %v3756_v11, %v8360_v6  ;;  %v3768_v61 = vrot.slane %v3756_v11, %v8361_v25 }
 0x78b   :  { %v3733_v32 = vmul.f32 %v4404_v17, %v3718_v38  ;;  %v3772_v20 = vrot.slane %v3756_v11, %v8362_v54 }
 0x78c   :  { %v3735_v47 = vsub.f32 1.0, %v3732_v51  ;;  %v3719_v14 = vmul.f32 %v3716_v0, %v3692_v40 }
 0x78d   :  { %v3736_v45 = vsub.f32 1.0, %v3733_v32 }
 0x78e   :  { %v3741_v56 = vsub.f32 0.0, %v3735_v47  ;;  %v3734_v4 = vmul.f32 %v4406_v19, %v3719_v14 }
 0x78f   :  { %v3742_v35 = vsub.f32 0.0, %v3736_v45 }
 0x790   :  { %v3744_v52 = vsel %vm3738_vm7, %v3735_v47, %v3741_v56  ;;  %v3737_v24 = vsub.f32 1.0, %v3734_v4 }
 0x791   :  { %v3747_v37 = vadd.f32 1.0, %v3744_v52  ;;  %v3745_v41 = vsel %vm3739_vm9, %v3736_v45, %v3742_v35 }
 0x792   :  { %v3748_v58 = vadd.f32 1.0, %v3745_v41  ;;  %v3743_v44 = vsub.f32 0.0, %v3737_v24 }
 0x793   :  { %v3750_v60 = vmul.f32 %v3747_v37, %v3666_v9 }
 0x794   :  { %v3751_v30 = vmul.f32 %v3748_v58, %v3667_v49  ;;  %v3746_v23 = vsel %vm3740_vm10, %v3737_v24, %v3743_v44 }
 0x795   :  { %3753 = vst [vmem:[#allocation5] sm:$0xff] %v3750_v60  ;;  %v3749_v62 = vadd.f32 1.0, %v3746_v23 }
 0x796   :  { %3754 = vst [vmem:[#allocation5 + $0x8] sm:$0xff] %v3751_v30 }
 0x797   :  { %v3752_v55 = vmul.f32 %v3749_v62, %v3668_v13 }
 0x799   :  { %3755 = vst.msk [vmem:[#allocation5 + $0x10] sm:$0xff] %vm8359_vm3, %v3752_v55 }
 0x79c   :  { %v3757_v8 = vld [vmem:[#allocation5] sm:$0xf]  ;;  %v3784_v46 = vld [vmem:[#allocation5] sm:$0xf0] }
 0x79d   :  { %v3776_v40 = vmul.f32 %v3764_v29, %v3757_v8  ;;  %v3803_v18 = vmul.f32 %v3791_v27, %v3784_v46  ;;  %v3758_v21 = vld [vmem:[#allocation5 + $0x8] sm:$0xf]  ;;  %v3785_v26 = vld [vmem:[#allocation5 + $0x8] sm:$0xf0] }
 0x79e   :  { %v3777_v33 = vmul.f32 %v3768_v61, %v3758_v21  ;;  %v3804_v36 = vmul.f32 %v3795_v39, %v3785_v26 }
 0x79f   :  { %3779 = vst [vmem:[#allocation5] sm:$0xf] %v3776_v40  ;;  %3806 = vst [vmem:[#allocation5] sm:$0xf0] %v3803_v18 }
 0x7a0   :  { %3780 = vst [vmem:[#allocation5 + $0x8] sm:$0xf] %v3777_v33  ;;  %3807 = vst [vmem:[#allocation5 + $0x8] sm:$0xf0] %v3804_v36  ;;  %v3759_v16 = vld [vmem:[#allocation5 + $0x10] sm:$0xf] }
 0x7a1   :  { %v3786_v63 = vld [vmem:[#allocation5 + $0x10] sm:$0xf0]  ;;  %v3778_v22 = vmul.f32 %v3772_v20, %v3759_v16 }
 0x7a2   :  { %v3805_v31 = vmul.f32 %v3799_v48, %v3786_v63 }
 0x7a3   :  { %3782 = vst.msk [vmem:[#allocation5 + $0x10] sm:$0xf] %vm3781_vm2, %v3778_v22 }
 0x7a4   :  { %3809 = vst.msk [vmem:[#allocation5 + $0x10] sm:$0xf0] %vm3808_vm14, %v3805_v31 }
 0x7a5   :  { %4432 = shalt.err (!%p4429_p4)
}
 0x7a6   :  { %s4433_s29 = scalar_lea.hbm %s7612_s8, 384 }
 0x7a7   :  { %p4434_p5 = scmp.ne.s32.totalorder %s7612_s8, %s4433_s29  ;;  %p4437_p6 = scmp.lt.u32.totalorder %s4433_s29, %s7612_s8 }
 0x7a9   :  { %p4439_p7 = pnand %p4437_p6, %p4434_p5 }
 0x7ab   :  { %4442 = shalt.err (!%p4439_p7)
}
 0x7ac   :  { %3819 = dma.vmem_to_hbm [thread:$0]  %s3817_s4, 384, %s7612_s8, [#allocation6]  }
 0x7ad   :  { %4443 = dma.done.wait [#allocation6], 384  }
 0x7ae   :  { %4444 = vsyncadd [#allocation6], 4294966912 }
 0x7af   :  { %3823 = vsyncpa [#allocation6], 1 }

</bundles_post_ra>
